<compile_context>
chip_gen: v7x
topology: tpu7x:2x2x1
jax: 0.10.0
libtpu: 0.0.40
codegen_flags: <defaults>
</compile_context>

<pallas_src>
import functools

import jax
import jax.numpy as jnp
import numpy as np
from jax.experimental import pallas as pl
from jax.experimental.pallas import tpu as pltpu

LN_EPS = 1e-5


def _round_up(x, m):
    return (x + m - 1) // m * m


def _tensorcores_per_chip():
    """Best-effort detection of TensorCores reachable by a 'parallel' grid axis."""
    try:
        kind = jax.devices()[0].device_kind.lower()
    except Exception:
        return 1
    if "lite" in kind or "v5e" in kind or "v6e" in kind:
        return 1                      # single TensorCore per chip
    if "v4" in kind or "v5p" in kind or "v7" in kind:
        return 2                      # megacore / dual-TC chips
    return 1


def _layernorm_relu(x, gamma, beta, inv_n):
    """LayerNorm (biased var, eps=1e-5, matches nn.LayerNorm) + ReLU, f32 math.

    Row sums are computed on the MXU (x @ ones, (x*x) @ ones) instead of
    cross-lane XLU reduces; padded feature columns are exactly 0 so summing
    over the padded width is exact, and inv_n carries the TRUE feature count.
    """
    d = x.shape[-1]
    ones_col = jnp.ones((d, 1), jnp.float32)
    s1 = jnp.dot(x, ones_col, preferred_element_type=jnp.float32)        # (tb, 1)
    s2 = jnp.dot(x * x, ones_col, preferred_element_type=jnp.float32)    # (tb, 1)
    mu = s1 * inv_n
    var = jnp.maximum(s2 * inv_n - mu * mu, 0.0)   # clamp: single-pass var can go <0
    y = (x - mu) * jax.lax.rsqrt(var + LN_EPS) * gamma + beta
    return jnp.maximum(y, 0.0)


def critic_kernel(state_ref, action_ref,
                  w1_ref, b1_ref, g1_ref, be1_ref,
                  w2s_ref, w2a_ref, b2_ref, g2_ref, be2_ref,
                  wq_ref, bq_ref,
                  q_ref, *, inv_n1, inv_n2):
    x = state_ref[...]
    a = action_ref[...]

    # fc1 (bf16 operands on the MXU, f32 accumulate) + LayerNorm + ReLU.
    h1 = jnp.dot(x.astype(jnp.bfloat16), w1_ref[...],
                 preferred_element_type=jnp.float32) + b1_ref[...]
    l1 = _layernorm_relu(h1, g1_ref[...], be1_ref[...], inv_n1)

    # fc2 over concat([l1, action]) == l1 @ W2_state + action @ W2_action (exact).
    h2 = (jnp.dot(l1.astype(jnp.bfloat16), w2s_ref[...],
                  preferred_element_type=jnp.float32)
          + jnp.dot(a.astype(jnp.bfloat16), w2a_ref[...],
                    preferred_element_type=jnp.float32)
          + b2_ref[...])
    l2 = _layernorm_relu(h2, g2_ref[...], be2_ref[...], inv_n2)

    # q head: output width 1 -> VPU multiply + one small lane reduce, stored
    # lane-dense as a (1, tb) row (padded wq columns are 0, so padding is exact).
    q_vec = jnp.sum(l2 * wq_ref[...], axis=-1)          # (tb,)
    q_ref[...] = q_vec[None, :] + bq_ref[...]           # (1, tb)


def prepare_params(params):
    """One-time parameter prep, OUTSIDE the per-call hot path.

    * Pads fc1/fc2 feature dims up to multiples of 128 (zero weights, bias,
      gamma, beta in the pad region -> padded activations are exactly 0 and
      LayerNorm statistics are unaffected).
    * Casts the MXU weight matrices to bf16 once (no per-call convert ops).
    Returns (prepared_params, (fc1_true, fc2_true)).
    """
    fc1 = params["w1"].shape[1]
    fc2 = params["w2s"].shape[1]
    fc1_p = _round_up(fc1, 128)
    fc2_p = _round_up(fc2, 128)

    def padc(a, cols):  # zero-pad the last (lane) dim
        return jnp.pad(a, ((0, 0), (0, cols - a.shape[1])))

    w2s = padc(params["w2s"], fc2_p)
    w2s = jnp.pad(w2s, ((0, fc1_p - w2s.shape[0]), (0, 0)))

    prepped = {
        "w1":  padc(params["w1"], fc1_p).astype(jnp.bfloat16),
        "b1":  padc(params["b1"], fc1_p),
        "g1":  padc(params["g1"], fc1_p),
        "be1": padc(params["be1"], fc1_p),
        "w2s": w2s.astype(jnp.bfloat16),
        "w2a": padc(params["w2a"], fc2_p).astype(jnp.bfloat16),
        "b2":  padc(params["b2"], fc2_p),
        "g2":  padc(params["g2"], fc2_p),
        "be2": padc(params["be2"], fc2_p),
        "wq":  padc(params["wq"], fc2_p),
        "bq":  params["bq"],
    }
    return prepped, (fc1, fc2)


def critic_forward(state, action, prepped, *, fc1_true, fc2_true,
                   max_block_b=1024, num_tensorcores=None):
    B, d_in = state.shape
    n_act = action.shape[1]
    fc1_p = prepped["w1"].shape[1]
    fc2_p = prepped["w2s"].shape[1]

    if num_tensorcores is None:
        num_tensorcores = _tensorcores_per_chip()

    # Grid shaping: one tile per available TensorCore (so 1 big tile on
    # v5e/v6e, 2 parallel tiles on v7x/megacore), tile a multiple of 128 for
    # lane-dense blocks, capped so f32 intermediates stay within scoped VMEM.
    tb = min(_round_up(pl.cdiv(B, num_tensorcores), 128), max_block_b)
    n_tiles = pl.cdiv(B, tb)
    bp = n_tiles * tb
    # NOTE: no jnp.pad of state/action here — block_shape need not divide the
    # batch; the ragged last block's OOB rows are garbage, stay row-local, and
    # are sliced off below. Avoids a full extra HBM read+write per call.

    row = lambda d: pl.BlockSpec((tb, d), lambda i: (i, 0))
    const = lambda arr: pl.BlockSpec(arr.shape, lambda i: (0, 0))
    # TODO(synk): on v7x with very large tb, pipeline_mode=pl.Buffered(1) on the
    # constant-index param specs would free their redundant second VMEM buffer.

    args = (state, action,
            prepped["w1"], prepped["b1"], prepped["g1"], prepped["be1"],
            prepped["w2s"], prepped["w2a"], prepped["b2"], prepped["g2"],
            prepped["be2"], prepped["wq"], prepped["bq"])
    in_specs = [row(d_in), row(n_act)] + [const(a) for a in args[2:]]

    # Rough per-step VMEM need: double-buffered streamed tiles + resident
    # params + f32 intermediates. Raise the scoped limit above v5e's 16 MiB
    # default, but stay well under v7x's 64 MiB physical VMEM.
    est = (2 * tb * (d_in + n_act) * 4 + 2 * tb * 4
           + (d_in * fc1_p + fc1_p * fc2_p + n_act * fc2_p) * 2
           + 10 * (fc1_p + fc2_p) * 4
           + 4 * tb * (fc1_p + fc2_p) * 4)
    vmem_limit = int(min(max(2 * est, 32 << 20), 48 << 20))

    kernel = functools.partial(critic_kernel,
                               inv_n1=1.0 / fc1_true, inv_n2=1.0 / fc2_true)

    q_rows = pl.pallas_call(
        kernel,
        out_shape=jax.ShapeDtypeStruct((1, bp), jnp.float32),
        grid=(n_tiles,),
        in_specs=in_specs,
        out_specs=pl.BlockSpec((1, tb), lambda i: (0, i)),
        compiler_params=pltpu.CompilerParams(
            dimension_semantics=("parallel",),   # shards across TCs on v7x/megacore
            vmem_limit_bytes=vmem_limit),
    )(*args)
    return q_rows[0, :B][:, None]


def init_params(key, input_dims, fc1_dims, fc2_dims, n_actions):
    """Deterministic init mirroring the PyTorch module's uniform ranges."""
    ks = jax.random.split(key, 6)
    f1 = 1.0 / np.sqrt(fc1_dims)      # fc1.weight.size()[0] == fc1_dims
    f2 = 1.0 / np.sqrt(fc2_dims)      # fc2.weight.size()[0] == fc2_dims
    f3 = 0.003
    u = lambda k, s, f: jax.random.uniform(k, s, jnp.float32, -f, f)
    w2_full = u(ks[2], (fc1_dims + n_actions, fc2_dims), f2)   # [in, out]
    return {
        "w1":  u(ks[0], (input_dims, fc1_dims), f1),
        "b1":  u(ks[1], (1, fc1_dims), f1),
        "g1":  jnp.ones((1, fc1_dims), jnp.float32),
        "be1": jnp.zeros((1, fc1_dims), jnp.float32),
        "w2s": w2_full[:fc1_dims, :],
        "w2a": w2_full[fc1_dims:, :],
        "b2":  u(ks[3], (1, fc2_dims), f2),
        "g2":  jnp.ones((1, fc2_dims), jnp.float32),
        "be2": jnp.zeros((1, fc2_dims), jnp.float32),
        "wq":  u(ks[4], (1, fc2_dims), f3),   # PyTorch q.weight layout (1, fc2)
        "bq":  u(ks[5], (1, 1), f3),
    }


def _ln_ref(x, gamma, beta):
    mu = jnp.mean(x, axis=-1, keepdims=True)
    var = jnp.mean((x - mu) ** 2, axis=-1, keepdims=True)
    return (x - mu) * jax.lax.rsqrt(var + LN_EPS) * gamma + beta


def critic_reference(state, action, p):
    """Pure-JAX reference on the UNPADDED params (same bf16-operand matmuls)."""
    bf = lambda t: t.astype(jnp.bfloat16)
    h1 = jnp.dot(bf(state), bf(p["w1"]), preferred_element_type=jnp.float32) + p["b1"]
    l1 = jnp.maximum(_ln_ref(h1, p["g1"], p["be1"]), 0.0)
    cat = jnp.concatenate([bf(l1), bf(action)], axis=1)
    w2 = jnp.concatenate([bf(p["w2s"]), bf(p["w2a"])], axis=0)
    h2 = jnp.dot(cat, w2, preferred_element_type=jnp.float32) + p["b2"]
    l2 = jnp.maximum(_ln_ref(h2, p["g2"], p["be2"]), 0.0)
    return l2 @ p["wq"].T + p["bq"]


if __name__ == "__main__":
    # Small but structure-exercising shapes: non-128 feature dims exercise the
    # pad-to-128 path (fc1 40->128, fc2 24->128); B=300 exercises a ragged
    # batch tile (no wrapper-side padding).
    B, INPUT_DIMS, FC1, FC2, N_ACT = 300, 16, 40, 24, 4

    key = jax.random.PRNGKey(0)
    k_state, k_action, k_params = jax.random.split(key, 3)
    state = jax.random.normal(k_state, (B, INPUT_DIMS), jnp.float32)
    action = jax.random.normal(k_action, (B, N_ACT), jnp.float32)
    params = init_params(k_params, INPUT_DIMS, FC1, FC2, N_ACT)

    # One-time param prep (padding + bf16 cast) outside the hot path.
    prepped, (fc1_true, fc2_true) = prepare_params(params)

    fwd = jax.jit(lambda s, a, p: critic_forward(
        s, a, p, fc1_true=fc1_true, fc2_true=fc2_true))
    q = jax.block_until_ready(fwd(state, action, prepped))

    q_ref = critic_reference(state, action, params)
    assert q.shape == (B, 1)
    # bf16 matmul operands -> looser tolerance than a pure-f32 check.
    np.testing.assert_allclose(np.asarray(q), np.asarray(q_ref), rtol=2e-2, atol=3e-3)

    print("KERNEL_OK")
</pallas_src>

<mosaic_0001>
module attributes {stable_mosaic.version = 11 : i64} {
  func.func @critic_kernel(%arg0: i32, %arg1: memref<384x16xf32, #tpu.memory_space<vmem>>, %arg2: memref<384x4xf32, #tpu.memory_space<vmem>>, %arg3: memref<16x128xbf16, #tpu.memory_space<vmem>>, %arg4: memref<1x128xf32, #tpu.memory_space<vmem>>, %arg5: memref<1x128xf32, #tpu.memory_space<vmem>>, %arg6: memref<1x128xf32, #tpu.memory_space<vmem>>, %arg7: memref<128x128xbf16, #tpu.memory_space<vmem>>, %arg8: memref<4x128xbf16, #tpu.memory_space<vmem>>, %arg9: memref<1x128xf32, #tpu.memory_space<vmem>>, %arg10: memref<1x128xf32, #tpu.memory_space<vmem>>, %arg11: memref<1x128xf32, #tpu.memory_space<vmem>>, %arg12: memref<1x128xf32, #tpu.memory_space<vmem>>, %arg13: memref<1x1xf32, #tpu.memory_space<vmem>>, %arg14: memref<1x384xf32, #tpu.memory_space<vmem>>) attributes {dimension_semantics = [#tpu.dimension_semantics<parallel>], iteration_bounds = array<i64: 1>, scalar_prefetch = 0 : i64, scratch_operands = 0 : i64, tpu.core_type = #tpu.core_type<tc>, window_params = [{transform_indices = @transform_0, window_bounds = array<i64: 384, 16>}, {transform_indices = @transform_1, window_bounds = array<i64: 384, 4>}, {pipeline_mode = #tpu.pipeline_mode<synchronous>, transform_indices = @transform_2, window_bounds = array<i64: 16, 128>}, {pipeline_mode = #tpu.pipeline_mode<synchronous>, transform_indices = @transform_3, window_bounds = array<i64: 1, 128>}, {pipeline_mode = #tpu.pipeline_mode<synchronous>, transform_indices = @transform_4, window_bounds = array<i64: 1, 128>}, {pipeline_mode = #tpu.pipeline_mode<synchronous>, transform_indices = @transform_5, window_bounds = array<i64: 1, 128>}, {pipeline_mode = #tpu.pipeline_mode<synchronous>, transform_indices = @transform_6, window_bounds = array<i64: 128, 128>}, {pipeline_mode = #tpu.pipeline_mode<synchronous>, transform_indices = @transform_7, window_bounds = array<i64: 4, 128>}, {pipeline_mode = #tpu.pipeline_mode<synchronous>, transform_indices = @transform_8, window_bounds = array<i64: 1, 128>}, {pipeline_mode = #tpu.pipeline_mode<synchronous>, transform_indices = @transform_9, window_bounds = array<i64: 1, 128>}, {pipeline_mode = #tpu.pipeline_mode<synchronous>, transform_indices = @transform_10, window_bounds = array<i64: 1, 128>}, {pipeline_mode = #tpu.pipeline_mode<synchronous>, transform_indices = @transform_11, window_bounds = array<i64: 1, 128>}, {pipeline_mode = #tpu.pipeline_mode<synchronous>, transform_indices = @transform_12, window_bounds = array<i64: 1, 1>}, {transform_indices = @transform_13, window_bounds = array<i64: 1, 384>}]} {
    %c0 = arith.constant 0 : index
    %c0_0 = arith.constant 0 : index
    %0 = vector.load %arg1[%c0, %c0_0] : memref<384x16xf32, #tpu.memory_space<vmem>>, vector<384x16xf32>
    %c0_1 = arith.constant 0 : index
    %c0_2 = arith.constant 0 : index
    %1 = vector.load %arg2[%c0_1, %c0_2] : memref<384x4xf32, #tpu.memory_space<vmem>>, vector<384x4xf32>
    %2 = arith.truncf %0 : vector<384x16xf32> to vector<384x16xbf16>
    %c0_3 = arith.constant 0 : index
    %c0_4 = arith.constant 0 : index
    %3 = vector.load %arg3[%c0_3, %c0_4] : memref<16x128xbf16, #tpu.memory_space<vmem>>, vector<16x128xbf16>
    %cst = arith.constant dense<0.000000e+00> : vector<384x128xf32>
    %4 = tpu.matmul %2, %3, %cst {dimension_numbers = #tpu.dot_dimension_numbers<[1], [0], [0], [1], [0, 0, 1, 1], [], []>} : vector<384x16xbf16>, vector<16x128xbf16>, vector<384x128xf32> -> vector<384x128xf32>
    %c0_5 = arith.constant 0 : index
    %c0_6 = arith.constant 0 : index
    %5 = vector.load %arg4[%c0_5, %c0_6] : memref<1x128xf32, #tpu.memory_space<vmem>>, vector<1x128xf32>
    %6 = vector.broadcast %5 : vector<1x128xf32> to vector<384x128xf32>
    %7 = arith.addf %4, %6 : vector<384x128xf32>
    %c0_7 = arith.constant 0 : index
    %c0_8 = arith.constant 0 : index
    %8 = vector.load %arg5[%c0_7, %c0_8] : memref<1x128xf32, #tpu.memory_space<vmem>>, vector<1x128xf32>
    %c0_9 = arith.constant 0 : index
    %c0_10 = arith.constant 0 : index
    %9 = vector.load %arg6[%c0_9, %c0_10] : memref<1x128xf32, #tpu.memory_space<vmem>>, vector<1x128xf32>
    %cst_11 = arith.constant 1.000000e+00 : f32
    %10 = vector.broadcast %cst_11 : f32 to vector<128x1xf32>
    %cst_12 = arith.constant dense<0.000000e+00> : vector<384x1xf32>
    %11 = tpu.matmul %7, %10, %cst_12 {dimension_numbers = #tpu.dot_dimension_numbers<[1], [0], [0], [1], [0, 0, 1, 1], [], []>} : vector<384x128xf32>, vector<128x1xf32>, vector<384x1xf32> -> vector<384x1xf32>
    %12 = arith.mulf %7, %7 : vector<384x128xf32>
    %cst_13 = arith.constant dense<0.000000e+00> : vector<384x1xf32>
    %13 = tpu.matmul %12, %10, %cst_13 {dimension_numbers = #tpu.dot_dimension_numbers<[1], [0], [0], [1], [0, 0, 1, 1], [], []>} : vector<384x128xf32>, vector<128x1xf32>, vector<384x1xf32> -> vector<384x1xf32>
    %cst_14 = arith.constant 2.500000e-02 : f32
    %14 = vector.broadcast %cst_14 : f32 to vector<384x1xf32>
    %15 = arith.mulf %11, %14 : vector<384x1xf32>
    %cst_15 = arith.constant 2.500000e-02 : f32
    %16 = vector.broadcast %cst_15 : f32 to vector<384x1xf32>
    %17 = arith.mulf %13, %16 : vector<384x1xf32>
    %18 = arith.mulf %15, %15 : vector<384x1xf32>
    %19 = arith.subf %17, %18 : vector<384x1xf32>
    %cst_16 = arith.constant 0.000000e+00 : f32
    %20 = vector.broadcast %cst_16 : f32 to vector<384x1xf32>
    %21 = arith.maximumf %19, %20 : vector<384x1xf32>
    %22 = vector.broadcast %15 : vector<384x1xf32> to vector<384x128xf32>
    %23 = arith.subf %7, %22 : vector<384x128xf32>
    %cst_17 = arith.constant 9.99999974E-6 : f32
    %24 = vector.broadcast %cst_17 : f32 to vector<384x1xf32>
    %25 = arith.addf %21, %24 : vector<384x1xf32>
    %26 = math.rsqrt %25 : vector<384x1xf32>
    %27 = vector.broadcast %26 : vector<384x1xf32> to vector<384x128xf32>
    %28 = arith.mulf %23, %27 : vector<384x128xf32>
    %29 = vector.broadcast %8 : vector<1x128xf32> to vector<384x128xf32>
    %30 = arith.mulf %28, %29 : vector<384x128xf32>
    %31 = vector.broadcast %9 : vector<1x128xf32> to vector<384x128xf32>
    %32 = arith.addf %30, %31 : vector<384x128xf32>
    %cst_18 = arith.constant 0.000000e+00 : f32
    %33 = vector.broadcast %cst_18 : f32 to vector<384x128xf32>
    %34 = arith.maximumf %32, %33 : vector<384x128xf32>
    %35 = arith.truncf %34 : vector<384x128xf32> to vector<384x128xbf16>
    %c0_19 = arith.constant 0 : index
    %c0_20 = arith.constant 0 : index
    %36 = vector.load %arg7[%c0_19, %c0_20] : memref<128x128xbf16, #tpu.memory_space<vmem>>, vector<128x128xbf16>
    %cst_21 = arith.constant dense<0.000000e+00> : vector<384x128xf32>
    %37 = tpu.matmul %35, %36, %cst_21 {dimension_numbers = #tpu.dot_dimension_numbers<[1], [0], [0], [1], [0, 0, 1, 1], [], []>} : vector<384x128xbf16>, vector<128x128xbf16>, vector<384x128xf32> -> vector<384x128xf32>
    %38 = arith.truncf %1 : vector<384x4xf32> to vector<384x4xbf16>
    %c0_22 = arith.constant 0 : index
    %c0_23 = arith.constant 0 : index
    %39 = vector.load %arg8[%c0_22, %c0_23] : memref<4x128xbf16, #tpu.memory_space<vmem>>, vector<4x128xbf16>
    %cst_24 = arith.constant dense<0.000000e+00> : vector<384x128xf32>
    %40 = tpu.matmul %38, %39, %cst_24 {dimension_numbers = #tpu.dot_dimension_numbers<[1], [0], [0], [1], [0, 0, 1, 1], [], []>} : vector<384x4xbf16>, vector<4x128xbf16>, vector<384x128xf32> -> vector<384x128xf32>
    %41 = arith.addf %37, %40 : vector<384x128xf32>
    %c0_25 = arith.constant 0 : index
    %c0_26 = arith.constant 0 : index
    %42 = vector.load %arg9[%c0_25, %c0_26] : memref<1x128xf32, #tpu.memory_space<vmem>>, vector<1x128xf32>
    %43 = vector.broadcast %42 : vector<1x128xf32> to vector<384x128xf32>
    %44 = arith.addf %41, %43 : vector<384x128xf32>
    %c0_27 = arith.constant 0 : index
    %c0_28 = arith.constant 0 : index
    %45 = vector.load %arg10[%c0_27, %c0_28] : memref<1x128xf32, #tpu.memory_space<vmem>>, vector<1x128xf32>
    %c0_29 = arith.constant 0 : index
    %c0_30 = arith.constant 0 : index
    %46 = vector.load %arg11[%c0_29, %c0_30] : memref<1x128xf32, #tpu.memory_space<vmem>>, vector<1x128xf32>
    %cst_31 = arith.constant 1.000000e+00 : f32
    %47 = vector.broadcast %cst_31 : f32 to vector<128x1xf32>
    %cst_32 = arith.constant dense<0.000000e+00> : vector<384x1xf32>
    %48 = tpu.matmul %44, %47, %cst_32 {dimension_numbers = #tpu.dot_dimension_numbers<[1], [0], [0], [1], [0, 0, 1, 1], [], []>} : vector<384x128xf32>, vector<128x1xf32>, vector<384x1xf32> -> vector<384x1xf32>
    %49 = arith.mulf %44, %44 : vector<384x128xf32>
    %cst_33 = arith.constant dense<0.000000e+00> : vector<384x1xf32>
    %50 = tpu.matmul %49, %47, %cst_33 {dimension_numbers = #tpu.dot_dimension_numbers<[1], [0], [0], [1], [0, 0, 1, 1], [], []>} : vector<384x128xf32>, vector<128x1xf32>, vector<384x1xf32> -> vector<384x1xf32>
    %cst_34 = arith.constant 0.0416666679 : f32
    %51 = vector.broadcast %cst_34 : f32 to vector<384x1xf32>
    %52 = arith.mulf %48, %51 : vector<384x1xf32>
    %cst_35 = arith.constant 0.0416666679 : f32
    %53 = vector.broadcast %cst_35 : f32 to vector<384x1xf32>
    %54 = arith.mulf %50, %53 : vector<384x1xf32>
    %55 = arith.mulf %52, %52 : vector<384x1xf32>
    %56 = arith.subf %54, %55 : vector<384x1xf32>
    %cst_36 = arith.constant 0.000000e+00 : f32
    %57 = vector.broadcast %cst_36 : f32 to vector<384x1xf32>
    %58 = arith.maximumf %56, %57 : vector<384x1xf32>
    %59 = vector.broadcast %52 : vector<384x1xf32> to vector<384x128xf32>
    %60 = arith.subf %44, %59 : vector<384x128xf32>
    %cst_37 = arith.constant 9.99999974E-6 : f32
    %61 = vector.broadcast %cst_37 : f32 to vector<384x1xf32>
    %62 = arith.addf %58, %61 : vector<384x1xf32>
    %63 = math.rsqrt %62 : vector<384x1xf32>
    %64 = vector.broadcast %63 : vector<384x1xf32> to vector<384x128xf32>
    %65 = arith.mulf %60, %64 : vector<384x128xf32>
    %66 = vector.broadcast %45 : vector<1x128xf32> to vector<384x128xf32>
    %67 = arith.mulf %65, %66 : vector<384x128xf32>
    %68 = vector.broadcast %46 : vector<1x128xf32> to vector<384x128xf32>
    %69 = arith.addf %67, %68 : vector<384x128xf32>
    %cst_38 = arith.constant 0.000000e+00 : f32
    %70 = vector.broadcast %cst_38 : f32 to vector<384x128xf32>
    %71 = arith.maximumf %69, %70 : vector<384x128xf32>
    %c0_39 = arith.constant 0 : index
    %c0_40 = arith.constant 0 : index
    %72 = vector.load %arg12[%c0_39, %c0_40] : memref<1x128xf32, #tpu.memory_space<vmem>>, vector<1x128xf32>
    %73 = vector.broadcast %72 : vector<1x128xf32> to vector<384x128xf32>
    %74 = arith.mulf %71, %73 : vector<384x128xf32>
    %cst_41 = arith.constant dense<0.000000e+00> : vector<384xf32>
    %75 = vector.multi_reduction <add>, %74, %cst_41 [1] : vector<384x128xf32> to vector<384xf32>
    %76 = vector.shape_cast %75 : vector<384xf32> to vector<1x384xf32>
    %c0_42 = arith.constant 0 : index
    %c0_43 = arith.constant 0 : index
    %77 = vector.load %arg13[%c0_42, %c0_43] : memref<1x1xf32, #tpu.memory_space<vmem>>, vector<1x1xf32>
    %78 = vector.broadcast %77 : vector<1x1xf32> to vector<1x384xf32>
    %79 = arith.addf %76, %78 : vector<1x384xf32>
    %c0_44 = arith.constant 0 : index
    %c0_45 = arith.constant 0 : index
    %80 = vector.load %arg14[%c0_44, %c0_45] : memref<1x384xf32, #tpu.memory_space<vmem>>, vector<1x384xf32>
    tpu.vector_store %arg14[%c0_44, %c0_45], %79 {strides = array<i32>} : memref<1x384xf32, #tpu.memory_space<vmem>>, vector<1x384xf32>,
    return
  }
  func.func @transform_0(%arg0: i32) -> (i32, i32) {
    %c0_i32 = arith.constant 0 : i32
    %c0_i32_0 = arith.constant 0 : i32
    return %arg0, %c0_i32 : i32, i32
  }
  func.func @transform_1(%arg0: i32) -> (i32, i32) {
    %c0_i32 = arith.constant 0 : i32
    %c0_i32_0 = arith.constant 0 : i32
    return %arg0, %c0_i32 : i32, i32
  }
  func.func @transform_2(%arg0: i32) -> (i32, i32) {
    %c0_i32 = arith.constant 0 : i32
    %c0_i32_0 = arith.constant 0 : i32
    %c0_i32_1 = arith.constant 0 : i32
    return %c0_i32, %c0_i32_0 : i32, i32
  }
  func.func @transform_3(%arg0: i32) -> (i32, i32) {
    %c0_i32 = arith.constant 0 : i32
    %c0_i32_0 = arith.constant 0 : i32
    %c0_i32_1 = arith.constant 0 : i32
    return %c0_i32, %c0_i32_0 : i32, i32
  }
  func.func @transform_4(%arg0: i32) -> (i32, i32) {
    %c0_i32 = arith.constant 0 : i32
    %c0_i32_0 = arith.constant 0 : i32
    %c0_i32_1 = arith.constant 0 : i32
    return %c0_i32, %c0_i32_0 : i32, i32
  }
  func.func @transform_5(%arg0: i32) -> (i32, i32) {
    %c0_i32 = arith.constant 0 : i32
    %c0_i32_0 = arith.constant 0 : i32
    %c0_i32_1 = arith.constant 0 : i32
    return %c0_i32, %c0_i32_0 : i32, i32
  }
  func.func @transform_6(%arg0: i32) -> (i32, i32) {
    %c0_i32 = arith.constant 0 : i32
    %c0_i32_0 = arith.constant 0 : i32
    %c0_i32_1 = arith.constant 0 : i32
    return %c0_i32, %c0_i32_0 : i32, i32
  }
  func.func @transform_7(%arg0: i32) -> (i32, i32) {
    %c0_i32 = arith.constant 0 : i32
    %c0_i32_0 = arith.constant 0 : i32
    %c0_i32_1 = arith.constant 0 : i32
    return %c0_i32, %c0_i32_0 : i32, i32
  }
  func.func @transform_8(%arg0: i32) -> (i32, i32) {
    %c0_i32 = arith.constant 0 : i32
    %c0_i32_0 = arith.constant 0 : i32
    %c0_i32_1 = arith.constant 0 : i32
    return %c0_i32, %c0_i32_0 : i32, i32
  }
  func.func @transform_9(%arg0: i32) -> (i32, i32) {
    %c0_i32 = arith.constant 0 : i32
    %c0_i32_0 = arith.constant 0 : i32
    %c0_i32_1 = arith.constant 0 : i32
    return %c0_i32, %c0_i32_0 : i32, i32
  }
  func.func @transform_10(%arg0: i32) -> (i32, i32) {
    %c0_i32 = arith.constant 0 : i32
    %c0_i32_0 = arith.constant 0 : i32
    %c0_i32_1 = arith.constant 0 : i32
    return %c0_i32, %c0_i32_0 : i32, i32
  }
  func.func @transform_11(%arg0: i32) -> (i32, i32) {
    %c0_i32 = arith.constant 0 : i32
    %c0_i32_0 = arith.constant 0 : i32
    %c0_i32_1 = arith.constant 0 : i32
    return %c0_i32, %c0_i32_0 : i32, i32
  }
  func.func @transform_12(%arg0: i32) -> (i32, i32) {
    %c0_i32 = arith.constant 0 : i32
    %c0_i32_0 = arith.constant 0 : i32
    %c0_i32_1 = arith.constant 0 : i32
    return %c0_i32, %c0_i32_0 : i32, i32
  }
  func.func @transform_13(%arg0: i32) -> (i32, i32) {
    %c0_i32 = arith.constant 0 : i32
    %c0_i32_0 = arith.constant 0 : i32
    return %c0_i32, %arg0 : i32, i32
  }
}

</mosaic_0001>

<bundles_post_ra>
// kernel: _lambda_.1
= control target key start
LH: loop header
LB: loop body
LE: loop exit
PB: predicated region body
PF: predicated region fallthrough
CT: control target
= control target key end

     0   :  { %vm182_vm0 = vcmask 130048   ;;  %v14483_v10 = vmov 1.0|1.0   ;;  %vm2346_vm1 = vcmask 1041408   ;;  %vm2273_vm2 = vcmask 31744   ;;  %s14469_s2 = inlined_call_operand.vmem [shape: bf16[16,128], index: 2, kind: input, shape index: {}]   ;;  %s14470_s0 = inlined_call_operand.vmem [shape: f32[300,16], index: 0, kind: input, shape index: {}]   ;;  %s14471_s3 = inlined_call_operand.vmem [shape: f32[1,128], index: 3, kind: input, shape index: {}]   ;;  %s14472_s7 = inlined_call_operand.vmem [shape: bf16[4,128], index: 7, kind: input, shape index: {}]   ;;  %s14473_s1 = inlined_call_operand.vmem [shape: f32[300,4], index: 1, kind: input, shape index: {}]   ;;  %s14474_s6 = inlined_call_operand.vmem [shape: bf16[128,128], index: 6, kind: input, shape index: {}]   ;;  %s14475_s12 = inlined_call_operand.<no memory space> [shape: f32[1,1], index: 12, kind: input, shape index: {}]   ;;  %s14476_s4 = inlined_call_operand.vmem [shape: f32[1,128], index: 4, kind: input, shape index: {}]   ;;  %s14477_s5 = inlined_call_operand.vmem [shape: f32[1,128], index: 5, kind: input, shape index: {}]   ;;  %s14478_s8 = inlined_call_operand.vmem [shape: f32[1,128], index: 8, kind: input, shape index: {}]   ;;  %s14479_s9 = inlined_call_operand.vmem [shape: f32[1,128], index: 9, kind: input, shape index: {}]   ;;  %s14480_s10 = inlined_call_operand.vmem [shape: f32[1,128], index: 10, kind: input, shape index: {}]   ;;  %s14481_s11 = inlined_call_operand.vmem [shape: f32[1,128], index: 11, kind: input, shape index: {}]   ;;  %s14482_s13 = inlined_call_operand.vmem [shape: f32[1,384], index: 13, kind: output, shape index: {}]  }
   0x1   :  { %v10324_v0 = vld [vmem:[%s14469_s2] sm:$0xff]   ;;  %v48_v2 = vld [vmem:[%s14470_s0 + $0x8] sm:$0xff]  ;;  %v49_v3 = vld [vmem:[%s14470_s0 + $0x10] sm:$0xff]  ;;  %vm8931_vm3 = vcmask 130112   ;;  %vm8938_vm4 = vcmask 195712   ;;  %vm8945_vm5 = vcmask 261312  }
   0x2   :  { %v47_v1 = vld [vmem:[%s14470_s0] sm:$0xff]  ;;  %9624 = vmatprep.subr.bf16.mxu0 %v10324_v0  ;;  %v50_v5 = vld [vmem:[%s14470_s0 + $0x18] sm:$0xff]  ;;  %v52_v7 = vld [vmem:[%s14470_s0 + $0x28] sm:$0xff]  ;;  %10268 = vmatprep.subr.bf16.mxu1 %v10324_v0  ;;  %vm8952_vm6 = vcmask 326912   ;;  %vm8959_vm7 = vcmask 392512   ;;  %vm8966_vm8 = vcmask 458112  }
   0x3   :  { %v143_v4 = vpack.c.bf16 %v48_v2, %v47_v1  ;;  %v51_v6 = vld [vmem:[%s14470_s0 + $0x20] sm:$0xff]  ;;  %9625 = vmatpush3.bf16.msra.mxu0 %v10324_v0  ;;  %v144_v8 = vpack.c.bf16 %v50_v5, %v49_v3  ;;  %10269 = vmatpush3.bf16.msra.mxu1 %v10324_v0  ;;  %v53_v11 = vld [vmem:[%s14470_s0 + $0x30] sm:$0xff]  ;;  %v54_v12 = vld [vmem:[%s14470_s0 + $0x38] sm:$0xff]  ;;  %vm8973_vm9 = vcmask 523712   ;;  %vm8980_vm10 = vcmask 589312  }
   0x4   :  { %v145_v9 = vpack.c.bf16 %v52_v7, %v51_v6  ;;  %10204 = vmatprep.subr.bf16.mxu1 %v14483_v10  ;;  %10220 = vmatprep.subr.bf16.mxu0 %v14483_v10  ;;  %v55_v13 = vld [vmem:[%s14470_s0 + $0x40] sm:$0xff]  ;;  %v56_v14 = vld [vmem:[%s14470_s0 + $0x48] sm:$0xff]  ;;  %v73_v17 = vld [vmem:[%s14470_s0 + $0xd0] sm:$0xff]  ;;  %v146_v18 = vpack.c.bf16 %v54_v12, %v53_v11  ;;  %vm8987_vm11 = vcmask 654912   ;;  %vm8994_vm12 = vcmask 720512  }
   0x5   :  { %9626 = vmatprep.mubr.msk.bf16.mxu0 %vm182_vm0, %v143_v4  ;;  %v71_v15 = vld [vmem:[%s14470_s0 + $0xc0] sm:$0xff]  ;;  %v72_v16 = vld [vmem:[%s14470_s0 + $0xc8] sm:$0xff]  ;;  %v74_v20 = vld [vmem:[%s14470_s0 + $0xd8] sm:$0xff]  ;;  %v147_v23 = vpack.c.bf16 %v56_v14, %v55_v13  ;;  %vm9001_vm13 = vcmask 786112   ;;  %vm9008_vm14 = vcmask 851712   ;;  %vm9015_vm15 = vcmask 917312  }
   0x6   :  { %9627 = vmatmul.mubr.msk.bf16.vlgmr.msra.gmra.mrb[0].mxu0 %vm182_vm0, %v144_v8  ;;  %v155_v19 = vpack.c.bf16 %v72_v16, %v71_v15  ;;  %v75_v21 = vld [vmem:[%s14470_s0 + $0xe0] sm:$0xff]  ;;  %v76_v22 = vld [vmem:[%s14470_s0 + $0xe8] sm:$0xff]  ;;  %v156_v24 = vpack.c.bf16 %v74_v20, %v73_v17  ;;  %v57_v26 = vld [vmem:[%s14470_s0 + $0x50] sm:$0xff] }
   0x7   :  { %9630 = vmatprep.mubr.msk.bf16.mxu0 %vm182_vm0, %v145_v9  ;;  %10221 = vmatpush3.bf16.msra.mxu0 %v14483_v10  ;;  %v157_v25 = vpack.c.bf16 %v76_v22, %v75_v21  ;;  %v77_v27 = vld [vmem:[%s14470_s0 + $0xf0] sm:$0xff]  ;;  %v78_v28 = vld [vmem:[%s14470_s0 + $0xf8] sm:$0xff]  ;;  %v79_v30 = vld [vmem:[%s14470_s0 + $0x100] sm:$0xff] }
   0x8   :  { %10222 = vmatprep.subr.bf16.mxu0 %v14483_v10  ;;  %9650 = vmatprep.mubr.msk.bf16.mxu1 %vm182_vm0, %v155_v19  ;;  %v58_v29 = vld [vmem:[%s14470_s0 + $0x58] sm:$0xff]  ;;  %v80_v31 = vld [vmem:[%s14470_s0 + $0x108] sm:$0xff]  ;;  %v59_v32 = vld [vmem:[%s14470_s0 + $0x60] sm:$0xff]  ;;  %v158_v34 = vpack.c.bf16 %v78_v28, %v77_v27 }
   0x9   :  { %9651 = vmatmul.mubr.msk.bf16.vlgmr.msra.gmra.mrb[0].mxu1 %vm182_vm0, %v156_v24  ;;  %v60_v33 = vld [vmem:[%s14470_s0 + $0x68] sm:$0xff]  ;;  %v148_v35 = vpack.c.bf16 %v58_v29, %v57_v26  ;;  %v159_v36 = vpack.c.bf16 %v80_v31, %v79_v30  ;;  %v61_v38 = vld [vmem:[%s14470_s0 + $0x70] sm:$0xff]  ;;  %v82_v40 = vld [vmem:[%s14470_s0 + $0x118] sm:$0xff] }
   0xa   :  { %9654 = vmatprep.mubr.msk.bf16.mxu1 %vm182_vm0, %v157_v25  ;;  %10205 = vmatpush3.bf16.msra.mxu1 %v14483_v10  ;;  %v149_v37 = vpack.c.bf16 %v60_v33, %v59_v32  ;;  %v81_v39 = vld [vmem:[%s14470_s0 + $0x110] sm:$0xff]  ;;  %v62_v41 = vld [vmem:[%s14470_s0 + $0x78] sm:$0xff]  ;;  %v83_v42 = vld [vmem:[%s14470_s0 + $0x120] sm:$0xff] }
   0xb   :  { %10223 = vmatpush3.bf16.msra.mxu0 %v14483_v10  ;;  %10206 = vmatprep.subr.bf16.mxu1 %v14483_v10  ;;  %v84_v43 = vld [vmem:[%s14470_s0 + $0x128] sm:$0xff]  ;;  %v63_v44 = vld [vmem:[%s14470_s0 + $0x80] sm:$0xff]  ;;  %v160_v46 = vpack.c.bf16 %v82_v40, %v81_v39  ;;  %v150_v47 = vpack.c.bf16 %v62_v41, %v61_v38  ;;  %v65_v50 = vld [vmem:[%s14470_s0 + $0x90] sm:$0xff] }
   0xc   :  { %10224 = vmatprep.subr.bf16.mxu0 %v14483_v10  ;;  %v64_v45 = vld [vmem:[%s14470_s0 + $0x88] sm:$0xff]  ;;  %v161_v48 = vpack.c.bf16 %v84_v43, %v83_v42  ;;  %v85_v51 = vld [vmem:[%s14470_s0 + $0x130] sm:$0xff]  ;;  %v86_v52 = vld [vmem:[%s14470_s0 + $0x138] sm:$0xff] }
   0xd   :  { %v151_v49 = vpack.c.bf16 %v64_v45, %v63_v44  ;;  %v66_v53 = vld [vmem:[%s14470_s0 + $0x98] sm:$0xff]  ;;  %v87_v54 = vld [vmem:[%s14470_s0 + $0x140] sm:$0xff]  ;;  %v88_v55 = vld [vmem:[%s14470_s0 + $0x148] sm:$0xff]  ;;  %v162_v58 = vpack.c.bf16 %v86_v52, %v85_v51 }
   0xe   :  { %9631 = vmatmul.mubr.msk.bf16.gmra.mrb[4].mxu0 %vm182_vm0, %v146_v18  ;;  %10207 = vmatpush3.bf16.msra.mxu1 %v14483_v10  ;;  %v67_v56 = vld [vmem:[%s14470_s0 + $0xa0] sm:$0xff]  ;;  %v68_v57 = vld [vmem:[%s14470_s0 + $0xa8] sm:$0xff]  ;;  %v152_v59 = vpack.c.bf16 %v66_v53, %v65_v50  ;;  %v163_v60 = vpack.c.bf16 %v88_v55, %v87_v54  ;;  %v69_v62 = vld [vmem:[%s14470_s0 + $0xb0] sm:$0xff] }
   0xf   :  { %9634 = vmatprep.mubr.msk.bf16.mxu0 %vm182_vm0, %v147_v23  ;;  %10225 = vmatpush3.bf16.msra.mxu0 %v14483_v10  ;;  %v153_v61 = vpack.c.bf16 %v68_v57, %v67_v56  ;;  %v89_v63 = vld [vmem:[%s14470_s0 + $0x150] sm:$0xff]  ;;  %v90_v0 = vld [vmem:[%s14470_s0 + $0x158] sm:$0xff]  ;;  %v91_v2 = vld [vmem:[%s14470_s0 + $0x160] sm:$0xff] }
  0x10   :  { %10226 = vmatprep.subr.bf16.mxu0 %v14483_v10  ;;  %10208 = vmatprep.subr.bf16.mxu1 %v14483_v10  ;;  %v70_v1 = vld [vmem:[%s14470_s0 + $0xb8] sm:$0xff]  ;;  %v92_v3 = vld [vmem:[%s14470_s0 + $0x168] sm:$0xff]  ;;  %v164_v4 = vpack.c.bf16 %v90_v0, %v89_v63  ;;  %v93_v7 = vld [vmem:[%s14470_s0 + $0x170] sm:$0xff] }
  0x11   :  { %9655 = vmatmul.mubr.msk.bf16.gmra.mrb[4].mxu1 %vm182_vm0, %v158_v34  ;;  %v154_v5 = vpack.c.bf16 %v70_v1, %v69_v62  ;;  %v165_v6 = vpack.c.bf16 %v92_v3, %v91_v2  ;;  %v94_v8 = vld [vmem:[%s14470_s0 + $0x178] sm:$0xff]  ;;  %v10805_v11 = vld [vmem:[%s14471_s3] ss:$0 sm:$0xff] }
  0x12   :  { %9658 = vmatprep.mubr.msk.bf16.mxu1 %vm182_vm0, %v159_v36  ;;  %10209 = vmatpush3.bf16.msra.mxu1 %v14483_v10  ;;  %v166_v9 = vpack.c.bf16 %v94_v8, %v93_v7 }
  0x13   :  { %10227 = vmatpush3.bf16.msra.mxu0 %v14483_v10  ;;  %10210 = vmatprep.subr.bf16.mxu1 %v14483_v10 }
  0x14   :  { %10228 = vmatprep.subr.bf16.mxu0 %v14483_v10 }
  0x16   :  { %9635 = vmatmul.mubr.msk.bf16.gmra.mrb[8].mxu0 %vm182_vm0, %v148_v35  ;;  %10211 = vmatpush3.bf16.msra.mxu1 %v14483_v10 }
  0x17   :  { %9638 = vmatprep.mubr.msk.bf16.mxu0 %vm182_vm0, %v149_v37  ;;  %10229 = vmatpush3.bf16.msra.mxu0 %v14483_v10 }
  0x18   :  { %10230 = vmatprep.subr.bf16.mxu0 %v14483_v10  ;;  %10212 = vmatprep.subr.bf16.mxu1 %v14483_v10 }
  0x19   :  { %9659 = vmatmul.mubr.msk.bf16.gmra.mrb[8].mxu1 %vm182_vm0, %v160_v46 }
  0x1a   :  { %9662 = vmatprep.mubr.msk.bf16.mxu1 %vm182_vm0, %v161_v48  ;;  %10213 = vmatpush3.bf16.msra.mxu1 %v14483_v10 }
  0x1b   :  { %10231 = vmatpush3.bf16.msra.mxu0 %v14483_v10  ;;  %10214 = vmatprep.subr.bf16.mxu1 %v14483_v10 }
  0x1c   :  { %10232 = vmatprep.subr.bf16.mxu0 %v14483_v10 }
  0x1e   :  { %9639 = vmatmul.mubr.msk.bf16.gmra.mrb[12].mxu0 %vm182_vm0, %v150_v47  ;;  %10215 = vmatpush3.bf16.msra.mxu1 %v14483_v10 }
  0x1f   :  { %9642 = vmatprep.mubr.msk.bf16.mxu0 %vm182_vm0, %v151_v49  ;;  %10233 = vmatpush3.bf16.msra.mxu0 %v14483_v10 }
  0x20   :  { %10234 = vmatprep.subr.bf16.mxu0 %v14483_v10  ;;  %10216 = vmatprep.subr.bf16.mxu1 %v14483_v10 }
  0x21   :  { %9663 = vmatmul.mubr.msk.bf16.gmra.mrb[12].mxu1 %vm182_vm0, %v162_v58 }
  0x22   :  { %9666 = vmatprep.mubr.msk.bf16.mxu1 %vm182_vm0, %v163_v60  ;;  %10217 = vmatpush3.bf16.msra.mxu1 %v14483_v10 }
  0x23   :  { %10235 = vmatpush3.bf16.msra.mxu0 %v14483_v10  ;;  %10218 = vmatprep.subr.bf16.mxu1 %v14483_v10 }
  0x24   :  { %10236 = vmatprep.subr.bf16.mxu0 %v14483_v10 }
  0x26   :  { %9643 = vmatmul.mubr.msk.bf16.gmra.mrb[16].mxu0 %vm182_vm0, %v152_v59  ;;  %10219 = vmatpush3.bf16.msra.mxu1 %v14483_v10 }
  0x27   :  { %9646 = vmatprep.mubr.msk.bf16.mxu0 %vm182_vm0, %v153_v61 }
  0x29   :  { %9667 = vmatmul.mubr.msk.bf16.gmra.mrb[16].mxu1 %vm182_vm0, %v164_v4 }
  0x2a   :  { %9670 = vmatprep.mubr.msk.bf16.mxu1 %vm182_vm0, %v165_v6 }
  0x2e   :  { %9647 = vmatmul.mubr.msk.bf16.gmra.mrb[20].mxu0 %vm182_vm0, %v154_v5 }
  0x31   :  { %9671 = vmatmul.mubr.msk.bf16.gmra.mrb[20].mxu1 %vm182_vm0, %v166_v9  ;;  %vm9022_vm0 = vcmask 982912  }
  0xd9   :  { %v9628_v12 = vpop.f32.mrb[0].mxu0 }
  0xda   :  { %v289_v13 = vpop.f32.mrb[1].mxu0  ;;  %v10811_v16 = vadd.f32 %v9628_v12, %v10805_v11 }
  0xdb   :  { %v10808_v14 = vadd.f32 %v10805_v11, %v289_v13  ;;  %v9629_v15 = vpop.f32.mrb[2].mxu0 }
  0xdc   :  { %14600 = vst [vmem:[#allocation4_spill] sm:$0xff] %v10811_v16  ;;  %v292_v17 = vpop.f32.mrb[3].mxu0  ;;  %v10820_v20 = vadd.f32 %v9629_v15, %v10805_v11  ;;  %v789_v22 = vmul.f32 %v10811_v16, %v10811_v16  ;;  %v10828_v23 = vpop.f32.mrb[0].mxu1 }
  0xdd   :  { %14599 = vst [vmem:[#allocation3_spill] sm:$0xff] %v10808_v14  ;;  %v10814_v18 = vadd.f32 %v10805_v11, %v292_v17  ;;  %9706 = vmatprep.mubr.f32.mxu1 %v10808_v14  ;;  %v787_v19 = vmul.f32 %v10808_v14, %v10808_v14  ;;  %v10830_v25 = vpop.f32.mrb[1].mxu1 }
  0xde   :  { %14602 = vst [vmem:[#allocation6_spill] sm:$0xff] %v10820_v20  ;;  %v10835_v28 = vpop.f32.mrb[2].mxu1  ;;  %v790_v31 = vmul.f32 %v10820_v20, %v10820_v20 }
  0xdf   :  { %14601 = vst [vmem:[#allocation5_spill] sm:$0xff] %v10814_v18  ;;  %v788_v21 = vmul.f32 %v10814_v18, %v10814_v18  ;;  %9707 = vmatmul.mubr.f32.vlgmr.msra.gmra.mrb[24].mxu1 %v10814_v18  ;;  %9810 = vmatprep.mubr.f32.mxu0 %v787_v19  ;;  %v10844_v32 = vpop.f32.mrb[3].mxu1 }
  0xe0   :  { %9709 = vmatprep.mubr.f32.mxu1 %v10811_v16 }
  0xe1   :  { %v9632_v24 = vpop.f32.mrb[4].mxu0  ;;  %9811 = vmatmul.mubr.f32.vlgmr.msra.gmra.mrb[24].mxu0 %v788_v21 }
  0xe2   :  { %v10833_v26 = vadd.f32 %v9632_v24, %v10805_v11  ;;  %v305_v27 = vpop.f32.mrb[5].mxu0  ;;  %9813 = vmatprep.mubr.f32.mxu0 %v789_v22  ;;  %10237 = vmatpush3.bf16.msra.mxu0 %v14483_v10 }
  0xe3   :  { %v10839_v29 = vadd.f32 %v10805_v11, %v305_v27  ;;  %v9633_v30 = vpop.f32.mrb[6].mxu0  ;;  %9710 = vmatmul.mubr.f32.gmra.mrb[26].mxu1 %v10820_v20  ;;  %10238 = vmatprep.subr.bf16.mxu0 %v14483_v10 }
  0xe4   :  { %14603 = vst [vmem:[#allocation7_spill] sm:$0xff] %v10833_v26  ;;  %v308_v33 = vpop.f32.mrb[7].mxu0  ;;  %v793_v36 = vmul.f32 %v10833_v26, %v10833_v26  ;;  %v10857_v37 = vadd.f32 %v9633_v30, %v10805_v11  ;;  %v10863_v39 = vpop.f32.mrb[4].mxu1 }
  0xe5   :  { %14604 = vst [vmem:[#allocation8_spill] sm:$0xff] %v10839_v29  ;;  %v10848_v34 = vadd.f32 %v10805_v11, %v308_v33  ;;  %9814 = vmatmul.mubr.f32.gmra.mrb[26].mxu0 %v790_v31  ;;  %9712 = vmatprep.mubr.f32.mxu1 %v10839_v29  ;;  %v791_v35 = vmul.f32 %v10839_v29, %v10839_v29  ;;  %v10866_v41 = vpop.f32.mrb[5].mxu1 }
  0xe6   :  { %10239 = vmatpush3.bf16.msra.mxu0 %v14483_v10  ;;  %14606 = vst [vmem:[#allocation10_spill] sm:$0xff] %v10857_v37  ;;  %v10871_v44 = vpop.f32.mrb[6].mxu1  ;;  %v794_v47 = vmul.f32 %v10857_v37, %v10857_v37 }
  0xe7   :  { %14605 = vst [vmem:[#allocation9_spill] sm:$0xff] %v10848_v34  ;;  %9713 = vmatmul.mubr.f32.gmra.mrb[28].mxu1 %v10848_v34  ;;  %9816 = vmatprep.mubr.f32.mxu0 %v791_v35  ;;  %v792_v38 = vmul.f32 %v10848_v34, %v10848_v34  ;;  %v10880_v48 = vpop.f32.mrb[7].mxu1 }
  0xe8   :  { %9715 = vmatprep.mubr.f32.mxu1 %v10833_v26  ;;  %10240 = vmatprep.subr.bf16.mxu0 %v14483_v10 }
  0xe9   :  { %v9636_v40 = vpop.f32.mrb[8].mxu0  ;;  %9817 = vmatmul.mubr.f32.gmra.mrb[28].mxu0 %v792_v38 }
  0xea   :  { %v10869_v42 = vadd.f32 %v9636_v40, %v10805_v11  ;;  %v321_v43 = vpop.f32.mrb[9].mxu0  ;;  %9819 = vmatprep.mubr.f32.mxu0 %v793_v36  ;;  %10241 = vmatpush3.bf16.msra.mxu0 %v14483_v10 }
  0xeb   :  { %v10875_v45 = vadd.f32 %v10805_v11, %v321_v43  ;;  %v9637_v46 = vpop.f32.mrb[10].mxu0  ;;  %9716 = vmatmul.mubr.f32.gmra.mrb[30].mxu1 %v10857_v37  ;;  %10242 = vmatprep.subr.bf16.mxu0 %v14483_v10 }
  0xec   :  { %14607 = vst [vmem:[#allocation11_spill] sm:$0xff] %v10869_v42  ;;  %v324_v49 = vpop.f32.mrb[11].mxu0  ;;  %v797_v52 = vmul.f32 %v10869_v42, %v10869_v42  ;;  %v10893_v53 = vadd.f32 %v9637_v46, %v10805_v11  ;;  %v9660_v55 = vpop.f32.mrb[8].mxu1 }
  0xed   :  { %14608 = vst [vmem:[#allocation12_spill] sm:$0xff] %v10875_v45  ;;  %v10884_v50 = vadd.f32 %v10805_v11, %v324_v49  ;;  %9820 = vmatmul.mubr.f32.gmra.mrb[30].mxu0 %v794_v47  ;;  %9718 = vmatprep.mubr.f32.mxu1 %v10875_v45  ;;  %v795_v51 = vmul.f32 %v10875_v45, %v10875_v45  ;;  %v10903_v58 = vpop.f32.mrb[9].mxu1 }
  0xee   :  { %10243 = vmatpush3.bf16.msra.mxu0 %v14483_v10  ;;  %14610 = vst [vmem:[#allocation14_spill] sm:$0xff] %v10893_v53  ;;  %v10901_v57 = vadd.f32 %v9660_v55, %v10805_v11  ;;  %v9661_v61 = vpop.f32.mrb[10].mxu1  ;;  %v798_v63 = vmul.f32 %v10893_v53, %v10893_v53 }
  0xef   :  { %14609 = vst [vmem:[#allocation13_spill] sm:$0xff] %v10884_v50  ;;  %9719 = vmatmul.mubr.f32.gmra.mrb[32].mxu1 %v10884_v50  ;;  %9822 = vmatprep.mubr.f32.mxu0 %v795_v51  ;;  %v796_v54 = vmul.f32 %v10884_v50, %v10884_v50  ;;  %v10916_v1 = vadd.f32 %v9661_v61, %v10805_v11  ;;  %v420_v2 = vpop.f32.mrb[11].mxu1 }
  0xf0   :  { %9721 = vmatprep.mubr.f32.mxu1 %v10869_v42  ;;  %10244 = vmatprep.subr.bf16.mxu0 %v14483_v10  ;;  %14611 = vst [vmem:[#allocation15_spill] sm:$0xff] %v10901_v57  ;;  %v10920_v4 = vadd.f32 %v10805_v11, %v420_v2 }
  0xf1   :  { %9823 = vmatmul.mubr.f32.gmra.mrb[32].mxu0 %v796_v54  ;;  %v9640_v56 = vpop.f32.mrb[12].mxu0  ;;  %14614 = vst [vmem:[#allocation18_spill] sm:$0xff] %v10916_v1 }
  0xf2   :  { %9825 = vmatprep.mubr.f32.mxu0 %v797_v52  ;;  %v10906_v59 = vadd.f32 %v9640_v56, %v10805_v11  ;;  %v337_v60 = vpop.f32.mrb[13].mxu0  ;;  %10245 = vmatpush3.bf16.msra.mxu0 %v14483_v10  ;;  %14615 = vst [vmem:[#allocation19_spill] sm:$0xff] %v10920_v4 }
  0xf3   :  { %9722 = vmatmul.mubr.f32.gmra.mrb[34].mxu1 %v10893_v53  ;;  %v10911_v62 = vadd.f32 %v10805_v11, %v337_v60  ;;  %v9641_v0 = vpop.f32.mrb[14].mxu0  ;;  %10246 = vmatprep.subr.bf16.mxu0 %v14483_v10 }
  0xf4   :  { %14612 = vst [vmem:[#allocation16_spill] sm:$0xff] %v10906_v59  ;;  %v340_v3 = vpop.f32.mrb[15].mxu0  ;;  %v10923_v5 = vadd.f32 %v9641_v0, %v10805_v11  ;;  %v801_v8 = vmul.f32 %v10906_v59, %v10906_v59  ;;  %v9664_v12 = vpop.f32.mrb[12].mxu1 }
  0xf5   :  { %14613 = vst [vmem:[#allocation17_spill] sm:$0xff] %v10911_v62  ;;  %9826 = vmatmul.mubr.f32.gmra.mrb[34].mxu0 %v798_v63  ;;  %v10926_v6 = vadd.f32 %v10805_v11, %v340_v3  ;;  %9724 = vmatprep.mubr.f32.mxu1 %v10911_v62  ;;  %v799_v7 = vmul.f32 %v10911_v62, %v10911_v62  ;;  %v433_v19 = vpop.f32.mrb[13].mxu1 }
  0xf6   :  { %14616 = vst [vmem:[#allocation20_spill] sm:$0xff] %v10923_v5  ;;  %10247 = vmatpush3.bf16.msra.mxu0 %v14483_v10  ;;  %v802_v13 = vmul.f32 %v10923_v5, %v10923_v5  ;;  %v10942_v17 = vadd.f32 %v9664_v12, %v10805_v11  ;;  %v10948_v24 = vadd.f32 %v10805_v11, %v433_v19  ;;  %v9665_v27 = vpop.f32.mrb[14].mxu1 }
  0xf7   :  { %14617 = vst [vmem:[#allocation21_spill] sm:$0xff] %v10926_v6  ;;  %9725 = vmatmul.mubr.f32.gmra.mrb[36].mxu1 %v10926_v6  ;;  %9828 = vmatprep.mubr.f32.mxu0 %v799_v7  ;;  %v800_v9 = vmul.f32 %v10926_v6, %v10926_v6  ;;  %v10956_v33 = vadd.f32 %v9665_v27, %v10805_v11  ;;  %v436_v35 = vpop.f32.mrb[15].mxu1 }
  0xf8   :  { %9727 = vmatprep.mubr.f32.mxu1 %v10906_v59  ;;  %10248 = vmatprep.subr.bf16.mxu0 %v14483_v10  ;;  %14618 = vst [vmem:[#allocation22_spill] sm:$0xff] %v10942_v17  ;;  %14620 = vst [vmem:[#allocation24_spill] sm:$0xff] %v10948_v24  ;;  %v10960_v38 = vadd.f32 %v10805_v11, %v436_v35  ;;  %v11013_v27 = vadd.f32 %v10805_v11, %v10830_v25 }
  0xf9   :  { %9829 = vmatmul.mubr.f32.gmra.mrb[36].mxu0 %v800_v9  ;;  %v9644_v15 = vpop.f32.mrb[16].mxu0  ;;  %14622 = vst [vmem:[#allocation26_spill] sm:$0xff] %v10956_v33 }
  0xfa   :  { %9831 = vmatprep.mubr.f32.mxu0 %v801_v8  ;;  %v10945_v21 = vadd.f32 %v9644_v15, %v10805_v11  ;;  %v353_v22 = vpop.f32.mrb[17].mxu0  ;;  %10249 = vmatpush3.bf16.msra.mxu0 %v14483_v10  ;;  %14623 = vst [vmem:[#allocation27_spill] sm:$0xff] %v10960_v38  ;;  %14634 = vst [vmem:[#allocation38_spill] sm:$0xff] %v11013_v27 }
  0xfb   :  { %9728 = vmatmul.mubr.f32.gmra.mrb[38].mxu1 %v10923_v5  ;;  %v10953_v30 = vadd.f32 %v10805_v11, %v353_v22  ;;  %v9645_v31 = vpop.f32.mrb[18].mxu0  ;;  %10250 = vmatprep.subr.bf16.mxu0 %v14483_v10 }
  0xfc   :  { %14619 = vst [vmem:[#allocation23_spill] sm:$0xff] %v10945_v21  ;;  %v356_v36 = vpop.f32.mrb[19].mxu0  ;;  %v10963_v40 = vadd.f32 %v9645_v31, %v10805_v11  ;;  %v805_v47 = vmul.f32 %v10945_v21, %v10945_v21  ;;  %v9668_v51 = vpop.f32.mrb[16].mxu1 }
  0xfd   :  { %14621 = vst [vmem:[#allocation25_spill] sm:$0xff] %v10953_v30  ;;  %9832 = vmatmul.mubr.f32.gmra.mrb[38].mxu0 %v802_v13  ;;  %v10966_v43 = vadd.f32 %v10805_v11, %v356_v36  ;;  %9730 = vmatprep.mubr.f32.mxu1 %v10953_v30  ;;  %v803_v46 = vmul.f32 %v10953_v30, %v10953_v30  ;;  %v449_v56 = vpop.f32.mrb[17].mxu1 }
  0xfe   :  { %14624 = vst [vmem:[#allocation28_spill] sm:$0xff] %v10963_v40  ;;  %10251 = vmatpush3.bf16.msra.mxu0 %v14483_v10  ;;  %v806_v52 = vmul.f32 %v10963_v40, %v10963_v40  ;;  %v10982_v55 = vadd.f32 %v9668_v51, %v10805_v11  ;;  %v10988_v63 = vadd.f32 %v10805_v11, %v449_v56  ;;  %v9669_v0 = vpop.f32.mrb[18].mxu1 }
  0xff   :  { %14625 = vst [vmem:[#allocation29_spill] sm:$0xff] %v10966_v43  ;;  %9731 = vmatmul.mubr.f32.gmra.mrb[40].mxu1 %v10966_v43  ;;  %9834 = vmatprep.mubr.f32.mxu0 %v803_v46  ;;  %v804_v49 = vmul.f32 %v10966_v43, %v10966_v43  ;;  %v10995_v7 = vadd.f32 %v9669_v0, %v10805_v11  ;;  %v452_v8 = vpop.f32.mrb[19].mxu1 }
 0x100   :  { %9733 = vmatprep.mubr.f32.mxu1 %v10945_v21  ;;  %10252 = vmatprep.subr.bf16.mxu0 %v14483_v10  ;;  %14626 = vst [vmem:[#allocation30_spill] sm:$0xff] %v10982_v55  ;;  %14628 = vst [vmem:[#allocation32_spill] sm:$0xff] %v10988_v63  ;;  %v10998_v12 = vadd.f32 %v10805_v11, %v452_v8  ;;  %v11023_v46 = vadd.f32 %v10805_v11, %v10844_v32 }
 0x101   :  { %9835 = vmatmul.mubr.f32.gmra.mrb[40].mxu0 %v804_v49  ;;  %v9648_v54 = vpop.f32.mrb[20].mxu0  ;;  %14630 = vst [vmem:[#allocation34_spill] sm:$0xff] %v10995_v7  ;;  %v11030_v49 = vadd.f32 %v10828_v23, %v10805_v11  ;;  %v811_v51 = vmul.f32 %v11013_v27, %v11013_v27  ;;  %v11047_v23 = vadd.f32 %v10835_v28, %v10805_v11 }
 0x102   :  { %9837 = vmatprep.mubr.f32.mxu0 %v805_v47  ;;  %v10985_v60 = vadd.f32 %v9648_v54, %v10805_v11  ;;  %v369_v61 = vpop.f32.mrb[21].mxu0  ;;  %14631 = vst [vmem:[#allocation35_spill] sm:$0xff] %v10998_v12  ;;  %14635 = vst [vmem:[#allocation39_spill] sm:$0xff] %v11023_v46  ;;  %v812_v0 = vmul.f32 %v11023_v46, %v11023_v46  ;;  %v11055_v8 = vadd.f32 %v10805_v11, %v10866_v41 }
 0x103   :  { %9734 = vmatmul.mubr.f32.gmra.mrb[42].mxu1 %v10963_v40  ;;  %v10992_v2 = vadd.f32 %v10805_v11, %v369_v61  ;;  %v9649_v3 = vpop.f32.mrb[22].mxu0  ;;  %14637 = vst [vmem:[#allocation41_spill] sm:$0xff] %v11030_v49  ;;  %14641 = vst [vmem:[#allocation45_spill] sm:$0xff] %v11047_v23  ;;  %v814_v28 = vmul.f32 %v11047_v23, %v11047_v23  ;;  %v10332_v40 = vld [vmem:[%s14474_s6 + $0x38] sm:$0xff]  }
 0x104   :  { %14627 = vst [vmem:[#allocation31_spill] sm:$0xff] %v10985_v60  ;;  %v372_v9 = vpop.f32.mrb[23].mxu0  ;;  %v11001_v13 = vadd.f32 %v9649_v3, %v10805_v11  ;;  %v809_v22 = vmul.f32 %v10985_v60, %v10985_v60  ;;  %v9672_v35 = vpop.f32.mrb[20].mxu1  ;;  %v813_v3 = vmul.f32 %v11030_v49, %v11030_v49  ;;  %14642 = vst [vmem:[#allocation46_spill] sm:$0xff] %v11055_v8 }
 0x105   :  { %14629 = vst [vmem:[#allocation33_spill] sm:$0xff] %v10992_v2  ;;  %9838 = vmatmul.mubr.f32.gmra.mrb[42].mxu0 %v806_v52  ;;  %v11004_v15 = vadd.f32 %v10805_v11, %v372_v9  ;;  %9736 = vmatprep.mubr.f32.mxu1 %v10992_v2  ;;  %v807_v19 = vmul.f32 %v10992_v2, %v10992_v2  ;;  %v465_v47 = vpop.f32.mrb[21].mxu1 }
 0x106   :  { %14632 = vst [vmem:[#allocation36_spill] sm:$0xff] %v11001_v13  ;;  %v810_v36 = vmul.f32 %v11001_v13, %v11001_v13  ;;  %v11026_v25 = vadd.f32 %v9672_v35, %v10805_v11  ;;  %v11035_v52 = vadd.f32 %v10805_v11, %v465_v47  ;;  %v9673_v54 = vpop.f32.mrb[22].mxu1  ;;  %v11063_v9 = vadd.f32 %v10805_v11, %v10880_v48 }
 0x107   :  { %14633 = vst [vmem:[#allocation37_spill] sm:$0xff] %v11004_v15  ;;  %9737 = vmatmul.mubr.f32.gmra.mrb[44].mxu1 %v11004_v15  ;;  %9840 = vmatprep.mubr.f32.mxu0 %v807_v19  ;;  %v808_v31 = vmul.f32 %v11004_v15, %v11004_v15  ;;  %v11039_v32 = vadd.f32 %v9673_v54, %v10805_v11  ;;  %v468_v56 = vpop.f32.mrb[23].mxu1 }
 0x108   :  { %9739 = vmatprep.mubr.f32.mxu1 %v10985_v60  ;;  %14636 = vst [vmem:[#allocation40_spill] sm:$0xff] %v11026_v25  ;;  %14638 = vst [vmem:[#allocation42_spill] sm:$0xff] %v11035_v52  ;;  %v11043_v61 = vadd.f32 %v10805_v11, %v468_v56  ;;  %v11067_v19 = vadd.f32 %v10863_v39, %v10805_v11  ;;  %v815_v41 = vmul.f32 %v11055_v8, %v11055_v8 }
 0x109   :  { %9841 = vmatmul.mubr.f32.gmra.mrb[44].mxu0 %v808_v31  ;;  %14639 = vst [vmem:[#allocation43_spill] sm:$0xff] %v11039_v32  ;;  %14643 = vst [vmem:[#allocation47_spill] sm:$0xff] %v11063_v9  ;;  %v816_v48 = vmul.f32 %v11063_v9, %v11063_v9  ;;  %v11083_v31 = vadd.f32 %v10805_v11, %v10903_v58  ;;  %v821_v58 = vmul.f32 %v10901_v57, %v10901_v57 }
 0x10a   :  { %9843 = vmatprep.mubr.f32.mxu0 %v809_v22  ;;  %14640 = vst [vmem:[#allocation44_spill] sm:$0xff] %v11043_v61  ;;  %14644 = vst [vmem:[#allocation48_spill] sm:$0xff] %v11067_v19  ;;  %v11075_v22 = vadd.f32 %v10871_v44, %v10805_v11  ;;  %v817_v39 = vmul.f32 %v11067_v19, %v11067_v19  ;;  %v820_v11 = vmul.f32 %v10920_v4, %v10920_v4 }
 0x10b   :  { %9740 = vmatmul.mubr.f32.gmra.mrb[46].mxu1 %v11001_v13  ;;  %14646 = vst [vmem:[#allocation50_spill] sm:$0xff] %v11083_v31  ;;  %v819_v35 = vmul.f32 %v11083_v31, %v11083_v31  ;;  %v823_v47 = vmul.f32 %v10948_v24, %v10948_v24  ;;  %v825_v54 = vmul.f32 %v10942_v17, %v10942_v17 }
 0x10c   :  { %9742 = vmatprep.mubr.f32.mxu1 %v11013_v27  ;;  %14645 = vst [vmem:[#allocation49_spill] sm:$0xff] %v11075_v22  ;;  %v818_v44 = vmul.f32 %v11075_v22, %v11075_v22  ;;  %v826_v56 = vmul.f32 %v10956_v33, %v10956_v33 }
 0x10d   :  { %9844 = vmatmul.mubr.f32.gmra.mrb[46].mxu0 %v810_v36  ;;  %v822_v36 = vmul.f32 %v10916_v1, %v10916_v1 }
 0x10e   :  { %9846 = vmatprep.mubr.f32.mxu0 %v811_v51  ;;  %v824_v51 = vmul.f32 %v10960_v38, %v10960_v38 }
 0x10f   :  { %9743 = vmatmul.mubr.f32.gmra.mrb[48].mxu1 %v11023_v46 }
 0x110   :  { %9745 = vmatprep.mubr.f32.mxu1 %v11030_v49 }
 0x111   :  { %9847 = vmatmul.mubr.f32.gmra.mrb[48].mxu0 %v812_v0  ;;  %v827_v0 = vmul.f32 %v10988_v63, %v10988_v63 }
 0x112   :  { %9849 = vmatprep.mubr.f32.mxu0 %v813_v3  ;;  %v828_v3 = vmul.f32 %v10998_v12, %v10998_v12 }
 0x113   :  { %9746 = vmatmul.mubr.f32.gmra.mrb[50].mxu1 %v11047_v23 }
 0x114   :  { %9748 = vmatprep.mubr.f32.mxu1 %v11055_v8 }
 0x115   :  { %9850 = vmatmul.mubr.f32.gmra.mrb[50].mxu0 %v814_v28  ;;  %v829_v28 = vmul.f32 %v10982_v55, %v10982_v55 }
 0x116   :  { %9852 = vmatprep.mubr.f32.mxu0 %v815_v41  ;;  %v830_v41 = vmul.f32 %v10995_v7, %v10995_v7 }
 0x117   :  { %9749 = vmatmul.mubr.f32.gmra.mrb[52].mxu1 %v11063_v9 }
 0x118   :  { %9751 = vmatprep.mubr.f32.mxu1 %v11067_v19 }
 0x119   :  { %9853 = vmatmul.mubr.f32.gmra.mrb[52].mxu0 %v816_v48  ;;  %v831_v48 = vmul.f32 %v11035_v52, %v11035_v52 }
 0x11a   :  { %9855 = vmatprep.mubr.f32.mxu0 %v817_v39  ;;  %v10526_v39 = vmov 0  }
 0x11b   :  { %9752 = vmatmul.mubr.f32.gmra.mrb[54].mxu1 %v11075_v22  ;;  %10322 = vset.pattern.permute.xlu0 %v10526_v39 }
 0x11c   :  { %9754 = vmatprep.mubr.f32.mxu1 %v11083_v31  ;;  %10323 = vset.pattern.permute.xlu1 %v10526_v39  ;;  %v101_v39 = vld [vmem:[%s14473_s1 + $0x30] sm:$0xff] }
 0x11d   :  { %9856 = vmatmul.mubr.f32.gmra.mrb[54].mxu0 %v818_v44  ;;  %v832_v44 = vmul.f32 %v11043_v61, %v11043_v61 }
 0x11e   :  { %9858 = vmatprep.mubr.f32.mxu0 %v819_v35  ;;  %v833_v35 = vmul.f32 %v11026_v25, %v11026_v25 }
 0x11f   :  { %9755 = vmatmul.mubr.f32.gmra.mrb[56].mxu1 %v10920_v4 }
 0x120   :  { %9757 = vmatprep.mubr.f32.mxu1 %v10901_v57 }
 0x121   :  { %9859 = vmatmul.mubr.f32.gmra.mrb[56].mxu0 %v820_v11  ;;  %v834_v11 = vmul.f32 %v11039_v32, %v11039_v32 }
 0x122   :  { %9861 = vmatprep.mubr.f32.mxu0 %v821_v58  ;;  %v2272_v58 = vld [vmem:[%s14472_s7] sm:$0x3] }
 0x123   :  { %9758 = vmatmul.mubr.f32.gmra.mrb[58].mxu1 %v10916_v1  ;;  %10318 = vmatprep.subr.msk.bf16.mxu1 %vm2346_vm1, %v2272_v58 }
 0x124   :  { %9760 = vmatprep.mubr.f32.mxu1 %v10948_v24 }
 0x125   :  { %9862 = vmatmul.mubr.f32.gmra.mrb[58].mxu0 %v822_v36  ;;  %v2348_v36 = vsel %vm2346_vm1, %v2272_v58, 0  ;;  %v104_v58 = vld [vmem:[%s14473_s1 + $0x48] sm:$0xff]  ;;  %vm9029_vm1 = vcmask 1048512  }
 0x126   :  { %9864 = vmatprep.mubr.f32.mxu0 %v823_v47  ;;  %9883 = vmatpush3.bf16.msra.mxu1 %v2348_v36  ;;  %v95_v47 = vld [vmem:[%s14473_s1] sm:$0xff] }
 0x127   :  { %9761 = vmatmul.mubr.f32.gmra.mrb[60].mxu1 %v10960_v38 }
 0x128   :  { %9763 = vmatprep.mubr.f32.mxu1 %v10942_v17 }
 0x129   :  { %9865 = vmatmul.mubr.f32.gmra.mrb[60].mxu0 %v824_v51  ;;  %v96_v51 = vld [vmem:[%s14473_s1 + $0x8] sm:$0xff] }
 0x12a   :  { %9867 = vmatprep.mubr.f32.mxu0 %v825_v54  ;;  %v2248_v54 = vpack.c.bf16 %v96_v51, %v95_v47  ;;  %v105_v47 = vld [vmem:[%s14473_s1 + $0x50] sm:$0xff]  ;;  %v106_v51 = vld [vmem:[%s14473_s1 + $0x58] sm:$0xff] }
 0x12b   :  { %9764 = vmatmul.mubr.f32.gmra.mrb[62].mxu1 %v10956_v33 }
 0x12c   :  { %9766 = vmatprep.mubr.f32.mxu1 %v10988_v63 }
 0x12d   :  { %9868 = vmatmul.mubr.f32.gmra.mrb[62].mxu0 %v826_v56  ;;  %v97_v56 = vld [vmem:[%s14473_s1 + $0x10] sm:$0xff] }
 0x12e   :  { %9870 = vmatprep.mubr.f32.mxu0 %v827_v0  ;;  %v98_v0 = vld [vmem:[%s14473_s1 + $0x18] sm:$0xff] }
 0x12f   :  { %9767 = vmatmul.mubr.f32.gmra.mrb[64].mxu1 %v10998_v12 }
 0x130   :  { %9769 = vmatprep.mubr.f32.mxu1 %v10982_v55 }
 0x131   :  { %9871 = vmatmul.mubr.f32.gmra.mrb[64].mxu0 %v828_v3  ;;  %v2249_v3 = vpack.c.bf16 %v98_v0, %v97_v56  ;;  %v107_v56 = vld [vmem:[%s14473_s1 + $0x60] sm:$0xff]  ;;  %v108_v0 = vld [vmem:[%s14473_s1 + $0x68] sm:$0xff] }
 0x132   :  { %9873 = vmatprep.mubr.f32.mxu0 %v829_v28  ;;  %v99_v28 = vld [vmem:[%s14473_s1 + $0x20] sm:$0xff] }
 0x133   :  { %9770 = vmatmul.mubr.f32.gmra.mrb[66].mxu1 %v10995_v7 }
 0x134   :  { %9772 = vmatprep.mubr.f32.mxu1 %v11035_v52 }
 0x135   :  { %9874 = vmatmul.mubr.f32.gmra.mrb[66].mxu0 %v830_v41  ;;  %v100_v41 = vld [vmem:[%s14473_s1 + $0x28] sm:$0xff] }
 0x136   :  { %9876 = vmatprep.mubr.f32.mxu0 %v831_v48  ;;  %v2250_v48 = vpack.c.bf16 %v100_v41, %v99_v28  ;;  %v109_v28 = vld [vmem:[%s14473_s1 + $0x70] sm:$0xff]  ;;  %v110_v41 = vld [vmem:[%s14473_s1 + $0x78] sm:$0xff] }
 0x137   :  { %9773 = vmatmul.mubr.f32.gmra.mrb[68].mxu1 %v11043_v61 }
 0x138   :  { %9775 = vmatprep.mubr.f32.mxu1 %v11026_v25 }
 0x139   :  { %9877 = vmatmul.mubr.f32.gmra.mrb[68].mxu0 %v832_v44  ;;  %v102_v44 = vld [vmem:[%s14473_s1 + $0x38] sm:$0xff] }
 0x13a   :  { %9879 = vmatprep.mubr.f32.mxu0 %v833_v35  ;;  %v2251_v35 = vpack.c.bf16 %v102_v44, %v101_v39  ;;  %v111_v39 = vld [vmem:[%s14473_s1 + $0x80] sm:$0xff]  ;;  %v112_v44 = vld [vmem:[%s14473_s1 + $0x88] sm:$0xff] }
 0x13b   :  { %9776 = vmatmul.mubr.f32.gmra.mrb[70].mxu1 %v11039_v32 }
 0x13c   :  { %9884 = vmatprep.mubr.msk.bf16.mxu1 %vm2273_vm2, %v2248_v54  ;;  %v2253_v54 = vpack.c.bf16 %v106_v51, %v105_v47  ;;  %v115_v47 = vld [vmem:[%s14473_s1 + $0xa0] sm:$0xff]  ;;  %v116_v51 = vld [vmem:[%s14473_s1 + $0xa8] sm:$0xff] }
 0x13d   :  { %9880 = vmatmul.mubr.f32.gmra.mrb[70].mxu0 %v834_v11  ;;  %v103_v11 = vld [vmem:[%s14473_s1 + $0x40] sm:$0xff] }
 0x13e   :  { %v2252_v36 = vpack.c.bf16 %v104_v58, %v103_v11  ;;  %v113_v11 = vld [vmem:[%s14473_s1 + $0x90] sm:$0xff]  ;;  %v114_v58 = vld [vmem:[%s14473_s1 + $0x98] sm:$0xff] }
 0x13f   :  { %9885 = vmatmul.mubr.msk.bf16.vlgmr.msra.gmra.mrb[72].mxu1 %vm2273_vm2, %v2249_v3  ;;  %v2254_v3 = vpack.c.bf16 %v108_v0, %v107_v56  ;;  %v117_v56 = vld [vmem:[%s14473_s1 + $0xb0] sm:$0xff]  ;;  %v118_v0 = vld [vmem:[%s14473_s1 + $0xb8] sm:$0xff] }
 0x140   :  { %9888 = vmatprep.mubr.msk.bf16.mxu1 %vm2273_vm2, %v2250_v48  ;;  %v2255_v48 = vpack.c.bf16 %v110_v41, %v109_v28  ;;  %v119_v28 = vld [vmem:[%s14473_s1 + $0xc0] sm:$0xff]  ;;  %v120_v41 = vld [vmem:[%s14473_s1 + $0xc8] sm:$0xff] }
 0x147   :  { %9889 = vmatmul.mubr.msk.bf16.gmra.mrb[76].mxu1 %vm2273_vm2, %v2251_v35  ;;  %v2256_v35 = vpack.c.bf16 %v112_v44, %v111_v39  ;;  %v121_v39 = vld [vmem:[%s14473_s1 + $0xd0] sm:$0xff]  ;;  %v122_v44 = vld [vmem:[%s14473_s1 + $0xd8] sm:$0xff] }
 0x148   :  { %9892 = vmatprep.mubr.msk.bf16.mxu1 %vm2273_vm2, %v2252_v36  ;;  %v2257_v36 = vpack.c.bf16 %v114_v58, %v113_v11  ;;  %v123_v58 = vld [vmem:[%s14473_s1 + $0xe0] sm:$0xff] }
 0x14f   :  { %9893 = vmatmul.mubr.msk.bf16.gmra.mrb[80].mxu1 %vm2273_vm2, %v2253_v54  ;;  %v2258_v54 = vpack.c.bf16 %v116_v51, %v115_v47 }
 0x150   :  { %9896 = vmatprep.mubr.msk.bf16.mxu1 %vm2273_vm2, %v2254_v3  ;;  %v2259_v3 = vpack.c.bf16 %v118_v0, %v117_v56  ;;  %v125_v56 = vld [vmem:[%s14473_s1 + $0xf0] sm:$0xff]  ;;  %v126_v0 = vld [vmem:[%s14473_s1 + $0xf8] sm:$0xff] }
 0x157   :  { %9897 = vmatmul.mubr.msk.bf16.gmra.mrb[84].mxu1 %vm2273_vm2, %v2255_v48  ;;  %v2260_v48 = vpack.c.bf16 %v120_v41, %v119_v28  ;;  %v2263_v41 = vpack.c.bf16 %v126_v0, %v125_v56 }
 0x158   :  { %9900 = vmatprep.mubr.msk.bf16.mxu1 %vm2273_vm2, %v2256_v35  ;;  %v2261_v35 = vpack.c.bf16 %v122_v44, %v121_v39 }
 0x15f   :  { %9901 = vmatmul.mubr.msk.bf16.gmra.mrb[88].mxu1 %vm2273_vm2, %v2257_v36  ;;  %v124_v36 = vld [vmem:[%s14473_s1 + $0xe8] sm:$0xff] }
 0x160   :  { %9904 = vmatprep.mubr.msk.bf16.mxu1 %vm2273_vm2, %v2258_v54  ;;  %v2262_v54 = vpack.c.bf16 %v124_v36, %v123_v58 }
 0x167   :  { %9905 = vmatmul.mubr.msk.bf16.gmra.mrb[92].mxu1 %vm2273_vm2, %v2259_v3 }
 0x168   :  { %9908 = vmatprep.mubr.msk.bf16.mxu1 %vm2273_vm2, %v2260_v48 }
 0x16f   :  { %9909 = vmatmul.mubr.msk.bf16.gmra.mrb[96].mxu1 %vm2273_vm2, %v2261_v35 }
 0x170   :  { %9912 = vmatprep.mubr.msk.bf16.mxu1 %vm2273_vm2, %v2262_v54 }
 0x177   :  { %9913 = vmatmul.mubr.msk.bf16.gmra.mrb[100].mxu1 %vm2273_vm2, %v2263_v41  ;;  %v127_v41 = vld [vmem:[%s14473_s1 + $0x100] sm:$0xff] }
 0x1b2   :  { %v9708_v11 = vpop.f32.mrb[24].mxu1 }
 0x1b3   :  { %v1141_v47 = vmul.f32 0.025, %v9708_v11  ;;  %v548_v51 = vpop.f32.mrb[25].mxu1 }
 0x1b4   :  { %v1140_v3 = vmul.f32 0.025, %v548_v51  ;;  %v9812_v28 = vpop.f32.mrb[24].mxu0 }
 0x1b5   :  { %v1237_v48 = vmul.f32 %v1141_v47, %v1141_v47  ;;  %v1189_v39 = vmul.f32 0.025, %v9812_v28  ;;  %v901_v44 = vpop.f32.mrb[25].mxu0  ;;  %1387 = vperm.xlu0 %10322, %v1141_v47  }
 0x1b6   :  { %v1236_v35 = vmul.f32 %v1140_v3, %v1140_v3  ;;  %v1188_v11 = vmul.f32 0.025, %v901_v44  ;;  %v9711_v58 = vpop.f32.mrb[26].mxu1 }
 0x1b7   :  { %v1285_v36 = vsub.f32 %v1189_v39, %v1237_v48  ;;  %v1143_v10 = vmul.f32 0.025, %v9711_v58  ;;  %v558_v32 = vpop.f32.mrb[27].mxu1  ;;  %v128_v48 = vld [vmem:[%s14473_s1 + $0x108] sm:$0xff] }
 0x1b8   :  { %v1284_v25 = vsub.f32 %v1188_v11, %v1236_v35  ;;  %v1142_v61 = vmul.f32 0.025, %v558_v32  ;;  %v9815_v52 = vpop.f32.mrb[26].mxu0 }
 0x1b9   :  { %v1333_v51 = vmax.f32 %v1285_v36, 0.0  ;;  %v1239_v7 = vmul.f32 %v1143_v10, %v1143_v10  ;;  %v1191_v56 = vmul.f32 0.025, %v9815_v52  ;;  %v911_v0 = vpop.f32.mrb[27].mxu0  ;;  %1382 = vperm.xlu0 %10322, %v1140_v3   ;;  %1397 = vperm.xlu1 %10323, %v1143_v10   ;;  %v2264_v52 = vpack.c.bf16 %v128_v48, %v127_v41  ;;  %v129_v10 = vld [vmem:[%s14473_s1 + $0x110] sm:$0xff]  ;;  %v130_v36 = vld [vmem:[%s14473_s1 + $0x118] sm:$0xff] }
 0x1ba   :  { %v1332_v47 = vmax.f32 %v1284_v25, 0.0  ;;  %v1238_v28 = vmul.f32 %v1142_v61, %v1142_v61  ;;  %v1190_v54 = vmul.f32 0.025, %v911_v0  ;;  %v9714_v55 = vpop.f32.mrb[28].mxu1  ;;  %v2265_v48 = vpack.c.bf16 %v130_v36, %v129_v10 }
 0x1bb   :  { %v1669_v32 = vadd.f32 1e-05, %v1333_v51  ;;  %v1287_v39 = vsub.f32 %v1191_v56, %v1239_v7  ;;  %v1145_v44 = vmul.f32 0.025, %v9714_v55  ;;  %v568_v35 = vpop.f32.mrb[29].mxu1  ;;  %9916 = vmatprep.mubr.msk.bf16.mxu1 %vm2273_vm2, %v2264_v52 }
 0x1bc   :  { %v1668_v25 = vadd.f32 1e-05, %v1332_v47  ;;  %v1286_v3 = vsub.f32 %v1190_v54, %v1238_v28  ;;  %v1144_v11 = vmul.f32 0.025, %v568_v35  ;;  %v9818_v58 = vpop.f32.mrb[28].mxu0  ;;  %v10325_v35 = vld [vmem:[%s14474_s6] sm:$0xff]   ;;  %9917 = vmatmul.mubr.msk.bf16.gmra.mrb[104].mxu1 %vm2273_vm2, %v2265_v48 }
 0x1bd   :  { %v11265_v0 = vmul.f32 %v1145_v44, %v1145_v44  ;;  %v11267_v12 = vmul.f32 0.025, %v9818_v58  ;;  %v921_v7 = vpop.f32.mrb[29].mxu0  ;;  %1392 = vperm.xlu1 %10323, %v1142_v61   ;;  %v1335_v58 = vmax.f32 %v1287_v39, 0.0  ;;  %9932 = vmatprep.subr.bf16.mxu1 %v10325_v35 }
 0x1be   :  { %10333 = vrsqrt.f32 %v1668_v25  ;;  %v1334_v55 = vmax.f32 %v1286_v3, 0.0  ;;  %v1240_v51 = vmul.f32 %v1144_v11, %v1144_v11  ;;  %v1192_v56 = vmul.f32 0.025, %v921_v7  ;;  %1402 = vperm.xlu0 %10322, %v1144_v11   ;;  %v9717_v47 = vpop.f32.mrb[30].mxu1  ;;  %9933 = vmatpush3.bf16.msra.mxu1 %v10325_v35  ;;  %v132_v35 = vld [vmem:[%s14473_s1 + $0x128] sm:$0xff] }
 0x1bf   :  { %v1289_v28 = vsub.f32 %v11267_v12, %v11265_v0  ;;  %v1147_v54 = vmul.f32 0.025, %v9717_v47  ;;  %v578_v41 = vpop.f32.mrb[31].mxu1  ;;  %10335 = vrsqrt.f32 %v1669_v32 }
 0x1c0   :  { %v1670_v61 = vadd.f32 1e-05, %v1334_v55  ;;  %v1288_v63 = vsub.f32 %v1192_v56, %v1240_v51  ;;  %v1146_v52 = vmul.f32 0.025, %v578_v41  ;;  %v9821_v25 = vpop.f32.mrb[30].mxu0  ;;  %v131_v41 = vld [vmem:[%s14473_s1 + $0x120] sm:$0xff] }
 0x1c1   :  { %v11275_v3 = vmul.f32 %v1147_v54, %v1147_v54  ;;  %v11277_v7 = vmul.f32 0.025, %v9821_v25  ;;  %v931_v11 = vpop.f32.mrb[31].mxu0  ;;  %1407 = vperm.xlu1 %10323, %v1145_v44   ;;  %v10326_v44 = vld [vmem:[%s14474_s6 + $0x8] sm:$0xff]   ;;  %v1671_v51 = vadd.f32 1e-05, %v1335_v58  ;;  %v2266_v33 = vpack.c.bf16 %v132_v35, %v131_v41 }
 0x1c2   :  { %v11280_v12 = vmul.f32 %v1146_v52, %v1146_v52  ;;  %v11282_v10 = vmul.f32 0.025, %v931_v11  ;;  %1412 = vperm.xlu0 %10322, %v1146_v52   ;;  %v9720_v36 = vpop.f32.mrb[32].mxu1  ;;  %9934 = vmatprep.subr.bf16.mxu1 %v10326_v44  ;;  %v133_v58 = vld [vmem:[%s14473_s1 + $0x130] sm:$0xff]  ;;  %10337 = vrsqrt.f32 %v1670_v61 }
 0x1c3   :  { %v1291_v39 = vsub.f32 %v11277_v7, %v11275_v3  ;;  %v1149_v0 = vmul.f32 0.025, %v9720_v36  ;;  %v588_v55 = vpop.f32.mrb[33].mxu1  ;;  %v10327_v36 = vld [vmem:[%s14474_s6 + $0x10] sm:$0xff]   ;;  %9935 = vmatpush3.bf16.msra.mxu1 %v10326_v44  ;;  %9920 = vmatprep.mubr.msk.bf16.mxu1 %vm2273_vm2, %v2266_v33  ;;  %10339 = vrsqrt.f32 %v1671_v51  ;;  %v10328_v33 = vld [vmem:[%s14474_s6 + $0x18] sm:$0xff]  }
 0x1c4   :  { %v1148_v56 = vmul.f32 0.025, %v588_v55  ;;  %v9824_v47 = vpop.f32.mrb[32].mxu0  ;;  %v1336_v55 = vmax.f32 %v1288_v63, 0.0  ;;  %9936 = vmatprep.subr.bf16.mxu1 %v10327_v36 }
 0x1c5   :  { %v11294_v48 = vmul.f32 %v1149_v0, %v1149_v0  ;;  %v11296_v52 = vmul.f32 0.025, %v9824_v47  ;;  %v941_v25 = vpop.f32.mrb[33].mxu0  ;;  %1417 = vperm.xlu1 %10323, %v1147_v54   ;;  %v134_v54 = vld [vmem:[%s14473_s1 + $0x138] sm:$0xff] }
 0x1c6   :  { %v11304_v3 = vmul.f32 %v1148_v56, %v1148_v56  ;;  %v11306_v7 = vmul.f32 0.025, %v941_v25  ;;  %1422 = vperm.xlu0 %10322, %v1148_v56   ;;  %v9723_v11 = vpop.f32.mrb[34].mxu1  ;;  %v2267_v24 = vpack.c.bf16 %v134_v54, %v133_v58  ;;  %v1672_v58 = vadd.f32 1e-05, %v1336_v55 }
 0x1c7   :  { %v1151_v32 = vmul.f32 0.025, %v9723_v11  ;;  %v598_v61 = vpop.f32.mrb[35].mxu1  ;;  %v1337_v11 = vmax.f32 %v1289_v28, 0.0  ;;  %9937 = vmatpush3.bf16.msra.mxu1 %v10327_v36  ;;  %v135_v36 = vld [vmem:[%s14473_s1 + $0x140] sm:$0xff] }
 0x1c8   :  { %v10334_v25 = vpop.eup %10333  ;;  %v1150_v17 = vmul.f32 0.025, %v598_v61  ;;  %v9827_v38 = vpop.f32.mrb[34].mxu0  ;;  %9921 = vmatmul.mubr.msk.bf16.gmra.mrb[108].mxu1 %vm2273_vm2, %v2267_v24  ;;  %9938 = vmatprep.subr.bf16.mxu1 %v10328_v33  ;;  %10341 = vrsqrt.f32 %v1672_v58  ;;  %v14648_v22 = vsub.f32 %v11306_v7, %v11304_v3 }
 0x1c9   :  { %v11318_v1 = vmul.f32 %v1151_v32, %v1151_v32  ;;  %v11320_v57 = vmul.f32 0.025, %v9827_v38  ;;  %v951_v63 = vpop.f32.mrb[35].mxu0  ;;  %1427 = vperm.xlu1 %10323, %v1149_v0   ;;  %v10336_v28 = vpop.eup %10335  ;;  %v1339_v0 = vmax.f32 %v1291_v39, 0.0  ;;  %v1673_v54 = vadd.f32 1e-05, %v1337_v11 }
 0x1ca   :  { %v11323_v44 = vmul.f32 %v1150_v17, %v1150_v17  ;;  %v11325_v41 = vmul.f32 0.025, %v951_v63  ;;  %1766 = vperm.xlu0 %10322, %v10334_v25   ;;  %v9726_v35 = vpop.f32.mrb[36].mxu1 }
 0x1cb   :  { %v11330_v38 = vmul.f32 0.025, %v9726_v35  ;;  %v608_v61 = vpop.f32.mrb[37].mxu1  ;;  %9939 = vmatpush3.bf16.msra.mxu1 %v10328_v33  ;;  %v1675_v31 = vadd.f32 1e-05, %v1339_v0  ;;  %10343 = vrsqrt.f32 %v1673_v54  ;;  %v138_v54 = vld [vmem:[%s14473_s1 + $0x158] sm:$0xff] }
 0x1cc   :  { %v1152_v25 = vmul.f32 0.025, %v608_v61  ;;  %v9830_v63 = vpop.f32.mrb[36].mxu0  ;;  %v10338_v11 = vpop.eup %10337 }
 0x1cd   :  { %1771 = vperm.xlu1 %10323, %v10336_v28   ;;  %v11339_v24 = vmul.f32 %v11330_v38, %v11330_v38  ;;  %v11341_v55 = vmul.f32 0.025, %v9830_v63  ;;  %v961_v35 = vpop.f32.mrb[37].mxu0  ;;  %v14647_v28 = vsub.f32 %v11282_v10, %v11280_v12  ;;  %v137_v63 = vld [vmem:[%s14473_s1 + $0x150] sm:$0xff] }
 0x1ce   :  { %1432 = vperm.xlu0 %10322, %v1150_v17   ;;  %v11346_v39 = vmul.f32 %v1152_v25, %v1152_v25  ;;  %v9729_v51 = vpop.f32.mrb[38].mxu1  ;;  %v11348_v61 = vmul.f32 0.025, %v961_v35  ;;  %v136_v17 = vld [vmem:[%s14473_s1 + $0x148] sm:$0xff]  ;;  %v2269_v9 = vpack.c.bf16 %v138_v54, %v137_v63 }
 0x1cf   :  { %v1338_v47 = vmax.f32 %v14647_v28, 0.0  ;;  %v11355_v56 = vmul.f32 0.025, %v9729_v51  ;;  %v618_v4 = vpop.f32.mrb[39].mxu1  ;;  %v2268_v10 = vpack.c.bf16 %v136_v17, %v135_v36 }
 0x1d0   :  { %v11362_v35 = vmul.f32 0.025, %v618_v4  ;;  %v9833_v12 = vpop.f32.mrb[38].mxu0 }
 0x1d1   :  { %1437 = vperm.xlu1 %10323, %v1151_v32   ;;  %v11366_v51 = vmul.f32 %v11355_v56, %v11355_v56  ;;  %v11368_v28 = vmul.f32 0.025, %v9833_v12  ;;  %v971_v33 = vpop.f32.mrb[39].mxu0  ;;  %9924 = vmatprep.mubr.msk.bf16.mxu1 %vm2273_vm2, %v2268_v10  ;;  %v1674_v36 = vadd.f32 1e-05, %v1338_v47 }
 0x1d2   :  { %1776 = vperm.xlu0 %10322, %v10338_v11   ;;  %v11375_v4 = vmul.f32 %v11362_v35, %v11362_v35  ;;  %v11377_v0 = vmul.f32 0.025, %v971_v33  ;;  %v9732_v32 = vpop.f32.mrb[40].mxu1  ;;  %v10340_v11 = vpop.eup %10339  ;;  %v1340_v33 = vmax.f32 %v14648_v22, 0.0  ;;  %9925 = vmatmul.mubr.msk.bf16.gmra.mrb[112].mxu1 %vm2273_vm2, %v2269_v9 }
 0x1d3   :  { %v11382_v12 = vmul.f32 0.025, %v9732_v32  ;;  %v628_v58 = vpop.f32.mrb[41].mxu1  ;;  %v10329_v32 = vld [vmem:[%s14474_s6 + $0x20] sm:$0xff]   ;;  %10345 = vrsqrt.f32 %v1674_v36 }
 0x1d4   :  { %v11392_v10 = vmul.f32 0.025, %v628_v58  ;;  %v9836_v47 = vpop.f32.mrb[40].mxu0  ;;  %9940 = vmatprep.subr.bf16.mxu1 %v10329_v32  ;;  %10347 = vrsqrt.f32 %v1675_v31 }
 0x1d5   :  { %1781 = vperm.xlu1 %10323, %v10340_v11   ;;  %v11399_v17 = vmul.f32 %v11382_v12, %v11382_v12  ;;  %v11401_v8 = vmul.f32 0.025, %v9836_v47  ;;  %v981_v3 = vpop.f32.mrb[41].mxu0  ;;  %v14649_v47 = vsub.f32 %v11296_v52, %v11294_v48  ;;  %9941 = vmatpush3.bf16.msra.mxu1 %v10329_v32  ;;  %v139_v48 = vld [vmem:[%s14473_s1 + $0x160] sm:$0xff] }
 0x1d6   :  { %1442 = vperm.xlu0 %10322, %v1152_v25   ;;  %v11405_v22 = vmul.f32 %v11392_v10, %v11392_v10  ;;  %v9735_v7 = vpop.f32.mrb[42].mxu1  ;;  %v11407_v58 = vmul.f32 0.025, %v981_v3  ;;  %v10330_v25 = vld [vmem:[%s14474_s6 + $0x28] sm:$0xff]   ;;  %v1676_v3 = vadd.f32 1e-05, %v1340_v33 }
 0x1d7   :  { %v11412_v54 = vmul.f32 0.025, %v9735_v7  ;;  %v638_v11 = vpop.f32.mrb[43].mxu1  ;;  %v1341_v19 = vmax.f32 %v14649_v47, 0.0  ;;  %v10342_v7 = vpop.eup %10341  ;;  %9942 = vmatprep.subr.bf16.mxu1 %v10330_v25  ;;  %v140_v47 = vld [vmem:[%s14473_s1 + $0x168] sm:$0xff] }
 0x1d8   :  { %v11422_v36 = vmul.f32 0.025, %v638_v11  ;;  %v9839_v23 = vpop.f32.mrb[42].mxu0  ;;  %v10344_v9 = vpop.eup %10343  ;;  %v2270_v13 = vpack.c.bf16 %v140_v47, %v139_v48  ;;  %10349 = vrsqrt.f32 %v1676_v3 }
 0x1d9   :  { %1447 = vperm.xlu1 %10323, %v11330_v38   ;;  %v11427_v63 = vmul.f32 %v11412_v54, %v11412_v54  ;;  %v11429_v49 = vmul.f32 0.025, %v9839_v23  ;;  %v991_v46 = vpop.f32.mrb[43].mxu0  ;;  %v1677_v31 = vadd.f32 1e-05, %v1341_v19  ;;  %9943 = vmatpush3.bf16.msra.mxu1 %v10330_v25  ;;  %v10331_v25 = vld [vmem:[%s14474_s6 + $0x30] sm:$0xff]  }
 0x1da   :  { %1786 = vperm.xlu0 %10322, %v10342_v7   ;;  %v11436_v52 = vmul.f32 %v11422_v36, %v11422_v36  ;;  %v11438_v33 = vmul.f32 0.025, %v991_v46  ;;  %v9738_v38 = vpop.f32.mrb[44].mxu1  ;;  %9928 = vmatprep.mubr.msk.bf16.mxu1 %vm2273_vm2, %v2270_v13 }
 0x1db   :  { %v11442_v23 = vmul.f32 0.025, %v9738_v38  ;;  %v648_v11 = vpop.f32.mrb[45].mxu1  ;;  %v141_v38 = vld [vmem:[%s14473_s1 + $0x170] sm:$0xff]  ;;  %9944 = vmatprep.subr.bf16.mxu1 %v10331_v25  ;;  %10351 = vrsqrt.f32 %v1677_v31 }
 0x1dc   :  { %v11449_v27 = vmul.f32 0.025, %v648_v11  ;;  %v9842_v46 = vpop.f32.mrb[44].mxu0  ;;  %v142_v11 = vld [vmem:[%s14473_s1 + $0x178] sm:$0xff] }
 0x1dd   :  { %1791 = vperm.xlu1 %10323, %v10344_v9   ;;  %v11456_v32 = vmul.f32 %v11442_v23, %v11442_v23  ;;  %v11458_v60 = vmul.f32 0.025, %v9842_v46  ;;  %v1001_v19 = vpop.f32.mrb[45].mxu0  ;;  %v14650_v46 = vsub.f32 %v11325_v41, %v11323_v44  ;;  %9945 = vmatpush3.bf16.msra.mxu1 %v10331_v25  ;;  %v10346_v44 = vpop.eup %10345 }
 0x1de   :  { %1452 = vperm.xlu0 %10322, %v11362_v35   ;;  %v11469_v9 = vmul.f32 %v11449_v27, %v11449_v27  ;;  %v9741_v48 = vpop.f32.mrb[46].mxu1  ;;  %v11471_v47 = vmul.f32 0.025, %v1001_v19  ;;  %v2271_v35 = vpack.c.bf16 %v142_v11, %v141_v38  ;;  %9946 = vmatprep.subr.bf16.mxu1 %v10332_v40 }
 0x1df   :  { %v1342_v7 = vmax.f32 %v14650_v46, 0.0  ;;  %v11479_v2 = vmul.f32 0.025, %v9741_v48  ;;  %v658_v3 = vpop.f32.mrb[47].mxu1  ;;  %v14651_v48 = vsub.f32 %v11320_v57, %v11318_v1 }
 0x1e0   :  { %v11486_v13 = vmul.f32 0.025, %v658_v3  ;;  %v9845_v21 = vpop.f32.mrb[46].mxu0  ;;  %9929 = vmatmul.mubr.msk.bf16.gmra.mrb[116].mxu1 %vm2273_vm2, %v2271_v35  ;;  %v10348_v35 = vpop.eup %10347 }
 0x1e1   :  { %1457 = vperm.xlu1 %10323, %v11355_v56   ;;  %v11491_v41 = vmul.f32 %v11479_v2, %v11479_v2  ;;  %v11493_v38 = vmul.f32 0.025, %v9845_v21  ;;  %v1011_v11 = vpop.f32.mrb[47].mxu0  ;;  %v1343_v46 = vmax.f32 %v14651_v48, 0.0  ;;  %v1678_v15 = vadd.f32 1e-05, %v1342_v7  ;;  %9947 = vmatpush3.bf16.msra.mxu1 %v10332_v40 }
 0x1e2   :  { %1796 = vperm.xlu0 %10322, %v10346_v44   ;;  %v11501_v25 = vmul.f32 %v11486_v13, %v11486_v13  ;;  %v11503_v56 = vmul.f32 0.025, %v1011_v11  ;;  %v9744_v3 = vpop.f32.mrb[48].mxu1  ;;  %v14652_v40 = vsub.f32 %v11348_v61, %v11346_v39  ;;  %v10350_v30 = vpop.eup %10349 }
 0x1e3   :  { %v11507_v19 = vmul.f32 0.025, %v9744_v3  ;;  %v668_v31 = vpop.f32.mrb[49].mxu1  ;;  %v1679_v21 = vadd.f32 1e-05, %v1343_v46  ;;  %10353 = vrsqrt.f32 %v1678_v15 }
 0x1e4   :  { %v11511_v1 = vmul.f32 0.025, %v668_v31  ;;  %v9848_v44 = vpop.f32.mrb[48].mxu0 }
 0x1e5   :  { %1801 = vperm.xlu1 %10323, %v10348_v35   ;;  %v11515_v11 = vmul.f32 %v11507_v19, %v11507_v19  ;;  %v11517_v7 = vmul.f32 0.025, %v9848_v44  ;;  %v1021_v48 = vpop.f32.mrb[49].mxu0  ;;  %v1344_v35 = vmax.f32 %v14652_v40, 0.0  ;;  %10355 = vrsqrt.f32 %v1679_v21  ;;  %v10352_v21 = vpop.eup %10351 }
 0x1e6   :  { %1462 = vperm.xlu0 %10322, %v11392_v10   ;;  %v11522_v3 = vmul.f32 %v11511_v1, %v11511_v1  ;;  %v9747_v57 = vpop.f32.mrb[50].mxu1  ;;  %v11524_v31 = vmul.f32 0.025, %v1021_v48 }
 0x1e7   :  { %v11531_v43 = vmul.f32 0.025, %v9747_v57  ;;  %v678_v46 = vpop.f32.mrb[51].mxu1  ;;  %v14653_v57 = vsub.f32 %v11341_v55, %v11339_v24  ;;  %v1680_v44 = vadd.f32 1e-05, %v1344_v35 }
 0x1e8   :  { %v11535_v5 = vmul.f32 0.025, %v678_v46  ;;  %v9851_v59 = vpop.f32.mrb[50].mxu0 }
 0x1e9   :  { %1467 = vperm.xlu1 %10323, %v11382_v12   ;;  %v11540_v15 = vmul.f32 %v11531_v43, %v11531_v43  ;;  %v11542_v39 = vmul.f32 0.025, %v9851_v59  ;;  %v1031_v61 = vpop.f32.mrb[51].mxu0  ;;  %v1345_v48 = vmax.f32 %v14653_v57, 0.0  ;;  %10357 = vrsqrt.f32 %v1680_v44 }
 0x1ea   :  { %1806 = vperm.xlu0 %10322, %v10350_v30   ;;  %v11549_v40 = vmul.f32 %v11535_v5, %v11535_v5  ;;  %v11551_v46 = vmul.f32 0.025, %v1031_v61  ;;  %v9750_v12 = vpop.f32.mrb[52].mxu1  ;;  %v18_v44 = vstv %s14475_s12 }
 0x1eb   :  { %v11555_v59 = vmul.f32 0.025, %v9750_v12  ;;  %v688_v6 = vpop.f32.mrb[53].mxu1  ;;  %v1681_v62 = vadd.f32 1e-05, %v1345_v48 }
 0x1ec   :  { %v11559_v55 = vmul.f32 0.025, %v688_v6  ;;  %v9854_v30 = vpop.f32.mrb[52].mxu0  ;;  %v14654_v6 = vsub.f32 %v11377_v0, %v11375_v4  ;;  %19 = vst [vmem:[#allocation2] sm:$0x1] %v18_v44 }
 0x1ed   :  { %1811 = vperm.xlu1 %10323, %v10352_v21   ;;  %v11563_v61 = vmul.f32 %v11555_v59, %v11555_v59  ;;  %v11565_v57 = vmul.f32 0.025, %v9854_v30  ;;  %v1041_v35 = vpop.f32.mrb[53].mxu0  ;;  %10359 = vrsqrt.f32 %v1681_v62 }
 0x1ee   :  { %1472 = vperm.xlu0 %10322, %v11422_v36   ;;  %v11570_v12 = vmul.f32 %v11559_v55, %v11559_v55  ;;  %v9753_v10 = vpop.f32.mrb[54].mxu1  ;;  %v11572_v24 = vmul.f32 0.025, %v1041_v35  ;;  %v1346_v21 = vmax.f32 %v14654_v6, 0.0  ;;  %v10354_v35 = vpop.eup %10353  ;;  %v14655_v6 = vsub.f32 %v11368_v28, %v11366_v51 }
 0x1ef   :  { %v11579_v53 = vmul.f32 0.025, %v9753_v10  ;;  %v698_v48 = vpop.f32.mrb[55].mxu1  ;;  %v10356_v62 = vpop.eup %10355 }
 0x1f0   :  { %v11583_v42 = vmul.f32 0.025, %v698_v48  ;;  %v9857_v50 = vpop.f32.mrb[54].mxu0  ;;  %v1347_v48 = vmax.f32 %v14655_v6, 0.0  ;;  %v1682_v45 = vadd.f32 1e-05, %v1346_v21 }
 0x1f1   :  { %1477 = vperm.xlu1 %10323, %v11412_v54   ;;  %v11591_v4 = vmul.f32 %v11579_v53, %v11579_v53  ;;  %v11593_v0 = vmul.f32 0.025, %v9857_v50  ;;  %v1051_v10 = vpop.f32.mrb[55].mxu0 }
 0x1f2   :  { %1816 = vperm.xlu0 %10322, %v10354_v35   ;;  %v11600_v30 = vmul.f32 %v11583_v42, %v11583_v42  ;;  %v11602_v36 = vmul.f32 0.025, %v1051_v10  ;;  %v9756_v54 = vpop.f32.mrb[56].mxu1  ;;  %v1683_v26 = vadd.f32 1e-05, %v1347_v48  ;;  %10361 = vrsqrt.f32 %v1682_v45 }
 0x1f3   :  { %v11606_v37 = vmul.f32 0.025, %v9756_v54  ;;  %v708_v44 = vpop.f32.mrb[57].mxu1  ;;  %v10358_v16 = vpop.eup %10357 }
 0x1f4   :  { %v11610_v28 = vmul.f32 0.025, %v708_v44  ;;  %v9860_v35 = vpop.f32.mrb[56].mxu0  ;;  %v14656_v44 = vsub.f32 %v11407_v58, %v11405_v22  ;;  %10363 = vrsqrt.f32 %v1683_v26 }
 0x1f5   :  { %1821 = vperm.xlu1 %10323, %v10356_v62   ;;  %v11614_v10 = vmul.f32 %v11606_v37, %v11606_v37  ;;  %v11616_v6 = vmul.f32 0.025, %v9860_v35  ;;  %v1061_v21 = vpop.f32.mrb[57].mxu0 }
 0x1f6   :  { %1482 = vperm.xlu0 %10322, %v11449_v27   ;;  %v11621_v54 = vmul.f32 %v11610_v28, %v11610_v28  ;;  %v9759_v50 = vpop.f32.mrb[58].mxu1  ;;  %v11623_v51 = vmul.f32 0.025, %v1061_v21  ;;  %v1348_v62 = vmax.f32 %v14656_v44, 0.0 }
 0x1f7   :  { %v11630_v34 = vmul.f32 0.025, %v9759_v50  ;;  %v718_v48 = vpop.f32.mrb[59].mxu1  ;;  %v14659_v50 = vsub.f32 %v11401_v8, %v11399_v17  ;;  %v10360_v26 = vpop.eup %10359 }
 0x1f8   :  { %v11634_v29 = vmul.f32 0.025, %v718_v48  ;;  %v9863_v20 = vpop.f32.mrb[58].mxu0  ;;  %v1684_v35 = vadd.f32 1e-05, %v1348_v62 }
 0x1f9   :  { %1487 = vperm.xlu1 %10323, %v11442_v23   ;;  %v11639_v45 = vmul.f32 %v11630_v34, %v11630_v34  ;;  %v11641_v22 = vmul.f32 0.025, %v9863_v20  ;;  %v1071_v58 = vpop.f32.mrb[59].mxu0  ;;  %v1349_v21 = vmax.f32 %v14659_v50, 0.0 }
 0x1fa   :  { %1826 = vperm.xlu0 %10322, %v10358_v16   ;;  %v11648_v44 = vmul.f32 %v11634_v29, %v11634_v29  ;;  %v11650_v48 = vmul.f32 0.025, %v1071_v58  ;;  %v9762_v23 = vpop.f32.mrb[60].mxu1  ;;  %10365 = vrsqrt.f32 %v1684_v35 }
 0x1fb   :  { %14657 = vst [vmem:[#allocation51_spill] sm:$0xff] %v11639_v45  ;;  %14658 = vst [vmem:[#allocation52_spill] sm:$0xff] %v11641_v22  ;;  %v11654_v20 = vmul.f32 0.025, %v9762_v23  ;;  %v728_v18 = vpop.f32.mrb[61].mxu1 }
 0x1fc   :  { %14660 = vst [vmem:[#allocation53_spill] sm:$0xff] %v11648_v44  ;;  %14661 = vst [vmem:[#allocation54_spill] sm:$0xff] %v11650_v48  ;;  %v11658_v17 = vmul.f32 0.025, %v728_v18  ;;  %v9866_v16 = vpop.f32.mrb[60].mxu0  ;;  %v14664_v18 = vsub.f32 %v11438_v33, %v11436_v52  ;;  %v10362_v48 = vpop.eup %10361 }
 0x1fd   :  { %1831 = vperm.xlu1 %10323, %v10360_v26   ;;  %v11662_v58 = vmul.f32 %v11654_v20, %v11654_v20  ;;  %v11664_v50 = vmul.f32 0.025, %v9866_v16  ;;  %v1081_v62 = vpop.f32.mrb[61].mxu0  ;;  %v1685_v14 = vadd.f32 1e-05, %v1349_v21 }
 0x1fe   :  { %1492 = vperm.xlu0 %10322, %v11486_v13   ;;  %v11669_v23 = vmul.f32 %v11658_v17, %v11658_v17  ;;  %v9765_v27 = vpop.f32.mrb[62].mxu1  ;;  %v11671_v8 = vmul.f32 0.025, %v1081_v62  ;;  %v1350_v26 = vmax.f32 %v14664_v18, 0.0 }
 0x1ff   :  { %14662 = vst [vmem:[#allocation55_spill] sm:$0xff] %v11662_v58  ;;  %14663 = vst [vmem:[#allocation56_spill] sm:$0xff] %v11664_v50  ;;  %v11678_v45 = vmul.f32 0.025, %v9765_v27  ;;  %v738_v21 = vpop.f32.mrb[63].mxu1  ;;  %10367 = vrsqrt.f32 %v1685_v14  ;;  %v14667_v27 = vsub.f32 %v11429_v49, %v11427_v63  ;;  %v10364_v14 = vpop.eup %10363 }
 0x200   :  { %v11682_v22 = vmul.f32 0.025, %v738_v21  ;;  %v9869_v44 = vpop.f32.mrb[62].mxu0  ;;  %v1686_v16 = vadd.f32 1e-05, %v1350_v26 }
 0x201   :  { %1497 = vperm.xlu1 %10323, %v11479_v2   ;;  %v11687_v35 = vmul.f32 %v11678_v45, %v11678_v45  ;;  %v11689_v52 = vmul.f32 0.025, %v9869_v44  ;;  %v1091_v33 = vpop.f32.mrb[63].mxu0  ;;  %v1351_v62 = vmax.f32 %v14667_v27, 0.0 }
 0x202   :  { %1836 = vperm.xlu0 %10322, %v10362_v48   ;;  %v11696_v18 = vmul.f32 %v11682_v22, %v11682_v22  ;;  %v11698_v21 = vmul.f32 0.025, %v1091_v33  ;;  %v9768_v2 = vpop.f32.mrb[64].mxu1  ;;  %10369 = vrsqrt.f32 %v1686_v16 }
 0x203   :  { %14665 = vst [vmem:[#allocation57_spill] sm:$0xff] %v11687_v35  ;;  %14666 = vst [vmem:[#allocation58_spill] sm:$0xff] %v11689_v52  ;;  %v11702_v44 = vmul.f32 0.025, %v9768_v2  ;;  %v748_v58 = vpop.f32.mrb[65].mxu1 }
 0x204   :  { %14668 = vst [vmem:[#allocation59_spill] sm:$0xff] %v11696_v18  ;;  %14669 = vst [vmem:[#allocation60_spill] sm:$0xff] %v11698_v21  ;;  %v11706_v63 = vmul.f32 0.025, %v748_v58  ;;  %v9872_v48 = vpop.f32.mrb[64].mxu0  ;;  %v14672_v58 = vsub.f32 %v11471_v47, %v11469_v9  ;;  %v10366_v21 = vpop.eup %10365 }
 0x205   :  { %1841 = vperm.xlu1 %10323, %v10364_v14   ;;  %v11710_v33 = vmul.f32 %v11702_v44, %v11702_v44  ;;  %v11712_v27 = vmul.f32 0.025, %v9872_v48  ;;  %v1101_v26 = vpop.f32.mrb[65].mxu0  ;;  %v1687_v50 = vadd.f32 1e-05, %v1351_v62 }
 0x206   :  { %1502 = vperm.xlu0 %10322, %v11511_v1   ;;  %v11717_v2 = vmul.f32 %v11706_v63, %v11706_v63  ;;  %v9771_v13 = vpop.f32.mrb[66].mxu1  ;;  %v11719_v49 = vmul.f32 0.025, %v1101_v26  ;;  %v1352_v14 = vmax.f32 %v14672_v58, 0.0 }
 0x207   :  { %14670 = vst [vmem:[#allocation61_spill] sm:$0xff] %v11710_v33  ;;  %14671 = vst [vmem:[#allocation62_spill] sm:$0xff] %v11712_v27  ;;  %v11726_v35 = vmul.f32 0.025, %v9771_v13  ;;  %v758_v62 = vpop.f32.mrb[67].mxu1  ;;  %10371 = vrsqrt.f32 %v1687_v50  ;;  %v14675_v13 = vsub.f32 %v11458_v60, %v11456_v32 }
 0x208   :  { %v11730_v52 = vmul.f32 0.025, %v758_v62  ;;  %v9875_v18 = vpop.f32.mrb[66].mxu0  ;;  %v1688_v48 = vadd.f32 1e-05, %v1352_v14 }
 0x209   :  { %1507 = vperm.xlu1 %10323, %v11507_v19   ;;  %v11735_v16 = vmul.f32 %v11726_v35, %v11726_v35  ;;  %v11737_v9 = vmul.f32 0.025, %v9875_v18  ;;  %v1111_v47 = vpop.f32.mrb[67].mxu0  ;;  %v1353_v26 = vmax.f32 %v14675_v13, 0.0  ;;  %v10368_v50 = vpop.eup %10367 }
 0x20a   :  { %1846 = vperm.xlu0 %10322, %v10366_v21   ;;  %v11744_v58 = vmul.f32 %v11730_v52, %v11730_v52  ;;  %v11746_v62 = vmul.f32 0.025, %v1111_v47  ;;  %v9774_v19 = vpop.f32.mrb[68].mxu1  ;;  %10373 = vrsqrt.f32 %v1688_v48 }
 0x20b   :  { %14673 = vst [vmem:[#allocation63_spill] sm:$0xff] %v11735_v16  ;;  %14674 = vst [vmem:[#allocation64_spill] sm:$0xff] %v11737_v9  ;;  %v11750_v18 = vmul.f32 0.025, %v9774_v19  ;;  %v768_v33 = vpop.f32.mrb[69].mxu1 }
 0x20c   :  { %14676 = vst [vmem:[#allocation65_spill] sm:$0xff] %v11744_v58  ;;  %v11754_v32 = vmul.f32 0.025, %v768_v33  ;;  %v9878_v21 = vpop.f32.mrb[68].mxu0  ;;  %v1689_v27 = vadd.f32 1e-05, %v1353_v26  ;;  %v14678_v33 = vsub.f32 %v11503_v56, %v11501_v25  ;;  %v10370_v58 = vpop.eup %10369 }
 0x20d   :  { %14677 = vst [vmem:[#allocation66_spill] sm:$0xff] %v11750_v18  ;;  %1851 = vperm.xlu1 %10323, %v10368_v50   ;;  %v11758_v47 = vmul.f32 %v11750_v18, %v11750_v18  ;;  %v11760_v13 = vmul.f32 0.025, %v9878_v21  ;;  %v1121_v14 = vpop.f32.mrb[69].mxu0 }
 0x20e   :  { %1512 = vperm.xlu0 %10322, %v11535_v5   ;;  %v11765_v19 = vmul.f32 %v11754_v32, %v11754_v32  ;;  %v9777_v1 = vpop.f32.mrb[70].mxu1  ;;  %v11767_v60 = vmul.f32 0.025, %v1121_v14  ;;  %v1354_v50 = vmax.f32 %v14678_v33, 0.0  ;;  %10375 = vrsqrt.f32 %v1689_v27 }
 0x20f   :  { %v11774_v18 = vmul.f32 0.025, %v9777_v1  ;;  %v778_v26 = vpop.f32.mrb[71].mxu1  ;;  %v14679_v1 = vsub.f32 %v11493_v38, %v11491_v41  ;;  %v14680_v41 = vsub.f32 %v11524_v31, %v11522_v3  ;;  %v14682_v3 = vsub.f32 %v11551_v46, %v11549_v40 }
 0x210   :  { %v11778_v16 = vmul.f32 0.025, %v778_v26  ;;  %v9881_v9 = vpop.f32.mrb[70].mxu0 }
 0x211   :  { %1517 = vperm.xlu1 %10323, %v11531_v43   ;;  %v11783_v48 = vmul.f32 %v11774_v18, %v11774_v18  ;;  %v11785_v25 = vmul.f32 0.025, %v9881_v9  ;;  %v1131_v56 = vpop.f32.mrb[71].mxu0  ;;  %v1355_v14 = vmax.f32 %v14679_v1, 0.0  ;;  %v1690_v43 = vadd.f32 1e-05, %v1354_v50  ;;  %v10372_v5 = vpop.eup %10371 }
 0x212   :  { %1856 = vperm.xlu0 %10322, %v10370_v58   ;;  %v11792_v33 = vmul.f32 %v11778_v16, %v11778_v16  ;;  %v11794_v26 = vmul.f32 0.025, %v1131_v56  ;;  %v1356_v38 = vmax.f32 %v14680_v41, 0.0  ;;  %v14681_v50 = vsub.f32 %v11517_v7, %v11515_v11 }
 0x213   :  { %v1691_v27 = vadd.f32 1e-05, %v1355_v14  ;;  %10377 = vrsqrt.f32 %v1690_v43  ;;  %v1358_v31 = vmax.f32 %v14682_v3, 0.0  ;;  %v14683_v11 = vsub.f32 %v11542_v39, %v11540_v15  ;;  %v14691_v3 = vld [vmem:[#allocation53_spill] sm:$0xff] }
 0x214   :  { %v1330_v9 = vsub.f32 %v11794_v26, %v11792_v33  ;;  %v10374_v58 = vpop.eup %10373  ;;  %v1357_v56 = vmax.f32 %v14681_v50, 0.0  ;;  %v1692_v1 = vadd.f32 1e-05, %v1356_v38  ;;  %v14725_v33 = vsub.f32 %v11785_v25, %v11783_v48 }
 0x215   :  { %1861 = vperm.xlu1 %10323, %v10372_v5   ;;  %10379 = vrsqrt.f32 %v1691_v27  ;;  %v1359_v7 = vmax.f32 %v14683_v11, 0.0 }
 0x216   :  { %1522 = vperm.xlu0 %10322, %v11559_v55   ;;  %v1693_v5 = vadd.f32 1e-05, %v1357_v56  ;;  %10381 = vrsqrt.f32 %v1692_v1  ;;  %v1379_v26 = vmax.f32 %v14725_v33, 0.0  ;;  %v4782_v33 = vld [vmem:[#allocation2] sm:$0x1] }
 0x218   :  { %v10376_v21 = vpop.eup %10375  ;;  %10383 = vrsqrt.f32 %v1693_v5  ;;  %v1715_v48 = vadd.f32 1e-05, %v1379_v26 }
 0x219   :  { %1527 = vperm.xlu1 %10323, %v11555_v59   ;;  %v1694_v59 = vadd.f32 1e-05, %v1358_v31 }
 0x21a   :  { %1866 = vperm.xlu0 %10322, %v10374_v58  }
 0x21b   :  { %10385 = vrsqrt.f32 %v1694_v59 }
 0x21d   :  { %1871 = vperm.xlu1 %10323, %v10376_v21   ;;  %v10378_v55 = vpop.eup %10377  ;;  %v1695_v21 = vadd.f32 1e-05, %v1359_v7  ;;  %v14694_v7 = vld [vmem:[#allocation51_spill] sm:$0xff] }
 0x21e   :  { %1532 = vperm.xlu0 %10322, %v11583_v42   ;;  %v14684_v42 = vsub.f32 %v11572_v24, %v11570_v12  ;;  %v14686_v24 = vsub.f32 %v11602_v36, %v11600_v30 }
 0x21f   :  { %v10380_v14 = vpop.eup %10379  ;;  %10387 = vrsqrt.f32 %v1695_v21 }
 0x220   :  { %v1360_v40 = vmax.f32 %v14684_v42, 0.0  ;;  %v10382_v46 = vpop.eup %10381  ;;  %v1362_v12 = vmax.f32 %v14686_v24, 0.0  ;;  %v11870_v24 = vld [vmem:[%s14476_s4] ss:$0 sm:$0xff] }
 0x221   :  { %1537 = vperm.xlu1 %10323, %v11579_v53   ;;  %v14685_v53 = vsub.f32 %v11565_v57, %v11563_v61 }
 0x222   :  { %1876 = vperm.xlu0 %10322, %v10378_v55   ;;  %v1696_v39 = vadd.f32 1e-05, %v1360_v40  ;;  %v10384_v43 = vpop.eup %10383  ;;  %v1698_v57 = vadd.f32 1e-05, %v1362_v12 }
 0x223   :  { %v1361_v15 = vmax.f32 %v14685_v53, 0.0 }
 0x224   :  { %10389 = vrsqrt.f32 %v1696_v39 }
 0x225   :  { %1881 = vperm.xlu1 %10323, %v10380_v14   ;;  %v1697_v27 = vadd.f32 1e-05, %v1361_v15  ;;  %v14697_v15 = vld [vmem:[#allocation3_spill] sm:$0xff] }
 0x226   :  { %1542 = vperm.xlu0 %10322, %v11610_v28   ;;  %v10386_v28 = vpop.eup %10385 }
 0x227   :  { %10391 = vrsqrt.f32 %v1697_v27 }
 0x228   :  { %10393 = vrsqrt.f32 %v1698_v57  ;;  %v14701_v57 = vld [vmem:[#allocation5_spill] sm:$0xff] }
 0x229   :  { %1547 = vperm.xlu1 %10323, %v11606_v37   ;;  %v14687_v37 = vsub.f32 %v11593_v0, %v11591_v4  ;;  %v10388_v41 = vpop.eup %10387  ;;  %v14689_v4 = vsub.f32 %v11616_v6, %v11614_v10  ;;  %v14693_v6 = vld [vmem:[#allocation52_spill] sm:$0xff] }
 0x22a   :  { %1886 = vperm.xlu0 %10322, %v10382_v46   ;;  %v14695_v59 = vsub.f32 %v14693_v6, %v14694_v7  ;;  %v14706_v6 = vld [vmem:[#allocation58_spill] sm:$0xff]  ;;  %v14707_v7 = vld [vmem:[#allocation57_spill] sm:$0xff] }
 0x22b   :  { %v1363_v61 = vmax.f32 %v14687_v37, 0.0  ;;  %v1365_v0 = vmax.f32 %v14689_v4, 0.0 }
 0x22c   :  { %v1367_v14 = vmax.f32 %v14695_v59, 0.0  ;;  %v14708_v59 = vsub.f32 %v14706_v6, %v14707_v7  ;;  %v14721_v6 = vsub.f32 %v11767_v60, %v11765_v19  ;;  %v14723_v60 = vsub.f32 %v11760_v13, %v11758_v47 }
 0x22d   :  { %1891 = vperm.xlu1 %10323, %v10384_v43   ;;  %v1699_v58 = vadd.f32 1e-05, %v1363_v61 }
 0x22e   :  { %1552 = vperm.xlu0 %10322, %v11634_v29   ;;  %v14688_v29 = vsub.f32 %v11623_v51, %v11621_v54  ;;  %v10390_v50 = vpop.eup %10389  ;;  %v1701_v51 = vadd.f32 1e-05, %v1365_v0  ;;  %v14690_v54 = vld [vmem:[#allocation54_spill] sm:$0xff]  ;;  %v1703_v46 = vadd.f32 1e-05, %v1367_v14  ;;  %v14702_v0 = vld [vmem:[#allocation60_spill] sm:$0xff] }
 0x22f   :  { %10395 = vrsqrt.f32 %v1699_v58  ;;  %v14692_v31 = vsub.f32 %v14690_v54, %v14691_v3  ;;  %v14705_v3 = vld [vmem:[#allocation4_spill] sm:$0xff]  ;;  %v1371_v14 = vmax.f32 %v14708_v59, 0.0  ;;  %v1376_v7 = vmax.f32 %v14721_v6, 0.0  ;;  %v14722_v59 = vld [vmem:[#allocation9_spill] sm:$0xff] }
 0x230   :  { %v1364_v30 = vmax.f32 %v14688_v29, 0.0  ;;  %v11880_v29 = vld [vmem:[%s14477_s5] ss:$0 sm:$0xff]  ;;  %v1377_v19 = vmax.f32 %v14723_v60, 0.0 }
 0x231   :  { %1557 = vperm.xlu1 %10323, %v11630_v34   ;;  %v10392_v1 = vpop.eup %10391 }
 0x232   :  { %1896 = vperm.xlu0 %10322, %v10386_v28   ;;  %v1700_v56 = vadd.f32 1e-05, %v1364_v30  ;;  %v10394_v11 = vpop.eup %10393  ;;  %v14699_v28 = vld [vmem:[#allocation55_spill] sm:$0xff] }
 0x234   :  { %v1388_v38 = vpop.permute.xlu0 %1387  ;;  %10397 = vrsqrt.f32 %v1700_v56  ;;  %v14703_v56 = vld [vmem:[#allocation59_spill] sm:$0xff] }
 0x235   :  { %1901 = vperm.xlu1 %10323, %v10388_v41   ;;  %10399 = vrsqrt.f32 %v1701_v51  ;;  %v1621_v41 = vsub.f32 %v14701_v57, %v1388_v38  ;;  %v14704_v38 = vsub.f32 %v14702_v0, %v14703_v56 }
 0x236   :  { %1562 = vperm.xlu0 %10322, %v11658_v17  }
 0x238   :  { %v1383_v36 = vpop.permute.xlu0 %1382  ;;  %v11836_v34 = vpop.permute.xlu1 %1397 }
 0x239   :  { %1567 = vperm.xlu1 %10323, %v11654_v20   ;;  %v1366_v20 = vmax.f32 %v14692_v31, 0.0  ;;  %v1620_v39 = vsub.f32 %v14697_v15, %v1383_v36 }
 0x23a   :  { %1906 = vperm.xlu0 %10322, %v10390_v50  }
 0x23b   :  { %v1702_v21 = vadd.f32 1e-05, %v1366_v20 }
 0x23c   :  { %v1393_v17 = vpop.permute.xlu1 %1392 }
 0x23d   :  { %v11842_v5 = vpop.permute.xlu0 %1402  ;;  %1911 = vperm.xlu1 %10323, %v10392_v1   ;;  %10401 = vrsqrt.f32 %v1702_v21  ;;  %v1370_v1 = vmax.f32 %v14704_v38, 0.0  ;;  %v1622_v31 = vsub.f32 %v14705_v3, %v1393_v17 }
 0x23e   :  { %1572 = vperm.xlu0 %10322, %v11682_v22   ;;  %v10396_v22 = vpop.eup %10395  ;;  %10403 = vrsqrt.f32 %v1703_v46 }
 0x23f   :  { %v10398_v27 = vpop.eup %10397  ;;  %v1706_v17 = vadd.f32 1e-05, %v1370_v1  ;;  %v14717_v1 = vld [vmem:[#allocation64_spill] sm:$0xff] }
 0x240   :  { %v11848_v55 = vpop.permute.xlu1 %1407  ;;  %v10400_v58 = vpop.eup %10399 }
 0x241   :  { %v11850_v10 = vpop.permute.xlu0 %1412  ;;  %1577 = vperm.xlu1 %10323, %v11678_v45   ;;  %v14696_v45 = vsub.f32 %v11671_v8, %v11669_v23 }
 0x242   :  { %1916 = vperm.xlu0 %10322, %v10394_v11  }
 0x243   :  { %v1368_v53 = vmax.f32 %v14696_v45, 0.0 }
 0x244   :  { %v11856_v42 = vpop.permute.xlu1 %1417 }
 0x245   :  { %v11858_v40 = vpop.permute.xlu0 %1422  ;;  %1921 = vperm.xlu1 %10323, %v10396_v22   ;;  %v1704_v23 = vadd.f32 1e-05, %v1368_v53  ;;  %v14709_v22 = vsub.f32 %v11719_v49, %v11717_v2  ;;  %v14710_v53 = vld [vmem:[#allocation6_spill] sm:$0xff]  ;;  %v14712_v2 = vld [vmem:[#allocation61_spill] sm:$0xff] }
 0x246   :  { %1582 = vperm.xlu0 %10322, %v11706_v63   ;;  %v14698_v63 = vld [vmem:[#allocation56_spill] sm:$0xff]  ;;  %v1623_v15 = vsub.f32 %v14710_v53, %v11836_v34  ;;  %v14711_v49 = vld [vmem:[#allocation62_spill] sm:$0xff]  ;;  %v14714_v34 = vld [vmem:[#allocation65_spill] sm:$0xff] }
 0x247   :  { %v14700_v37 = vsub.f32 %v14698_v63, %v14699_v28  ;;  %10405 = vrsqrt.f32 %v1704_v23  ;;  %v10402_v11 = vpop.eup %10401  ;;  %v1372_v46 = vmax.f32 %v14709_v22, 0.0  ;;  %v14713_v23 = vsub.f32 %v14711_v49, %v14712_v2 }
 0x248   :  { %v11865_v43 = vpop.permute.xlu1 %1427  ;;  %v1713_v49 = vadd.f32 1e-05, %v1377_v19 }
 0x249   :  { %v1767_v12 = vpop.permute.xlu0 %1766  ;;  %1587 = vperm.xlu1 %10323, %v11702_v44   ;;  %v1369_v61 = vmax.f32 %v14700_v37, 0.0  ;;  %v1707_v37 = vadd.f32 1e-05, %v1371_v14  ;;  %v1373_v57 = vmax.f32 %v14713_v23, 0.0  ;;  %v1625_v14 = vsub.f32 %v14722_v59, %v11848_v55 }
 0x24a   :  { %v2004_v8 = vmul.f32 %v1767_v12, %v1620_v39  ;;  %1926 = vperm.xlu0 %10322, %v10398_v27   ;;  %v10404_v12 = vpop.eup %10403  ;;  %v1378_v55 = vmax.f32 %v1330_v9, 0.0 }
 0x24b   :  { %v1705_v4 = vadd.f32 1e-05, %v1369_v61 }
 0x24c   :  { %v2058_v30 = vmul.f32 %v11870_v24, %v2004_v8  ;;  %v1772_v36 = vpop.permute.xlu1 %1771 }
 0x24d   :  { %v2005_v44 = vmul.f32 %v1772_v36, %v1621_v41  ;;  %v11883_v50 = vpop.permute.xlu0 %1432  ;;  %1931 = vperm.xlu1 %10323, %v10400_v58   ;;  %10407 = vrsqrt.f32 %v1705_v4  ;;  %v1708_v41 = vadd.f32 1e-05, %v1372_v46  ;;  %v14715_v58 = vsub.f32 %v11746_v62, %v14714_v34  ;;  %v14716_v4 = vld [vmem:[#allocation8_spill] sm:$0xff] }
 0x24e   :  { %1592 = vperm.xlu0 %10322, %v11730_v52   ;;  %v2112_v51 = vadd.f32 %v11880_v29, %v2058_v30  ;;  %10409 = vrsqrt.f32 %v1706_v17  ;;  %v1624_v0 = vsub.f32 %v14716_v4, %v11842_v5 }
 0x24f   :  { %v2059_v54 = vmul.f32 %v11870_v24, %v2005_v44  ;;  %v1374_v30 = vmax.f32 %v14715_v58, 0.0  ;;  %10411 = vrsqrt.f32 %v1707_v37  ;;  %v14724_v37 = vld [vmem:[#allocation7_spill] sm:$0xff] }
 0x250   :  { %v11892_v20 = vpop.permute.xlu1 %1437  ;;  %v2160_v39 = vmax.f32 %v2112_v51, 0.0  ;;  %v14718_v51 = vld [vmem:[#allocation63_spill] sm:$0xff]  ;;  %10413 = vrsqrt.f32 %v1708_v41 }
 0x251   :  { %v2113_v52 = vadd.f32 %v11880_v29, %v2059_v54  ;;  %v1777_v21 = vpop.permute.xlu0 %1776  ;;  %1597 = vperm.xlu1 %10323, %v11726_v35   ;;  %v10406_v38 = vpop.eup %10405 }
 0x252   :  { %v2006_v45 = vmul.f32 %v1777_v21, %v1622_v31  ;;  %1936 = vperm.xlu0 %10322, %v10402_v11   ;;  %v14720_v31 = vld [vmem:[#allocation66_spill] sm:$0xff]  ;;  %v1709_v11 = vadd.f32 1e-05, %v1373_v57  ;;  %v1714_v57 = vadd.f32 1e-05, %v1378_v55 }
 0x253   :  { %v2161_v27 = vmax.f32 %v2113_v52, 0.0  ;;  %v1710_v52 = vadd.f32 1e-05, %v1374_v30  ;;  %v14730_v55 = vld [vmem:[#allocation14_spill] sm:$0xff] }
 0x254   :  { %v2060_v63 = vmul.f32 %v11870_v24, %v2006_v45  ;;  %v1782_v28 = vpop.permute.xlu1 %1781  ;;  %10415 = vrsqrt.f32 %v1709_v11  ;;  %v14728_v11 = vld [vmem:[#allocation13_spill] sm:$0xff] }
 0x255   :  { %v2007_v61 = vmul.f32 %v1782_v28, %v1623_v15  ;;  %v11905_v35 = vpop.permute.xlu0 %1442  ;;  %1941 = vperm.xlu1 %10323, %v10404_v12   ;;  %v2208_v8 = vpack.c.bf16 %v2161_v27, %v2160_v39  ;;  %v1712_v12 = vadd.f32 1e-05, %v1376_v7  ;;  %10417 = vrsqrt.f32 %v1710_v52 }
 0x256   :  { %1602 = vperm.xlu0 %10322, %v11754_v32   ;;  %v2114_v36 = vadd.f32 %v11880_v29, %v2060_v63  ;;  %v14719_v32 = vsub.f32 %v14717_v1, %v14718_v51  ;;  %v1629_v6 = vsub.f32 %v14728_v11, %v11865_v43  ;;  %v14729_v43 = vld [vmem:[#allocation11_spill] sm:$0xff] }
 0x257   :  { %v2061_v44 = vmul.f32 %v11870_v24, %v2007_v61  ;;  %9948 = vmatprep.mubr.bf16.mxu1 %v2208_v8  ;;  %v10408_v46 = vpop.eup %10407  ;;  %v1626_v61 = vsub.f32 %v14724_v37, %v11850_v10  ;;  %v14726_v10 = vld [vmem:[#allocation10_spill] sm:$0xff] }
 0x258   :  { %v11918_v56 = vpop.permute.xlu1 %1447  ;;  %v1375_v54 = vmax.f32 %v14719_v32, 0.0  ;;  %v2162_v21 = vmax.f32 %v2114_v36, 0.0  ;;  %v10410_v47 = vpop.eup %10409  ;;  %v1627_v23 = vsub.f32 %v14726_v10, %v11856_v42 }
 0x259   :  { %v2115_v3 = vadd.f32 %v11880_v29, %v2061_v44  ;;  %v1787_v62 = vpop.permute.xlu0 %1786  ;;  %1607 = vperm.xlu1 %10323, %v14720_v31   ;;  %v10412_v2 = vpop.eup %10411 }
 0x25a   :  { %v2008_v5 = vmul.f32 %v1787_v62, %v1624_v0  ;;  %1946 = vperm.xlu0 %10322, %v10406_v38   ;;  %v1711_v53 = vadd.f32 1e-05, %v1375_v54  ;;  %v10414_v58 = vpop.eup %10413  ;;  %v14727_v38 = vld [vmem:[#allocation12_spill] sm:$0xff] }
 0x25b   :  { %v2163_v22 = vmax.f32 %v2115_v3, 0.0  ;;  %v1628_v1 = vsub.f32 %v14727_v38, %v11858_v40  ;;  %v14733_v38 = vld [vmem:[#allocation16_spill] sm:$0xff] }
 0x25c   :  { %v2062_v45 = vmul.f32 %v11870_v24, %v2008_v5  ;;  %v1792_v17 = vpop.permute.xlu1 %1791  ;;  %10419 = vrsqrt.f32 %v1711_v53  ;;  %v1630_v53 = vsub.f32 %v14729_v43, %v11883_v50 }
 0x25d   :  { %v2209_v15 = vpack.c.bf16 %v2163_v22, %v2162_v21  ;;  %v2009_v39 = vmul.f32 %v1792_v17, %v1625_v14  ;;  %v11931_v27 = vpop.permute.xlu0 %1452  ;;  %1951 = vperm.xlu1 %10323, %v10408_v46   ;;  %10421 = vrsqrt.f32 %v1712_v12 }
 0x25e   :  { %1612 = vperm.xlu0 %10322, %v11778_v16   ;;  %v2116_v63 = vadd.f32 %v11880_v29, %v2062_v45  ;;  %10423 = vrsqrt.f32 %v1713_v49  ;;  %v10416_v0 = vpop.eup %10415 }
 0x25f   :  { %v2063_v28 = vmul.f32 %v11870_v24, %v2009_v39  ;;  %9949 = vmatmul.mubr.bf16.vlgmr.msra.gmra.mrb[72].mxu1 %v2209_v15  ;;  %10425 = vrsqrt.f32 %v1714_v57  ;;  %v10418_v32 = vpop.eup %10417 }
 0x260   :  { %v11944_v8 = vpop.permute.xlu1 %1457  ;;  %v2164_v41 = vmax.f32 %v2116_v63, 0.0  ;;  %10427 = vrsqrt.f32 %v1715_v48  ;;  %v1631_v63 = vsub.f32 %v14730_v55, %v11892_v20 }
 0x261   :  { %v2117_v13 = vadd.f32 %v11880_v29, %v2063_v28  ;;  %v1797_v16 = vpop.permute.xlu0 %1796  ;;  %1617 = vperm.xlu1 %10323, %v11774_v18  }
 0x262   :  { %v2010_v9 = vmul.f32 %v1797_v16, %v1626_v61  ;;  %1956 = vperm.xlu0 %10322, %v10410_v47  }
 0x263   :  { %v2165_v34 = vmax.f32 %v2117_v13, 0.0 }
 0x264   :  { %v2064_v30 = vmul.f32 %v11870_v24, %v2010_v9  ;;  %v1802_v36 = vpop.permute.xlu1 %1801 }
 0x265   :  { %v2011_v18 = vmul.f32 %v1802_v36, %v1627_v23  ;;  %v11954_v44 = vpop.permute.xlu0 %1462  ;;  %1961 = vperm.xlu1 %10323, %v10412_v2   ;;  %v2210_v4 = vpack.c.bf16 %v2165_v34, %v2164_v41  ;;  %v14731_v2 = vld [vmem:[#allocation17_spill] sm:$0xff] }
 0x266   :  { %1966 = vperm.xlu0 %10322, %v10414_v58   ;;  %v2118_v25 = vadd.f32 %v11880_v29, %v2064_v30  ;;  %v10420_v31 = vpop.eup %10419  ;;  %v1632_v20 = vsub.f32 %v14731_v2, %v11905_v35  ;;  %v14732_v34 = vld [vmem:[#allocation21_spill] sm:$0xff] }
 0x267   :  { %v2065_v42 = vmul.f32 %v11870_v24, %v2011_v18  ;;  %9952 = vmatprep.mubr.bf16.mxu1 %v2210_v4  ;;  %v10422_v59 = vpop.eup %10421  ;;  %v1633_v58 = vsub.f32 %v14732_v34, %v11918_v56 }
 0x268   :  { %v11960_v51 = vpop.permute.xlu1 %1467  ;;  %v2166_v7 = vmax.f32 %v2118_v25, 0.0  ;;  %v10424_v17 = vpop.eup %10423 }
 0x269   :  { %v2119_v54 = vadd.f32 %v11880_v29, %v2065_v42  ;;  %v1807_v3 = vpop.permute.xlu0 %1806  ;;  %1971 = vperm.xlu1 %10323, %v10416_v0   ;;  %v10426_v39 = vpop.eup %10425 }
 0x26a   :  { %v2012_v62 = vmul.f32 %v1807_v3, %v1628_v1  ;;  %1976 = vperm.xlu0 %10322, %v10418_v32   ;;  %v10428_v61 = vpop.eup %10427  ;;  %v1634_v1 = vsub.f32 %v14733_v38, %v11931_v27 }
 0x26b   :  { %v2167_v5 = vmax.f32 %v2119_v54, 0.0 }
 0x26c   :  { %v2066_v14 = vmul.f32 %v11870_v24, %v2012_v62  ;;  %v1812_v40 = vpop.permute.xlu1 %1811  ;;  %v14734_v62 = vld [vmem:[#allocation20_spill] sm:$0xff] }
 0x26d   :  { %v2013_v52 = vmul.f32 %v1812_v40, %v1629_v6  ;;  %v11966_v21 = vpop.permute.xlu0 %1472  ;;  %1981 = vperm.xlu1 %10323, %v10420_v31   ;;  %v2211_v22 = vpack.c.bf16 %v2167_v5, %v2166_v7  ;;  %v1635_v31 = vsub.f32 %v14734_v62, %v11944_v8 }
 0x26e   :  { %1986 = vperm.xlu0 %10322, %v10422_v59   ;;  %v2120_v46 = vadd.f32 %v11880_v29, %v2066_v14 }
 0x26f   :  { %v2067_v45 = vmul.f32 %v11870_v24, %v2013_v52  ;;  %9953 = vmatmul.mubr.bf16.gmra.mrb[76].mxu1 %v2211_v22  ;;  %v14735_v22 = vld [vmem:[#allocation25_spill] sm:$0xff] }
 0x270   :  { %v11972_v15 = vpop.permute.xlu1 %1477  ;;  %v2168_v28 = vmax.f32 %v2120_v46, 0.0  ;;  %v1636_v46 = vsub.f32 %v14735_v22, %v11954_v44 }
 0x271   :  { %v2121_v60 = vadd.f32 %v11880_v29, %v2067_v45  ;;  %v1817_v19 = vpop.permute.xlu0 %1816  ;;  %1991 = vperm.xlu1 %10323, %v10424_v17  }
 0x272   :  { %v2014_v12 = vmul.f32 %v1817_v19, %v1630_v53  ;;  %1996 = vperm.xlu0 %10322, %v10426_v39   ;;  %v14736_v53 = vld [vmem:[#allocation29_spill] sm:$0xff] }
 0x273   :  { %v2169_v37 = vmax.f32 %v2121_v60, 0.0  ;;  %v1637_v39 = vsub.f32 %v14736_v53, %v11960_v51 }
 0x274   :  { %v2068_v47 = vmul.f32 %v11870_v24, %v2014_v12  ;;  %v1822_v13 = vpop.permute.xlu1 %1821 }
 0x275   :  { %v2015_v16 = vmul.f32 %v1822_v13, %v1631_v63  ;;  %v11978_v50 = vpop.permute.xlu0 %1482  ;;  %2001 = vperm.xlu1 %10323, %v10428_v61   ;;  %v2212_v49 = vpack.c.bf16 %v2169_v37, %v2168_v28 }
 0x276   :  { %v2122_v26 = vadd.f32 %v11880_v29, %v2068_v47  ;;  %v14737_v47 = vld [vmem:[#allocation23_spill] sm:$0xff] }
 0x277   :  { %v2069_v9 = vmul.f32 %v11870_v24, %v2015_v16  ;;  %9956 = vmatprep.mubr.bf16.mxu1 %v2212_v49  ;;  %v1638_v13 = vsub.f32 %v14737_v47, %v11966_v21 }
 0x278   :  { %v11984_v10 = vpop.permute.xlu1 %1487  ;;  %v2170_v30 = vmax.f32 %v2122_v26, 0.0  ;;  %v14738_v26 = vld [vmem:[#allocation28_spill] sm:$0xff] }
 0x279   :  { %v2123_v23 = vadd.f32 %v11880_v29, %v2069_v9  ;;  %v1827_v57 = vpop.permute.xlu0 %1826  ;;  %4785 = vperm.xlu1 %10323, %v4782_v33   ;;  %v1639_v9 = vsub.f32 %v14738_v26, %v11972_v15 }
 0x27a   :  { %v2016_v41 = vmul.f32 %v1827_v57, %v1632_v20 }
 0x27b   :  { %v2171_v36 = vmax.f32 %v2123_v23, 0.0 }
 0x27c   :  { %v2070_v18 = vmul.f32 %v11870_v24, %v2016_v41  ;;  %v1832_v4 = vpop.permute.xlu1 %1831 }
 0x27d   :  { %v2017_v48 = vmul.f32 %v1832_v4, %v1633_v58  ;;  %v11990_v25 = vpop.permute.xlu0 %1492  ;;  %v2213_v42 = vpack.c.bf16 %v2171_v36, %v2170_v30  ;;  %v14739_v36 = vld [vmem:[#allocation33_spill] sm:$0xff] }
 0x27e   :  { %v2124_v35 = vadd.f32 %v11880_v29, %v2070_v18  ;;  %v1640_v18 = vsub.f32 %v14739_v36, %v11978_v50 }
 0x27f   :  { %v2071_v0 = vmul.f32 %v11870_v24, %v2017_v48  ;;  %9957 = vmatmul.mubr.bf16.gmra.mrb[80].mxu1 %v2213_v42 }
 0x280   :  { %v11996_v32 = vpop.permute.xlu1 %1497  ;;  %v2172_v11 = vmax.f32 %v2124_v35, 0.0  ;;  %v14740_v35 = vld [vmem:[#allocation37_spill] sm:$0xff] }
 0x281   :  { %v2125_v56 = vadd.f32 %v11880_v29, %v2071_v0  ;;  %v1837_v54 = vpop.permute.xlu0 %1836  ;;  %v1641_v0 = vsub.f32 %v14740_v35, %v11984_v10 }
 0x282   :  { %v2018_v3 = vmul.f32 %v1837_v54, %v1634_v1 }
 0x283   :  { %v2173_v6 = vmax.f32 %v2125_v56, 0.0 }
 0x284   :  { %v2072_v7 = vmul.f32 %v11870_v24, %v2018_v3  ;;  %v1842_v5 = vpop.permute.xlu1 %1841 }
 0x285   :  { %v2019_v59 = vmul.f32 %v1842_v5, %v1635_v31  ;;  %v12002_v14 = vpop.permute.xlu0 %1502  ;;  %v2214_v40 = vpack.c.bf16 %v2173_v6, %v2172_v11  ;;  %v14741_v6 = vld [vmem:[#allocation31_spill] sm:$0xff] }
 0x286   :  { %v2126_v27 = vadd.f32 %v11880_v29, %v2072_v7  ;;  %v1642_v7 = vsub.f32 %v14741_v6, %v11990_v25 }
 0x287   :  { %v2073_v52 = vmul.f32 %v11870_v24, %v2019_v59  ;;  %9960 = vmatprep.mubr.bf16.mxu1 %v2214_v40 }
 0x288   :  { %v12008_v45 = vpop.permute.xlu1 %1507  ;;  %v2174_v60 = vmax.f32 %v2126_v27, 0.0  ;;  %v14742_v27 = vld [vmem:[#allocation36_spill] sm:$0xff] }
 0x289   :  { %v2127_v8 = vadd.f32 %v11880_v29, %v2073_v52  ;;  %v1847_v17 = vpop.permute.xlu0 %1846  ;;  %v1643_v52 = vsub.f32 %v14742_v27, %v11996_v32 }
 0x28a   :  { %v2020_v43 = vmul.f32 %v1847_v17, %v1636_v46 }
 0x28b   :  { %v2175_v19 = vmax.f32 %v2127_v8, 0.0 }
 0x28c   :  { %v2074_v12 = vmul.f32 %v11870_v24, %v2020_v43  ;;  %v1852_v55 = vpop.permute.xlu1 %1851 }
 0x28d   :  { %v2021_v63 = vmul.f32 %v1852_v55, %v1637_v39  ;;  %v12014_v28 = vpop.permute.xlu0 %1512  ;;  %v2215_v37 = vpack.c.bf16 %v2175_v19, %v2174_v60  ;;  %v14743_v19 = vld [vmem:[#allocation38_spill] sm:$0xff] }
 0x28e   :  { %v2128_v44 = vadd.f32 %v11880_v29, %v2074_v12  ;;  %v1644_v12 = vsub.f32 %v14743_v19, %v12002_v14 }
 0x28f   :  { %v2075_v61 = vmul.f32 %v11870_v24, %v2021_v63  ;;  %9961 = vmatmul.mubr.bf16.gmra.mrb[84].mxu1 %v2215_v37 }
 0x290   :  { %v12020_v16 = vpop.permute.xlu1 %1517  ;;  %v2176_v2 = vmax.f32 %v2128_v44, 0.0  ;;  %v14744_v44 = vld [vmem:[#allocation39_spill] sm:$0xff] }
 0x291   :  { %v2129_v51 = vadd.f32 %v11880_v29, %v2075_v61  ;;  %v1857_v49 = vpop.permute.xlu0 %1856  ;;  %v1645_v61 = vsub.f32 %v14744_v44, %v12008_v45 }
 0x292   :  { %v2022_v33 = vmul.f32 %v1857_v49, %v1638_v13 }
 0x293   :  { %v2177_v20 = vmax.f32 %v2129_v51, 0.0 }
 0x294   :  { %v2076_v23 = vmul.f32 %v11870_v24, %v2022_v33  ;;  %v1862_v57 = vpop.permute.xlu1 %1861 }
 0x295   :  { %v2023_v41 = vmul.f32 %v1862_v57, %v1639_v9  ;;  %v12026_v34 = vpop.permute.xlu0 %1522  ;;  %v2216_v58 = vpack.c.bf16 %v2177_v20, %v2176_v2  ;;  %v14745_v20 = vld [vmem:[#allocation41_spill] sm:$0xff] }
 0x296   :  { %v2130_v21 = vadd.f32 %v11880_v29, %v2076_v23  ;;  %v1646_v23 = vsub.f32 %v14745_v20, %v12014_v28 }
 0x297   :  { %v2077_v30 = vmul.f32 %v11870_v24, %v2023_v41  ;;  %9964 = vmatprep.mubr.bf16.mxu1 %v2216_v58 }
 0x298   :  { %v12032_v4 = vpop.permute.xlu1 %1527  ;;  %v2178_v38 = vmax.f32 %v2130_v21, 0.0  ;;  %v14746_v21 = vld [vmem:[#allocation45_spill] sm:$0xff] }
 0x299   :  { %v2131_v15 = vadd.f32 %v11880_v29, %v2077_v30  ;;  %v1867_v48 = vpop.permute.xlu0 %1866  ;;  %v1647_v30 = vsub.f32 %v14746_v21, %v12020_v16 }
 0x29a   :  { %v2024_v42 = vmul.f32 %v1867_v48, %v1640_v18 }
 0x29b   :  { %v2179_v1 = vmax.f32 %v2131_v15, 0.0 }
 0x29c   :  { %v2078_v56 = vmul.f32 %v11870_v24, %v2024_v42  ;;  %v1872_v54 = vpop.permute.xlu1 %1871 }
 0x29d   :  { %v2025_v3 = vmul.f32 %v1872_v54, %v1641_v0  ;;  %v12038_v62 = vpop.permute.xlu0 %1532  ;;  %v2217_v31 = vpack.c.bf16 %v2179_v1, %v2178_v38  ;;  %v14747_v1 = vld [vmem:[#allocation46_spill] sm:$0xff] }
 0x29e   :  { %v2132_v50 = vadd.f32 %v11880_v29, %v2078_v56  ;;  %v1648_v56 = vsub.f32 %v14747_v1, %v12026_v34 }
 0x29f   :  { %v2079_v11 = vmul.f32 %v11870_v24, %v2025_v3  ;;  %9965 = vmatmul.mubr.bf16.gmra.mrb[88].mxu1 %v2217_v31 }
 0x2a0   :  { %v12044_v5 = vpop.permute.xlu1 %1537  ;;  %v2180_v22 = vmax.f32 %v2132_v50, 0.0  ;;  %v14748_v50 = vld [vmem:[#allocation47_spill] sm:$0xff] }
 0x2a1   :  { %v2133_v10 = vadd.f32 %v11880_v29, %v2079_v11  ;;  %v1877_v59 = vpop.permute.xlu0 %1876  ;;  %v1649_v11 = vsub.f32 %v14748_v50, %v12032_v4 }
 0x2a2   :  { %v2026_v40 = vmul.f32 %v1877_v59, %v1642_v7 }
 0x2a3   :  { %v2181_v46 = vmax.f32 %v2133_v10, 0.0 }
 0x2a4   :  { %v2080_v8 = vmul.f32 %v11870_v24, %v2026_v40  ;;  %v1882_v17 = vpop.permute.xlu1 %1881 }
 0x2a5   :  { %v2027_v43 = vmul.f32 %v1882_v17, %v1643_v52  ;;  %v12050_v53 = vpop.permute.xlu0 %1542  ;;  %v2218_v39 = vpack.c.bf16 %v2181_v46, %v2180_v22  ;;  %v14749_v46 = vld [vmem:[#allocation48_spill] sm:$0xff] }
 0x2a6   :  { %v2134_v25 = vadd.f32 %v11880_v29, %v2080_v8  ;;  %v1650_v8 = vsub.f32 %v14749_v46, %v12038_v62 }
 0x2a7   :  { %v2081_v60 = vmul.f32 %v11870_v24, %v2027_v43  ;;  %9968 = vmatprep.mubr.bf16.mxu1 %v2218_v39 }
 0x2a8   :  { %v12056_v55 = vpop.permute.xlu1 %1547  ;;  %v2182_v47 = vmax.f32 %v2134_v25, 0.0  ;;  %v14750_v25 = vld [vmem:[#allocation49_spill] sm:$0xff] }
 0x2a9   :  { %v2135_v32 = vadd.f32 %v11880_v29, %v2081_v60  ;;  %v1887_v63 = vpop.permute.xlu0 %1886  ;;  %v1651_v60 = vsub.f32 %v14750_v25, %v12044_v5 }
 0x2aa   :  { %v2028_v37 = vmul.f32 %v1887_v63, %v1644_v12 }
 0x2ab   :  { %v2183_v13 = vmax.f32 %v2135_v32, 0.0 }
 0x2ac   :  { %v2082_v51 = vmul.f32 %v11870_v24, %v2028_v37  ;;  %v1892_v49 = vpop.permute.xlu1 %1891 }
 0x2ad   :  { %v2029_v33 = vmul.f32 %v1892_v49, %v1645_v61  ;;  %v12062_v26 = vpop.permute.xlu0 %1552  ;;  %v2219_v9 = vpack.c.bf16 %v2183_v13, %v2182_v47  ;;  %v14751_v13 = vld [vmem:[#allocation50_spill] sm:$0xff] }
 0x2ae   :  { %v2136_v14 = vadd.f32 %v11880_v29, %v2082_v51  ;;  %v1652_v51 = vsub.f32 %v14751_v13, %v12050_v53 }
 0x2af   :  { %v2083_v2 = vmul.f32 %v11870_v24, %v2029_v33  ;;  %9969 = vmatmul.mubr.bf16.gmra.mrb[92].mxu1 %v2219_v9 }
 0x2b0   :  { %v12068_v57 = vpop.permute.xlu1 %1557  ;;  %v2184_v36 = vmax.f32 %v2136_v14, 0.0  ;;  %v14752_v14 = vld [vmem:[#allocation19_spill] sm:$0xff] }
 0x2b1   :  { %v2137_v45 = vadd.f32 %v11880_v29, %v2083_v2  ;;  %v1897_v41 = vpop.permute.xlu0 %1896  ;;  %v1653_v2 = vsub.f32 %v14752_v14, %v12056_v55 }
 0x2b2   :  { %v2030_v58 = vmul.f32 %v1897_v41, %v1646_v23 }
 0x2b3   :  { %v2185_v18 = vmax.f32 %v2137_v45, 0.0 }
 0x2b4   :  { %v2084_v15 = vmul.f32 %v11870_v24, %v2030_v58  ;;  %v1902_v48 = vpop.permute.xlu1 %1901 }
 0x2b5   :  { %v2031_v42 = vmul.f32 %v1902_v48, %v1647_v30  ;;  %v12074_v35 = vpop.permute.xlu0 %1562  ;;  %v2220_v0 = vpack.c.bf16 %v2185_v18, %v2184_v36  ;;  %v14753_v18 = vld [vmem:[#allocation15_spill] sm:$0xff] }
 0x2b6   :  { %v2138_v28 = vadd.f32 %v11880_v29, %v2084_v15  ;;  %v1654_v15 = vsub.f32 %v14753_v18, %v12062_v26 }
 0x2b7   :  { %v2085_v38 = vmul.f32 %v11870_v24, %v2031_v42  ;;  %9972 = vmatprep.mubr.bf16.mxu1 %v2220_v0 }
 0x2b8   :  { %v12080_v54 = vpop.permute.xlu1 %1567  ;;  %v2186_v6 = vmax.f32 %v2138_v28, 0.0  ;;  %v14754_v28 = vld [vmem:[#allocation18_spill] sm:$0xff] }
 0x2b9   :  { %v2139_v16 = vadd.f32 %v11880_v29, %v2085_v38  ;;  %v1907_v3 = vpop.permute.xlu0 %1906  ;;  %v1655_v38 = vsub.f32 %v14754_v28, %v12068_v57 }
 0x2ba   :  { %v2032_v31 = vmul.f32 %v1907_v3, %v1648_v56 }
 0x2bb   :  { %v2187_v7 = vmax.f32 %v2139_v16, 0.0 }
 0x2bc   :  { %v2086_v10 = vmul.f32 %v11870_v24, %v2032_v31  ;;  %v1912_v59 = vpop.permute.xlu1 %1911 }
 0x2bd   :  { %v2033_v40 = vmul.f32 %v1912_v59, %v1649_v11  ;;  %v12086_v27 = vpop.permute.xlu0 %1572  ;;  %v2221_v52 = vpack.c.bf16 %v2187_v7, %v2186_v6  ;;  %v14755_v7 = vld [vmem:[#allocation24_spill] sm:$0xff] }
 0x2be   :  { %v2140_v34 = vadd.f32 %v11880_v29, %v2086_v10  ;;  %v1656_v10 = vsub.f32 %v14755_v7, %v12074_v35 }
 0x2bf   :  { %v2087_v22 = vmul.f32 %v11870_v24, %v2033_v40  ;;  %9973 = vmatmul.mubr.bf16.gmra.mrb[96].mxu1 %v2221_v52 }
 0x2c0   :  { %v12092_v17 = vpop.permute.xlu1 %1577  ;;  %v2188_v19 = vmax.f32 %v2140_v34, 0.0  ;;  %v14756_v34 = vld [vmem:[#allocation27_spill] sm:$0xff] }
 0x2c1   :  { %v2141_v4 = vadd.f32 %v11880_v29, %v2087_v22  ;;  %v1917_v43 = vpop.permute.xlu0 %1916  ;;  %v1657_v22 = vsub.f32 %v14756_v34, %v12080_v54 }
 0x2c2   :  { %v2034_v39 = vmul.f32 %v1917_v43, %v1650_v8 }
 0x2c3   :  { %v2189_v12 = vmax.f32 %v2141_v4, 0.0 }
 0x2c4   :  { %v2088_v32 = vmul.f32 %v11870_v24, %v2034_v39  ;;  %v1922_v63 = vpop.permute.xlu1 %1921 }
 0x2c5   :  { %v2035_v37 = vmul.f32 %v1922_v63, %v1651_v60  ;;  %v12098_v44 = vpop.permute.xlu0 %1582  ;;  %v2222_v61 = vpack.c.bf16 %v2189_v12, %v2188_v19  ;;  %v14757_v12 = vld [vmem:[#allocation22_spill] sm:$0xff] }
 0x2c6   :  { %v2142_v62 = vadd.f32 %v11880_v29, %v2088_v32  ;;  %v1658_v32 = vsub.f32 %v14757_v12, %v12086_v27 }
 0x2c7   :  { %v2089_v47 = vmul.f32 %v11870_v24, %v2035_v37  ;;  %9976 = vmatprep.mubr.bf16.mxu1 %v2222_v61 }
 0x2c8   :  { %v12104_v49 = vpop.permute.xlu1 %1587  ;;  %v2190_v20 = vmax.f32 %v2142_v62, 0.0  ;;  %v14758_v62 = vld [vmem:[#allocation26_spill] sm:$0xff] }
 0x2c9   :  { %v2143_v5 = vadd.f32 %v11880_v29, %v2089_v47  ;;  %v1927_v33 = vpop.permute.xlu0 %1926  ;;  %v1659_v47 = vsub.f32 %v14758_v62, %v12092_v17  ;;  %v14761_v17 = vld [vmem:[#allocation30_spill] sm:$0xff] }
 0x2ca   :  { %v2036_v9 = vmul.f32 %v1927_v33, %v1652_v51 }
 0x2cb   :  { %v2191_v23 = vmax.f32 %v2143_v5, 0.0  ;;  %v14759_v5 = vld [vmem:[#allocation32_spill] sm:$0xff] }
 0x2cc   :  { %v2090_v45 = vmul.f32 %v11870_v24, %v2036_v9  ;;  %v1932_v41 = vpop.permute.xlu1 %1931  ;;  %v1660_v33 = vsub.f32 %v14759_v5, %v12098_v44 }
 0x2cd   :  { %v2037_v58 = vmul.f32 %v1932_v41, %v1653_v2  ;;  %v12110_v21 = vpop.permute.xlu0 %1592  ;;  %v2223_v30 = vpack.c.bf16 %v2191_v23, %v2190_v20 }
 0x2ce   :  { %v2144_v53 = vadd.f32 %v11880_v29, %v2090_v45  ;;  %v14760_v45 = vld [vmem:[#allocation35_spill] sm:$0xff] }
 0x2cf   :  { %v2091_v36 = vmul.f32 %v11870_v24, %v2037_v58  ;;  %9977 = vmatmul.mubr.bf16.gmra.mrb[100].mxu1 %v2223_v30  ;;  %v1661_v41 = vsub.f32 %v14760_v45, %v12104_v49  ;;  %v12175_v45 = vld [vmem:[%s14478_s8] ss:$0 sm:$0xff] }
 0x2d0   :  { %v12116_v48 = vpop.permute.xlu1 %1597  ;;  %v2192_v1 = vmax.f32 %v2144_v53, 0.0  ;;  %v1662_v53 = vsub.f32 %v14761_v17, %v12110_v21 }
 0x2d1   :  { %v2145_v55 = vadd.f32 %v11880_v29, %v2091_v36  ;;  %v1937_v42 = vpop.permute.xlu0 %1936 }
 0x2d2   :  { %v2038_v0 = vmul.f32 %v1937_v42, %v1654_v15  ;;  %v14762_v42 = vld [vmem:[#allocation34_spill] sm:$0xff] }
 0x2d3   :  { %v2193_v56 = vmax.f32 %v2145_v55, 0.0 }
 0x2d4   :  { %v2092_v16 = vmul.f32 %v11870_v24, %v2038_v0  ;;  %v1942_v3 = vpop.permute.xlu1 %1941  ;;  %v1663_v0 = vsub.f32 %v14762_v42, %v12116_v48 }
 0x2d5   :  { %v2039_v31 = vmul.f32 %v1942_v3, %v1655_v38  ;;  %v1603_v50 = vpop.permute.xlu0 %1602  ;;  %v2224_v11 = vpack.c.bf16 %v2193_v56, %v2192_v1 }
 0x2d6   :  { %v2146_v6 = vadd.f32 %v11880_v29, %v2092_v16  ;;  %v14763_v16 = vld [vmem:[#allocation42_spill] sm:$0xff] }
 0x2d7   :  { %v2093_v26 = vmul.f32 %v11870_v24, %v2039_v31  ;;  %9980 = vmatprep.mubr.bf16.mxu1 %v2224_v11  ;;  %v1664_v3 = vsub.f32 %v14763_v16, %v1603_v50  ;;  %v14765_v50 = vld [vmem:[#allocation40_spill] sm:$0xff] }
 0x2d8   :  { %v12126_v59 = vpop.permute.xlu1 %1607  ;;  %v2194_v46 = vmax.f32 %v2146_v6, 0.0 }
 0x2d9   :  { %v2147_v57 = vadd.f32 %v11880_v29, %v2093_v26  ;;  %v1947_v40 = vpop.permute.xlu0 %1946 }
 0x2da   :  { %v2040_v52 = vmul.f32 %v1947_v40, %v1656_v10  ;;  %v14764_v10 = vld [vmem:[#allocation44_spill] sm:$0xff] }
 0x2db   :  { %v2195_v8 = vmax.f32 %v2147_v57, 0.0  ;;  %v1665_v48 = vsub.f32 %v14764_v10, %v12126_v59 }
 0x2dc   :  { %v2094_v4 = vmul.f32 %v11870_v24, %v2040_v52  ;;  %v1952_v43 = vpop.permute.xlu1 %1951 }
 0x2dd   :  { %v2041_v39 = vmul.f32 %v1952_v43, %v1657_v22  ;;  %v1613_v25 = vpop.permute.xlu0 %1612  ;;  %v2225_v60 = vpack.c.bf16 %v2195_v8, %v2194_v46 }
 0x2de   :  { %v2148_v19 = vadd.f32 %v11880_v29, %v2094_v4  ;;  %v1666_v46 = vsub.f32 %v14765_v50, %v1613_v25 }
 0x2df   :  { %v2095_v35 = vmul.f32 %v11870_v24, %v2041_v39  ;;  %9981 = vmatmul.mubr.bf16.gmra.mrb[104].mxu1 %v2225_v60 }
 0x2e0   :  { %v1618_v63 = vpop.permute.xlu1 %1617  ;;  %v2196_v13 = vmax.f32 %v2148_v19, 0.0 }
 0x2e1   :  { %v2149_v37 = vadd.f32 %v11880_v29, %v2095_v35  ;;  %v1957_v54 = vpop.permute.xlu0 %1956  ;;  %v14766_v35 = vld [vmem:[#allocation43_spill] sm:$0xff] }
 0x2e2   :  { %v2042_v61 = vmul.f32 %v1957_v54, %v1658_v32  ;;  %v1667_v59 = vsub.f32 %v14766_v35, %v1618_v63 }
 0x2e3   :  { %v2197_v51 = vmax.f32 %v2149_v37, 0.0 }
 0x2e4   :  { %v2096_v9 = vmul.f32 %v11870_v24, %v2042_v61  ;;  %v1962_v14 = vpop.permute.xlu1 %1961 }
 0x2e5   :  { %v2043_v2 = vmul.f32 %v1962_v14, %v1659_v47  ;;  %v1967_v20 = vpop.permute.xlu0 %1966  ;;  %v2226_v23 = vpack.c.bf16 %v2197_v51, %v2196_v13 }
 0x2e6   :  { %v2044_v27 = vmul.f32 %v1967_v20, %v1660_v33  ;;  %v2150_v58 = vadd.f32 %v11880_v29, %v2096_v9 }
 0x2e7   :  { %v2097_v30 = vmul.f32 %v11870_v24, %v2043_v2  ;;  %9984 = vmatprep.mubr.bf16.mxu1 %v2226_v23 }
 0x2e8   :  { %v2098_v44 = vmul.f32 %v11870_v24, %v2044_v27  ;;  %v1972_v36 = vpop.permute.xlu1 %1971  ;;  %v2198_v1 = vmax.f32 %v2150_v58, 0.0 }
 0x2e9   :  { %v2151_v18 = vadd.f32 %v11880_v29, %v2097_v30  ;;  %v2045_v15 = vmul.f32 %v1972_v36, %v1661_v41  ;;  %v1977_v55 = vpop.permute.xlu0 %1976 }
 0x2ea   :  { %v2046_v28 = vmul.f32 %v1977_v55, %v1662_v53  ;;  %v2152_v49 = vadd.f32 %v11880_v29, %v2098_v44  ;;  %v14770_v44 = vmov 1.0|1.0  }
 0x2eb   :  { %v2099_v38 = vmul.f32 %v11870_v24, %v2045_v15  ;;  %v2199_v56 = vmax.f32 %v2151_v18, 0.0 }
 0x2ec   :  { %v2100_v21 = vmul.f32 %v11870_v24, %v2046_v28  ;;  %v1982_v31 = vpop.permute.xlu1 %1981  ;;  %v2200_v34 = vmax.f32 %v2152_v49, 0.0 }
 0x2ed   :  { %v2153_v11 = vadd.f32 %v11880_v29, %v2099_v38  ;;  %v2047_v6 = vmul.f32 %v1982_v31, %v1663_v0  ;;  %v1987_v26 = vpop.permute.xlu0 %1986  ;;  %v2227_v7 = vpack.c.bf16 %v2199_v56, %v2198_v1 }
 0x2ee   :  { %v2048_v57 = vmul.f32 %v1987_v26, %v1664_v3  ;;  %v2154_v40 = vadd.f32 %v11880_v29, %v2100_v21 }
 0x2ef   :  { %v2101_v52 = vmul.f32 %v11870_v24, %v2047_v6  ;;  %9985 = vmatmul.mubr.bf16.gmra.mrb[108].mxu1 %v2227_v7  ;;  %v2201_v22 = vmax.f32 %v2153_v11, 0.0 }
 0x2f0   :  { %v2102_v8 = vmul.f32 %v11870_v24, %v2048_v57  ;;  %v1992_v4 = vpop.permute.xlu1 %1991  ;;  %v2202_v54 = vmax.f32 %v2154_v40, 0.0 }
 0x2f1   :  { %v2155_v43 = vadd.f32 %v11880_v29, %v2101_v52  ;;  %v2049_v39 = vmul.f32 %v1992_v4, %v1665_v48  ;;  %v1997_v60 = vpop.permute.xlu0 %1996  ;;  %v2228_v19 = vpack.c.bf16 %v2201_v22, %v2200_v34 }
 0x2f2   :  { %v2050_v12 = vmul.f32 %v1997_v60, %v1666_v46  ;;  %v2156_v32 = vadd.f32 %v11880_v29, %v2102_v8 }
 0x2f3   :  { %v2103_v37 = vmul.f32 %v11870_v24, %v2049_v39  ;;  %9988 = vmatprep.mubr.bf16.mxu1 %v2228_v19  ;;  %v2203_v61 = vmax.f32 %v2155_v43, 0.0 }
 0x2f4   :  { %v2104_v25 = vmul.f32 %v11870_v24, %v2050_v12  ;;  %v2002_v62 = vpop.permute.xlu1 %2001  ;;  %v2204_v63 = vmax.f32 %v2156_v32, 0.0 }
 0x2f5   :  { %v2157_v47 = vadd.f32 %v11880_v29, %v2103_v37  ;;  %v2051_v13 = vmul.f32 %v2002_v62, %v1667_v59  ;;  %v2229_v51 = vpack.c.bf16 %v2203_v61, %v2202_v54 }
 0x2f6   :  { %v2158_v5 = vadd.f32 %v11880_v29, %v2104_v25 }
 0x2f7   :  { %v2105_v33 = vmul.f32 %v11870_v24, %v2051_v13  ;;  %9989 = vmatmul.mubr.bf16.gmra.mrb[112].mxu1 %v2229_v51  ;;  %v2205_v9 = vmax.f32 %v2157_v47, 0.0 }
 0x2f8   :  { %v2206_v20 = vmax.f32 %v2158_v5, 0.0 }
 0x2f9   :  { %v2159_v14 = vadd.f32 %v11880_v29, %v2105_v33  ;;  %v2230_v2 = vpack.c.bf16 %v2205_v9, %v2204_v63 }
 0x2fb   :  { %9992 = vmatprep.mubr.bf16.mxu1 %v2230_v2  ;;  %v2207_v23 = vmax.f32 %v2159_v14, 0.0 }
 0x2fd   :  { %v2231_v27 = vpack.c.bf16 %v2207_v23, %v2206_v20 }
 0x2ff   :  { %9993 = vmatmul.mubr.bf16.gmra.mrb[116].mxu1 %v2231_v27 }
 0x332   :  { %v9950_v41 = vpop.f32.mrb[72].mxu1 }
 0x333   :  { %v2657_v58 = vpop.f32.mrb[73].mxu1  ;;  %v12185_v53 = vadd.f32 %v9950_v41, %v12175_v45 }
 0x334   :  { %v12178_v24 = vadd.f32 %v12175_v45, %v2657_v58  ;;  %v9951_v30 = vpop.f32.mrb[74].mxu1 }
 0x335   :  { %v2660_v17 = vpop.f32.mrb[75].mxu1  ;;  %14769 = vst [vmem:[#allocation52_spill] sm:$0xff] %v12185_v53  ;;  %v12191_v36 = vadd.f32 %v9951_v30, %v12175_v45 }
 0x336   :  { %14767 = vst [vmem:[#allocation54_spill] sm:$0xff] %v12178_v24  ;;  %v12181_v29 = vadd.f32 %v12175_v45, %v2660_v17  ;;  %10028 = vmatprep.mubr.f32.mxu0 %v12178_v24 }
 0x337   :  { %14771 = vst [vmem:[#allocation51_spill] sm:$0xff] %v12191_v36 }
 0x338   :  { %14768 = vst [vmem:[#allocation53_spill] sm:$0xff] %v12181_v29  ;;  %10029 = vmatmul.mubr.f32.vlgmr.msra.gmra.mrb[72].mxu0 %v12181_v29 }
 0x339   :  { %10031 = vmatprep.mubr.f32.mxu0 %v12185_v53  ;;  %10253 = vmatpush3.bf16.msra.mxu0 %v14770_v44 }
 0x33a   :  { %10254 = vmatprep.subr.bf16.mxu0 %v14770_v44 }
 0x33c   :  { %10032 = vmatmul.mubr.f32.gmra.mrb[74].mxu0 %v12191_v36 }
 0x33d   :  { %10255 = vmatpush3.bf16.msra.mxu0 %v14770_v44 }
 0x33e   :  { %10256 = vmatprep.subr.bf16.mxu0 %v14770_v44 }
 0x341   :  { %10257 = vmatpush3.bf16.msra.mxu0 %v14770_v44 }
 0x342   :  { %v9954_v18 = vpop.f32.mrb[76].mxu1  ;;  %10258 = vmatprep.subr.bf16.mxu0 %v14770_v44 }
 0x343   :  { %v2673_v15 = vpop.f32.mrb[77].mxu1  ;;  %v12209_v49 = vadd.f32 %v9954_v18, %v12175_v45 }
 0x344   :  { %v12200_v55 = vadd.f32 %v12175_v45, %v2673_v15  ;;  %v9955_v42 = vpop.f32.mrb[78].mxu1 }
 0x345   :  { %v2676_v0 = vpop.f32.mrb[79].mxu1  ;;  %10259 = vmatpush3.bf16.msra.mxu0 %v14770_v44  ;;  %14774 = vst [vmem:[#allocation55_spill] sm:$0xff] %v12209_v49  ;;  %v12215_v38 = vadd.f32 %v9955_v42, %v12175_v45 }
 0x346   :  { %14772 = vst [vmem:[#allocation3_spill] sm:$0xff] %v12200_v55  ;;  %v12204_v28 = vadd.f32 %v12175_v45, %v2676_v0  ;;  %10034 = vmatprep.mubr.f32.mxu0 %v12200_v55  ;;  %10260 = vmatprep.subr.bf16.mxu0 %v14770_v44 }
 0x347   :  { %14775 = vst [vmem:[#allocation5_spill] sm:$0xff] %v12215_v38 }
 0x348   :  { %14773 = vst [vmem:[#allocation56_spill] sm:$0xff] %v12204_v28  ;;  %10035 = vmatmul.mubr.f32.gmra.mrb[76].mxu0 %v12204_v28 }
 0x349   :  { %10037 = vmatprep.mubr.f32.mxu0 %v12209_v49  ;;  %10261 = vmatpush3.bf16.msra.mxu0 %v14770_v44 }
 0x34a   :  { %10262 = vmatprep.subr.bf16.mxu0 %v14770_v44 }
 0x34c   :  { %10038 = vmatmul.mubr.f32.gmra.mrb[78].mxu0 %v12215_v38 }
 0x34d   :  { %10263 = vmatpush3.bf16.msra.mxu0 %v14770_v44 }
 0x34e   :  { %10264 = vmatprep.subr.bf16.mxu0 %v14770_v44 }
 0x351   :  { %10265 = vmatpush3.bf16.msra.mxu0 %v14770_v44 }
 0x352   :  { %v9958_v1 = vpop.f32.mrb[80].mxu1  ;;  %10266 = vmatprep.subr.bf16.mxu0 %v14770_v44 }
 0x353   :  { %v2689_v56 = vpop.f32.mrb[81].mxu1  ;;  %v12232_v11 = vadd.f32 %v9958_v1, %v12175_v45 }
 0x354   :  { %v12224_v16 = vadd.f32 %v12175_v45, %v2689_v56  ;;  %v9959_v3 = vpop.f32.mrb[82].mxu1 }
 0x355   :  { %v2692_v21 = vpop.f32.mrb[83].mxu1  ;;  %10267 = vmatpush3.bf16.msra.mxu0 %v14770_v44  ;;  %14778 = vst [vmem:[#allocation4_spill] sm:$0xff] %v12232_v11  ;;  %v12237_v6 = vadd.f32 %v9959_v3, %v12175_v45 }
 0x356   :  { %14776 = vst [vmem:[#allocation60_spill] sm:$0xff] %v12224_v16  ;;  %v12228_v31 = vadd.f32 %v12175_v45, %v2692_v21  ;;  %10040 = vmatprep.mubr.f32.mxu0 %v12224_v16 }
 0x357   :  { %14779 = vst [vmem:[#allocation58_spill] sm:$0xff] %v12237_v6 }
 0x358   :  { %14777 = vst [vmem:[#allocation59_spill] sm:$0xff] %v12228_v31  ;;  %10041 = vmatmul.mubr.f32.gmra.mrb[80].mxu0 %v12228_v31 }
 0x359   :  { %10043 = vmatprep.mubr.f32.mxu0 %v12232_v11 }
 0x35c   :  { %10044 = vmatmul.mubr.f32.gmra.mrb[82].mxu0 %v12237_v6 }
 0x362   :  { %v9962_v26 = vpop.f32.mrb[84].mxu1 }
 0x363   :  { %v2705_v7 = vpop.f32.mrb[85].mxu1  ;;  %v12248_v52 = vadd.f32 %v9962_v26, %v12175_v45 }
 0x364   :  { %v12241_v10 = vadd.f32 %v12175_v45, %v2705_v7  ;;  %v9963_v48 = vpop.f32.mrb[86].mxu1 }
 0x365   :  { %v2708_v57 = vpop.f32.mrb[87].mxu1  ;;  %14782 = vst [vmem:[#allocation62_spill] sm:$0xff] %v12248_v52  ;;  %v12253_v34 = vadd.f32 %v9963_v48, %v12175_v45 }
 0x366   :  { %14780 = vst [vmem:[#allocation57_spill] sm:$0xff] %v12241_v10  ;;  %v12244_v40 = vadd.f32 %v12175_v45, %v2708_v57  ;;  %10046 = vmatprep.mubr.f32.mxu0 %v12241_v10 }
 0x367   :  { %14783 = vst [vmem:[#allocation61_spill] sm:$0xff] %v12253_v34 }
 0x368   :  { %14781 = vst [vmem:[#allocation6_spill] sm:$0xff] %v12244_v40  ;;  %10047 = vmatmul.mubr.f32.gmra.mrb[84].mxu0 %v12244_v40 }
 0x369   :  { %10049 = vmatprep.mubr.f32.mxu0 %v12248_v52 }
 0x36c   :  { %10050 = vmatmul.mubr.f32.gmra.mrb[86].mxu0 %v12253_v34 }
 0x372   :  { %v9966_v22 = vpop.f32.mrb[88].mxu1 }
 0x373   :  { %v2721_v50 = vpop.f32.mrb[89].mxu1  ;;  %v12264_v39 = vadd.f32 %v9966_v22, %v12175_v45 }
 0x374   :  { %v12257_v46 = vadd.f32 %v12175_v45, %v2721_v50  ;;  %v9967_v8 = vpop.f32.mrb[90].mxu1 }
 0x375   :  { %v2724_v4 = vpop.f32.mrb[91].mxu1  ;;  %14786 = vst [vmem:[#allocation64_spill] sm:$0xff] %v12264_v39  ;;  %v12269_v60 = vadd.f32 %v9967_v8, %v12175_v45 }
 0x376   :  { %14784 = vst [vmem:[#allocation65_spill] sm:$0xff] %v12257_v46  ;;  %v12260_v43 = vadd.f32 %v12175_v45, %v2724_v4  ;;  %10052 = vmatprep.mubr.f32.mxu0 %v12257_v46 }
 0x377   :  { %14787 = vst [vmem:[#allocation63_spill] sm:$0xff] %v12269_v60 }
 0x378   :  { %14785 = vst [vmem:[#allocation8_spill] sm:$0xff] %v12260_v43  ;;  %10053 = vmatmul.mubr.f32.gmra.mrb[88].mxu0 %v12260_v43 }
 0x379   :  { %10055 = vmatprep.mubr.f32.mxu0 %v12264_v39 }
 0x37c   :  { %10056 = vmatmul.mubr.f32.gmra.mrb[90].mxu0 %v12269_v60 }
 0x382   :  { %v9970_v19 = vpop.f32.mrb[92].mxu1 }
 0x383   :  { %v2737_v35 = vpop.f32.mrb[93].mxu1  ;;  %v12280_v54 = vadd.f32 %v9970_v19, %v12175_v45 }
 0x384   :  { %v12273_v59 = vadd.f32 %v12175_v45, %v2737_v35  ;;  %v9971_v12 = vpop.f32.mrb[94].mxu1 }
 0x385   :  { %v2740_v32 = vpop.f32.mrb[95].mxu1  ;;  %14790 = vst [vmem:[#allocation7_spill] sm:$0xff] %v12280_v54  ;;  %v12285_v61 = vadd.f32 %v9971_v12, %v12175_v45 }
 0x386   :  { %14788 = vst [vmem:[#allocation66_spill] sm:$0xff] %v12273_v59  ;;  %v12276_v37 = vadd.f32 %v12175_v45, %v2740_v32  ;;  %10058 = vmatprep.mubr.f32.mxu0 %v12273_v59 }
 0x387   :  { %14791 = vst [vmem:[#allocation10_spill] sm:$0xff] %v12285_v61 }
 0x388   :  { %14789 = vst [vmem:[#allocation9_spill] sm:$0xff] %v12276_v37  ;;  %10059 = vmatmul.mubr.f32.gmra.mrb[92].mxu0 %v12276_v37 }
 0x389   :  { %10061 = vmatprep.mubr.f32.mxu0 %v12280_v54 }
 0x38c   :  { %10062 = vmatmul.mubr.f32.gmra.mrb[94].mxu0 %v12285_v61 }
 0x392   :  { %v9974_v25 = vpop.f32.mrb[96].mxu1 }
 0x393   :  { %v2753_v62 = vpop.f32.mrb[97].mxu1  ;;  %v12296_v33 = vadd.f32 %v9974_v25, %v12175_v45 }
 0x394   :  { %v12289_v47 = vadd.f32 %v12175_v45, %v2753_v62  ;;  %v9975_v13 = vpop.f32.mrb[98].mxu1 }
 0x395   :  { %v2756_v51 = vpop.f32.mrb[99].mxu1  ;;  %14794 = vst [vmem:[#allocation11_spill] sm:$0xff] %v12296_v33  ;;  %v12301_v63 = vadd.f32 %v9975_v13, %v12175_v45 }
 0x396   :  { %14792 = vst [vmem:[#allocation12_spill] sm:$0xff] %v12289_v47  ;;  %v12292_v5 = vadd.f32 %v12175_v45, %v2756_v51  ;;  %10064 = vmatprep.mubr.f32.mxu0 %v12289_v47 }
 0x397   :  { %14795 = vst [vmem:[#allocation14_spill] sm:$0xff] %v12301_v63 }
 0x398   :  { %14793 = vst [vmem:[#allocation13_spill] sm:$0xff] %v12292_v5  ;;  %10065 = vmatmul.mubr.f32.gmra.mrb[96].mxu0 %v12292_v5 }
 0x399   :  { %10067 = vmatprep.mubr.f32.mxu0 %v12296_v33 }
 0x39c   :  { %10068 = vmatmul.mubr.f32.gmra.mrb[98].mxu0 %v12301_v63 }
 0x3a2   :  { %v9978_v9 = vpop.f32.mrb[100].mxu1 }
 0x3a3   :  { %v2769_v14 = vpop.f32.mrb[101].mxu1  ;;  %v12312_v41 = vadd.f32 %v9978_v9, %v12175_v45 }
 0x3a4   :  { %v12305_v2 = vadd.f32 %v12175_v45, %v2769_v14  ;;  %v9979_v20 = vpop.f32.mrb[102].mxu1 }
 0x3a5   :  { %v2772_v23 = vpop.f32.mrb[103].mxu1  ;;  %14798 = vst [vmem:[#allocation16_spill] sm:$0xff] %v12312_v41  ;;  %v12317_v58 = vadd.f32 %v9979_v20, %v12175_v45 }
 0x3a6   :  { %14796 = vst [vmem:[#allocation17_spill] sm:$0xff] %v12305_v2  ;;  %v12308_v27 = vadd.f32 %v12175_v45, %v2772_v23  ;;  %10070 = vmatprep.mubr.f32.mxu0 %v12305_v2 }
 0x3a7   :  { %14799 = vst [vmem:[#allocation20_spill] sm:$0xff] %v12317_v58 }
 0x3a8   :  { %14797 = vst [vmem:[#allocation21_spill] sm:$0xff] %v12308_v27  ;;  %10071 = vmatmul.mubr.f32.gmra.mrb[100].mxu0 %v12308_v27 }
 0x3a9   :  { %10073 = vmatprep.mubr.f32.mxu0 %v12312_v41 }
 0x3ac   :  { %10074 = vmatmul.mubr.f32.gmra.mrb[102].mxu0 %v12317_v58 }
 0x3b2   :  { %v9982_v30 = vpop.f32.mrb[104].mxu1 }
 0x3b3   :  { %v2785_v17 = vpop.f32.mrb[105].mxu1  ;;  %v12328_v0 = vadd.f32 %v9982_v30, %v12175_v45 }
 0x3b4   :  { %v12321_v44 = vadd.f32 %v12175_v45, %v2785_v17  ;;  %v9983_v18 = vpop.f32.mrb[106].mxu1  ;;  %v3210_v17 = vmul.f32 %v12178_v24, %v12178_v24 }
 0x3b5   :  { %v2788_v15 = vpop.f32.mrb[107].mxu1  ;;  %14802 = vst [vmem:[#allocation23_spill] sm:$0xff] %v12328_v0  ;;  %v12333_v1 = vadd.f32 %v9983_v18, %v12175_v45  ;;  %v3211_v18 = vmul.f32 %v12181_v29, %v12181_v29 }
 0x3b6   :  { %14800 = vst [vmem:[#allocation25_spill] sm:$0xff] %v12321_v44  ;;  %v12324_v42 = vadd.f32 %v12175_v45, %v2788_v15  ;;  %10076 = vmatprep.mubr.f32.mxu0 %v12321_v44  ;;  %v3212_v15 = vmul.f32 %v12185_v53, %v12185_v53 }
 0x3b7   :  { %14803 = vst [vmem:[#allocation28_spill] sm:$0xff] %v12333_v1 }
 0x3b8   :  { %14801 = vst [vmem:[#allocation29_spill] sm:$0xff] %v12324_v42  ;;  %10077 = vmatmul.mubr.f32.gmra.mrb[104].mxu0 %v12324_v42 }
 0x3b9   :  { %10079 = vmatprep.mubr.f32.mxu0 %v12328_v0 }
 0x3bc   :  { %10080 = vmatmul.mubr.f32.gmra.mrb[106].mxu0 %v12333_v1 }
 0x3c2   :  { %v9986_v56 = vpop.f32.mrb[108].mxu1 }
 0x3c3   :  { %v2801_v3 = vpop.f32.mrb[109].mxu1  ;;  %v12344_v57 = vadd.f32 %v9986_v56, %v12175_v45  ;;  %v3213_v56 = vmul.f32 %v12191_v36, %v12191_v36 }
 0x3c4   :  { %v12337_v21 = vadd.f32 %v12175_v45, %v2801_v3  ;;  %v9987_v26 = vpop.f32.mrb[110].mxu1  ;;  %v3215_v3 = vmul.f32 %v12204_v28, %v12204_v28 }
 0x3c5   :  { %v2804_v7 = vpop.f32.mrb[111].mxu1  ;;  %14806 = vst [vmem:[#allocation31_spill] sm:$0xff] %v12344_v57  ;;  %v12349_v22 = vadd.f32 %v9987_v26, %v12175_v45  ;;  %v3216_v26 = vmul.f32 %v12209_v49, %v12209_v49 }
 0x3c6   :  { %14804 = vst [vmem:[#allocation33_spill] sm:$0xff] %v12337_v21  ;;  %v12340_v48 = vadd.f32 %v12175_v45, %v2804_v7  ;;  %10082 = vmatprep.mubr.f32.mxu0 %v12337_v21  ;;  %v3217_v7 = vmul.f32 %v12215_v38, %v12215_v38 }
 0x3c7   :  { %14807 = vst [vmem:[#allocation36_spill] sm:$0xff] %v12349_v22 }
 0x3c8   :  { %14805 = vst [vmem:[#allocation37_spill] sm:$0xff] %v12340_v48  ;;  %10083 = vmatmul.mubr.f32.gmra.mrb[108].mxu0 %v12340_v48 }
 0x3c9   :  { %10085 = vmatprep.mubr.f32.mxu0 %v12344_v57 }
 0x3ca   :  { %v9990_v50 = vpop.f32.mrb[112].mxu1 }
 0x3cb   :  { %v2817_v8 = vpop.f32.mrb[113].mxu1  ;;  %v12360_v32 = vadd.f32 %v9990_v50, %v12175_v45  ;;  %v3218_v50 = vmul.f32 %v12224_v16, %v12224_v16 }
 0x3cc   :  { %v12352_v4 = vadd.f32 %v12175_v45, %v2817_v8  ;;  %v9991_v19 = vpop.f32.mrb[114].mxu1  ;;  %10086 = vmatmul.mubr.f32.gmra.mrb[110].mxu0 %v12349_v22  ;;  %v3219_v8 = vmul.f32 %v12228_v31, %v12228_v31 }
 0x3cd   :  { %v2820_v35 = vpop.f32.mrb[115].mxu1  ;;  %14810 = vst [vmem:[#allocation41_spill] sm:$0xff] %v12360_v32  ;;  %v12365_v25 = vadd.f32 %v9991_v19, %v12175_v45  ;;  %v3220_v19 = vmul.f32 %v12232_v11, %v12232_v11 }
 0x3ce   :  { %14808 = vst [vmem:[#allocation38_spill] sm:$0xff] %v12352_v4  ;;  %v12356_v12 = vadd.f32 %v12175_v45, %v2820_v35  ;;  %10088 = vmatprep.mubr.f32.mxu0 %v12352_v4  ;;  %v3221_v35 = vmul.f32 %v12237_v6, %v12237_v6 }
 0x3cf   :  { %14811 = vst [vmem:[#allocation45_spill] sm:$0xff] %v12365_v25 }
 0x3d0   :  { %14809 = vst [vmem:[#allocation39_spill] sm:$0xff] %v12356_v12  ;;  %10089 = vmatmul.mubr.f32.gmra.mrb[112].mxu0 %v12356_v12 }
 0x3d1   :  { %10091 = vmatprep.mubr.f32.mxu0 %v12360_v32 }
 0x3d2   :  { %v9994_v62 = vpop.f32.mrb[116].mxu1 }
 0x3d3   :  { %v2833_v13 = vpop.f32.mrb[117].mxu1  ;;  %v12376_v23 = vadd.f32 %v9994_v62, %v12175_v45  ;;  %v3222_v62 = vmul.f32 %v12241_v10, %v12241_v10 }
 0x3d4   :  { %v12368_v51 = vadd.f32 %v12175_v45, %v2833_v13  ;;  %v9995_v9 = vpop.f32.mrb[118].mxu1  ;;  %10092 = vmatmul.mubr.f32.gmra.mrb[114].mxu0 %v12365_v25  ;;  %v3223_v13 = vmul.f32 %v12244_v40, %v12244_v40 }
 0x3d5   :  { %v2836_v14 = vpop.f32.mrb[119].mxu1  ;;  %14814 = vst [vmem:[#allocation48_spill] sm:$0xff] %v12376_v23  ;;  %v12381_v30 = vadd.f32 %v9995_v9, %v12175_v45  ;;  %v3224_v9 = vmul.f32 %v12248_v52, %v12248_v52 }
 0x3d6   :  { %14812 = vst [vmem:[#allocation46_spill] sm:$0xff] %v12368_v51  ;;  %v12372_v20 = vadd.f32 %v12175_v45, %v2836_v14  ;;  %10094 = vmatprep.mubr.f32.mxu0 %v12368_v51  ;;  %v3214_v45 = vmul.f32 %v12200_v55, %v12200_v55  ;;  %v3225_v14 = vmul.f32 %v12253_v34, %v12253_v34 }
 0x3d7   :  { %14815 = vst [vmem:[#allocation49_spill] sm:$0xff] %v12381_v30 }
 0x3d8   :  { %14813 = vst [vmem:[#allocation47_spill] sm:$0xff] %v12372_v20  ;;  %10095 = vmatmul.mubr.f32.gmra.mrb[116].mxu0 %v12372_v20 }
 0x3d9   :  { %10097 = vmatprep.mubr.f32.mxu0 %v12376_v23 }
 0x3dc   :  { %10098 = vmatmul.mubr.f32.gmra.mrb[118].mxu0 %v12381_v30 }
 0x3dd   :  { %10132 = vmatprep.mubr.f32.mxu0 %v3210_v17  ;;  %v3226_v17 = vmul.f32 %v12257_v46, %v12257_v46 }
 0x3e0   :  { %10133 = vmatmul.mubr.f32.vlgmr.msra.gmra.mrb[120].mxu0 %v3211_v18  ;;  %v3227_v18 = vmul.f32 %v12260_v43, %v12260_v43 }
 0x3e1   :  { %10135 = vmatprep.mubr.f32.mxu0 %v3212_v15  ;;  %v3228_v15 = vmul.f32 %v12264_v39, %v12264_v39 }
 0x3e4   :  { %10136 = vmatmul.mubr.f32.gmra.mrb[122].mxu0 %v3213_v56  ;;  %v3229_v56 = vmul.f32 %v12269_v60, %v12269_v60 }
 0x3e5   :  { %10138 = vmatprep.mubr.f32.mxu0 %v3214_v45  ;;  %v3230_v45 = vmul.f32 %v12273_v59, %v12273_v59 }
 0x3e8   :  { %10139 = vmatmul.mubr.f32.gmra.mrb[124].mxu0 %v3215_v3  ;;  %v3231_v3 = vmul.f32 %v12276_v37, %v12276_v37 }
 0x3e9   :  { %10141 = vmatprep.mubr.f32.mxu0 %v3216_v26  ;;  %v3232_v26 = vmul.f32 %v12280_v54, %v12280_v54 }
 0x3ec   :  { %10142 = vmatmul.mubr.f32.gmra.mrb[126].mxu0 %v3217_v7  ;;  %v3233_v7 = vmul.f32 %v12285_v61, %v12285_v61 }
 0x3ed   :  { %10144 = vmatprep.mubr.f32.mxu0 %v3218_v50 }
 0x3f0   :  { %10145 = vmatmul.mubr.f32.gmra.mrb[128].mxu0 %v3219_v8  ;;  %v3234_v8 = vmul.f32 %v12289_v47, %v12289_v47 }
 0x3f1   :  { %10147 = vmatprep.mubr.f32.mxu0 %v3220_v19 }
 0x3f4   :  { %10148 = vmatmul.mubr.f32.gmra.mrb[130].mxu0 %v3221_v35 }
 0x3f5   :  { %10150 = vmatprep.mubr.f32.mxu0 %v3222_v62 }
 0x3f8   :  { %10151 = vmatmul.mubr.f32.gmra.mrb[132].mxu0 %v3223_v13  ;;  %v3235_v13 = vmul.f32 %v12292_v5, %v12292_v5 }
 0x3f9   :  { %10153 = vmatprep.mubr.f32.mxu0 %v3224_v9 }
 0x3fc   :  { %10154 = vmatmul.mubr.f32.gmra.mrb[134].mxu0 %v3225_v14  ;;  %v3236_v14 = vmul.f32 %v12296_v33, %v12296_v33 }
 0x3fd   :  { %10156 = vmatprep.mubr.f32.mxu0 %v3226_v17 }
 0x400   :  { %10157 = vmatmul.mubr.f32.gmra.mrb[136].mxu0 %v3227_v18 }
 0x401   :  { %10159 = vmatprep.mubr.f32.mxu0 %v3228_v15 }
 0x404   :  { %10160 = vmatmul.mubr.f32.gmra.mrb[138].mxu0 %v3229_v56  ;;  %v3237_v56 = vmul.f32 %v12301_v63, %v12301_v63 }
 0x405   :  { %10162 = vmatprep.mubr.f32.mxu0 %v3230_v45  ;;  %v3238_v45 = vmul.f32 %v12305_v2, %v12305_v2 }
 0x408   :  { %10163 = vmatmul.mubr.f32.gmra.mrb[140].mxu0 %v3231_v3  ;;  %v3239_v3 = vmul.f32 %v12308_v27, %v12308_v27 }
 0x409   :  { %10165 = vmatprep.mubr.f32.mxu0 %v3232_v26  ;;  %v3240_v26 = vmul.f32 %v12312_v41, %v12312_v41 }
 0x40b   :  { %v10030_v50 = vpop.f32.mrb[72].mxu0 }
 0x40c   :  { %v12434_v19 = vmul.f32 0.041666668, %v10030_v50  ;;  %v2971_v35 = vpop.f32.mrb[73].mxu0  ;;  %10166 = vmatmul.mubr.f32.gmra.mrb[142].mxu0 %v3233_v7  ;;  %v3241_v7 = vmul.f32 %v12317_v58, %v12317_v58 }
 0x40d   :  { %v12436_v62 = vmul.f32 0.041666668, %v2971_v35  ;;  %10168 = vmatprep.mubr.f32.mxu0 %v3234_v8  ;;  %v3242_v8 = vmul.f32 %v12321_v44, %v12321_v44 }
 0x40e   :  { %3810 = vperm.xlu1 %10323, %v12434_v19  }
 0x40f   :  { %v10033_v9 = vpop.f32.mrb[74].mxu0  ;;  %3805 = vperm.xlu0 %10322, %v12436_v62   ;;  %v3659_v16 = vmul.f32 %v12436_v62, %v12436_v62 }
 0x410   :  { %v12444_v17 = vmul.f32 0.041666668, %v10033_v9  ;;  %v2981_v18 = vpop.f32.mrb[75].mxu0  ;;  %10169 = vmatmul.mubr.f32.gmra.mrb[144].mxu0 %v3235_v13 }
 0x411   :  { %v12446_v15 = vmul.f32 0.041666668, %v2981_v18  ;;  %10171 = vmatprep.mubr.f32.mxu0 %v3236_v14  ;;  %v3243_v14 = vmul.f32 %v12324_v42, %v12324_v42 }
 0x412   :  { %3820 = vperm.xlu1 %10323, %v12444_v17  }
 0x413   :  { %3815 = vperm.xlu0 %10322, %v12446_v15   ;;  %v3661_v36 = vmul.f32 %v12446_v15, %v12446_v15 }
 0x414   :  { %10172 = vmatmul.mubr.f32.gmra.mrb[146].mxu0 %v3237_v56  ;;  %v3244_v56 = vmul.f32 %v12328_v0, %v12328_v0 }
 0x415   :  { %10174 = vmatprep.mubr.f32.mxu0 %v3238_v45 }
 0x418   :  { %10175 = vmatmul.mubr.f32.gmra.mrb[148].mxu0 %v3239_v3 }
 0x419   :  { %10177 = vmatprep.mubr.f32.mxu0 %v3240_v26 }
 0x41b   :  { %v10036_v50 = vpop.f32.mrb[76].mxu0 }
 0x41c   :  { %v12462_v35 = vmul.f32 0.041666668, %v10036_v50  ;;  %v2991_v13 = vpop.f32.mrb[77].mxu0  ;;  %10178 = vmatmul.mubr.f32.gmra.mrb[150].mxu0 %v3241_v7  ;;  %v3245_v7 = vmul.f32 %v12333_v1, %v12333_v1  ;;  %v3246_v50 = vmul.f32 %v12337_v21, %v12337_v21 }
 0x41d   :  { %v12464_v9 = vmul.f32 0.041666668, %v2991_v13  ;;  %10180 = vmatprep.mubr.f32.mxu0 %v3242_v8  ;;  %v3247_v8 = vmul.f32 %v12340_v48, %v12340_v48  ;;  %v3248_v13 = vmul.f32 %v12344_v57, %v12344_v57 }
 0x41e   :  { %3830 = vperm.xlu1 %10323, %v12462_v35  }
 0x41f   :  { %v10039_v18 = vpop.f32.mrb[78].mxu0  ;;  %3825 = vperm.xlu0 %10322, %v12464_v9  }
 0x420   :  { %v12472_v45 = vmul.f32 0.041666668, %v10039_v18  ;;  %v3001_v3 = vpop.f32.mrb[79].mxu0  ;;  %10181 = vmatmul.mubr.f32.gmra.mrb[152].mxu0 %v3243_v14  ;;  %v3249_v14 = vmul.f32 %v12349_v22, %v12349_v22 }
 0x421   :  { %v12474_v26 = vmul.f32 0.041666668, %v3001_v3  ;;  %10183 = vmatprep.mubr.f32.mxu0 %v3244_v56  ;;  %v3250_v56 = vmul.f32 %v12352_v4, %v12352_v4 }
 0x422   :  { %3840 = vperm.xlu1 %10323, %v12472_v45  }
 0x423   :  { %3835 = vperm.xlu0 %10322, %v12474_v26  }
 0x424   :  { %10184 = vmatmul.mubr.f32.gmra.mrb[154].mxu0 %v3245_v7 }
 0x425   :  { %10186 = vmatprep.mubr.f32.mxu0 %v3246_v50  ;;  %v3251_v50 = vmul.f32 %v12356_v12, %v12356_v12 }
 0x428   :  { %10187 = vmatmul.mubr.f32.gmra.mrb[156].mxu0 %v3247_v8 }
 0x429   :  { %10189 = vmatprep.mubr.f32.mxu0 %v3248_v13  ;;  %v3252_v13 = vmul.f32 %v12360_v32, %v12360_v32 }
 0x42b   :  { %v10042_v18 = vpop.f32.mrb[80].mxu0 }
 0x42c   :  { %v12490_v3 = vmul.f32 0.041666668, %v10042_v18  ;;  %v3011_v21 = vpop.f32.mrb[81].mxu0  ;;  %10190 = vmatmul.mubr.f32.gmra.mrb[158].mxu0 %v3249_v14  ;;  %v3254_v14 = vmul.f32 %v12368_v51, %v12368_v51 }
 0x42d   :  { %v12492_v7 = vmul.f32 0.041666668, %v3011_v21  ;;  %10192 = vmatprep.mubr.f32.mxu0 %v3250_v56  ;;  %v3253_v21 = vmul.f32 %v12365_v25, %v12365_v25  ;;  %v3255_v56 = vmul.f32 %v12372_v20, %v12372_v20 }
 0x42e   :  { %3850 = vperm.xlu1 %10323, %v12490_v3  }
 0x42f   :  { %v10045_v8 = vpop.f32.mrb[82].mxu0  ;;  %3845 = vperm.xlu0 %10322, %v12492_v7  }
 0x430   :  { %v12500_v57 = vmul.f32 0.041666668, %v10045_v8  ;;  %v3021_v18 = vpop.f32.mrb[83].mxu0  ;;  %10193 = vmatmul.mubr.f32.gmra.mrb[160].mxu0 %v3251_v50  ;;  %v3256_v50 = vmul.f32 %v12376_v23, %v12376_v23  ;;  %v3257_v8 = vmul.f32 %v12381_v30, %v12381_v30 }
 0x431   :  { %v12502_v4 = vmul.f32 0.041666668, %v3021_v18  ;;  %10195 = vmatprep.mubr.f32.mxu0 %v3252_v13 }
 0x432   :  { %3860 = vperm.xlu1 %10323, %v12500_v57  }
 0x433   :  { %3855 = vperm.xlu0 %10322, %v12502_v4  }
 0x434   :  { %10196 = vmatmul.mubr.f32.gmra.mrb[162].mxu0 %v3253_v21 }
 0x435   :  { %10198 = vmatprep.mubr.f32.mxu0 %v3254_v14 }
 0x438   :  { %10199 = vmatmul.mubr.f32.gmra.mrb[164].mxu0 %v3255_v56 }
 0x439   :  { %10201 = vmatprep.mubr.f32.mxu0 %v3256_v50 }
 0x43b   :  { %v10048_v13 = vpop.f32.mrb[84].mxu0 }
 0x43c   :  { %v12516_v18 = vmul.f32 0.041666668, %v10048_v13  ;;  %v3031_v32 = vpop.f32.mrb[85].mxu0  ;;  %10202 = vmatmul.mubr.f32.gmra.mrb[166].mxu0 %v3257_v8 }
 0x43d   :  { %v12518_v25 = vmul.f32 0.041666668, %v3031_v32 }
 0x43e   :  { %3870 = vperm.xlu1 %10323, %v12516_v18  }
 0x43f   :  { %v10051_v21 = vpop.f32.mrb[86].mxu0  ;;  %3865 = vperm.xlu0 %10322, %v12518_v25  }
 0x440   :  { %v12522_v14 = vmul.f32 0.041666668, %v10051_v21  ;;  %v3041_v23 = vpop.f32.mrb[87].mxu0 }
 0x441   :  { %v12524_v56 = vmul.f32 0.041666668, %v3041_v23 }
 0x442   :  { %3880 = vperm.xlu1 %10323, %v12522_v14  }
 0x443   :  { %3875 = vperm.xlu0 %10322, %v12524_v56  }
 0x44b   :  { %v10054_v50 = vpop.f32.mrb[88].mxu0 }
 0x44c   :  { %v12528_v13 = vmul.f32 0.041666668, %v10054_v50  ;;  %v3051_v8 = vpop.f32.mrb[89].mxu0 }
 0x44d   :  { %v12530_v32 = vmul.f32 0.041666668, %v3051_v8 }
 0x44e   :  { %3890 = vperm.xlu1 %10323, %v12528_v13  }
 0x44f   :  { %v10057_v30 = vpop.f32.mrb[90].mxu0  ;;  %3885 = vperm.xlu0 %10322, %v12530_v32  }
 0x450   :  { %v12534_v21 = vmul.f32 0.041666668, %v10057_v30  ;;  %v3061_v51 = vpop.f32.mrb[91].mxu0 }
 0x451   :  { %v12536_v23 = vmul.f32 0.041666668, %v3061_v51 }
 0x452   :  { %3900 = vperm.xlu1 %10323, %v12534_v21  }
 0x453   :  { %3895 = vperm.xlu0 %10322, %v12536_v23  }
 0x45b   :  { %v10060_v20 = vpop.f32.mrb[92].mxu0 }
 0x45c   :  { %v12540_v50 = vmul.f32 0.041666668, %v10060_v20  ;;  %v3071_v12 = vpop.f32.mrb[93].mxu0 }
 0x45d   :  { %v12542_v8 = vmul.f32 0.041666668, %v3071_v12 }
 0x45e   :  { %3910 = vperm.xlu1 %10323, %v12540_v50  }
 0x45f   :  { %v10063_v22 = vpop.f32.mrb[94].mxu0  ;;  %3905 = vperm.xlu0 %10322, %v12542_v8  }
 0x460   :  { %v12546_v30 = vmul.f32 0.041666668, %v10063_v22  ;;  %v3081_v48 = vpop.f32.mrb[95].mxu0 }
 0x461   :  { %v12548_v51 = vmul.f32 0.041666668, %v3081_v48 }
 0x462   :  { %3920 = vperm.xlu1 %10323, %v12546_v30  }
 0x463   :  { %3915 = vperm.xlu0 %10322, %v12548_v51  }
 0x46b   :  { %v10066_v0 = vpop.f32.mrb[96].mxu0 }
 0x46c   :  { %v12552_v20 = vmul.f32 0.041666668, %v10066_v0  ;;  %v3091_v1 = vpop.f32.mrb[97].mxu0 }
 0x46d   :  { %v12554_v12 = vmul.f32 0.041666668, %v3091_v1 }
 0x46e   :  { %3930 = vperm.xlu1 %10323, %v12552_v20  }
 0x46f   :  { %v10069_v44 = vpop.f32.mrb[98].mxu0  ;;  %3925 = vperm.xlu0 %10322, %v12554_v12  }
 0x470   :  { %v12558_v22 = vmul.f32 0.041666668, %v10069_v44  ;;  %v3101_v42 = vpop.f32.mrb[99].mxu0 }
 0x471   :  { %v12560_v48 = vmul.f32 0.041666668, %v3101_v42 }
 0x472   :  { %3940 = vperm.xlu1 %10323, %v12558_v22  }
 0x473   :  { %3935 = vperm.xlu0 %10322, %v12560_v48  }
 0x47b   :  { %v10072_v41 = vpop.f32.mrb[100].mxu0 }
 0x47c   :  { %v12564_v0 = vmul.f32 0.041666668, %v10072_v41  ;;  %v3111_v58 = vpop.f32.mrb[101].mxu0 }
 0x47d   :  { %v12566_v1 = vmul.f32 0.041666668, %v3111_v58 }
 0x47e   :  { %3950 = vperm.xlu1 %10323, %v12564_v0  }
 0x47f   :  { %v10075_v2 = vpop.f32.mrb[102].mxu0  ;;  %3945 = vperm.xlu0 %10322, %v12566_v1  }
 0x480   :  { %v12570_v44 = vmul.f32 0.041666668, %v10075_v2  ;;  %v3121_v27 = vpop.f32.mrb[103].mxu0 }
 0x481   :  { %v12572_v42 = vmul.f32 0.041666668, %v3121_v27 }
 0x482   :  { %3960 = vperm.xlu1 %10323, %v12570_v44  }
 0x483   :  { %3955 = vperm.xlu0 %10322, %v12572_v42  }
 0x48b   :  { %v10078_v33 = vpop.f32.mrb[104].mxu0 }
 0x48c   :  { %v12576_v41 = vmul.f32 0.041666668, %v10078_v33  ;;  %v3131_v63 = vpop.f32.mrb[105].mxu0 }
 0x48d   :  { %v12578_v58 = vmul.f32 0.041666668, %v3131_v63 }
 0x48e   :  { %3970 = vperm.xlu1 %10323, %v12576_v41  }
 0x48f   :  { %v10081_v47 = vpop.f32.mrb[106].mxu0  ;;  %3965 = vperm.xlu0 %10322, %v12578_v58  }
 0x490   :  { %v12582_v2 = vmul.f32 0.041666668, %v10081_v47  ;;  %v3141_v5 = vpop.f32.mrb[107].mxu0 }
 0x491   :  { %v12584_v27 = vmul.f32 0.041666668, %v3141_v5 }
 0x492   :  { %3980 = vperm.xlu1 %10323, %v12582_v2  }
 0x493   :  { %3975 = vperm.xlu0 %10322, %v12584_v27  }
 0x49b   :  { %v10084_v54 = vpop.f32.mrb[108].mxu0 }
 0x49c   :  { %v12588_v33 = vmul.f32 0.041666668, %v10084_v54  ;;  %v3151_v61 = vpop.f32.mrb[109].mxu0 }
 0x49d   :  { %v12590_v63 = vmul.f32 0.041666668, %v3151_v61 }
 0x49e   :  { %3990 = vperm.xlu1 %10323, %v12588_v33  }
 0x49f   :  { %v10087_v59 = vpop.f32.mrb[110].mxu0  ;;  %3985 = vperm.xlu0 %10322, %v12590_v63  }
 0x4a0   :  { %v12594_v47 = vmul.f32 0.041666668, %v10087_v59  ;;  %v3161_v37 = vpop.f32.mrb[111].mxu0 }
 0x4a1   :  { %v12596_v5 = vmul.f32 0.041666668, %v3161_v37 }
 0x4a2   :  { %4000 = vperm.xlu1 %10323, %v12594_v47  }
 0x4a3   :  { %v10090_v39 = vpop.f32.mrb[112].mxu0  ;;  %3995 = vperm.xlu0 %10322, %v12596_v5  }
 0x4a4   :  { %v12600_v54 = vmul.f32 0.041666668, %v10090_v39  ;;  %v3171_v60 = vpop.f32.mrb[113].mxu0 }
 0x4a5   :  { %v12602_v61 = vmul.f32 0.041666668, %v3171_v60 }
 0x4a6   :  { %4010 = vperm.xlu1 %10323, %v12600_v54  }
 0x4a7   :  { %v10093_v46 = vpop.f32.mrb[114].mxu0  ;;  %4005 = vperm.xlu0 %10322, %v12602_v61  }
 0x4a8   :  { %v12606_v59 = vmul.f32 0.041666668, %v10093_v46  ;;  %v3181_v43 = vpop.f32.mrb[115].mxu0 }
 0x4a9   :  { %v12608_v37 = vmul.f32 0.041666668, %v3181_v43 }
 0x4aa   :  { %4020 = vperm.xlu1 %10323, %v12606_v59  }
 0x4ab   :  { %4015 = vperm.xlu0 %10322, %v12608_v37   ;;  %v10096_v52 = vpop.f32.mrb[116].mxu0 }
 0x4ac   :  { %v12612_v39 = vmul.f32 0.041666668, %v10096_v52  ;;  %v3191_v34 = vpop.f32.mrb[117].mxu0  ;;  %v3660_v52 = vmul.f32 %v12434_v19, %v12434_v19 }
 0x4ad   :  { %v12614_v60 = vmul.f32 0.041666668, %v3191_v34 }
 0x4ae   :  { %4030 = vperm.xlu1 %10323, %v12612_v39  }
 0x4af   :  { %4025 = vperm.xlu0 %10322, %v12614_v60   ;;  %v10099_v10 = vpop.f32.mrb[118].mxu0 }
 0x4b0   :  { %v12618_v46 = vmul.f32 0.041666668, %v10099_v10  ;;  %v3201_v40 = vpop.f32.mrb[119].mxu0 }
 0x4b1   :  { %v12620_v43 = vmul.f32 0.041666668, %v3201_v40  ;;  %v3662_v40 = vmul.f32 %v12444_v17, %v12444_v17 }
 0x4b2   :  { %14816 = vst [vmem:[#allocation50_spill] sm:$0xff] %v12618_v46  ;;  %4040 = vperm.xlu1 %10323, %v12618_v46  }
 0x4b3   :  { %14817 = vst [vmem:[#allocation19_spill] sm:$0xff] %v12620_v43  ;;  %4035 = vperm.xlu0 %10322, %v12620_v43   ;;  %v10134_v11 = vpop.f32.mrb[120].mxu0 }
 0x4b4   :  { %v3612_v34 = vmul.f32 0.041666668, %v10134_v11  ;;  %v3324_v6 = vpop.f32.mrb[121].mxu0 }
 0x4b5   :  { %v3611_v31 = vmul.f32 0.041666668, %v3324_v6 }
 0x4b6   :  { %v3708_v49 = vsub.f32 %v3612_v34, %v3660_v52 }
 0x4b7   :  { %v3707_v10 = vsub.f32 %v3611_v31, %v3659_v16  ;;  %v10137_v38 = vpop.f32.mrb[122].mxu0  ;;  %v3664_v16 = vmul.f32 %v12462_v35, %v12462_v35 }
 0x4b8   :  { %v3756_v55 = vmax.f32 %v3708_v49, 0.0  ;;  %v3614_v28 = vmul.f32 0.041666668, %v10137_v38  ;;  %v3334_v53 = vpop.f32.mrb[123].mxu0  ;;  %v3663_v49 = vmul.f32 %v12464_v9, %v12464_v9 }
 0x4b9   :  { %v3755_v24 = vmax.f32 %v3707_v10, 0.0  ;;  %v3613_v19 = vmul.f32 0.041666668, %v3334_v53  ;;  %v3665_v10 = vmul.f32 %v12474_v26, %v12474_v26 }
 0x4ba   :  { %v4092_v11 = vadd.f32 1e-05, %v3756_v55  ;;  %v3710_v29 = vsub.f32 %v3614_v28, %v3662_v40 }
 0x4bb   :  { %v4091_v43 = vadd.f32 1e-05, %v3755_v24  ;;  %v3709_v46 = vsub.f32 %v3613_v19, %v3661_v36  ;;  %v10140_v62 = vpop.f32.mrb[124].mxu0  ;;  %v3666_v36 = vmul.f32 %v12472_v45, %v12472_v45 }
 0x4bc   :  { %10429 = vrsqrt.f32 %v4092_v11  ;;  %v3758_v31 = vmax.f32 %v3710_v29, 0.0  ;;  %v3616_v6 = vmul.f32 0.041666668, %v10140_v62  ;;  %v3344_v17 = vpop.f32.mrb[125].mxu0 }
 0x4bd   :  { %10431 = vrsqrt.f32 %v4091_v43  ;;  %v3757_v38 = vmax.f32 %v3709_v46, 0.0  ;;  %v3615_v15 = vmul.f32 0.041666668, %v3344_v17  ;;  %v3667_v17 = vmul.f32 %v12492_v7, %v12492_v7 }
 0x4be   :  { %v4094_v52 = vadd.f32 1e-05, %v3758_v31  ;;  %v3712_v53 = vsub.f32 %v3616_v6, %v3664_v16  ;;  %v3668_v16 = vmul.f32 %v12490_v3, %v12490_v3 }
 0x4bf   :  { %v4093_v55 = vadd.f32 1e-05, %v3757_v38  ;;  %v3711_v28 = vsub.f32 %v3615_v15, %v3663_v49  ;;  %v10143_v24 = vpop.f32.mrb[126].mxu0  ;;  %v12644_v15 = vpop.permute.xlu1 %4785 }
 0x4c0   :  { %10433 = vrsqrt.f32 %v4094_v52  ;;  %v3760_v35 = vmax.f32 %v3712_v53, 0.0  ;;  %v3618_v34 = vmul.f32 0.041666668, %v10143_v24  ;;  %v3354_v29 = vpop.f32.mrb[127].mxu0  ;;  %14818 = vst [vmem:[#allocation15_spill] sm:$0xff] %v12644_v15 }
 0x4c1   :  { %10435 = vrsqrt.f32 %v4093_v55  ;;  %v3759_v9 = vmax.f32 %v3711_v28, 0.0  ;;  %v3617_v43 = vmul.f32 0.041666668, %v3354_v29  ;;  %v3669_v29 = vmul.f32 %v12502_v4, %v12502_v4 }
 0x4c2   :  { %v4096_v46 = vadd.f32 1e-05, %v3760_v35  ;;  %v3714_v40 = vsub.f32 %v3618_v34, %v3666_v36  ;;  %v3670_v36 = vmul.f32 %v12500_v57, %v12500_v57 }
 0x4c3   :  { %v4095_v19 = vadd.f32 1e-05, %v3759_v9  ;;  %v3713_v11 = vsub.f32 %v3617_v43, %v3665_v10  ;;  %v10146_v62 = vpop.f32.mrb[128].mxu0 }
 0x4c4   :  { %10437 = vrsqrt.f32 %v4096_v46  ;;  %v3762_v45 = vmax.f32 %v3714_v40, 0.0  ;;  %v3620_v31 = vmul.f32 0.041666668, %v10146_v62  ;;  %v3364_v6 = vpop.f32.mrb[129].mxu0  ;;  %v12650_v46 = vpop.permute.xlu1 %3810 }
 0x4c5   :  { %10439 = vrsqrt.f32 %v4095_v19  ;;  %v3761_v26 = vmax.f32 %v3713_v11, 0.0  ;;  %v3619_v49 = vmul.f32 0.041666668, %v3364_v6  ;;  %v12652_v62 = vpop.permute.xlu0 %3805 }
 0x4c6   :  { %v10430_v38 = vpop.eup %10429  ;;  %v4098_v52 = vadd.f32 1e-05, %v3762_v45  ;;  %v3716_v53 = vsub.f32 %v3620_v31, %v3668_v16  ;;  %v3672_v31 = vmul.f32 %v12516_v18, %v12516_v18  ;;  %v3674_v18 = vmul.f32 %v12522_v14, %v12522_v14 }
 0x4c7   :  { %v10432_v55 = vpop.eup %10431  ;;  %v4097_v28 = vadd.f32 1e-05, %v3761_v26  ;;  %v3715_v24 = vsub.f32 %v3619_v49, %v3667_v17  ;;  %4194 = vperm.xlu1 %10323, %v10430_v38   ;;  %v10149_v3 = vpop.f32.mrb[130].mxu0  ;;  %v3671_v26 = vmul.f32 %v12518_v25, %v12518_v25 }
 0x4c8   :  { %10441 = vrsqrt.f32 %v4098_v52  ;;  %v3764_v35 = vmax.f32 %v3716_v53, 0.0  ;;  %v3622_v34 = vmul.f32 0.041666668, %v10149_v3  ;;  %4189 = vperm.xlu0 %10322, %v10432_v55   ;;  %v3374_v7 = vpop.f32.mrb[131].mxu0 }
 0x4c9   :  { %10443 = vrsqrt.f32 %v4097_v28  ;;  %v3763_v10 = vmax.f32 %v3715_v24, 0.0  ;;  %v3621_v9 = vmul.f32 0.041666668, %v3374_v7 }
 0x4ca   :  { %v10434_v43 = vpop.eup %10433  ;;  %v4100_v40 = vadd.f32 1e-05, %v3764_v35  ;;  %v3718_v19 = vsub.f32 %v3622_v34, %v3670_v36  ;;  %v12660_v35 = vpop.permute.xlu1 %3820 }
 0x4cb   :  { %v10436_v11 = vpop.eup %10435  ;;  %v4099_v57 = vadd.f32 1e-05, %v3763_v10  ;;  %v3717_v16 = vsub.f32 %v3621_v9, %v3669_v29  ;;  %4204 = vperm.xlu1 %10323, %v10434_v43   ;;  %v10152_v45 = vpop.f32.mrb[132].mxu0  ;;  %v3673_v29 = vmul.f32 %v12524_v56, %v12524_v56 }
 0x4cc   :  { %10445 = vrsqrt.f32 %v4100_v40  ;;  %v3766_v4 = vmax.f32 %v3718_v19, 0.0  ;;  %v3624_v6 = vmul.f32 0.041666668, %v10152_v45  ;;  %4199 = vperm.xlu0 %10322, %v10436_v11   ;;  %v3384_v17 = vpop.f32.mrb[133].mxu0  ;;  %v12664_v10 = vpop.permute.xlu0 %3815 }
 0x4cd   :  { %10447 = vrsqrt.f32 %v4099_v57  ;;  %v3765_v49 = vmax.f32 %v3717_v16, 0.0  ;;  %v3623_v38 = vmul.f32 0.041666668, %v3384_v17 }
 0x4ce   :  { %v10438_v52 = vpop.eup %10437  ;;  %v4102_v53 = vadd.f32 1e-05, %v3766_v4  ;;  %v3720_v55 = vsub.f32 %v3624_v6, %v3672_v31  ;;  %v3676_v31 = vmul.f32 %v12528_v13, %v12528_v13  ;;  %v12668_v4 = vpop.permute.xlu1 %3830 }
 0x4cf   :  { %v10440_v28 = vpop.eup %10439  ;;  %v4101_v24 = vadd.f32 1e-05, %v3765_v49  ;;  %v3719_v3 = vsub.f32 %v3623_v38, %v3671_v26  ;;  %4214 = vperm.xlu1 %10323, %v10438_v52   ;;  %v10155_v36 = vpop.f32.mrb[134].mxu0  ;;  %v3675_v26 = vmul.f32 %v12530_v32, %v12530_v32 }
 0x4d0   :  { %10449 = vrsqrt.f32 %v4102_v53  ;;  %v3768_v34 = vmax.f32 %v3720_v55, 0.0  ;;  %v3626_v7 = vmul.f32 0.041666668, %v10155_v36  ;;  %4209 = vperm.xlu0 %10322, %v10440_v28   ;;  %v3394_v25 = vpop.f32.mrb[135].mxu0  ;;  %v12672_v49 = vpop.permute.xlu0 %3825 }
 0x4d1   :  { %10451 = vrsqrt.f32 %v4101_v24  ;;  %v3767_v9 = vmax.f32 %v3719_v3, 0.0  ;;  %v3625_v43 = vmul.f32 0.041666668, %v3394_v25  ;;  %v3677_v25 = vmul.f32 %v12536_v23, %v12536_v23 }
 0x4d2   :  { %v10442_v40 = vpop.eup %10441  ;;  %v4104_v19 = vadd.f32 1e-05, %v3768_v34  ;;  %v3722_v11 = vsub.f32 %v3626_v7, %v3674_v18  ;;  %v3678_v18 = vmul.f32 %v12534_v21, %v12534_v21 }
 0x4d3   :  { %v10444_v57 = vpop.eup %10443  ;;  %v4103_v14 = vadd.f32 1e-05, %v3767_v9  ;;  %v3721_v16 = vsub.f32 %v3625_v43, %v3673_v29  ;;  %4224 = vperm.xlu1 %10323, %v10442_v40   ;;  %v10158_v45 = vpop.f32.mrb[136].mxu0 }
 0x4d4   :  { %10453 = vrsqrt.f32 %v4104_v19  ;;  %v3770_v56 = vmax.f32 %v3722_v11, 0.0  ;;  %v3628_v6 = vmul.f32 0.041666668, %v10158_v45  ;;  %4219 = vperm.xlu0 %10322, %v10444_v57   ;;  %v3404_v17 = vpop.f32.mrb[137].mxu0  ;;  %v12678_v40 = vpop.permute.xlu1 %3840 }
 0x4d5   :  { %10455 = vrsqrt.f32 %v4103_v14  ;;  %v3769_v38 = vmax.f32 %v3721_v16, 0.0  ;;  %v3627_v52 = vmul.f32 0.041666668, %v3404_v17  ;;  %v12680_v14 = vpop.permute.xlu0 %3835  ;;  %v3679_v17 = vmul.f32 %v12542_v8, %v12542_v8 }
 0x4d6   :  { %v10446_v53 = vpop.eup %10445  ;;  %v4106_v55 = vadd.f32 1e-05, %v3770_v56  ;;  %v3724_v28 = vsub.f32 %v3628_v6, %v3676_v31  ;;  %v3680_v31 = vmul.f32 %v12540_v50, %v12540_v50 }
 0x4d7   :  { %v10448_v24 = vpop.eup %10447  ;;  %v4105_v13 = vadd.f32 1e-05, %v3769_v38  ;;  %v3723_v3 = vsub.f32 %v3627_v52, %v3675_v26  ;;  %4234 = vperm.xlu1 %10323, %v10446_v53   ;;  %v10161_v36 = vpop.f32.mrb[138].mxu0 }
 0x4d8   :  { %10457 = vrsqrt.f32 %v4106_v55  ;;  %v3772_v34 = vmax.f32 %v3724_v28, 0.0  ;;  %v3630_v7 = vmul.f32 0.041666668, %v10161_v36  ;;  %4229 = vperm.xlu0 %10322, %v10448_v24   ;;  %v3414_v32 = vpop.f32.mrb[139].mxu0  ;;  %v12686_v53 = vpop.permute.xlu1 %3850 }
 0x4d9   :  { %10459 = vrsqrt.f32 %v4105_v13  ;;  %v3771_v29 = vmax.f32 %v3723_v3, 0.0  ;;  %v3629_v9 = vmul.f32 0.041666668, %v3414_v32  ;;  %v12688_v13 = vpop.permute.xlu0 %3845  ;;  %v3681_v32 = vmul.f32 %v12548_v51, %v12548_v51 }
 0x4da   :  { %v10450_v43 = vpop.eup %10449  ;;  %v4108_v19 = vadd.f32 1e-05, %v3772_v34  ;;  %v3726_v11 = vsub.f32 %v3630_v7, %v3678_v18  ;;  %v3682_v18 = vmul.f32 %v12546_v30, %v12546_v30  ;;  %v3684_v30 = vmul.f32 %v12552_v20, %v12552_v20 }
 0x4db   :  { %v10452_v57 = vpop.eup %10451  ;;  %v4107_v21 = vadd.f32 1e-05, %v3771_v29  ;;  %v3725_v16 = vsub.f32 %v3629_v9, %v3677_v25  ;;  %4244 = vperm.xlu1 %10323, %v10450_v43   ;;  %v10164_v45 = vpop.f32.mrb[140].mxu0 }
 0x4dc   :  { %10461 = vrsqrt.f32 %v4108_v19  ;;  %v3774_v23 = vmax.f32 %v3726_v11, 0.0  ;;  %v3632_v56 = vmul.f32 0.041666668, %v10164_v45  ;;  %4239 = vperm.xlu0 %10322, %v10452_v57   ;;  %v3424_v6 = vpop.f32.mrb[141].mxu0  ;;  %v12696_v45 = vpop.permute.xlu1 %3860 }
 0x4dd   :  { %10463 = vrsqrt.f32 %v4107_v21  ;;  %v3773_v26 = vmax.f32 %v3725_v16, 0.0  ;;  %v3631_v38 = vmul.f32 0.041666668, %v3424_v6  ;;  %v12700_v6 = vpop.permute.xlu0 %3855 }
 0x4de   :  { %v10454_v52 = vpop.eup %10453  ;;  %v4110_v55 = vadd.f32 1e-05, %v3774_v23  ;;  %v3728_v28 = vsub.f32 %v3632_v56, %v3680_v31  ;;  %v3683_v56 = vmul.f32 %v12554_v12, %v12554_v12 }
 0x4df   :  { %v10456_v24 = vpop.eup %10455  ;;  %v4109_v50 = vadd.f32 1e-05, %v3773_v26  ;;  %v3727_v3 = vsub.f32 %v3631_v38, %v3679_v17  ;;  %4254 = vperm.xlu1 %10323, %v10454_v52   ;;  %v10167_v36 = vpop.f32.mrb[142].mxu0 }
 0x4e0   :  { %10465 = vrsqrt.f32 %v4110_v55  ;;  %v3776_v8 = vmax.f32 %v3728_v28, 0.0  ;;  %v3634_v34 = vmul.f32 0.041666668, %v10167_v36  ;;  %4249 = vperm.xlu0 %10322, %v10456_v24   ;;  %v3434_v7 = vpop.f32.mrb[143].mxu0  ;;  %v12704_v36 = vpop.permute.xlu1 %3870 }
 0x4e1   :  { %10467 = vrsqrt.f32 %v4109_v50  ;;  %v3775_v25 = vmax.f32 %v3727_v3, 0.0  ;;  %v3633_v29 = vmul.f32 0.041666668, %v3434_v7  ;;  %v3686_v3 = vmul.f32 %v12558_v22, %v12558_v22  ;;  %v12708_v7 = vpop.permute.xlu0 %3865 }
 0x4e2   :  { %v10458_v9 = vpop.eup %10457  ;;  %v4112_v43 = vadd.f32 1e-05, %v3776_v8  ;;  %v3730_v19 = vsub.f32 %v3634_v34, %v3682_v18  ;;  %v3685_v34 = vmul.f32 %v12560_v48, %v12560_v48 }
 0x4e3   :  { %v10460_v11 = vpop.eup %10459  ;;  %v4111_v57 = vadd.f32 1e-05, %v3775_v25  ;;  %v3729_v21 = vsub.f32 %v3633_v29, %v3681_v32  ;;  %4264 = vperm.xlu1 %10323, %v10458_v9   ;;  %v10170_v16 = vpop.f32.mrb[144].mxu0 }
 0x4e4   :  { %10469 = vrsqrt.f32 %v4112_v43  ;;  %v3778_v31 = vmax.f32 %v3730_v19, 0.0  ;;  %v3636_v23 = vmul.f32 0.041666668, %v10170_v16  ;;  %4259 = vperm.xlu0 %10322, %v10460_v11   ;;  %v3444_v51 = vpop.f32.mrb[145].mxu0 }
 0x4e5   :  { %10471 = vrsqrt.f32 %v4111_v57  ;;  %v3777_v17 = vmax.f32 %v3729_v21, 0.0  ;;  %v3635_v26 = vmul.f32 0.041666668, %v3444_v51  ;;  %v3688_v21 = vmul.f32 %v12564_v0, %v12564_v0 }
 0x4e6   :  { %v10462_v38 = vpop.eup %10461  ;;  %v4114_v52 = vadd.f32 1e-05, %v3778_v31  ;;  %v3732_v55 = vsub.f32 %v3636_v23, %v3684_v30  ;;  %v3687_v31 = vmul.f32 %v12566_v1, %v12566_v1 }
 0x4e7   :  { %v10464_v28 = vpop.eup %10463  ;;  %v4113_v20 = vadd.f32 1e-05, %v3777_v17  ;;  %v3731_v24 = vsub.f32 %v3635_v26, %v3683_v56  ;;  %4274 = vperm.xlu1 %10323, %v10462_v38   ;;  %v10173_v50 = vpop.f32.mrb[146].mxu0 }
 0x4e8   :  { %10473 = vrsqrt.f32 %v4114_v52  ;;  %v3780_v12 = vmax.f32 %v3732_v55, 0.0  ;;  %v3638_v18 = vmul.f32 0.041666668, %v10173_v50  ;;  %4269 = vperm.xlu0 %10322, %v10464_v28   ;;  %v3454_v8 = vpop.f32.mrb[147].mxu0  ;;  %v12714_v17 = vpop.permute.xlu1 %3880 }
 0x4e9   :  { %10475 = vrsqrt.f32 %v4113_v20  ;;  %v3779_v32 = vmax.f32 %v3731_v24, 0.0  ;;  %v3637_v25 = vmul.f32 0.041666668, %v3454_v8  ;;  %v12716_v55 = vpop.permute.xlu0 %3875  ;;  %v3690_v24 = vmul.f32 %v12570_v44, %v12570_v44 }
 0x4ea   :  { %v10466_v29 = vpop.eup %10465  ;;  %v4116_v9 = vadd.f32 1e-05, %v3780_v12  ;;  %v3734_v43 = vsub.f32 %v3638_v18, %v3686_v3  ;;  %v3689_v12 = vmul.f32 %v12572_v42, %v12572_v42 }
 0x4eb   :  { %v10468_v19 = vpop.eup %10467  ;;  %v4115_v22 = vadd.f32 1e-05, %v3779_v32  ;;  %v3733_v11 = vsub.f32 %v3637_v25, %v3685_v34  ;;  %4284 = vperm.xlu1 %10323, %v10466_v29   ;;  %v10176_v57 = vpop.f32.mrb[148].mxu0 }
 0x4ec   :  { %10477 = vrsqrt.f32 %v4116_v9  ;;  %v3782_v16 = vmax.f32 %v3734_v43, 0.0  ;;  %v3640_v30 = vmul.f32 0.041666668, %v10176_v57  ;;  %4279 = vperm.xlu0 %10322, %v10468_v19   ;;  %v3464_v48 = vpop.f32.mrb[149].mxu0  ;;  %v12722_v32 = vpop.permute.xlu1 %3890 }
 0x4ed   :  { %10479 = vrsqrt.f32 %v4115_v22  ;;  %v3781_v23 = vmax.f32 %v3733_v11, 0.0  ;;  %v3639_v51 = vmul.f32 0.041666668, %v3464_v48  ;;  %v12724_v43 = vpop.permute.xlu0 %3885  ;;  %v3692_v11 = vmul.f32 %v12576_v41, %v12576_v41 }
 0x4ee   :  { %v10470_v56 = vpop.eup %10469  ;;  %v4118_v26 = vadd.f32 1e-05, %v3782_v16  ;;  %v3736_v38 = vsub.f32 %v3640_v30, %v3688_v21  ;;  %v3691_v16 = vmul.f32 %v12578_v58, %v12578_v58  ;;  %v3694_v41 = vmul.f32 %v12582_v2, %v12582_v2 }
 0x4ef   :  { %v10472_v52 = vpop.eup %10471  ;;  %v4117_v0 = vadd.f32 1e-05, %v3781_v23  ;;  %v3735_v28 = vsub.f32 %v3639_v51, %v3687_v31  ;;  %4294 = vperm.xlu1 %10323, %v10470_v56   ;;  %v10179_v20 = vpop.f32.mrb[150].mxu0 }
 0x4f0   :  { %10481 = vrsqrt.f32 %v4118_v26  ;;  %v3784_v1 = vmax.f32 %v3736_v38, 0.0  ;;  %v3642_v50 = vmul.f32 0.041666668, %v10179_v20  ;;  %4289 = vperm.xlu0 %10322, %v10472_v52   ;;  %v3474_v3 = vpop.f32.mrb[151].mxu0 }
 0x4f1   :  { %10483 = vrsqrt.f32 %v4117_v0  ;;  %v3783_v18 = vmax.f32 %v3735_v28, 0.0  ;;  %v3641_v8 = vmul.f32 0.041666668, %v3474_v3  ;;  %v12732_v0 = vpop.permute.xlu1 %3900 }
 0x4f2   :  { %v10474_v34 = vpop.eup %10473  ;;  %v4120_v25 = vadd.f32 1e-05, %v3784_v1  ;;  %v3738_v29 = vsub.f32 %v3642_v50, %v3690_v24  ;;  %v3693_v24 = vmul.f32 %v12584_v27, %v12584_v27  ;;  %v12736_v1 = vpop.permute.xlu0 %3895 }
 0x4f3   :  { %v10476_v9 = vpop.eup %10475  ;;  %v4119_v44 = vadd.f32 1e-05, %v3783_v18  ;;  %v3737_v19 = vsub.f32 %v3641_v8, %v3689_v12  ;;  %4304 = vperm.xlu1 %10323, %v10474_v34   ;;  %v10182_v22 = vpop.f32.mrb[152].mxu0 }
 0x4f4   :  { %10485 = vrsqrt.f32 %v4120_v25  ;;  %v3786_v42 = vmax.f32 %v3738_v29, 0.0  ;;  %v3644_v57 = vmul.f32 0.041666668, %v10182_v22  ;;  %4299 = vperm.xlu0 %10322, %v10476_v9   ;;  %v3484_v21 = vpop.f32.mrb[153].mxu0  ;;  %v3696_v9 = vmul.f32 %v12588_v33, %v12588_v33 }
 0x4f5   :  { %10487 = vrsqrt.f32 %v4119_v44  ;;  %v3785_v30 = vmax.f32 %v3737_v19, 0.0  ;;  %v3643_v48 = vmul.f32 0.041666668, %v3484_v21  ;;  %v12740_v44 = vpop.permute.xlu1 %3910 }
 0x4f6   :  { %v10478_v31 = vpop.eup %10477  ;;  %v4122_v23 = vadd.f32 1e-05, %v3786_v42  ;;  %v3740_v51 = vsub.f32 %v3644_v57, %v3692_v11  ;;  %v3695_v11 = vmul.f32 %v12590_v63, %v12590_v63  ;;  %v12744_v42 = vpop.permute.xlu0 %3905 }
 0x4f7   :  { %v10480_v56 = vpop.eup %10479  ;;  %v4121_v26 = vadd.f32 1e-05, %v3785_v30  ;;  %v3739_v38 = vsub.f32 %v3643_v48, %v3691_v16  ;;  %4314 = vperm.xlu1 %10323, %v10478_v31   ;;  %v10185_v52 = vpop.f32.mrb[154].mxu0 }
 0x4f8   :  { %10489 = vrsqrt.f32 %v4122_v23  ;;  %v3788_v28 = vmax.f32 %v3740_v51, 0.0  ;;  %v3646_v20 = vmul.f32 0.041666668, %v10185_v52  ;;  %4309 = vperm.xlu0 %10322, %v10480_v56   ;;  %v3494_v58 = vpop.f32.mrb[155].mxu0  ;;  %v3698_v56 = vmul.f32 %v12594_v47, %v12594_v47 }
 0x4f9   :  { %10491 = vrsqrt.f32 %v4121_v26  ;;  %v3787_v50 = vmax.f32 %v3739_v38, 0.0  ;;  %v3645_v3 = vmul.f32 0.041666668, %v3494_v58  ;;  %v3697_v52 = vmul.f32 %v12596_v5, %v12596_v5  ;;  %v12750_v58 = vpop.permute.xlu1 %3920 }
 0x4fa   :  { %v10482_v12 = vpop.eup %10481  ;;  %v4124_v18 = vadd.f32 1e-05, %v3788_v28  ;;  %v3742_v8 = vsub.f32 %v3646_v20, %v3694_v41 }
 0x4fb   :  { %v10484_v34 = vpop.eup %10483  ;;  %v4123_v2 = vadd.f32 1e-05, %v3787_v50  ;;  %v3741_v25 = vsub.f32 %v3645_v3, %v3693_v24  ;;  %4324 = vperm.xlu1 %10323, %v10482_v12   ;;  %v10188_v29 = vpop.f32.mrb[156].mxu0 }
 0x4fc   :  { %10493 = vrsqrt.f32 %v4124_v18  ;;  %v3790_v27 = vmax.f32 %v3742_v8, 0.0  ;;  %v3648_v19 = vmul.f32 0.041666668, %v10188_v29  ;;  %4319 = vperm.xlu0 %10322, %v10484_v34   ;;  %v3504_v22 = vpop.f32.mrb[157].mxu0  ;;  %v12752_v12 = vpop.permute.xlu0 %3915  ;;  %v3700_v34 = vmul.f32 %v12600_v54, %v12600_v54 }
 0x4fd   :  { %10495 = vrsqrt.f32 %v4123_v2  ;;  %v3789_v57 = vmax.f32 %v3741_v25, 0.0  ;;  %v3647_v21 = vmul.f32 0.041666668, %v3504_v22  ;;  %v3699_v29 = vmul.f32 %v12602_v61, %v12602_v61  ;;  %v12758_v22 = vpop.permute.xlu1 %3930 }
 0x4fe   :  { %v10486_v16 = vpop.eup %10485  ;;  %v4126_v30 = vadd.f32 1e-05, %v3790_v27  ;;  %v3744_v48 = vsub.f32 %v3648_v19, %v3696_v9 }
 0x4ff   :  { %v10488_v31 = vpop.eup %10487  ;;  %v4125_v33 = vadd.f32 1e-05, %v3789_v57  ;;  %v3743_v23 = vsub.f32 %v3647_v21, %v3695_v11  ;;  %4334 = vperm.xlu1 %10323, %v10486_v16   ;;  %v10191_v51 = vpop.f32.mrb[158].mxu0 }
 0x500   :  { %10497 = vrsqrt.f32 %v4126_v30  ;;  %v3792_v26 = vmax.f32 %v3744_v48, 0.0  ;;  %v3650_v38 = vmul.f32 0.041666668, %v10191_v51  ;;  %4329 = vperm.xlu0 %10322, %v10488_v31   ;;  %v3514_v63 = vpop.f32.mrb[159].mxu0  ;;  %v12760_v16 = vpop.permute.xlu0 %3925  ;;  %v3702_v31 = vmul.f32 %v12606_v59, %v12606_v59 }
 0x501   :  { %10499 = vrsqrt.f32 %v4125_v33  ;;  %v3791_v41 = vmax.f32 %v3743_v23, 0.0  ;;  %v3649_v28 = vmul.f32 0.041666668, %v3514_v63  ;;  %v3701_v51 = vmul.f32 %v12608_v37, %v12608_v37 }
 0x502   :  { %v10490_v20 = vpop.eup %10489  ;;  %v4128_v24 = vadd.f32 1e-05, %v3792_v26  ;;  %v3746_v50 = vsub.f32 %v3650_v38, %v3698_v56  ;;  %v3704_v59 = vmul.f32 %v12612_v39, %v12612_v39 }
 0x503   :  { %v10492_v3 = vpop.eup %10491  ;;  %v4127_v47 = vadd.f32 1e-05, %v3791_v41  ;;  %v3745_v18 = vsub.f32 %v3649_v28, %v3697_v52  ;;  %4344 = vperm.xlu1 %10323, %v10490_v20   ;;  %v10194_v8 = vpop.f32.mrb[160].mxu0 }
 0x504   :  { %10501 = vrsqrt.f32 %v4128_v24  ;;  %v3794_v5 = vmax.f32 %v3746_v50, 0.0  ;;  %v3652_v2 = vmul.f32 0.041666668, %v10194_v8  ;;  %4339 = vperm.xlu0 %10322, %v10492_v3   ;;  %v3524_v25 = vpop.f32.mrb[161].mxu0  ;;  %v12768_v50 = vpop.permute.xlu1 %3940 }
 0x505   :  { %10503 = vrsqrt.f32 %v4127_v47  ;;  %v3793_v9 = vmax.f32 %v3745_v18, 0.0  ;;  %v3651_v27 = vmul.f32 0.041666668, %v3524_v25  ;;  %v3703_v18 = vmul.f32 %v12614_v60, %v12614_v60  ;;  %v12772_v8 = vpop.permute.xlu0 %3935 }
 0x506   :  { %v10494_v19 = vpop.eup %10493  ;;  %v4130_v11 = vadd.f32 1e-05, %v3794_v5  ;;  %v3748_v57 = vsub.f32 %v3652_v2, %v3700_v34 }
 0x507   :  { %v10496_v21 = vpop.eup %10495  ;;  %v4129_v54 = vadd.f32 1e-05, %v3793_v9  ;;  %v3747_v30 = vsub.f32 %v3651_v27, %v3699_v29  ;;  %4354 = vperm.xlu1 %10323, %v10494_v19   ;;  %v10197_v48 = vpop.f32.mrb[162].mxu0 }
 0x508   :  { %10505 = vrsqrt.f32 %v4130_v11  ;;  %v3796_v61 = vmax.f32 %v3748_v57, 0.0  ;;  %v3654_v33 = vmul.f32 0.041666668, %v10197_v48  ;;  %4349 = vperm.xlu0 %10322, %v10496_v21   ;;  %v3534_v23 = vpop.f32.mrb[163].mxu0  ;;  %v14819_v11 = vld [vmem:[#allocation50_spill] sm:$0xff]  ;;  %v12776_v21 = vpop.permute.xlu1 %3950  ;;  %v14820_v48 = vld [vmem:[#allocation19_spill] sm:$0xff] }
 0x509   :  { %10507 = vrsqrt.f32 %v4129_v54  ;;  %v3795_v56 = vmax.f32 %v3747_v30, 0.0  ;;  %v3653_v26 = vmul.f32 0.041666668, %v3534_v23  ;;  %v3706_v57 = vmul.f32 %v14819_v11, %v14819_v11 }
 0x50a   :  { %v10498_v38 = vpop.eup %10497  ;;  %v4132_v63 = vadd.f32 1e-05, %v3796_v61  ;;  %v3750_v52 = vsub.f32 %v3654_v33, %v3702_v31  ;;  %v3705_v31 = vmul.f32 %v14820_v48, %v14820_v48  ;;  %v12780_v61 = vpop.permute.xlu0 %3945 }
 0x50b   :  { %v10500_v41 = vpop.eup %10499  ;;  %v4131_v28 = vadd.f32 1e-05, %v3795_v56  ;;  %v3749_v20 = vsub.f32 %v3653_v26, %v3701_v51  ;;  %4364 = vperm.xlu1 %10323, %v10498_v38   ;;  %v10200_v24 = vpop.f32.mrb[164].mxu0 }
 0x50c   :  { %10509 = vrsqrt.f32 %v4132_v63  ;;  %v3798_v3 = vmax.f32 %v3750_v52, 0.0  ;;  %v3656_v47 = vmul.f32 0.041666668, %v10200_v24  ;;  %4359 = vperm.xlu0 %10322, %v10500_v41   ;;  %v3544_v37 = vpop.f32.mrb[165].mxu0  ;;  %v12782_v24 = vpop.permute.xlu1 %3960 }
 0x50d   :  { %10511 = vrsqrt.f32 %v4131_v28  ;;  %v3797_v34 = vmax.f32 %v3749_v20, 0.0  ;;  %v3655_v5 = vmul.f32 0.041666668, %v3544_v37 }
 0x50e   :  { %v10502_v2 = vpop.eup %10501  ;;  %v4134_v25 = vadd.f32 1e-05, %v3798_v3  ;;  %v3752_v29 = vsub.f32 %v3656_v47, %v3704_v59  ;;  %v12784_v47 = vpop.permute.xlu0 %3955 }
 0x50f   :  { %v10504_v9 = vpop.eup %10503  ;;  %v4133_v39 = vadd.f32 1e-05, %v3797_v34  ;;  %v3751_v27 = vsub.f32 %v3655_v5, %v3703_v18  ;;  %4374 = vperm.xlu1 %10323, %v10502_v2   ;;  %v10203_v19 = vpop.f32.mrb[166].mxu0 }
 0x510   :  { %10513 = vrsqrt.f32 %v4134_v25  ;;  %v3800_v60 = vmax.f32 %v3752_v29, 0.0  ;;  %v3658_v54 = vmul.f32 0.041666668, %v10203_v19  ;;  %4369 = vperm.xlu0 %10322, %v10504_v9   ;;  %v3554_v30 = vpop.f32.mrb[167].mxu0  ;;  %v12786_v34 = vpop.permute.xlu1 %3970 }
 0x511   :  { %10515 = vrsqrt.f32 %v4133_v39  ;;  %v3799_v33 = vmax.f32 %v3751_v27, 0.0  ;;  %v3657_v23 = vmul.f32 0.041666668, %v3554_v30 }
 0x512   :  { %v10506_v51 = vpop.eup %10505  ;;  %v4136_v56 = vadd.f32 1e-05, %v3800_v60  ;;  %v3754_v26 = vsub.f32 %v3658_v54, %v3706_v57  ;;  %v12788_v2 = vpop.permute.xlu0 %3965 }
 0x513   :  { %v10508_v38 = vpop.eup %10507  ;;  %v4135_v63 = vadd.f32 1e-05, %v3799_v33  ;;  %v3753_v52 = vsub.f32 %v3657_v23, %v3705_v31  ;;  %4384 = vperm.xlu1 %10323, %v10506_v51  }
 0x514   :  { %10517 = vrsqrt.f32 %v4136_v56  ;;  %v3802_v41 = vmax.f32 %v3754_v26, 0.0  ;;  %4379 = vperm.xlu0 %10322, %v10508_v38   ;;  %v12790_v9 = vpop.permute.xlu1 %3980  ;;  %v14823_v38 = vld [vmem:[#allocation53_spill] sm:$0xff] }
 0x515   :  { %10519 = vrsqrt.f32 %v4135_v63  ;;  %v3801_v28 = vmax.f32 %v3753_v52, 0.0  ;;  %v4044_v63 = vsub.f32 %v14823_v38, %v12650_v46  ;;  %v14824_v52 = vld [vmem:[#allocation54_spill] sm:$0xff] }
 0x516   :  { %v10510_v20 = vpop.eup %10509  ;;  %v4138_v59 = vadd.f32 1e-05, %v3802_v41  ;;  %v12792_v39 = vpop.permute.xlu0 %3975  ;;  %v4043_v41 = vsub.f32 %v14824_v52, %v12652_v62  ;;  %v14826_v62 = vld [vmem:[#allocation52_spill] sm:$0xff] }
 0x517   :  { %v10512_v3 = vpop.eup %10511  ;;  %v4137_v37 = vadd.f32 1e-05, %v3801_v28  ;;  %4394 = vperm.xlu1 %10323, %v10510_v20   ;;  %v12825_v28 = vld [vmem:[%s14479_s9] ss:$0 sm:$0xff] }
 0x518   :  { %10521 = vrsqrt.f32 %v4138_v59  ;;  %4389 = vperm.xlu0 %10322, %v10512_v3  }
 0x519   :  { %10523 = vrsqrt.f32 %v4137_v37  ;;  %v12830_v37 = vld [vmem:[%s14480_s10] ss:$0 sm:$0xff] }
 0x51a   :  { %v10514_v18 = vpop.eup %10513 }
 0x51b   :  { %v10516_v5 = vpop.eup %10515  ;;  %4404 = vperm.xlu1 %10323, %v10514_v18  }
 0x51c   :  { %4399 = vperm.xlu0 %10322, %v10516_v5   ;;  %v14825_v5 = vld [vmem:[#allocation51_spill] sm:$0xff] }
 0x51d   :  { %v12794_v11 = vpop.permute.xlu1 %3990  ;;  %v4046_v46 = vsub.f32 %v14825_v5, %v12660_v35  ;;  %v14827_v35 = vld [vmem:[#allocation56_spill] sm:$0xff] }
 0x51e   :  { %v10518_v25 = vpop.eup %10517  ;;  %v12796_v57 = vpop.permute.xlu0 %3985 }
 0x51f   :  { %v10520_v29 = vpop.eup %10519  ;;  %4414 = vperm.xlu1 %10323, %v10518_v25  }
 0x520   :  { %4409 = vperm.xlu0 %10322, %v10520_v29   ;;  %v4045_v29 = vsub.f32 %v14826_v62, %v12664_v10 }
 0x521   :  { %v12798_v60 = vpop.permute.xlu1 %4000 }
 0x522   :  { %v10522_v27 = vpop.eup %10521  ;;  %v12800_v54 = vpop.permute.xlu0 %3995 }
 0x523   :  { %v10524_v19 = vpop.eup %10523  ;;  %4424 = vperm.xlu1 %10323, %v10522_v27  }
 0x524   :  { %4419 = vperm.xlu0 %10322, %v10524_v19  }
 0x525   :  { %v12802_v30 = vpop.permute.xlu1 %4010 }
 0x526   :  { %v12804_v48 = vpop.permute.xlu0 %4005 }
 0x529   :  { %v12806_v31 = vpop.permute.xlu1 %4020 }
 0x52a   :  { %v12808_v33 = vpop.permute.xlu0 %4015 }
 0x52d   :  { %v12810_v23 = vpop.permute.xlu1 %4030 }
 0x52e   :  { %v12812_v51 = vpop.permute.xlu0 %4025 }
 0x531   :  { %v12814_v56 = vpop.permute.xlu1 %4040 }
 0x532   :  { %14821 = vst [vmem:[#allocation18_spill] sm:$0xff] %v12814_v56  ;;  %v12816_v26 = vpop.permute.xlu0 %4035 }
 0x533   :  { %14822 = vst [vmem:[#allocation24_spill] sm:$0xff] %v12816_v26 }
 0x546   :  { %v4195_v20 = vpop.permute.xlu1 %4194 }
 0x547   :  { %v4428_v59 = vmul.f32 %v4195_v20, %v4044_v63  ;;  %v4190_v3 = vpop.permute.xlu0 %4189 }
 0x548   :  { %v4427_v18 = vmul.f32 %v4190_v3, %v4043_v41  ;;  %v12843_v41 = vld [vmem:[%s14481_s11] ss:$0 sm:$0xff] }
 0x549   :  { %v4482_v25 = vmul.f32 %v12825_v28, %v4428_v59  ;;  %v4048_v59 = vsub.f32 %v14827_v35, %v12668_v4 }
 0x54a   :  { %v4481_v27 = vmul.f32 %v12825_v28, %v4427_v18  ;;  %v4205_v19 = vpop.permute.xlu1 %4204  ;;  %v14828_v18 = vld [vmem:[#allocation3_spill] sm:$0xff] }
 0x54b   :  { %v4536_v38 = vadd.f32 %v12830_v37, %v4482_v25  ;;  %v4430_v63 = vmul.f32 %v4205_v19, %v4046_v46  ;;  %v4200_v52 = vpop.permute.xlu0 %4199  ;;  %v4047_v5 = vsub.f32 %v14828_v18, %v12672_v49 }
 0x54c   :  { %v4535_v20 = vadd.f32 %v12830_v37, %v4481_v27  ;;  %v4429_v15 = vmul.f32 %v4200_v52, %v4045_v29 }
 0x54d   :  { %v4484_v10 = vmul.f32 %v12825_v28, %v4430_v63  ;;  %v4584_v3 = vmax.f32 %v4536_v38, 0.0  ;;  %v14829_v38 = vld [vmem:[#allocation5_spill] sm:$0xff] }
 0x54e   :  { %v4483_v46 = vmul.f32 %v12825_v28, %v4429_v15  ;;  %v4215_v25 = vpop.permute.xlu1 %4214  ;;  %v4583_v62 = vmax.f32 %v4535_v20, 0.0  ;;  %v4050_v63 = vsub.f32 %v14829_v38, %v12678_v40  ;;  %v14830_v20 = vld [vmem:[#allocation55_spill] sm:$0xff] }
 0x54f   :  { %v4538_v29 = vadd.f32 %v12830_v37, %v4484_v10  ;;  %v4432_v27 = vmul.f32 %v4215_v25, %v4048_v59  ;;  %v4210_v19 = vpop.permute.xlu0 %4209  ;;  %v4639_v52 = vmul.f32 %v12843_v41, %v4584_v3  ;;  %v4049_v35 = vsub.f32 %v14830_v20, %v12680_v14  ;;  %v14832_v14 = vld [vmem:[#allocation60_spill] sm:$0xff] }
 0x550   :  { %v4537_v26 = vadd.f32 %v12830_v37, %v4483_v46  ;;  %v4431_v56 = vmul.f32 %v4210_v19, %v4047_v5  ;;  %v4638_v4 = vmul.f32 %v12843_v41, %v4583_v62 }
 0x551   :  { %v4486_v49 = vmul.f32 %v12825_v28, %v4432_v27  ;;  %4688 = vadd.xlane.f32.xlu1 %v4639_v52  ;;  %v4586_v15 = vmax.f32 %v4538_v29, 0.0  ;;  %v14831_v27 = vld [vmem:[#allocation59_spill] sm:$0xff] }
 0x552   :  { %v4485_v59 = vmul.f32 %v12825_v28, %v4431_v56  ;;  %v4225_v10 = vpop.permute.xlu1 %4224  ;;  %4686 = vadd.xlane.f32.xlu0 %v4638_v4  ;;  %v4585_v62 = vmax.f32 %v4537_v26, 0.0  ;;  %v4052_v29 = vsub.f32 %v14831_v27, %v12686_v53  ;;  %v4051_v56 = vsub.f32 %v14832_v14, %v12688_v13 }
 0x553   :  { %v4540_v3 = vadd.f32 %v12830_v37, %v4486_v49  ;;  %v4434_v18 = vmul.f32 %v4225_v10, %v4050_v63  ;;  %v4220_v5 = vpop.permute.xlu0 %4219  ;;  %v4641_v46 = vmul.f32 %v12843_v41, %v4586_v15  ;;  %v14833_v10 = vld [vmem:[#allocation58_spill] sm:$0xff] }
 0x554   :  { %v4539_v25 = vadd.f32 %v12830_v37, %v4485_v59  ;;  %v4433_v40 = vmul.f32 %v4220_v5, %v4049_v35  ;;  %v4640_v53 = vmul.f32 %v12843_v41, %v4585_v62  ;;  %v4054_v13 = vsub.f32 %v14833_v10, %v12696_v45  ;;  %v14834_v5 = vld [vmem:[#allocation4_spill] sm:$0xff] }
 0x555   :  { %v4488_v19 = vmul.f32 %v12825_v28, %v4434_v18  ;;  %v4588_v20 = vmax.f32 %v4540_v3, 0.0 }
 0x556   :  { %v4487_v52 = vmul.f32 %v12825_v28, %v4433_v40  ;;  %v4235_v4 = vpop.permute.xlu1 %4234  ;;  %4692 = vadd.xlane.f32.xlu0 %v4641_v46  ;;  %v4587_v38 = vmax.f32 %v4539_v25, 0.0  ;;  %v4053_v46 = vsub.f32 %v14834_v5, %v12700_v6  ;;  %v14835_v6 = vld [vmem:[#allocation6_spill] sm:$0xff] }
 0x557   :  { %v4542_v63 = vadd.f32 %v12830_v37, %v4488_v19  ;;  %v4436_v49 = vmul.f32 %v4235_v4, %v4052_v29  ;;  %v4230_v15 = vpop.permute.xlu0 %4229  ;;  %v4643_v62 = vmul.f32 %v12843_v41, %v4588_v20  ;;  %v4056_v4 = vsub.f32 %v14835_v6, %v12704_v36 }
 0x558   :  { %v4541_v26 = vadd.f32 %v12830_v37, %v4487_v52  ;;  %v4435_v35 = vmul.f32 %v4230_v15, %v4051_v56  ;;  %v4642_v59 = vmul.f32 %v12843_v41, %v4587_v38 }
 0x559   :  { %v4490_v18 = vmul.f32 %v12825_v28, %v4436_v49  ;;  %v4590_v19 = vmax.f32 %v4542_v63, 0.0  ;;  %v14836_v49 = vld [vmem:[#allocation57_spill] sm:$0xff] }
 0x55a   :  { %v4489_v25 = vmul.f32 %v12825_v28, %v4435_v35  ;;  %v4245_v40 = vpop.permute.xlu1 %4244  ;;  %4690 = vadd.xlane.f32.xlu0 %v4640_v53  ;;  %4694 = vadd.xlane.f32.xlu1 %v4642_v59  ;;  %v4589_v3 = vmax.f32 %v4541_v26, 0.0  ;;  %v4055_v15 = vsub.f32 %v14836_v49, %v12708_v7  ;;  %v14837_v7 = vld [vmem:[#allocation61_spill] sm:$0xff] }
 0x55b   :  { %v4438_v27 = vmul.f32 %v4245_v40, %v4054_v13  ;;  %v4240_v29 = vpop.permute.xlu0 %4239  ;;  %v4544_v14 = vadd.f32 %v12830_v37, %v4490_v18  ;;  %v4645_v10 = vmul.f32 %v12843_v41, %v4590_v19  ;;  %v14838_v40 = vld [vmem:[#allocation62_spill] sm:$0xff] }
 0x55c   :  { %v4543_v45 = vadd.f32 %v12830_v37, %v4489_v25  ;;  %v4437_v56 = vmul.f32 %v4240_v29, %v4053_v46  ;;  %v4644_v52 = vmul.f32 %v12843_v41, %v4589_v3  ;;  %v4058_v46 = vsub.f32 %v14837_v7, %v12714_v17 }
 0x55d   :  { %v4492_v38 = vmul.f32 %v12825_v28, %v4438_v27  ;;  %v4592_v5 = vmax.f32 %v4544_v14, 0.0  ;;  %v4057_v3 = vsub.f32 %v14838_v40, %v12716_v55  ;;  %v14839_v55 = vld [vmem:[#allocation8_spill] sm:$0xff] }
 0x55e   :  { %v4491_v26 = vmul.f32 %v12825_v28, %v4437_v56  ;;  %v4255_v35 = vpop.permute.xlu1 %4254  ;;  %4696 = vadd.xlane.f32.xlu0 %v4643_v62  ;;  %4698 = vadd.xlane.f32.xlu1 %v4644_v52  ;;  %v4591_v63 = vmax.f32 %v4543_v45, 0.0 }
 0x55f   :  { %v4546_v20 = vadd.f32 %v12830_v37, %v4492_v38  ;;  %v4440_v53 = vmul.f32 %v4255_v35, %v4056_v4  ;;  %v4250_v59 = vpop.permute.xlu0 %4249  ;;  %v4647_v17 = vmul.f32 %v12843_v41, %v4592_v5  ;;  %v4060_v38 = vsub.f32 %v14839_v55, %v12722_v32  ;;  %v14844_v55 = vld [vmem:[#allocation66_spill] sm:$0xff] }
 0x560   :  { %v4545_v13 = vadd.f32 %v12830_v37, %v4491_v26  ;;  %v4439_v36 = vmul.f32 %v4250_v59, %v4055_v15  ;;  %v4646_v18 = vmul.f32 %v12843_v41, %v4591_v63  ;;  %v14840_v15 = vld [vmem:[#allocation65_spill] sm:$0xff] }
 0x561   :  { %v4494_v25 = vmul.f32 %v12825_v28, %v4440_v53  ;;  %v4594_v52 = vmax.f32 %v4546_v20, 0.0  ;;  %v4059_v26 = vsub.f32 %v14840_v15, %v12724_v43  ;;  %v14841_v43 = vld [vmem:[#allocation63_spill] sm:$0xff] }
 0x562   :  { %v4493_v27 = vmul.f32 %v12825_v28, %v4439_v36  ;;  %v4265_v29 = vpop.permute.xlu1 %4264  ;;  %4700 = vadd.xlane.f32.xlu0 %v4645_v10  ;;  %4702 = vadd.xlane.f32.xlu1 %v4646_v18  ;;  %v4593_v62 = vmax.f32 %v4545_v13, 0.0  ;;  %v4062_v7 = vsub.f32 %v14841_v43, %v12732_v0 }
 0x563   :  { %v4548_v19 = vadd.f32 %v12830_v37, %v4494_v25  ;;  %v4442_v45 = vmul.f32 %v4265_v29, %v4058_v46  ;;  %v4260_v56 = vpop.permute.xlu0 %4259  ;;  %v4649_v10 = vmul.f32 %v12843_v41, %v4594_v52  ;;  %v14842_v25 = vld [vmem:[#allocation64_spill] sm:$0xff] }
 0x564   :  { %v4547_v14 = vadd.f32 %v12830_v37, %v4493_v27  ;;  %v4441_v6 = vmul.f32 %v4260_v56, %v4057_v3  ;;  %v4648_v4 = vmul.f32 %v12843_v41, %v4593_v62  ;;  %v4061_v40 = vsub.f32 %v14842_v25, %v12736_v1  ;;  %v14843_v1 = vld [vmem:[#allocation9_spill] sm:$0xff] }
 0x565   :  { %v4496_v49 = vmul.f32 %v12825_v28, %v4442_v45  ;;  %v4596_v13 = vmax.f32 %v4548_v19, 0.0 }
 0x566   :  { %v4495_v35 = vmul.f32 %v12825_v28, %v4441_v6  ;;  %v4275_v63 = vpop.permute.xlu1 %4274  ;;  %4704 = vadd.xlane.f32.xlu0 %v4647_v17  ;;  %4706 = vadd.xlane.f32.xlu1 %v4648_v4  ;;  %v4595_v20 = vmax.f32 %v4547_v14, 0.0  ;;  %v4064_v17 = vsub.f32 %v14843_v1, %v12740_v44 }
 0x567   :  { %v4444_v53 = vmul.f32 %v4275_v63, %v4060_v38  ;;  %v4270_v59 = vpop.permute.xlu0 %4269  ;;  %v4550_v36 = vadd.f32 %v12830_v37, %v4496_v49  ;;  %v4651_v56 = vmul.f32 %v12843_v41, %v4596_v13  ;;  %v4063_v38 = vsub.f32 %v14844_v55, %v12744_v42  ;;  %v14845_v42 = vld [vmem:[#allocation10_spill] sm:$0xff] }
 0x568   :  { %v4549_v32 = vadd.f32 %v12830_v37, %v4495_v35  ;;  %v4443_v18 = vmul.f32 %v4270_v59, %v4059_v26  ;;  %v4650_v5 = vmul.f32 %v12843_v41, %v4595_v20 }
 0x569   :  { %v4498_v46 = vmul.f32 %v12825_v28, %v4444_v53  ;;  %v4598_v6 = vmax.f32 %v4550_v36, 0.0  ;;  %v4066_v36 = vsub.f32 %v14845_v42, %v12750_v58 }
 0x56a   :  { %v4497_v3 = vmul.f32 %v12825_v28, %v4443_v18  ;;  %v4285_v27 = vpop.permute.xlu1 %4284  ;;  %4708 = vadd.xlane.f32.xlu0 %v4649_v10  ;;  %4710 = vadd.xlane.f32.xlu1 %v4650_v5  ;;  %v4597_v29 = vmax.f32 %v4549_v32, 0.0  ;;  %v14846_v18 = vld [vmem:[#allocation7_spill] sm:$0xff] }
 0x56b   :  { %v4552_v62 = vadd.f32 %v12830_v37, %v4498_v46  ;;  %v4446_v19 = vmul.f32 %v4285_v27, %v4062_v7  ;;  %v4280_v45 = vpop.permute.xlu0 %4279  ;;  %v4653_v44 = vmul.f32 %v12843_v41, %v4598_v6  ;;  %v4065_v5 = vsub.f32 %v14846_v18, %v12752_v12  ;;  %v14847_v12 = vld [vmem:[#allocation13_spill] sm:$0xff] }
 0x56c   :  { %v4551_v52 = vadd.f32 %v12830_v37, %v4497_v3  ;;  %v4445_v0 = vmul.f32 %v4280_v45, %v4061_v40  ;;  %v4652_v14 = vmul.f32 %v12843_v41, %v4597_v29  ;;  %v4068_v45 = vsub.f32 %v14847_v12, %v12758_v22 }
 0x56d   :  { %v4500_v4 = vmul.f32 %v12825_v28, %v4446_v19  ;;  %v4600_v53 = vmax.f32 %v4552_v62, 0.0 }
 0x56e   :  { %v4499_v49 = vmul.f32 %v12825_v28, %v4445_v0  ;;  %v4295_v15 = vpop.permute.xlu1 %4294  ;;  %4712 = vadd.xlane.f32.xlu0 %v4651_v56  ;;  %4714 = vadd.xlane.f32.xlu1 %v4652_v14  ;;  %v4599_v26 = vmax.f32 %v4551_v52, 0.0  ;;  %v14848_v52 = vld [vmem:[#allocation12_spill] sm:$0xff] }
 0x56f   :  { %v4554_v35 = vadd.f32 %v12830_v37, %v4500_v4  ;;  %v4448_v63 = vmul.f32 %v4295_v15, %v4064_v17  ;;  %v4290_v20 = vpop.permute.xlu0 %4289  ;;  %v4655_v3 = vmul.f32 %v12843_v41, %v4600_v53  ;;  %v4067_v0 = vsub.f32 %v14848_v52, %v12760_v16  ;;  %v14849_v16 = vld [vmem:[#allocation14_spill] sm:$0xff] }
 0x570   :  { %v4553_v59 = vadd.f32 %v12830_v37, %v4499_v49  ;;  %v4447_v10 = vmul.f32 %v4290_v20, %v4063_v38  ;;  %v4654_v13 = vmul.f32 %v12843_v41, %v4599_v26  ;;  %v14850_v20 = vld [vmem:[#allocation11_spill] sm:$0xff] }
 0x571   :  { %v4502_v32 = vmul.f32 %v12825_v28, %v4448_v63  ;;  %v4602_v27 = vmax.f32 %v4554_v35, 0.0  ;;  %v4070_v35 = vsub.f32 %v14849_v16, %v12768_v50  ;;  %v4069_v53 = vsub.f32 %v14850_v20, %v12772_v8  ;;  %v14851_v8 = vld [vmem:[#allocation21_spill] sm:$0xff] }
 0x572   :  { %v4501_v43 = vmul.f32 %v12825_v28, %v4447_v10  ;;  %v4305_v7 = vpop.permute.xlu1 %4304  ;;  %4716 = vadd.xlane.f32.xlu0 %v4653_v44  ;;  %4718 = vadd.xlane.f32.xlu1 %v4654_v13  ;;  %v4601_v46 = vmax.f32 %v4553_v59, 0.0 }
 0x573   :  { %v4450_v25 = vmul.f32 %v4305_v7, %v4066_v36  ;;  %v4300_v40 = vpop.permute.xlu0 %4299  ;;  %v4556_v29 = vadd.f32 %v12830_v37, %v4502_v32  ;;  %v4657_v38 = vmul.f32 %v12843_v41, %v4602_v27  ;;  %v4072_v7 = vsub.f32 %v14851_v8, %v12776_v21 }
 0x574   :  { %v4555_v58 = vadd.f32 %v12830_v37, %v4501_v43  ;;  %v4449_v62 = vmul.f32 %v4300_v40, %v4065_v5  ;;  %v4656_v19 = vmul.f32 %v12843_v41, %v4601_v46 }
 0x575   :  { %v4504_v56 = vmul.f32 %v12825_v28, %v4450_v25  ;;  %v4604_v26 = vmax.f32 %v4556_v29, 0.0  ;;  %v14852_v25 = vld [vmem:[#allocation17_spill] sm:$0xff] }
 0x576   :  { %v4503_v14 = vmul.f32 %v12825_v28, %v4449_v62  ;;  %v4315_v6 = vpop.permute.xlu1 %4314  ;;  %4720 = vadd.xlane.f32.xlu0 %v4655_v3  ;;  %4722 = vadd.xlane.f32.xlu1 %v4656_v19  ;;  %v4603_v1 = vmax.f32 %v4555_v58, 0.0  ;;  %v4071_v40 = vsub.f32 %v14852_v25, %v12780_v61  ;;  %v14853_v61 = vld [vmem:[#allocation20_spill] sm:$0xff] }
 0x577   :  { %v4558_v17 = vadd.f32 %v12830_v37, %v4504_v56  ;;  %v4452_v4 = vmul.f32 %v4315_v6, %v4068_v45  ;;  %v4310_v55 = vpop.permute.xlu0 %4309  ;;  %v4659_v50 = vmul.f32 %v12843_v41, %v4604_v26  ;;  %v14854_v6 = vld [vmem:[#allocation16_spill] sm:$0xff] }
 0x578   :  { %v4557_v49 = vadd.f32 %v12830_v37, %v4503_v14  ;;  %v4451_v22 = vmul.f32 %v4310_v55, %v4067_v0  ;;  %v4658_v15 = vmul.f32 %v12843_v41, %v4603_v1  ;;  %v4074_v0 = vsub.f32 %v14853_v61, %v12782_v24  ;;  %v14860_v61 = vld [vmem:[#allocation33_spill] sm:$0xff] }
 0x579   :  { %v4506_v63 = vmul.f32 %v12825_v28, %v4452_v4  ;;  %v4606_v32 = vmax.f32 %v4558_v17, 0.0  ;;  %v4073_v1 = vsub.f32 %v14854_v6, %v12784_v47  ;;  %v14855_v47 = vld [vmem:[#allocation29_spill] sm:$0xff] }
 0x57a   :  { %v4505_v59 = vmul.f32 %v12825_v28, %v4451_v22  ;;  %v4325_v10 = vpop.permute.xlu1 %4324  ;;  %4724 = vadd.xlane.f32.xlu0 %v4657_v38  ;;  %4726 = vadd.xlane.f32.xlu1 %v4658_v15  ;;  %v4605_v44 = vmax.f32 %v4557_v49, 0.0 }
 0x57b   :  { %v4560_v13 = vadd.f32 %v12830_v37, %v4506_v63  ;;  %v4454_v42 = vmul.f32 %v4325_v10, %v4070_v35  ;;  %v4320_v36 = vpop.permute.xlu0 %4319  ;;  %v4661_v19 = vmul.f32 %v12843_v41, %v4606_v32  ;;  %v4076_v63 = vsub.f32 %v14855_v47, %v12786_v34 }
 0x57c   :  { %v4559_v18 = vadd.f32 %v12830_v37, %v4505_v59  ;;  %v4453_v5 = vmul.f32 %v4320_v36, %v4069_v53  ;;  %v4660_v43 = vmul.f32 %v12843_v41, %v4605_v44  ;;  %v14856_v53 = vld [vmem:[#allocation25_spill] sm:$0xff] }
 0x57d   :  { %v4508_v46 = vmul.f32 %v12825_v28, %v4454_v42  ;;  %v4608_v12 = vmax.f32 %v4560_v13, 0.0  ;;  %v4075_v59 = vsub.f32 %v14856_v53, %v12788_v2  ;;  %v14857_v2 = vld [vmem:[#allocation28_spill] sm:$0xff] }
 0x57e   :  { %v4507_v3 = vmul.f32 %v12825_v28, %v4453_v5  ;;  %v4335_v27 = vpop.permute.xlu1 %4334  ;;  %4728 = vadd.xlane.f32.xlu0 %v4659_v50  ;;  %4730 = vadd.xlane.f32.xlu1 %v4660_v43  ;;  %v4607_v29 = vmax.f32 %v4559_v18, 0.0  ;;  %v4078_v8 = vsub.f32 %v14857_v2, %v12790_v9 }
 0x57f   :  { %v4456_v58 = vmul.f32 %v4335_v27, %v4072_v7  ;;  %v4330_v62 = vpop.permute.xlu0 %4329  ;;  %v4562_v45 = vadd.f32 %v12830_v37, %v4508_v46  ;;  %v4663_v15 = vmul.f32 %v12843_v41, %v4608_v12  ;;  %v14858_v46 = vld [vmem:[#allocation23_spill] sm:$0xff] }
 0x580   :  { %v4561_v21 = vadd.f32 %v12830_v37, %v4507_v3  ;;  %v4455_v56 = vmul.f32 %v4330_v62, %v4071_v40  ;;  %v4662_v52 = vmul.f32 %v12843_v41, %v4607_v29  ;;  %v4077_v25 = vsub.f32 %v14858_v46, %v12792_v39  ;;  %v14859_v39 = vld [vmem:[#allocation37_spill] sm:$0xff] }
 0x581   :  { %v4510_v14 = vmul.f32 %v12825_v28, %v4456_v58  ;;  %v4610_v35 = vmax.f32 %v4562_v45, 0.0 }
 0x582   :  { %v4509_v17 = vmul.f32 %v12825_v28, %v4455_v56  ;;  %v4345_v4 = vpop.permute.xlu1 %4344  ;;  %4732 = vadd.xlane.f32.xlu0 %v4661_v19  ;;  %4734 = vadd.xlane.f32.xlu1 %v4662_v52  ;;  %v4609_v55 = vmax.f32 %v4561_v21, 0.0  ;;  %v4080_v56 = vsub.f32 %v14859_v39, %v12794_v11 }
 0x583   :  { %v4564_v38 = vadd.f32 %v12830_v37, %v4510_v14  ;;  %v4458_v49 = vmul.f32 %v4345_v4, %v4074_v0  ;;  %v4340_v22 = vpop.permute.xlu0 %4339  ;;  %v4665_v34 = vmul.f32 %v12843_v41, %v4610_v35  ;;  %v4079_v0 = vsub.f32 %v14860_v61, %v12796_v57  ;;  %v14861_v57 = vld [vmem:[#allocation36_spill] sm:$0xff] }
 0x584   :  { %v4563_v26 = vadd.f32 %v12830_v37, %v4509_v17  ;;  %v4457_v24 = vmul.f32 %v4340_v22, %v4073_v1  ;;  %v4664_v16 = vmul.f32 %v12843_v41, %v4609_v55 }
 0x585   :  { %v4512_v20 = vmul.f32 %v12825_v28, %v4458_v49  ;;  %v4612_v18 = vmax.f32 %v4564_v38, 0.0 }
 0x586   :  { %v4511_v10 = vmul.f32 %v12825_v28, %v4457_v24  ;;  %v4355_v44 = vpop.permute.xlu1 %4354  ;;  %4736 = vadd.xlane.f32.xlu0 %v4663_v15  ;;  %4738 = vadd.xlane.f32.xlu1 %v4664_v16  ;;  %v4611_v13 = vmax.f32 %v4563_v26, 0.0  ;;  %v4082_v26 = vsub.f32 %v14861_v57, %v12798_v60  ;;  %v14862_v16 = vld [vmem:[#allocation31_spill] sm:$0xff] }
 0x587   :  { %v4566_v42 = vadd.f32 %v12830_v37, %v4512_v20  ;;  %v4460_v36 = vmul.f32 %v4355_v44, %v4076_v63  ;;  %v4350_v32 = vpop.permute.xlu0 %4349  ;;  %v4667_v62 = vmul.f32 %v12843_v41, %v4612_v18  ;;  %v4081_v35 = vsub.f32 %v14862_v16, %v12800_v54  ;;  %v14863_v54 = vld [vmem:[#allocation39_spill] sm:$0xff] }
 0x588   :  { %v4565_v5 = vadd.f32 %v12830_v37, %v4511_v10  ;;  %v4459_v50 = vmul.f32 %v4350_v32, %v4075_v59  ;;  %v4666_v43 = vmul.f32 %v12843_v41, %v4611_v13  ;;  %v4084_v32 = vsub.f32 %v14863_v54, %v12802_v30 }
 0x589   :  { %v4514_v7 = vmul.f32 %v12825_v28, %v4460_v36  ;;  %v4614_v19 = vmax.f32 %v4566_v42, 0.0 }
 0x58a   :  { %v4513_v40 = vmul.f32 %v12825_v28, %v4459_v50  ;;  %v4365_v3 = vpop.permute.xlu1 %4364  ;;  %4740 = vadd.xlane.f32.xlu0 %v4665_v34  ;;  %4742 = vadd.xlane.f32.xlu1 %v4666_v43  ;;  %v4613_v27 = vmax.f32 %v4565_v5, 0.0  ;;  %v14864_v5 = vld [vmem:[#allocation38_spill] sm:$0xff] }
 0x58b   :  { %v4462_v29 = vmul.f32 %v4365_v3, %v4078_v8  ;;  %v4360_v58 = vpop.permute.xlu0 %4359  ;;  %v4568_v12 = vadd.f32 %v12830_v37, %v4514_v7  ;;  %v4669_v38 = vmul.f32 %v12843_v41, %v4614_v19  ;;  %v4083_v50 = vsub.f32 %v14864_v5, %v12804_v48  ;;  %v14865_v48 = vld [vmem:[#allocation45_spill] sm:$0xff] }
 0x58c   :  { %v4567_v9 = vadd.f32 %v12830_v37, %v4513_v40  ;;  %v4461_v45 = vmul.f32 %v4360_v58, %v4077_v25  ;;  %v4668_v21 = vmul.f32 %v12843_v41, %v4613_v27 }
 0x58d   :  { %v4516_v52 = vmul.f32 %v12825_v28, %v4462_v29  ;;  %v4616_v15 = vmax.f32 %v4568_v12, 0.0  ;;  %v4086_v29 = vsub.f32 %v14865_v48, %v12806_v31 }
 0x58e   :  { %v4515_v14 = vmul.f32 %v12825_v28, %v4461_v45  ;;  %v4375_v6 = vpop.permute.xlu1 %4374  ;;  %4744 = vadd.xlane.f32.xlu0 %v4667_v62  ;;  %4746 = vadd.xlane.f32.xlu1 %v4668_v21  ;;  %v4615_v1 = vmax.f32 %v4567_v9, 0.0  ;;  %v14866_v62 = vld [vmem:[#allocation41_spill] sm:$0xff] }
 0x58f   :  { %v4570_v17 = vadd.f32 %v12830_v37, %v4516_v52  ;;  %v4464_v4 = vmul.f32 %v4375_v6, %v4080_v56  ;;  %v4370_v55 = vpop.permute.xlu0 %4369  ;;  %v4671_v60 = vmul.f32 %v12843_v41, %v4616_v15  ;;  %v4085_v19 = vsub.f32 %v14866_v62, %v12808_v33  ;;  %v14867_v33 = vld [vmem:[#allocation47_spill] sm:$0xff] }
 0x590   :  { %v4569_v49 = vadd.f32 %v12830_v37, %v4515_v14  ;;  %v4463_v11 = vmul.f32 %v4370_v55, %v4079_v0  ;;  %v4670_v22 = vmul.f32 %v12843_v41, %v4615_v1  ;;  %v4088_v6 = vsub.f32 %v14867_v33, %v12810_v23 }
 0x591   :  { %v4518_v24 = vmul.f32 %v12825_v28, %v4464_v4  ;;  %v4618_v44 = vmax.f32 %v4570_v17, 0.0  ;;  %v14868_v17 = vld [vmem:[#allocation46_spill] sm:$0xff] }
 0x592   :  { %v4517_v47 = vmul.f32 %v12825_v28, %v4463_v11  ;;  %v4385_v63 = vpop.permute.xlu1 %4384  ;;  %4748 = vadd.xlane.f32.xlu0 %v4669_v38  ;;  %4750 = vadd.xlane.f32.xlu1 %v4670_v22  ;;  %v4617_v20 = vmax.f32 %v4569_v49, 0.0  ;;  %v4087_v4 = vsub.f32 %v14868_v17, %v12812_v51  ;;  %v14870_v51 = vld [vmem:[#allocation49_spill] sm:$0xff] }
 0x593   :  { %v4572_v53 = vadd.f32 %v12830_v37, %v4518_v24  ;;  %v4466_v59 = vmul.f32 %v4385_v63, %v4082_v26  ;;  %v4380_v10 = vpop.permute.xlu0 %4379  ;;  %v4673_v46 = vmul.f32 %v12843_v41, %v4618_v44 }
 0x594   :  { %v4571_v13 = vadd.f32 %v12830_v37, %v4517_v47  ;;  %v4465_v42 = vmul.f32 %v4380_v10, %v4081_v35  ;;  %v4672_v36 = vmul.f32 %v12843_v41, %v4617_v20  ;;  %v14869_v35 = vld [vmem:[#allocation18_spill] sm:$0xff]  ;;  %v14871_v20 = vld [vmem:[#allocation24_spill] sm:$0xff] }
 0x595   :  { %v4520_v18 = vmul.f32 %v12825_v28, %v4466_v59  ;;  %v4620_v25 = vmax.f32 %v4572_v53, 0.0  ;;  %v4090_v47 = vsub.f32 %v14870_v51, %v14869_v35  ;;  %v14872_v53 = vld [vmem:[#allocation48_spill] sm:$0xff] }
 0x596   :  { %v4519_v34 = vmul.f32 %v12825_v28, %v4465_v42  ;;  %v4395_v43 = vpop.permute.xlu1 %4394  ;;  %4752 = vadd.xlane.f32.xlu0 %v4671_v60  ;;  %4754 = vadd.xlane.f32.xlu1 %v4672_v36  ;;  %v4619_v2 = vmax.f32 %v4571_v13, 0.0  ;;  %v4089_v59 = vsub.f32 %v14872_v53, %v14871_v20 }
 0x597   :  { %v4468_v8 = vmul.f32 %v4395_v43, %v4084_v32  ;;  %v4390_v7 = vpop.permute.xlu0 %4389  ;;  %v4574_v40 = vadd.f32 %v12830_v37, %v4520_v18  ;;  %v4675_v52 = vmul.f32 %v12843_v41, %v4620_v25 }
 0x598   :  { %v4573_v30 = vadd.f32 %v12830_v37, %v4519_v34  ;;  %v4467_v3 = vmul.f32 %v4390_v7, %v4083_v50  ;;  %v4674_v27 = vmul.f32 %v12843_v41, %v4619_v2 }
 0x599   :  { %v4522_v58 = vmul.f32 %v12825_v28, %v4468_v8  ;;  %v4622_v14 = vmax.f32 %v4574_v40, 0.0 }
 0x59a   :  { %v4521_v12 = vmul.f32 %v12825_v28, %v4467_v3  ;;  %v4405_v9 = vpop.permute.xlu1 %4404  ;;  %4756 = vadd.xlane.f32.xlu0 %v4673_v46  ;;  %4758 = vadd.xlane.f32.xlu1 %v4674_v27  ;;  %v4621_v45 = vmax.f32 %v4573_v30, 0.0 }
 0x59b   :  { %v4576_v21 = vadd.f32 %v12830_v37, %v4522_v58  ;;  %v4470_v39 = vmul.f32 %v4405_v9, %v4086_v29  ;;  %v4400_v56 = vpop.permute.xlu0 %4399  ;;  %v4677_v23 = vmul.f32 %v12843_v41, %v4622_v14  ;;  %v4788_v29 = vlaneseq  ;;  %v14873_v9 = vld [vmem:[#allocation15_spill] sm:$0xff] }
 0x59c   :  { %v4575_v61 = vadd.f32 %v12830_v37, %v4521_v12  ;;  %v4469_v31 = vmul.f32 %v4400_v56, %v4085_v19  ;;  %v4676_v0 = vmul.f32 %v12843_v41, %v4621_v45 }
 0x59d   :  { %v4524_v1 = vmul.f32 %v12825_v28, %v4470_v39  ;;  %v4624_v57 = vmax.f32 %v4576_v21, 0.0  ;;  %v13074_v58 = vshrl.u32 %v4788_v29, 7  ;;  %vm9215_vm2 = vcmp.lt.s32.totalorder %v4788_v29, 384 }
 0x59e   :  { %v4523_v55 = vmul.f32 %v12825_v28, %v4469_v31  ;;  %v4415_v38 = vpop.permute.xlu1 %4414  ;;  %4760 = vadd.xlane.f32.xlu0 %v4675_v52  ;;  %4762 = vadd.xlane.f32.xlu1 %v4676_v0  ;;  %v4623_v49 = vmax.f32 %v4575_v61, 0.0 }
 0x59f   :  { %v4578_v11 = vadd.f32 %v12830_v37, %v4524_v1  ;;  %v4472_v22 = vmul.f32 %v4415_v38, %v4088_v6  ;;  %v4410_v15 = vpop.permute.xlu0 %4409  ;;  %v4679_v36 = vmul.f32 %v12843_v41, %v4624_v57  ;;  %v13077_v19 = vsub.s32 0, %v13074_v58 }
 0x5a0   :  { %v4577_v26 = vadd.f32 %v12830_v37, %v4523_v55  ;;  %v4471_v24 = vmul.f32 %v4410_v15, %v4087_v4  ;;  %v4678_v16 = vmul.f32 %v12843_v41, %v4623_v49  ;;  %v13084_v21 = vsub.s32 1, %v13074_v58 }
 0x5a1   :  { %v4526_v63 = vmul.f32 %v12825_v28, %v4472_v22  ;;  %v4626_v54 = vmax.f32 %v4578_v11, 0.0  ;;  %v13081_v45 = vrot.slane %v14873_v9, %v13077_v19  ;;  %v13090_v39 = vsub.s32 3, %v13074_v58 }
 0x5a2   :  { %v4525_v10 = vmul.f32 %v12825_v28, %v4471_v24  ;;  %v4425_v44 = vpop.permute.xlu1 %4424  ;;  %4764 = vadd.xlane.f32.xlu0 %v4677_v23  ;;  %4766 = vadd.xlane.f32.xlu1 %v4678_v16  ;;  %v4625_v13 = vmax.f32 %v4577_v26, 0.0  ;;  %v13093_v52 = vsub.s32 4, %v13074_v58  ;;  %v13096_v61 = vsub.s32 5, %v13074_v58 }
 0x5a3   :  { %v4474_v42 = vmul.f32 %v4425_v44, %v4090_v47  ;;  %v4420_v60 = vpop.permute.xlu0 %4419  ;;  %v4580_v32 = vadd.f32 %v12830_v37, %v4526_v63  ;;  %v4681_v8 = vmul.f32 %v12843_v41, %v4626_v54  ;;  %v13099_v31 = vsub.s32 6, %v13074_v58 }
 0x5a4   :  { %v4579_v18 = vadd.f32 %v12830_v37, %v4525_v10  ;;  %v4473_v5 = vmul.f32 %v4420_v60, %v4089_v59  ;;  %v4680_v50 = vmul.f32 %v12843_v41, %v4625_v13  ;;  %v13102_v0 = vsub.s32 7, %v13074_v58 }
 0x5a5   :  { %v4528_v34 = vmul.f32 %v12825_v28, %v4474_v42  ;;  %v4628_v7 = vmax.f32 %v4580_v32, 0.0 }
 0x5a6   :  { %v4527_v43 = vmul.f32 %v12825_v28, %v4473_v5  ;;  %4768 = vadd.xlane.f32.xlu0 %v4679_v36  ;;  %4770 = vadd.xlane.f32.xlu1 %v4680_v50  ;;  %v4627_v2 = vmax.f32 %v4579_v18, 0.0 }
 0x5a7   :  { %v4582_v46 = vadd.f32 %v12830_v37, %v4528_v34  ;;  %v4683_v27 = vmul.f32 %v12843_v41, %v4628_v7 }
 0x5a8   :  { %v4581_v25 = vadd.f32 %v12830_v37, %v4527_v43  ;;  %v4682_v40 = vmul.f32 %v12843_v41, %v4627_v2  ;;  %v10527_v37 = vmov 1966171168  }
 0x5a9   :  { %v4630_v3 = vmax.f32 %v4582_v46, 0.0  ;;  %v6429_v62 = vunpack.c.l.s4 %v10527_v37 }
 0x5aa   :  { %4772 = vadd.xlane.f32.xlu0 %v4681_v8  ;;  %4774 = vadd.xlane.f32.xlu1 %v4682_v40  ;;  %v4629_v30 = vmax.f32 %v4581_v25, 0.0 }
 0x5ab   :  { %v4685_v48 = vmul.f32 %v12843_v41, %v4630_v3  ;;  %v6430_v12 = vunpack.c.0.s8 %v6429_v62 }
 0x5ac   :  { %v4684_v28 = vmul.f32 %v12843_v41, %v4629_v30  ;;  %v13087_v41 = vsub.s32 2, %v13074_v58 }
 0x5ad   :  { %v13107_v1 = vsub.s32 %v6430_v12, %v13074_v58 }
 0x5ae   :  { %4776 = vadd.xlane.f32.xlu0 %v4683_v27  ;;  %4778 = vadd.xlane.f32.xlu1 %v4684_v28 }
 0x5b2   :  { %4780 = vadd.xlane.f32.xlu0 %v4685_v48 }
 0x5de   :  { %v4689_v56 = vpop.xlane.xlu1 %4688 }
 0x5df   :  { %v4793_v14 = vadd.f32 %v13081_v45, %v4689_v56  ;;  %v4687_v33 = vpop.xlane.xlu0 %4686 }
 0x5e0   :  { %v4792_v6 = vadd.f32 %v13081_v45, %v4687_v33 }
 0x5e1   :  { %v4923_v17 = vrot.slane %v4793_v14, %v13077_v19  ;;  %v4927_v4 = vrot.slane %v4793_v14, %v13084_v21  ;;  %v4931_v55 = vrot.slane %v4793_v14, %v13087_v41  ;;  %v4935_v38 = vrot.slane %v4793_v14, %v13090_v39 }
 0x5e2   :  { %v4939_v49 = vrot.slane %v4793_v14, %v13093_v52  ;;  %v4943_v11 = vrot.slane %v4793_v14, %v13096_v61  ;;  %v4947_v22 = vrot.slane %v4793_v14, %v13099_v31  ;;  %v4951_v15 = vrot.slane %v4793_v14, %v13102_v0 }
 0x5e3   :  { %v4693_v57 = vpop.xlane.xlu0 %4692  ;;  %v6473_v26 = vcombine.low %v4923_v17, %v4927_v4  ;;  %v6474_v24 = vcombine.low %v4931_v55, %v4935_v38  ;;  %v4891_v23 = vrot.slane %v4792_v6, %v13077_v19  ;;  %v4895_v16 = vrot.slane %v4792_v6, %v13084_v21 }
 0x5e4   :  { %v4795_v35 = vadd.f32 %v13081_v45, %v4693_v57  ;;  %v6475_v51 = vcombine.low %v4939_v49, %v4943_v11  ;;  %v6476_v47 = vcombine.low %v4947_v22, %v4951_v15  ;;  %v4899_v63 = vrot.slane %v4792_v6, %v13087_v41 }
 0x5e5   :  { %v6483_v20 = vrot.slane %v6473_v26, %v13107_v1  ;;  %v6490_v53 = vrot.slane %v6474_v24, %v13107_v1  ;;  %v4903_v59 = vrot.slane %v4792_v6, %v13090_v39  ;;  %v4907_v10 = vrot.slane %v4792_v6, %v13093_v52 }
 0x5e6   :  { %v6497_v44 = vrot.slane %v6475_v51, %v13107_v1  ;;  %v6504_v13 = vrot.slane %v6476_v47, %v13107_v1  ;;  %v4911_v42 = vrot.slane %v4792_v6, %v13096_v61  ;;  %v4915_v60 = vrot.slane %v4792_v6, %v13099_v31 }
 0x5e7   :  { %v4695_v36 = vpop.xlane.xlu1 %4694  ;;  %v4691_v54 = vpop.xlane.xlu0 %4690  ;;  %v6505_v32 = vcombine.low %v6483_v20, %v6490_v53  ;;  %v4919_v18 = vrot.slane %v4792_v6, %v13102_v0  ;;  %v6424_v5 = vcombine.low %v4891_v23, %v4895_v16  ;;  %v6425_v50 = vcombine.low %v4899_v63, %v4903_v59 }
 0x5e8   :  { %v13131_v34 = vadd.f32 %v13081_v45, %v4695_v36  ;;  %v4794_v43 = vadd.f32 %v13081_v45, %v4691_v54  ;;  %v6506_v2 = vcombine.low %v6497_v44, %v6504_v13  ;;  %v6426_v8 = vcombine.low %v4907_v10, %v4911_v42 }
 0x5e9   :  { %v6513_v7 = vrot.slane %v6505_v32, %v13107_v1  ;;  %v6427_v46 = vcombine.low %v4915_v60, %v4919_v18  ;;  %v6434_v25 = vrot.slane %v6424_v5, %v13107_v1  ;;  %v6441_v40 = vrot.slane %v6425_v50, %v13107_v1 }
 0x5ea   :  { %v6520_v30 = vrot.slane %v6506_v2, %v13107_v1  ;;  %v6448_v3 = vrot.slane %v6426_v8, %v13107_v1  ;;  %v4987_v27 = vrot.slane %v4795_v35, %v13077_v19  ;;  %v4991_v28 = vrot.slane %v4795_v35, %v13084_v21 }
 0x5eb   :  { %v4699_v48 = vpop.xlane.xlu1 %4698  ;;  %v4697_v37 = vpop.xlane.xlu0 %4696  ;;  %v6455_v62 = vrot.slane %v6427_v46, %v13107_v1  ;;  %v6456_v12 = vcombine.low %v6434_v25, %v6441_v40  ;;  %v4995_v9 = vrot.slane %v4795_v35, %v13087_v41  ;;  %v4999_v56 = vrot.slane %v4795_v35, %v13090_v39 }
 0x5ec   :  { %v13145_v14 = vadd.f32 %v13081_v45, %v4699_v48  ;;  %v13148_v33 = vadd.f32 %v13081_v45, %v4697_v37  ;;  %v6521_v6 = vcombine.low %v6513_v7, %v6520_v30  ;;  %v5003_v17 = vrot.slane %v4795_v35, %v13093_v52 }
 0x5ed   :  { %v6457_v4 = vcombine.low %v6448_v3, %v6455_v62  ;;  %v6464_v55 = vrot.slane %v6456_v12, %v13107_v1  ;;  %v5007_v38 = vrot.slane %v4795_v35, %v13096_v61  ;;  %v5011_v49 = vrot.slane %v4795_v35, %v13099_v31 }
 0x5ee   :  { %8780 = vperm.xlu1 %10323, %v6521_v6   ;;  %v5015_v11 = vrot.slane %v4795_v35, %v13102_v0  ;;  %v6571_v22 = vcombine.low %v4987_v27, %v4991_v28  ;;  %v6572_v15 = vcombine.low %v4995_v9, %v4999_v56  ;;  %v4955_v57 = vrot.slane %v4794_v43, %v13077_v19 }
 0x5ef   :  { %v6471_v26 = vrot.slane %v6457_v4, %v13107_v1  ;;  %v4703_v24 = vpop.xlane.xlu1 %4702  ;;  %v4701_v23 = vpop.xlane.xlu0 %4700  ;;  %v6573_v16 = vcombine.low %v5003_v17, %v5007_v38  ;;  %v4959_v51 = vrot.slane %v4794_v43, %v13084_v21  ;;  %v4963_v47 = vrot.slane %v4794_v43, %v13087_v41 }
 0x5f0   :  { %v13160_v63 = vadd.f32 %v13081_v45, %v4703_v24  ;;  %v13163_v20 = vadd.f32 %v13081_v45, %v4701_v23  ;;  %v6574_v35 = vcombine.low %v5011_v49, %v5015_v11  ;;  %v6581_v53 = vrot.slane %v6571_v22, %v13107_v1 }
 0x5f1   :  { %v6472_v59 = vcombine.low %v6464_v55, %v6471_v26  ;;  %v6588_v10 = vrot.slane %v6572_v15, %v13107_v1  ;;  %v6595_v44 = vrot.slane %v6573_v16, %v13107_v1  ;;  %v4967_v13 = vrot.slane %v4794_v43, %v13090_v39 }
 0x5f2   :  { %v6602_v42 = vrot.slane %v6574_v35, %v13107_v1  ;;  %v4971_v60 = vrot.slane %v4794_v43, %v13093_v52  ;;  %v4975_v36 = vrot.slane %v4794_v43, %v13096_v61  ;;  %v4979_v54 = vrot.slane %v4794_v43, %v13099_v31 }
 0x5f3   :  { %8777 = vperm.xlu0 %10322, %v6472_v59   ;;  %v6603_v32 = vcombine.low %v6581_v53, %v6588_v10  ;;  %v4707_v18 = vpop.xlane.xlu1 %4706  ;;  %v4705_v5 = vpop.xlane.xlu0 %4704  ;;  %v4983_v50 = vrot.slane %v4794_v43, %v13102_v0  ;;  %v6522_v2 = vcombine.low %v4955_v57, %v4959_v51  ;;  %v6523_v8 = vcombine.low %v4963_v47, %v4967_v13 }
 0x5f4   :  { %v6604_v7 = vcombine.low %v6595_v44, %v6602_v42  ;;  %v13175_v46 = vadd.f32 %v13081_v45, %v4707_v18  ;;  %v13178_v25 = vadd.f32 %v13081_v45, %v4705_v5  ;;  %v6524_v40 = vcombine.low %v4971_v60, %v4975_v36 }
 0x5f5   :  { %v6611_v30 = vrot.slane %v6603_v32, %v13107_v1  ;;  %v6525_v3 = vcombine.low %v4979_v54, %v4983_v50  ;;  %v6532_v27 = vrot.slane %v6522_v2, %v13107_v1  ;;  %v6539_v28 = vrot.slane %v6523_v8, %v13107_v1 }
 0x5f6   :  { %v6618_v48 = vrot.slane %v6604_v7, %v13107_v1  ;;  %v6546_v43 = vrot.slane %v6524_v40, %v13107_v1  ;;  %v5019_v37 = vrot.slane %v13131_v34, %v13077_v19  ;;  %v5023_v62 = vrot.slane %v13131_v34, %v13084_v21 }
 0x5f7   :  { %v6553_v12 = vrot.slane %v6525_v3, %v13107_v1  ;;  %v6554_v9 = vcombine.low %v6532_v27, %v6539_v28  ;;  %v4711_v56 = vpop.xlane.xlu1 %4710  ;;  %v4709_v6 = vpop.xlane.xlu0 %4708  ;;  %v5027_v17 = vrot.slane %v13131_v34, %v13087_v41  ;;  %v5031_v4 = vrot.slane %v13131_v34, %v13090_v39 }
 0x5f8   :  { %v6619_v55 = vcombine.low %v6611_v30, %v6618_v48  ;;  %v13195_v38 = vadd.f32 %v13081_v45, %v4711_v56  ;;  %v13198_v49 = vadd.f32 %v13081_v45, %v4709_v6  ;;  %v5035_v11 = vrot.slane %v13131_v34, %v13093_v52 }
 0x5f9   :  { %v6555_v22 = vcombine.low %v6546_v43, %v6553_v12  ;;  %v6562_v15 = vrot.slane %v6554_v9, %v13107_v1  ;;  %v5039_v57 = vrot.slane %v13131_v34, %v13096_v61  ;;  %v5043_v26 = vrot.slane %v13131_v34, %v13099_v31 }
 0x5fa   :  { %8786 = vperm.xlu0 %10322, %v6619_v55   ;;  %v5047_v24 = vrot.slane %v13131_v34, %v13102_v0  ;;  %v6620_v23 = vcombine.low %v5019_v37, %v5023_v62  ;;  %v6621_v16 = vcombine.low %v5027_v17, %v5031_v4  ;;  %v5051_v51 = vrot.slane %v13148_v33, %v13077_v19 }
 0x5fb   :  { %v6569_v47 = vrot.slane %v6555_v22, %v13107_v1  ;;  %v6622_v35 = vcombine.low %v5035_v11, %v5039_v57  ;;  %v5055_v53 = vrot.slane %v13148_v33, %v13084_v21  ;;  %v5059_v59 = vrot.slane %v13148_v33, %v13087_v41  ;;  %v4715_v42 = vpop.xlane.xlu1 %4714  ;;  %v4713_v18 = vpop.xlane.xlu0 %4712 }
 0x5fc   :  { %v6623_v10 = vcombine.low %v5043_v26, %v5047_v24  ;;  %v6630_v44 = vrot.slane %v6620_v23, %v13107_v1  ;;  %v6637_v13 = vrot.slane %v6621_v16, %v13107_v1  ;;  %v5063_v34 = vrot.slane %v13148_v33, %v13090_v39 }
 0x5fd   :  { %v6570_v60 = vcombine.low %v6562_v15, %v6569_v47  ;;  %v6644_v36 = vrot.slane %v6622_v35, %v13107_v1  ;;  %v5067_v54 = vrot.slane %v13148_v33, %v13093_v52  ;;  %v5071_v32 = vrot.slane %v13148_v33, %v13096_v61 }
 0x5fe   :  { %v6651_v5 = vrot.slane %v6623_v10, %v13107_v1  ;;  %v6652_v50 = vcombine.low %v6630_v44, %v6637_v13  ;;  %v5075_v2 = vrot.slane %v13148_v33, %v13099_v31  ;;  %v5079_v8 = vrot.slane %v13148_v33, %v13102_v0 }
 0x5ff   :  { %8783 = vperm.xlu1 %10323, %v6570_v60   ;;  %v6669_v7 = vcombine.low %v5051_v51, %v5055_v53  ;;  %v6670_v40 = vcombine.low %v5059_v59, %v5063_v34  ;;  %v6671_v30 = vcombine.low %v5067_v54, %v5071_v32  ;;  %v13231_v3 = vadd.f32 %v13081_v45, %v4715_v42  ;;  %v4719_v42 = vpop.xlane.xlu1 %4718 }
 0x600   :  { %v6653_v27 = vcombine.low %v6644_v36, %v6651_v5  ;;  %v6660_v28 = vrot.slane %v6652_v50, %v13107_v1  ;;  %v6672_v48 = vcombine.low %v5075_v2, %v5079_v8  ;;  %v13235_v43 = vadd.f32 %v13081_v45, %v4713_v18  ;;  %v4717_v18 = vpop.xlane.xlu0 %4716 }
 0x601   :  { %v6679_v37 = vrot.slane %v6669_v7, %v13107_v1  ;;  %v6686_v62 = vrot.slane %v6670_v40, %v13107_v1  ;;  %v6693_v33 = vrot.slane %v6671_v30, %v13107_v1  ;;  %v5083_v12 = vrot.slane %v13145_v14, %v13077_v19 }
 0x602   :  { %v6667_v9 = vrot.slane %v6653_v27, %v13107_v1  ;;  %v6700_v56 = vrot.slane %v6672_v48, %v13107_v1  ;;  %v5087_v6 = vrot.slane %v13145_v14, %v13084_v21  ;;  %v5091_v17 = vrot.slane %v13145_v14, %v13087_v41 }
 0x603   :  { %v6701_v4 = vcombine.low %v6679_v37, %v6686_v62  ;;  %v5095_v55 = vrot.slane %v13145_v14, %v13090_v39  ;;  %v5099_v11 = vrot.slane %v13145_v14, %v13093_v52  ;;  %v5103_v22 = vrot.slane %v13145_v14, %v13096_v61 }
 0x604   :  { %v6668_v15 = vcombine.low %v6660_v28, %v6667_v9  ;;  %v6702_v57 = vcombine.low %v6693_v33, %v6700_v56  ;;  %v5107_v26 = vrot.slane %v13145_v14, %v13099_v31  ;;  %v5111_v24 = vrot.slane %v13145_v14, %v13102_v0 }
 0x605   :  { %v6709_v23 = vrot.slane %v6701_v4, %v13107_v1  ;;  %v6718_v16 = vcombine.low %v5083_v12, %v5087_v6  ;;  %v6719_v51 = vcombine.low %v5091_v17, %v5095_v55  ;;  %v6720_v47 = vcombine.low %v5099_v11, %v5103_v22 }
 0x606   :  { %8789 = vperm.xlu1 %10323, %v6668_v15   ;;  %v6716_v35 = vrot.slane %v6702_v57, %v13107_v1  ;;  %v6721_v53 = vcombine.low %v5107_v26, %v5111_v24  ;;  %v5115_v59 = vrot.slane %v13163_v20, %v13077_v19  ;;  %v5119_v10 = vrot.slane %v13163_v20, %v13084_v21 }
 0x607   :  { %v6728_v44 = vrot.slane %v6718_v16, %v13107_v1  ;;  %v6735_v13 = vrot.slane %v6719_v51, %v13107_v1  ;;  %v6742_v14 = vrot.slane %v6720_v47, %v13107_v1  ;;  %v5123_v34 = vrot.slane %v13163_v20, %v13087_v41 }
 0x608   :  { %v6717_v60 = vcombine.low %v6709_v23, %v6716_v35  ;;  %v6749_v36 = vrot.slane %v6721_v53, %v13107_v1  ;;  %v5127_v54 = vrot.slane %v13163_v20, %v13090_v39  ;;  %v5131_v32 = vrot.slane %v13163_v20, %v13093_v52 }
 0x609   :  { %v6750_v5 = vcombine.low %v6728_v44, %v6735_v13  ;;  %v5135_v50 = vrot.slane %v13163_v20, %v13096_v61  ;;  %v5139_v2 = vrot.slane %v13163_v20, %v13099_v31  ;;  %v5143_v8 = vrot.slane %v13163_v20, %v13102_v0 }
 0x60a   :  { %8792 = vperm.xlu0 %10322, %v6717_v60   ;;  %v6751_v7 = vcombine.low %v6742_v14, %v6749_v36  ;;  %v6767_v40 = vcombine.low %v5115_v59, %v5119_v10  ;;  %v6768_v30 = vcombine.low %v5123_v34, %v5127_v54  ;;  %v13281_v27 = vadd.f32 %v13081_v45, %v4719_v42  ;;  %v4723_v42 = vpop.xlane.xlu1 %4722 }
 0x60b   :  { %v6758_v28 = vrot.slane %v6750_v5, %v13107_v1  ;;  %v6769_v48 = vcombine.low %v5131_v32, %v5135_v50  ;;  %v6770_v37 = vcombine.low %v5139_v2, %v5143_v8  ;;  %v13285_v62 = vadd.f32 %v13081_v45, %v4717_v18  ;;  %v4721_v18 = vpop.xlane.xlu0 %4720 }
 0x60c   :  { %v6765_v33 = vrot.slane %v6751_v7, %v13107_v1  ;;  %v6777_v12 = vrot.slane %v6767_v40, %v13107_v1  ;;  %v6784_v20 = vrot.slane %v6768_v30, %v13107_v1  ;;  %v5147_v9 = vrot.slane %v13160_v63, %v13077_v19 }
 0x60d   :  { %v6791_v56 = vrot.slane %v6769_v48, %v13107_v1  ;;  %v6798_v6 = vrot.slane %v6770_v37, %v13107_v1  ;;  %v5151_v17 = vrot.slane %v13160_v63, %v13084_v21  ;;  %v5155_v4 = vrot.slane %v13160_v63, %v13087_v41 }
 0x60e   :  { %v6766_v55 = vcombine.low %v6758_v28, %v6765_v33  ;;  %v6799_v11 = vcombine.low %v6777_v12, %v6784_v20  ;;  %v5159_v22 = vrot.slane %v13160_v63, %v13090_v39  ;;  %v5163_v15 = vrot.slane %v13160_v63, %v13093_v52 }
 0x60f   :  { %v6800_v57 = vcombine.low %v6791_v56, %v6798_v6  ;;  %v5167_v26 = vrot.slane %v13160_v63, %v13096_v61  ;;  %v5171_v24 = vrot.slane %v13160_v63, %v13099_v31  ;;  %v5175_v23 = vrot.slane %v13160_v63, %v13102_v0 }
 0x610   :  { %8795 = vperm.xlu1 %10323, %v6766_v55   ;;  %v6807_v16 = vrot.slane %v6799_v11, %v13107_v1  ;;  %v6816_v51 = vcombine.low %v5147_v9, %v5151_v17  ;;  %v6817_v47 = vcombine.low %v5155_v4, %v5159_v22  ;;  %v5179_v35 = vrot.slane %v13178_v25, %v13077_v19 }
 0x611   :  { %v6814_v53 = vrot.slane %v6800_v57, %v13107_v1  ;;  %v6818_v59 = vcombine.low %v5163_v15, %v5167_v26  ;;  %v6819_v10 = vcombine.low %v5171_v24, %v5175_v23  ;;  %v5183_v44 = vrot.slane %v13178_v25, %v13084_v21 }
 0x612   :  { %v6826_v13 = vrot.slane %v6816_v51, %v13107_v1  ;;  %v6833_v14 = vrot.slane %v6817_v47, %v13107_v1  ;;  %v5187_v63 = vrot.slane %v13178_v25, %v13087_v41  ;;  %v5191_v34 = vrot.slane %v13178_v25, %v13090_v39 }
 0x613   :  { %v6815_v60 = vcombine.low %v6807_v16, %v6814_v53  ;;  %v6840_v36 = vrot.slane %v6818_v59, %v13107_v1  ;;  %v6847_v54 = vrot.slane %v6819_v10, %v13107_v1  ;;  %v5195_v32 = vrot.slane %v13178_v25, %v13093_v52 }
 0x614   :  { %v6848_v5 = vcombine.low %v6826_v13, %v6833_v14  ;;  %v5199_v50 = vrot.slane %v13178_v25, %v13096_v61  ;;  %v5203_v2 = vrot.slane %v13178_v25, %v13099_v31  ;;  %v5207_v8 = vrot.slane %v13178_v25, %v13102_v0 }
 0x615   :  { %8798 = vperm.xlu0 %10322, %v6815_v60   ;;  %v6849_v7 = vcombine.low %v6840_v36, %v6847_v54  ;;  %v6865_v40 = vcombine.low %v5179_v35, %v5183_v44  ;;  %v6866_v30 = vcombine.low %v5187_v63, %v5191_v34  ;;  %v13331_v28 = vadd.f32 %v13081_v45, %v4723_v42  ;;  %v4727_v42 = vpop.xlane.xlu1 %4726 }
 0x616   :  { %v6856_v48 = vrot.slane %v6848_v5, %v13107_v1  ;;  %v6867_v37 = vcombine.low %v5195_v32, %v5199_v50  ;;  %v6868_v33 = vcombine.low %v5203_v2, %v5207_v8  ;;  %v13335_v12 = vadd.f32 %v13081_v45, %v4721_v18  ;;  %v4725_v18 = vpop.xlane.xlu0 %4724 }
 0x617   :  { %v6863_v20 = vrot.slane %v6849_v7, %v13107_v1  ;;  %v6875_v9 = vrot.slane %v6865_v40, %v13107_v1  ;;  %v6882_v25 = vrot.slane %v6866_v30, %v13107_v1  ;;  %v5211_v56 = vrot.slane %v13175_v46, %v13077_v19 }
 0x618   :  { %v6889_v6 = vrot.slane %v6867_v37, %v13107_v1  ;;  %v6896_v17 = vrot.slane %v6868_v33, %v13107_v1  ;;  %v5215_v4 = vrot.slane %v13175_v46, %v13084_v21  ;;  %v5219_v55 = vrot.slane %v13175_v46, %v13087_v41 }
 0x619   :  { %v6864_v11 = vcombine.low %v6856_v48, %v6863_v20  ;;  %v6897_v22 = vcombine.low %v6875_v9, %v6882_v25  ;;  %v5223_v15 = vrot.slane %v13175_v46, %v13090_v39  ;;  %v5227_v57 = vrot.slane %v13175_v46, %v13093_v52 }
 0x61a   :  { %v6898_v26 = vcombine.low %v6889_v6, %v6896_v17  ;;  %v5231_v24 = vrot.slane %v13175_v46, %v13096_v61  ;;  %v5235_v23 = vrot.slane %v13175_v46, %v13099_v31  ;;  %v5239_v16 = vrot.slane %v13175_v46, %v13102_v0 }
 0x61b   :  { %8801 = vperm.xlu1 %10323, %v6864_v11   ;;  %v6905_v51 = vrot.slane %v6897_v22, %v13107_v1  ;;  %v6914_v47 = vcombine.low %v5211_v56, %v5215_v4  ;;  %v6915_v35 = vcombine.low %v5219_v55, %v5223_v15  ;;  %v5243_v53 = vrot.slane %v13198_v49, %v13077_v19 }
 0x61c   :  { %v6912_v59 = vrot.slane %v6898_v26, %v13107_v1  ;;  %v6916_v10 = vcombine.low %v5227_v57, %v5231_v24  ;;  %v6917_v44 = vcombine.low %v5235_v23, %v5239_v16  ;;  %v5247_v13 = vrot.slane %v13198_v49, %v13084_v21 }
 0x61d   :  { %v6924_v14 = vrot.slane %v6914_v47, %v13107_v1  ;;  %v6931_v63 = vrot.slane %v6915_v35, %v13107_v1  ;;  %v5251_v46 = vrot.slane %v13198_v49, %v13087_v41  ;;  %v5255_v34 = vrot.slane %v13198_v49, %v13090_v39 }
 0x61e   :  { %v6913_v60 = vcombine.low %v6905_v51, %v6912_v59  ;;  %v6938_v36 = vrot.slane %v6916_v10, %v13107_v1  ;;  %v6945_v54 = vrot.slane %v6917_v44, %v13107_v1  ;;  %v5259_v32 = vrot.slane %v13198_v49, %v13093_v52 }
 0x61f   :  { %v6946_v5 = vcombine.low %v6924_v14, %v6931_v63  ;;  %v5263_v50 = vrot.slane %v13198_v49, %v13096_v61  ;;  %v5267_v2 = vrot.slane %v13198_v49, %v13099_v31  ;;  %v5271_v8 = vrot.slane %v13198_v49, %v13102_v0 }
 0x620   :  { %8804 = vperm.xlu0 %10322, %v6913_v60   ;;  %v6947_v7 = vcombine.low %v6938_v36, %v6945_v54  ;;  %v6963_v40 = vcombine.low %v5243_v53, %v5247_v13  ;;  %v6964_v30 = vcombine.low %v5251_v46, %v5255_v34  ;;  %v13381_v48 = vadd.f32 %v13081_v45, %v4727_v42  ;;  %v4731_v42 = vpop.xlane.xlu1 %4730 }
 0x621   :  { %v6954_v37 = vrot.slane %v6946_v5, %v13107_v1  ;;  %v6965_v33 = vcombine.low %v5259_v32, %v5263_v50  ;;  %v6966_v20 = vcombine.low %v5267_v2, %v5271_v8  ;;  %v13385_v9 = vadd.f32 %v13081_v45, %v4725_v18  ;;  %v4729_v18 = vpop.xlane.xlu0 %4728 }
 0x622   :  { %v6961_v25 = vrot.slane %v6947_v7, %v13107_v1  ;;  %v6973_v56 = vrot.slane %v6963_v40, %v13107_v1  ;;  %v6980_v49 = vrot.slane %v6964_v30, %v13107_v1  ;;  %v5275_v6 = vrot.slane %v13195_v38, %v13077_v19 }
 0x623   :  { %v6987_v17 = vrot.slane %v6965_v33, %v13107_v1  ;;  %v6994_v4 = vrot.slane %v6966_v20, %v13107_v1  ;;  %v5279_v55 = vrot.slane %v13195_v38, %v13084_v21  ;;  %v5283_v11 = vrot.slane %v13195_v38, %v13087_v41 }
 0x624   :  { %v6962_v22 = vcombine.low %v6954_v37, %v6961_v25  ;;  %v6995_v15 = vcombine.low %v6973_v56, %v6980_v49  ;;  %v5287_v57 = vrot.slane %v13195_v38, %v13090_v39  ;;  %v5291_v26 = vrot.slane %v13195_v38, %v13093_v52 }
 0x625   :  { %v6996_v24 = vcombine.low %v6987_v17, %v6994_v4  ;;  %v5295_v23 = vrot.slane %v13195_v38, %v13096_v61  ;;  %v5299_v16 = vrot.slane %v13195_v38, %v13099_v31  ;;  %v5303_v51 = vrot.slane %v13195_v38, %v13102_v0 }
 0x626   :  { %8807 = vperm.xlu1 %10323, %v6962_v22   ;;  %v7003_v47 = vrot.slane %v6995_v15, %v13107_v1  ;;  %v7012_v35 = vcombine.low %v5275_v6, %v5279_v55  ;;  %v7013_v53 = vcombine.low %v5283_v11, %v5287_v57  ;;  %v5307_v59 = vrot.slane %v13235_v43, %v13077_v19 }
 0x627   :  { %v7010_v10 = vrot.slane %v6996_v24, %v13107_v1  ;;  %v7014_v44 = vcombine.low %v5291_v26, %v5295_v23  ;;  %v7015_v13 = vcombine.low %v5299_v16, %v5303_v51  ;;  %v5311_v14 = vrot.slane %v13235_v43, %v13084_v21 }
 0x628   :  { %v7022_v63 = vrot.slane %v7012_v35, %v13107_v1  ;;  %v7029_v46 = vrot.slane %v7013_v53, %v13107_v1  ;;  %v5315_v38 = vrot.slane %v13235_v43, %v13087_v41  ;;  %v5319_v34 = vrot.slane %v13235_v43, %v13090_v39 }
 0x629   :  { %v7011_v60 = vcombine.low %v7003_v47, %v7010_v10  ;;  %v7036_v36 = vrot.slane %v7014_v44, %v13107_v1  ;;  %v7043_v54 = vrot.slane %v7015_v13, %v13107_v1  ;;  %v5323_v32 = vrot.slane %v13235_v43, %v13093_v52 }
 0x62a   :  { %v7044_v5 = vcombine.low %v7022_v63, %v7029_v46  ;;  %v5327_v50 = vrot.slane %v13235_v43, %v13096_v61  ;;  %v5331_v2 = vrot.slane %v13235_v43, %v13099_v31  ;;  %v5335_v8 = vrot.slane %v13235_v43, %v13102_v0 }
 0x62b   :  { %8810 = vperm.xlu0 %10322, %v7011_v60   ;;  %v7045_v7 = vcombine.low %v7036_v36, %v7043_v54  ;;  %v7061_v40 = vcombine.low %v5307_v59, %v5311_v14  ;;  %v7062_v30 = vcombine.low %v5315_v38, %v5319_v34  ;;  %v13431_v37 = vadd.f32 %v13081_v45, %v4731_v42  ;;  %v4735_v42 = vpop.xlane.xlu1 %4734 }
 0x62c   :  { %v7052_v33 = vrot.slane %v7044_v5, %v13107_v1  ;;  %v7063_v20 = vcombine.low %v5323_v32, %v5327_v50  ;;  %v7064_v25 = vcombine.low %v5331_v2, %v5335_v8  ;;  %v13435_v56 = vadd.f32 %v13081_v45, %v4729_v18  ;;  %v4733_v18 = vpop.xlane.xlu0 %4732 }
 0x62d   :  { %v7059_v49 = vrot.slane %v7045_v7, %v13107_v1  ;;  %v7071_v6 = vrot.slane %v7061_v40, %v13107_v1  ;;  %v7078_v43 = vrot.slane %v7062_v30, %v13107_v1  ;;  %v5339_v17 = vrot.slane %v13231_v3, %v13077_v19 }
 0x62e   :  { %v7085_v4 = vrot.slane %v7063_v20, %v13107_v1  ;;  %v7092_v55 = vrot.slane %v7064_v25, %v13107_v1  ;;  %v5343_v11 = vrot.slane %v13231_v3, %v13084_v21  ;;  %v5347_v22 = vrot.slane %v13231_v3, %v13087_v41 }
 0x62f   :  { %v7060_v15 = vcombine.low %v7052_v33, %v7059_v49  ;;  %v7093_v57 = vcombine.low %v7071_v6, %v7078_v43  ;;  %v5351_v26 = vrot.slane %v13231_v3, %v13090_v39  ;;  %v5355_v24 = vrot.slane %v13231_v3, %v13093_v52 }
 0x630   :  { %v7094_v23 = vcombine.low %v7085_v4, %v7092_v55  ;;  %v5359_v16 = vrot.slane %v13231_v3, %v13096_v61  ;;  %v5363_v51 = vrot.slane %v13231_v3, %v13099_v31  ;;  %v5367_v47 = vrot.slane %v13231_v3, %v13102_v0 }
 0x631   :  { %8813 = vperm.xlu1 %10323, %v7060_v15   ;;  %v7101_v35 = vrot.slane %v7093_v57, %v13107_v1  ;;  %v7110_v53 = vcombine.low %v5339_v17, %v5343_v11  ;;  %v7111_v59 = vcombine.low %v5347_v22, %v5351_v26  ;;  %v5371_v10 = vrot.slane %v13285_v62, %v13077_v19 }
 0x632   :  { %v7108_v44 = vrot.slane %v7094_v23, %v13107_v1  ;;  %v7112_v13 = vcombine.low %v5355_v24, %v5359_v16  ;;  %v7113_v14 = vcombine.low %v5363_v51, %v5367_v47  ;;  %v5375_v63 = vrot.slane %v13285_v62, %v13084_v21 }
 0x633   :  { %v7120_v46 = vrot.slane %v7110_v53, %v13107_v1  ;;  %v7127_v38 = vrot.slane %v7111_v59, %v13107_v1  ;;  %v5379_v3 = vrot.slane %v13285_v62, %v13087_v41  ;;  %v5383_v34 = vrot.slane %v13285_v62, %v13090_v39 }
 0x634   :  { %v7109_v60 = vcombine.low %v7101_v35, %v7108_v44  ;;  %v7134_v36 = vrot.slane %v7112_v13, %v13107_v1  ;;  %v7141_v54 = vrot.slane %v7113_v14, %v13107_v1  ;;  %v5387_v32 = vrot.slane %v13285_v62, %v13093_v52 }
 0x635   :  { %v7142_v5 = vcombine.low %v7120_v46, %v7127_v38  ;;  %v5391_v50 = vrot.slane %v13285_v62, %v13096_v61  ;;  %v5395_v2 = vrot.slane %v13285_v62, %v13099_v31  ;;  %v5399_v8 = vrot.slane %v13285_v62, %v13102_v0 }
 0x636   :  { %8816 = vperm.xlu0 %10322, %v7109_v60   ;;  %v7143_v7 = vcombine.low %v7134_v36, %v7141_v54  ;;  %v7159_v40 = vcombine.low %v5371_v10, %v5375_v63  ;;  %v7160_v30 = vcombine.low %v5379_v3, %v5383_v34  ;;  %v13481_v33 = vadd.f32 %v13081_v45, %v4735_v42  ;;  %v4739_v42 = vpop.xlane.xlu1 %4738 }
 0x637   :  { %v7150_v20 = vrot.slane %v7142_v5, %v13107_v1  ;;  %v7161_v25 = vcombine.low %v5387_v32, %v5391_v50  ;;  %v7162_v49 = vcombine.low %v5395_v2, %v5399_v8  ;;  %v13485_v6 = vadd.f32 %v13081_v45, %v4733_v18  ;;  %v4737_v18 = vpop.xlane.xlu0 %4736 }
 0x638   :  { %v7157_v43 = vrot.slane %v7143_v7, %v13107_v1  ;;  %v7169_v17 = vrot.slane %v7159_v40, %v13107_v1  ;;  %v7176_v62 = vrot.slane %v7160_v30, %v13107_v1  ;;  %v5403_v4 = vrot.slane %v13281_v27, %v13077_v19 }
 0x639   :  { %v7183_v55 = vrot.slane %v7161_v25, %v13107_v1  ;;  %v7190_v11 = vrot.slane %v7162_v49, %v13107_v1  ;;  %v5407_v22 = vrot.slane %v13281_v27, %v13084_v21  ;;  %v5411_v15 = vrot.slane %v13281_v27, %v13087_v41 }
 0x63a   :  { %v7158_v57 = vcombine.low %v7150_v20, %v7157_v43  ;;  %v7191_v26 = vcombine.low %v7169_v17, %v7176_v62  ;;  %v5415_v24 = vrot.slane %v13281_v27, %v13090_v39  ;;  %v5419_v23 = vrot.slane %v13281_v27, %v13093_v52 }
 0x63b   :  { %v7192_v16 = vcombine.low %v7183_v55, %v7190_v11  ;;  %v5423_v51 = vrot.slane %v13281_v27, %v13096_v61  ;;  %v5427_v47 = vrot.slane %v13281_v27, %v13099_v31  ;;  %v5431_v35 = vrot.slane %v13281_v27, %v13102_v0 }
 0x63c   :  { %8819 = vperm.xlu1 %10323, %v7158_v57   ;;  %v7199_v53 = vrot.slane %v7191_v26, %v13107_v1  ;;  %v7208_v59 = vcombine.low %v5403_v4, %v5407_v22  ;;  %v7209_v10 = vcombine.low %v5411_v15, %v5415_v24  ;;  %v5435_v44 = vrot.slane %v13335_v12, %v13077_v19 }
 0x63d   :  { %v7206_v13 = vrot.slane %v7192_v16, %v13107_v1  ;;  %v7210_v14 = vcombine.low %v5419_v23, %v5423_v51  ;;  %v7211_v63 = vcombine.low %v5427_v47, %v5431_v35  ;;  %v5439_v46 = vrot.slane %v13335_v12, %v13084_v21 }
 0x63e   :  { %v7218_v38 = vrot.slane %v7208_v59, %v13107_v1  ;;  %v7225_v3 = vrot.slane %v7209_v10, %v13107_v1  ;;  %v5443_v27 = vrot.slane %v13335_v12, %v13087_v41  ;;  %v5447_v34 = vrot.slane %v13335_v12, %v13090_v39 }
 0x63f   :  { %v7207_v60 = vcombine.low %v7199_v53, %v7206_v13  ;;  %v7232_v36 = vrot.slane %v7210_v14, %v13107_v1  ;;  %v7239_v54 = vrot.slane %v7211_v63, %v13107_v1  ;;  %v5451_v32 = vrot.slane %v13335_v12, %v13093_v52 }
 0x640   :  { %v7240_v5 = vcombine.low %v7218_v38, %v7225_v3  ;;  %v5455_v50 = vrot.slane %v13335_v12, %v13096_v61  ;;  %v5459_v2 = vrot.slane %v13335_v12, %v13099_v31  ;;  %v5463_v8 = vrot.slane %v13335_v12, %v13102_v0 }
 0x641   :  { %8822 = vperm.xlu0 %10322, %v7207_v60   ;;  %v7241_v7 = vcombine.low %v7232_v36, %v7239_v54  ;;  %v7257_v40 = vcombine.low %v5435_v44, %v5439_v46  ;;  %v7258_v30 = vcombine.low %v5443_v27, %v5447_v34  ;;  %v13531_v20 = vadd.f32 %v13081_v45, %v4739_v42  ;;  %v4743_v42 = vpop.xlane.xlu1 %4742 }
 0x642   :  { %v7248_v25 = vrot.slane %v7240_v5, %v13107_v1  ;;  %v7259_v49 = vcombine.low %v5451_v32, %v5455_v50  ;;  %v7260_v43 = vcombine.low %v5459_v2, %v5463_v8  ;;  %v13535_v17 = vadd.f32 %v13081_v45, %v4737_v18  ;;  %v4741_v18 = vpop.xlane.xlu0 %4740 }
 0x643   :  { %v7255_v62 = vrot.slane %v7241_v7, %v13107_v1  ;;  %v7267_v4 = vrot.slane %v7257_v40, %v13107_v1  ;;  %v7274_v12 = vrot.slane %v7258_v30, %v13107_v1  ;;  %v5467_v55 = vrot.slane %v13331_v28, %v13077_v19 }
 0x644   :  { %v7281_v11 = vrot.slane %v7259_v49, %v13107_v1  ;;  %v7288_v22 = vrot.slane %v7260_v43, %v13107_v1  ;;  %v5471_v15 = vrot.slane %v13331_v28, %v13084_v21  ;;  %v5475_v57 = vrot.slane %v13331_v28, %v13087_v41 }
 0x645   :  { %v7256_v26 = vcombine.low %v7248_v25, %v7255_v62  ;;  %v7289_v24 = vcombine.low %v7267_v4, %v7274_v12  ;;  %v5479_v23 = vrot.slane %v13331_v28, %v13090_v39  ;;  %v5483_v16 = vrot.slane %v13331_v28, %v13093_v52 }
 0x646   :  { %v7290_v51 = vcombine.low %v7281_v11, %v7288_v22  ;;  %v5487_v47 = vrot.slane %v13331_v28, %v13096_v61  ;;  %v5491_v35 = vrot.slane %v13331_v28, %v13099_v31  ;;  %v5495_v53 = vrot.slane %v13331_v28, %v13102_v0 }
 0x647   :  { %8825 = vperm.xlu1 %10323, %v7256_v26   ;;  %v7297_v59 = vrot.slane %v7289_v24, %v13107_v1  ;;  %v7306_v10 = vcombine.low %v5467_v55, %v5471_v15  ;;  %v7307_v44 = vcombine.low %v5475_v57, %v5479_v23  ;;  %v5499_v13 = vrot.slane %v13385_v9, %v13077_v19 }
 0x648   :  { %v7304_v14 = vrot.slane %v7290_v51, %v13107_v1  ;;  %v7308_v63 = vcombine.low %v5483_v16, %v5487_v47  ;;  %v7309_v46 = vcombine.low %v5491_v35, %v5495_v53  ;;  %v5503_v38 = vrot.slane %v13385_v9, %v13084_v21 }
 0x649   :  { %v7316_v3 = vrot.slane %v7306_v10, %v13107_v1  ;;  %v7323_v27 = vrot.slane %v7307_v44, %v13107_v1  ;;  %v5507_v28 = vrot.slane %v13385_v9, %v13087_v41  ;;  %v5511_v34 = vrot.slane %v13385_v9, %v13090_v39 }
 0x64a   :  { %v7305_v60 = vcombine.low %v7297_v59, %v7304_v14  ;;  %v7330_v36 = vrot.slane %v7308_v63, %v13107_v1  ;;  %v7337_v54 = vrot.slane %v7309_v46, %v13107_v1  ;;  %v5515_v32 = vrot.slane %v13385_v9, %v13093_v52 }
 0x64b   :  { %v7338_v5 = vcombine.low %v7316_v3, %v7323_v27  ;;  %v5519_v50 = vrot.slane %v13385_v9, %v13096_v61  ;;  %v5523_v2 = vrot.slane %v13385_v9, %v13099_v31  ;;  %v5527_v8 = vrot.slane %v13385_v9, %v13102_v0 }
 0x64c   :  { %8828 = vperm.xlu0 %10322, %v7305_v60   ;;  %v7339_v7 = vcombine.low %v7330_v36, %v7337_v54  ;;  %v7355_v40 = vcombine.low %v5499_v13, %v5503_v38  ;;  %v7356_v30 = vcombine.low %v5507_v28, %v5511_v34  ;;  %v13581_v25 = vadd.f32 %v13081_v45, %v4743_v42  ;;  %v4747_v42 = vpop.xlane.xlu1 %4746 }
 0x64d   :  { %v7346_v49 = vrot.slane %v7338_v5, %v13107_v1  ;;  %v7357_v43 = vcombine.low %v5515_v32, %v5519_v50  ;;  %v7358_v62 = vcombine.low %v5523_v2, %v5527_v8  ;;  %v13585_v4 = vadd.f32 %v13081_v45, %v4741_v18  ;;  %v4745_v18 = vpop.xlane.xlu0 %4744 }
 0x64e   :  { %v7353_v12 = vrot.slane %v7339_v7, %v13107_v1  ;;  %v7365_v55 = vrot.slane %v7355_v40, %v13107_v1  ;;  %v7372_v9 = vrot.slane %v7356_v30, %v13107_v1  ;;  %v5531_v11 = vrot.slane %v13381_v48, %v13077_v19 }
 0x64f   :  { %v7379_v22 = vrot.slane %v7357_v43, %v13107_v1  ;;  %v7386_v15 = vrot.slane %v7358_v62, %v13107_v1  ;;  %v5535_v57 = vrot.slane %v13381_v48, %v13084_v21  ;;  %v5539_v26 = vrot.slane %v13381_v48, %v13087_v41 }
 0x650   :  { %v7354_v24 = vcombine.low %v7346_v49, %v7353_v12  ;;  %v7387_v23 = vcombine.low %v7365_v55, %v7372_v9  ;;  %v5543_v16 = vrot.slane %v13381_v48, %v13090_v39  ;;  %v5547_v51 = vrot.slane %v13381_v48, %v13093_v52 }
 0x651   :  { %v7388_v47 = vcombine.low %v7379_v22, %v7386_v15  ;;  %v5551_v35 = vrot.slane %v13381_v48, %v13096_v61  ;;  %v5555_v53 = vrot.slane %v13381_v48, %v13099_v31  ;;  %v5559_v59 = vrot.slane %v13381_v48, %v13102_v0 }
 0x652   :  { %8831 = vperm.xlu1 %10323, %v7354_v24   ;;  %v7395_v10 = vrot.slane %v7387_v23, %v13107_v1  ;;  %v7404_v44 = vcombine.low %v5531_v11, %v5535_v57  ;;  %v7405_v13 = vcombine.low %v5539_v26, %v5543_v16  ;;  %v5563_v14 = vrot.slane %v13435_v56, %v13077_v19 }
 0x653   :  { %v7402_v63 = vrot.slane %v7388_v47, %v13107_v1  ;;  %v7406_v46 = vcombine.low %v5547_v51, %v5551_v35  ;;  %v7407_v38 = vcombine.low %v5555_v53, %v5559_v59  ;;  %v5567_v3 = vrot.slane %v13435_v56, %v13084_v21 }
 0x654   :  { %v7414_v27 = vrot.slane %v7404_v44, %v13107_v1  ;;  %v7421_v28 = vrot.slane %v7405_v13, %v13107_v1  ;;  %v5571_v48 = vrot.slane %v13435_v56, %v13087_v41  ;;  %v5575_v34 = vrot.slane %v13435_v56, %v13090_v39 }
 0x655   :  { %v7403_v60 = vcombine.low %v7395_v10, %v7402_v63  ;;  %v7428_v36 = vrot.slane %v7406_v46, %v13107_v1  ;;  %v7435_v54 = vrot.slane %v7407_v38, %v13107_v1  ;;  %v5579_v32 = vrot.slane %v13435_v56, %v13093_v52 }
 0x656   :  { %v7436_v5 = vcombine.low %v7414_v27, %v7421_v28  ;;  %v5583_v50 = vrot.slane %v13435_v56, %v13096_v61  ;;  %v5587_v2 = vrot.slane %v13435_v56, %v13099_v31  ;;  %v5591_v8 = vrot.slane %v13435_v56, %v13102_v0 }
 0x657   :  { %8834 = vperm.xlu0 %10322, %v7403_v60   ;;  %v7437_v7 = vcombine.low %v7428_v36, %v7435_v54  ;;  %v7453_v40 = vcombine.low %v5563_v14, %v5567_v3  ;;  %v7454_v30 = vcombine.low %v5571_v48, %v5575_v34  ;;  %v13631_v49 = vadd.f32 %v13081_v45, %v4747_v42  ;;  %v4751_v42 = vpop.xlane.xlu1 %4750 }
 0x658   :  { %v7444_v43 = vrot.slane %v7436_v5, %v13107_v1  ;;  %v7455_v62 = vcombine.low %v5579_v32, %v5583_v50  ;;  %v7456_v12 = vcombine.low %v5587_v2, %v5591_v8  ;;  %v13635_v55 = vadd.f32 %v13081_v45, %v4745_v18  ;;  %v4749_v18 = vpop.xlane.xlu0 %4748 }
 0x659   :  { %v7451_v9 = vrot.slane %v7437_v7, %v13107_v1  ;;  %v7463_v11 = vrot.slane %v7453_v40, %v13107_v1  ;;  %v7470_v56 = vrot.slane %v7454_v30, %v13107_v1  ;;  %v5595_v22 = vrot.slane %v13431_v37, %v13077_v19 }
 0x65a   :  { %v7477_v15 = vrot.slane %v7455_v62, %v13107_v1  ;;  %v7484_v57 = vrot.slane %v7456_v12, %v13107_v1  ;;  %v5599_v26 = vrot.slane %v13431_v37, %v13084_v21  ;;  %v5603_v24 = vrot.slane %v13431_v37, %v13087_v41 }
 0x65b   :  { %v7452_v23 = vcombine.low %v7444_v43, %v7451_v9  ;;  %v7485_v16 = vcombine.low %v7463_v11, %v7470_v56  ;;  %v5607_v51 = vrot.slane %v13431_v37, %v13090_v39  ;;  %v5611_v47 = vrot.slane %v13431_v37, %v13093_v52 }
 0x65c   :  { %v7486_v35 = vcombine.low %v7477_v15, %v7484_v57  ;;  %v5615_v53 = vrot.slane %v13431_v37, %v13096_v61  ;;  %v5619_v59 = vrot.slane %v13431_v37, %v13099_v31  ;;  %v5623_v10 = vrot.slane %v13431_v37, %v13102_v0 }
 0x65d   :  { %8837 = vperm.xlu1 %10323, %v7452_v23   ;;  %v7493_v44 = vrot.slane %v7485_v16, %v13107_v1  ;;  %v7502_v13 = vcombine.low %v5595_v22, %v5599_v26  ;;  %v7503_v14 = vcombine.low %v5603_v24, %v5607_v51  ;;  %v5627_v63 = vrot.slane %v13485_v6, %v13077_v19 }
 0x65e   :  { %v7500_v46 = vrot.slane %v7486_v35, %v13107_v1  ;;  %v7504_v38 = vcombine.low %v5611_v47, %v5615_v53  ;;  %v7505_v3 = vcombine.low %v5619_v59, %v5623_v10  ;;  %v5631_v27 = vrot.slane %v13485_v6, %v13084_v21 }
 0x65f   :  { %v7512_v28 = vrot.slane %v7502_v13, %v13107_v1  ;;  %v7519_v48 = vrot.slane %v7503_v14, %v13107_v1  ;;  %v5635_v37 = vrot.slane %v13485_v6, %v13087_v41  ;;  %v5639_v34 = vrot.slane %v13485_v6, %v13090_v39 }
 0x660   :  { %v7501_v60 = vcombine.low %v7493_v44, %v7500_v46  ;;  %v7526_v36 = vrot.slane %v7504_v38, %v13107_v1  ;;  %v7533_v54 = vrot.slane %v7505_v3, %v13107_v1  ;;  %v5643_v32 = vrot.slane %v13485_v6, %v13093_v52 }
 0x661   :  { %v7534_v5 = vcombine.low %v7512_v28, %v7519_v48  ;;  %v5647_v50 = vrot.slane %v13485_v6, %v13096_v61  ;;  %v5651_v2 = vrot.slane %v13485_v6, %v13099_v31  ;;  %v5655_v8 = vrot.slane %v13485_v6, %v13102_v0 }
 0x662   :  { %8840 = vperm.xlu0 %10322, %v7501_v60   ;;  %v7535_v7 = vcombine.low %v7526_v36, %v7533_v54  ;;  %v7551_v40 = vcombine.low %v5627_v63, %v5631_v27  ;;  %v7552_v30 = vcombine.low %v5635_v37, %v5639_v34  ;;  %v13681_v43 = vadd.f32 %v13081_v45, %v4751_v42  ;;  %v4755_v42 = vpop.xlane.xlu1 %4754  ;;  %v4753_v60 = vpop.xlane.xlu0 %4752 }
 0x663   :  { %v7542_v62 = vrot.slane %v7534_v5, %v13107_v1  ;;  %v7553_v12 = vcombine.low %v5643_v32, %v5647_v50  ;;  %v7554_v9 = vcombine.low %v5651_v2, %v5655_v8  ;;  %v13685_v11 = vadd.f32 %v13081_v45, %v4749_v18 }
 0x664   :  { %v7549_v56 = vrot.slane %v7535_v7, %v13107_v1  ;;  %v7561_v22 = vrot.slane %v7551_v40, %v13107_v1  ;;  %v7568_v6 = vrot.slane %v7552_v30, %v13107_v1  ;;  %v5659_v15 = vrot.slane %v13481_v33, %v13077_v19 }
 0x665   :  { %v7575_v57 = vrot.slane %v7553_v12, %v13107_v1  ;;  %v7582_v26 = vrot.slane %v7554_v9, %v13107_v1  ;;  %v5663_v24 = vrot.slane %v13481_v33, %v13084_v21  ;;  %v5667_v23 = vrot.slane %v13481_v33, %v13087_v41 }
 0x666   :  { %v7550_v16 = vcombine.low %v7542_v62, %v7549_v56  ;;  %v7583_v51 = vcombine.low %v7561_v22, %v7568_v6  ;;  %v5671_v47 = vrot.slane %v13481_v33, %v13090_v39  ;;  %v5675_v35 = vrot.slane %v13481_v33, %v13093_v52 }
 0x667   :  { %v7584_v53 = vcombine.low %v7575_v57, %v7582_v26  ;;  %v5679_v59 = vrot.slane %v13481_v33, %v13096_v61  ;;  %v5683_v10 = vrot.slane %v13481_v33, %v13099_v31  ;;  %v5687_v44 = vrot.slane %v13481_v33, %v13102_v0 }
 0x668   :  { %8843 = vperm.xlu1 %10323, %v7550_v16   ;;  %v7591_v13 = vrot.slane %v7583_v51, %v13107_v1  ;;  %v7600_v14 = vcombine.low %v5659_v15, %v5663_v24  ;;  %v7601_v63 = vcombine.low %v5667_v23, %v5671_v47  ;;  %v5691_v46 = vrot.slane %v13535_v17, %v13077_v19  ;;  %v4759_v51 = vpop.xlane.xlu1 %4758  ;;  %v4757_v47 = vpop.xlane.xlu0 %4756 }
 0x669   :  { %v7598_v38 = vrot.slane %v7584_v53, %v13107_v1  ;;  %v7602_v3 = vcombine.low %v5675_v35, %v5679_v59  ;;  %v7603_v27 = vcombine.low %v5683_v10, %v5687_v44  ;;  %v5695_v28 = vrot.slane %v13535_v17, %v13084_v21 }
 0x66a   :  { %v7610_v48 = vrot.slane %v7600_v14, %v13107_v1  ;;  %v7617_v37 = vrot.slane %v7601_v63, %v13107_v1  ;;  %v5699_v33 = vrot.slane %v13535_v17, %v13087_v41  ;;  %v5703_v34 = vrot.slane %v13535_v17, %v13090_v39 }
 0x66b   :  { %v7599_v36 = vcombine.low %v7591_v13, %v7598_v38  ;;  %v7624_v54 = vrot.slane %v7602_v3, %v13107_v1  ;;  %v7631_v32 = vrot.slane %v7603_v27, %v13107_v1  ;;  %v5707_v18 = vrot.slane %v13535_v17, %v13093_v52 }
 0x66c   :  { %v7632_v5 = vcombine.low %v7610_v48, %v7617_v37  ;;  %v5711_v50 = vrot.slane %v13535_v17, %v13096_v61  ;;  %v5715_v2 = vrot.slane %v13535_v17, %v13099_v31  ;;  %v5719_v8 = vrot.slane %v13535_v17, %v13102_v0 }
 0x66d   :  { %8846 = vperm.xlu0 %10322, %v7599_v36   ;;  %v7633_v7 = vcombine.low %v7624_v54, %v7631_v32  ;;  %v7649_v40 = vcombine.low %v5691_v46, %v5695_v28  ;;  %v7650_v30 = vcombine.low %v5699_v33, %v5703_v34  ;;  %v13731_v62 = vadd.f32 %v13081_v45, %v4755_v42 }
 0x66e   :  { %v7640_v12 = vrot.slane %v7632_v5, %v13107_v1  ;;  %v7651_v9 = vcombine.low %v5707_v18, %v5711_v50  ;;  %v7652_v56 = vcombine.low %v5715_v2, %v5719_v8  ;;  %v13735_v22 = vadd.f32 %v13081_v45, %v4753_v60  ;;  %v4763_v5 = vpop.xlane.xlu1 %4762  ;;  %v4761_v50 = vpop.xlane.xlu0 %4760 }
 0x66f   :  { %v7647_v6 = vrot.slane %v7633_v7, %v13107_v1  ;;  %v7659_v15 = vrot.slane %v7649_v40, %v13107_v1  ;;  %v7666_v17 = vrot.slane %v7650_v30, %v13107_v1  ;;  %v5755_v57 = vrot.slane %v13585_v4, %v13077_v19 }
 0x670   :  { %v7673_v26 = vrot.slane %v7651_v9, %v13107_v1  ;;  %v7680_v24 = vrot.slane %v7652_v56, %v13107_v1  ;;  %v5759_v23 = vrot.slane %v13585_v4, %v13084_v21  ;;  %v5763_v16 = vrot.slane %v13585_v4, %v13087_v41 }
 0x671   :  { %v7648_v35 = vcombine.low %v7640_v12, %v7647_v6  ;;  %v7681_v53 = vcombine.low %v7659_v15, %v7666_v17  ;;  %v5767_v59 = vrot.slane %v13585_v4, %v13090_v39  ;;  %v5771_v10 = vrot.slane %v13585_v4, %v13093_v52 }
 0x672   :  { %v7682_v44 = vcombine.low %v7673_v26, %v7680_v24  ;;  %v5775_v13 = vrot.slane %v13585_v4, %v13096_v61  ;;  %v5779_v14 = vrot.slane %v13585_v4, %v13099_v31  ;;  %v5783_v63 = vrot.slane %v13585_v4, %v13102_v0 }
 0x673   :  { %8849 = vperm.xlu1 %10323, %v7648_v35   ;;  %v7689_v46 = vrot.slane %v7681_v53, %v13107_v1  ;;  %v7747_v38 = vcombine.low %v5755_v57, %v5759_v23  ;;  %v7748_v3 = vcombine.low %v5763_v16, %v5767_v59  ;;  %v13760_v27 = vadd.f32 %v13081_v45, %v4759_v51 }
 0x674   :  { %v7696_v28 = vrot.slane %v7682_v44, %v13107_v1  ;;  %v7749_v48 = vcombine.low %v5771_v10, %v5775_v13  ;;  %v7750_v37 = vcombine.low %v5779_v14, %v5783_v63  ;;  %v13764_v33 = vadd.f32 %v13081_v45, %v4757_v47  ;;  %v4767_v13 = vpop.xlane.xlu1 %4766  ;;  %v4765_v14 = vpop.xlane.xlu0 %4764 }
 0x675   :  { %v7757_v34 = vrot.slane %v7747_v38, %v13107_v1  ;;  %v7764_v42 = vrot.slane %v7748_v3, %v13107_v1  ;;  %v5723_v4 = vrot.slane %v13531_v20, %v13077_v19  ;;  %v5727_v60 = vrot.slane %v13531_v20, %v13084_v21 }
 0x676   :  { %v7697_v36 = vcombine.low %v7689_v46, %v7696_v28  ;;  %v7771_v54 = vrot.slane %v7749_v48, %v13107_v1  ;;  %v7778_v32 = vrot.slane %v7750_v37, %v13107_v1  ;;  %v5731_v18 = vrot.slane %v13531_v20, %v13087_v41 }
 0x677   :  { %v7779_v2 = vcombine.low %v7757_v34, %v7764_v42  ;;  %v5735_v8 = vrot.slane %v13531_v20, %v13090_v39  ;;  %v5739_v7 = vrot.slane %v13531_v20, %v13093_v52  ;;  %v5743_v40 = vrot.slane %v13531_v20, %v13096_v61 }
 0x678   :  { %8852 = vperm.xlu0 %10322, %v7697_v36   ;;  %v7780_v30 = vcombine.low %v7771_v54, %v7778_v32  ;;  %v5747_v12 = vrot.slane %v13531_v20, %v13099_v31  ;;  %v5751_v9 = vrot.slane %v13531_v20, %v13102_v0  ;;  %v7698_v56 = vcombine.low %v5723_v4, %v5727_v60 }
 0x679   :  { %v7787_v6 = vrot.slane %v7779_v2, %v13107_v1  ;;  %v7699_v15 = vcombine.low %v5731_v18, %v5735_v8  ;;  %v7700_v17 = vcombine.low %v5739_v7, %v5743_v40  ;;  %v13788_v57 = vadd.f32 %v13081_v45, %v4763_v5 }
 0x67a   :  { %v7794_v26 = vrot.slane %v7780_v30, %v13107_v1  ;;  %v7701_v24 = vcombine.low %v5747_v12, %v5751_v9  ;;  %v7708_v23 = vrot.slane %v7698_v56, %v13107_v1  ;;  %v13793_v16 = vadd.f32 %v13081_v45, %v4761_v50 }
 0x67b   :  { %v7715_v51 = vrot.slane %v7699_v15, %v13107_v1  ;;  %v7722_v20 = vrot.slane %v7700_v17, %v13107_v1  ;;  %v5819_v47 = vrot.slane %v13635_v55, %v13077_v19  ;;  %v5823_v35 = vrot.slane %v13635_v55, %v13084_v21 }
 0x67c   :  { %v7795_v53 = vcombine.low %v7787_v6, %v7794_v26  ;;  %v7729_v59 = vrot.slane %v7701_v24, %v13107_v1  ;;  %v5827_v10 = vrot.slane %v13635_v55, %v13087_v41  ;;  %v5831_v44 = vrot.slane %v13635_v55, %v13090_v39 }
 0x67d   :  { %v7730_v63 = vcombine.low %v7708_v23, %v7715_v51  ;;  %v5835_v46 = vrot.slane %v13635_v55, %v13093_v52  ;;  %v5839_v38 = vrot.slane %v13635_v55, %v13096_v61  ;;  %v5843_v3 = vrot.slane %v13635_v55, %v13099_v31 }
 0x67e   :  { %8858 = vperm.xlu1 %10323, %v7795_v53   ;;  %v7731_v28 = vcombine.low %v7722_v20, %v7729_v59  ;;  %v5847_v48 = vrot.slane %v13635_v55, %v13102_v0  ;;  %v7845_v37 = vcombine.low %v5819_v47, %v5823_v35  ;;  %v7846_v34 = vcombine.low %v5827_v10, %v5831_v44 }
 0x67f   :  { %v7738_v42 = vrot.slane %v7730_v63, %v13107_v1  ;;  %v7847_v4 = vcombine.low %v5835_v46, %v5839_v38  ;;  %v13816_v60 = vadd.f32 %v13081_v45, %v4767_v13  ;;  %v13819_v36 = vadd.f32 %v13081_v45, %v4765_v14  ;;  %v4771_v46 = vpop.xlane.xlu1 %4770  ;;  %v4769_v38 = vpop.xlane.xlu0 %4768 }
 0x680   :  { %v7745_v54 = vrot.slane %v7731_v28, %v13107_v1  ;;  %v7848_v32 = vcombine.low %v5843_v3, %v5847_v48  ;;  %v7855_v18 = vrot.slane %v7845_v37, %v13107_v1  ;;  %v7862_v5 = vrot.slane %v7846_v34, %v13107_v1 }
 0x681   :  { %v7869_v55 = vrot.slane %v7847_v4, %v13107_v1  ;;  %v5787_v50 = vrot.slane %v13581_v25, %v13077_v19  ;;  %v5791_v2 = vrot.slane %v13581_v25, %v13084_v21  ;;  %v5795_v8 = vrot.slane %v13581_v25, %v13087_v41 }
 0x682   :  { %v7746_v7 = vcombine.low %v7738_v42, %v7745_v54  ;;  %v7876_v40 = vrot.slane %v7848_v32, %v13107_v1  ;;  %v7877_v30 = vcombine.low %v7855_v18, %v7862_v5  ;;  %v5799_v12 = vrot.slane %v13581_v25, %v13090_v39 }
 0x683   :  { %v5803_v9 = vrot.slane %v13581_v25, %v13093_v52  ;;  %v5807_v56 = vrot.slane %v13581_v25, %v13096_v61  ;;  %v5811_v6 = vrot.slane %v13581_v25, %v13099_v31  ;;  %v5815_v15 = vrot.slane %v13581_v25, %v13102_v0 }
 0x684   :  { %8855 = vperm.xlu1 %10323, %v7746_v7   ;;  %v7878_v17 = vcombine.low %v7869_v55, %v7876_v40  ;;  %v7885_v26 = vrot.slane %v7877_v30, %v13107_v1  ;;  %v7796_v24 = vcombine.low %v5787_v50, %v5791_v2  ;;  %v7797_v23 = vcombine.low %v5795_v8, %v5799_v12 }
 0x685   :  { %v7798_v51 = vcombine.low %v5803_v9, %v5807_v56  ;;  %v7799_v20 = vcombine.low %v5811_v6, %v5815_v15  ;;  %v5947_v47 = vrot.slane %v13735_v22, %v13077_v19  ;;  %v5951_v35 = vrot.slane %v13735_v22, %v13084_v21 }
 0x686   :  { %v7892_v53 = vrot.slane %v7878_v17, %v13107_v1  ;;  %v7806_v59 = vrot.slane %v7796_v24, %v13107_v1  ;;  %v7813_v25 = vrot.slane %v7797_v23, %v13107_v1  ;;  %v5955_v10 = vrot.slane %v13735_v22, %v13087_v41 }
 0x687   :  { %v7820_v44 = vrot.slane %v7798_v51, %v13107_v1  ;;  %v7827_v13 = vrot.slane %v7799_v20, %v13107_v1  ;;  %v5959_v14 = vrot.slane %v13735_v22, %v13090_v39  ;;  %v5963_v63 = vrot.slane %v13735_v22, %v13093_v52 }
 0x688   :  { %v7893_v3 = vcombine.low %v7885_v26, %v7892_v53  ;;  %v7828_v28 = vcombine.low %v7806_v59, %v7813_v25  ;;  %v5967_v48 = vrot.slane %v13735_v22, %v13096_v61  ;;  %v5971_v37 = vrot.slane %v13735_v22, %v13099_v31 }
 0x689   :  { %v7829_v34 = vcombine.low %v7820_v44, %v7827_v13  ;;  %v5975_v42 = vrot.slane %v13735_v22, %v13102_v0  ;;  %v8041_v4 = vcombine.low %v5947_v47, %v5951_v35  ;;  %v8042_v54 = vcombine.low %v5955_v10, %v5959_v14 }
 0x68a   :  { %8864 = vperm.xlu1 %10323, %v7893_v3   ;;  %v7836_v32 = vrot.slane %v7828_v28, %v13107_v1  ;;  %v8043_v18 = vcombine.low %v5963_v63, %v5967_v48  ;;  %v13866_v5 = vadd.f32 %v13081_v45, %v4771_v46  ;;  %v13869_v55 = vadd.f32 %v13081_v45, %v4769_v38  ;;  %v4775_v28 = vpop.xlane.xlu1 %4774  ;;  %v4773_v48 = vpop.xlane.xlu0 %4772 }
 0x68b   :  { %v7843_v50 = vrot.slane %v7829_v34, %v13107_v1  ;;  %v8044_v2 = vcombine.low %v5971_v37, %v5975_v42  ;;  %v8051_v8 = vrot.slane %v8041_v4, %v13107_v1  ;;  %v8058_v7 = vrot.slane %v8042_v54, %v13107_v1 }
 0x68c   :  { %v8065_v22 = vrot.slane %v8043_v18, %v13107_v1  ;;  %v5851_v40 = vrot.slane %v13631_v49, %v13077_v19  ;;  %v5855_v30 = vrot.slane %v13631_v49, %v13084_v21  ;;  %v5859_v12 = vrot.slane %v13631_v49, %v13087_v41 }
 0x68d   :  { %v7844_v9 = vcombine.low %v7836_v32, %v7843_v50  ;;  %v8072_v56 = vrot.slane %v8044_v2, %v13107_v1  ;;  %v8073_v6 = vcombine.low %v8051_v8, %v8058_v7  ;;  %v5863_v15 = vrot.slane %v13631_v49, %v13090_v39 }
 0x68e   :  { %v5867_v17 = vrot.slane %v13631_v49, %v13093_v52  ;;  %v5871_v26 = vrot.slane %v13631_v49, %v13096_v61  ;;  %v5875_v24 = vrot.slane %v13631_v49, %v13099_v31  ;;  %v5879_v23 = vrot.slane %v13631_v49, %v13102_v0 }
 0x68f   :  { %8861 = vperm.xlu1 %10323, %v7844_v9   ;;  %v8074_v51 = vcombine.low %v8065_v22, %v8072_v56  ;;  %v8081_v20 = vrot.slane %v8073_v6, %v13107_v1  ;;  %v7894_v47 = vcombine.low %v5851_v40, %v5855_v30  ;;  %v7895_v35 = vcombine.low %v5859_v12, %v5863_v15 }
 0x690   :  { %v7896_v53 = vcombine.low %v5867_v17, %v5871_v26  ;;  %v7897_v59 = vcombine.low %v5875_v24, %v5879_v23  ;;  %v6011_v25 = vrot.slane %v13764_v33, %v13077_v19  ;;  %v6015_v10 = vrot.slane %v13764_v33, %v13084_v21 }
 0x691   :  { %v8088_v44 = vrot.slane %v8074_v51, %v13107_v1  ;;  %v7904_v13 = vrot.slane %v7894_v47, %v13107_v1  ;;  %v7911_v49 = vrot.slane %v7895_v35, %v13107_v1  ;;  %v6019_v14 = vrot.slane %v13764_v33, %v13087_v41 }
 0x692   :  { %v7918_v63 = vrot.slane %v7896_v53, %v13107_v1  ;;  %v7925_v46 = vrot.slane %v7897_v59, %v13107_v1  ;;  %v6023_v38 = vrot.slane %v13764_v33, %v13090_v39  ;;  %v6027_v3 = vrot.slane %v13764_v33, %v13093_v52 }
 0x693   :  { %v8089_v37 = vcombine.low %v8081_v20, %v8088_v44  ;;  %v7926_v34 = vcombine.low %v7904_v13, %v7911_v49  ;;  %v6031_v42 = vrot.slane %v13764_v33, %v13096_v61  ;;  %v6035_v4 = vrot.slane %v13764_v33, %v13099_v31 }
 0x694   :  { %v7927_v54 = vcombine.low %v7918_v63, %v7925_v46  ;;  %v6039_v32 = vrot.slane %v13764_v33, %v13102_v0  ;;  %v8139_v18 = vcombine.low %v6011_v25, %v6015_v10  ;;  %v8140_v50 = vcombine.low %v6019_v14, %v6023_v38 }
 0x695   :  { %8876 = vperm.xlu0 %10322, %v8089_v37   ;;  %v7934_v2 = vrot.slane %v7926_v34, %v13107_v1  ;;  %v8141_v8 = vcombine.low %v6027_v3, %v6031_v42  ;;  %v13916_v7 = vadd.f32 %v13081_v45, %v4775_v28  ;;  %v13919_v22 = vadd.f32 %v13081_v45, %v4773_v48  ;;  %v4779_v34 = vpop.xlane.xlu1 %4778  ;;  %v4777_v42 = vpop.xlane.xlu0 %4776 }
 0x696   :  { %v7941_v40 = vrot.slane %v7927_v54, %v13107_v1  ;;  %v8142_v30 = vcombine.low %v6035_v4, %v6039_v32  ;;  %v8149_v12 = vrot.slane %v8139_v18, %v13107_v1  ;;  %v8156_v9 = vrot.slane %v8140_v50, %v13107_v1 }
 0x697   :  { %v8163_v33 = vrot.slane %v8141_v8, %v13107_v1  ;;  %v5915_v56 = vrot.slane %v13681_v43, %v13077_v19  ;;  %v5919_v6 = vrot.slane %v13681_v43, %v13084_v21  ;;  %v5923_v15 = vrot.slane %v13681_v43, %v13087_v41 }
 0x698   :  { %v7942_v17 = vcombine.low %v7934_v2, %v7941_v40  ;;  %v8170_v26 = vrot.slane %v8142_v30, %v13107_v1  ;;  %v8171_v24 = vcombine.low %v8149_v12, %v8156_v9  ;;  %v5927_v23 = vrot.slane %v13681_v43, %v13090_v39 }
 0x699   :  { %v5931_v51 = vrot.slane %v13681_v43, %v13093_v52  ;;  %v5935_v20 = vrot.slane %v13681_v43, %v13096_v61  ;;  %v5939_v47 = vrot.slane %v13681_v43, %v13099_v31  ;;  %v5943_v35 = vrot.slane %v13681_v43, %v13102_v0 }
 0x69a   :  { %8867 = vperm.xlu1 %10323, %v7942_v17   ;;  %v8172_v53 = vcombine.low %v8163_v33, %v8170_v26  ;;  %v8179_v59 = vrot.slane %v8171_v24, %v13107_v1  ;;  %v7992_v25 = vcombine.low %v5915_v56, %v5919_v6  ;;  %v7993_v10 = vcombine.low %v5923_v15, %v5927_v23 }
 0x69b   :  { %v7994_v44 = vcombine.low %v5931_v51, %v5935_v20  ;;  %v7995_v13 = vcombine.low %v5939_v47, %v5943_v35  ;;  %v6075_v49 = vrot.slane %v13793_v16, %v13077_v19  ;;  %v6079_v14 = vrot.slane %v13793_v16, %v13084_v21 }
 0x69c   :  { %v8186_v63 = vrot.slane %v8172_v53, %v13107_v1  ;;  %v8002_v46 = vrot.slane %v7992_v25, %v13107_v1  ;;  %v8009_v43 = vrot.slane %v7993_v10, %v13107_v1  ;;  %v6083_v38 = vrot.slane %v13793_v16, %v13087_v41 }
 0x69d   :  { %v8016_v3 = vrot.slane %v7994_v44, %v13107_v1  ;;  %v8023_v28 = vrot.slane %v7995_v13, %v13107_v1  ;;  %v6087_v48 = vrot.slane %v13793_v16, %v13090_v39  ;;  %v6091_v37 = vrot.slane %v13793_v16, %v13093_v52 }
 0x69e   :  { %v8187_v4 = vcombine.low %v8179_v59, %v8186_v63  ;;  %v8024_v54 = vcombine.low %v8002_v46, %v8009_v43  ;;  %v6095_v32 = vrot.slane %v13793_v16, %v13096_v61  ;;  %v6099_v18 = vrot.slane %v13793_v16, %v13099_v31 }
 0x69f   :  { %v8025_v50 = vcombine.low %v8016_v3, %v8023_v28  ;;  %v6103_v2 = vrot.slane %v13793_v16, %v13102_v0  ;;  %v8237_v8 = vcombine.low %v6075_v49, %v6079_v14  ;;  %v8238_v40 = vcombine.low %v6083_v38, %v6087_v48 }
 0x6a0   :  { %8882 = vperm.xlu0 %10322, %v8187_v4   ;;  %v8032_v30 = vrot.slane %v8024_v54, %v13107_v1  ;;  %v8239_v12 = vcombine.low %v6091_v37, %v6095_v32  ;;  %v13966_v9 = vadd.f32 %v13081_v45, %v4779_v34  ;;  %v13969_v33 = vadd.f32 %v13081_v45, %v4777_v42  ;;  %v4781_v54 = vpop.xlane.xlu0 %4780 }
 0x6a1   :  { %v8039_v56 = vrot.slane %v8025_v50, %v13107_v1  ;;  %v8240_v6 = vcombine.low %v6099_v18, %v6103_v2  ;;  %v8247_v15 = vrot.slane %v8237_v8, %v13107_v1  ;;  %v8254_v17 = vrot.slane %v8238_v40, %v13107_v1 }
 0x6a2   :  { %v8261_v16 = vrot.slane %v8239_v12, %v13107_v1  ;;  %v5979_v26 = vrot.slane %v13731_v62, %v13077_v19  ;;  %v5983_v24 = vrot.slane %v13731_v62, %v13084_v21  ;;  %v5987_v23 = vrot.slane %v13731_v62, %v13087_v41 }
 0x6a3   :  { %v8040_v51 = vcombine.low %v8032_v30, %v8039_v56  ;;  %v8268_v20 = vrot.slane %v8240_v6, %v13107_v1  ;;  %v8269_v47 = vcombine.low %v8247_v15, %v8254_v17  ;;  %v5991_v35 = vrot.slane %v13731_v62, %v13090_v39 }
 0x6a4   :  { %v5995_v53 = vrot.slane %v13731_v62, %v13093_v52  ;;  %v5999_v59 = vrot.slane %v13731_v62, %v13096_v61  ;;  %v6003_v25 = vrot.slane %v13731_v62, %v13099_v31  ;;  %v6007_v10 = vrot.slane %v13731_v62, %v13102_v0 }
 0x6a5   :  { %8873 = vperm.xlu1 %10323, %v8040_v51   ;;  %v8270_v44 = vcombine.low %v8261_v16, %v8268_v20  ;;  %v8277_v13 = vrot.slane %v8269_v47, %v13107_v1  ;;  %v8090_v49 = vcombine.low %v5979_v26, %v5983_v24  ;;  %v8091_v14 = vcombine.low %v5987_v23, %v5991_v35 }
 0x6a6   :  { %v8092_v63 = vcombine.low %v5995_v53, %v5999_v59  ;;  %v8093_v46 = vcombine.low %v6003_v25, %v6007_v10  ;;  %v6139_v43 = vrot.slane %v13819_v36, %v13077_v19  ;;  %v6143_v38 = vrot.slane %v13819_v36, %v13084_v21 }
 0x6a7   :  { %v8284_v3 = vrot.slane %v8270_v44, %v13107_v1  ;;  %v8100_v28 = vrot.slane %v8090_v49, %v13107_v1  ;;  %v8107_v62 = vrot.slane %v8091_v14, %v13107_v1  ;;  %v6147_v48 = vrot.slane %v13819_v36, %v13087_v41 }
 0x6a8   :  { %v8114_v37 = vrot.slane %v8092_v63, %v13107_v1  ;;  %v8121_v34 = vrot.slane %v8093_v46, %v13107_v1  ;;  %v6151_v42 = vrot.slane %v13819_v36, %v13090_v39  ;;  %v6155_v4 = vrot.slane %v13819_v36, %v13093_v52 }
 0x6a9   :  { %v8285_v32 = vcombine.low %v8277_v13, %v8284_v3  ;;  %v8122_v18 = vcombine.low %v8100_v28, %v8107_v62  ;;  %v6159_v50 = vrot.slane %v13819_v36, %v13096_v61  ;;  %v6163_v2 = vrot.slane %v13819_v36, %v13099_v31 }
 0x6aa   :  { %v8123_v8 = vcombine.low %v8114_v37, %v8121_v34  ;;  %v6167_v40 = vrot.slane %v13819_v36, %v13102_v0  ;;  %v8335_v30 = vcombine.low %v6139_v43, %v6143_v38  ;;  %v8336_v12 = vcombine.low %v6147_v48, %v6151_v42 }
 0x6ab   :  { %8888 = vperm.xlu0 %10322, %v8285_v32   ;;  %v8130_v56 = vrot.slane %v8122_v18, %v13107_v1  ;;  %v8337_v6 = vcombine.low %v6155_v4, %v6159_v50  ;;  %v14016_v15 = vadd.f32 %v13081_v45, %v4781_v54  ;;  %v6043_v17 = vrot.slane %v13760_v27, %v13077_v19 }
 0x6ac   :  { %v8137_v16 = vrot.slane %v8123_v8, %v13107_v1  ;;  %v8338_v26 = vcombine.low %v6163_v2, %v6167_v40  ;;  %v8345_v24 = vrot.slane %v8335_v30, %v13107_v1  ;;  %v8352_v23 = vrot.slane %v8336_v12, %v13107_v1 }
 0x6ad   :  { %v8359_v36 = vrot.slane %v8337_v6, %v13107_v1  ;;  %v6047_v51 = vrot.slane %v13760_v27, %v13084_v21  ;;  %v6051_v20 = vrot.slane %v13760_v27, %v13087_v41  ;;  %v6055_v45 = vrot.slane %v13760_v27, %v13090_v39 }
 0x6ae   :  { %v8138_v47 = vcombine.low %v8130_v56, %v8137_v16  ;;  %v8366_v35 = vrot.slane %v8338_v26, %v13107_v1  ;;  %v8367_v53 = vcombine.low %v8345_v24, %v8352_v23  ;;  %v6059_v59 = vrot.slane %v13760_v27, %v13093_v52 }
 0x6af   :  { %v6063_v25 = vrot.slane %v13760_v27, %v13096_v61  ;;  %v6067_v10 = vrot.slane %v13760_v27, %v13099_v31  ;;  %v6071_v44 = vrot.slane %v13760_v27, %v13102_v0  ;;  %v8188_v13 = vcombine.low %v6043_v17, %v6047_v51 }
 0x6b0   :  { %8879 = vperm.xlu1 %10323, %v8138_v47   ;;  %v8368_v49 = vcombine.low %v8359_v36, %v8366_v35  ;;  %v8375_v14 = vrot.slane %v8367_v53, %v13107_v1  ;;  %v8189_v63 = vcombine.low %v6051_v20, %v6055_v45  ;;  %v6203_v46 = vrot.slane %v13869_v55, %v13077_v19 }
 0x6b1   :  { %v8190_v43 = vcombine.low %v6059_v59, %v6063_v25  ;;  %v8191_v38 = vcombine.low %v6067_v10, %v6071_v44  ;;  %v8198_v3 = vrot.slane %v8188_v13, %v13107_v1  ;;  %v6207_v28 = vrot.slane %v13869_v55, %v13084_v21 }
 0x6b2   :  { %v8382_v62 = vrot.slane %v8368_v49, %v13107_v1  ;;  %v8205_v27 = vrot.slane %v8189_v63, %v13107_v1  ;;  %v6211_v48 = vrot.slane %v13869_v55, %v13087_v41  ;;  %v6215_v37 = vrot.slane %v13869_v55, %v13090_v39 }
 0x6b3   :  { %v8212_v34 = vrot.slane %v8190_v43, %v13107_v1  ;;  %v8219_v42 = vrot.slane %v8191_v38, %v13107_v1  ;;  %v6219_v4 = vrot.slane %v13869_v55, %v13093_v52  ;;  %v6223_v54 = vrot.slane %v13869_v55, %v13096_v61 }
 0x6b4   :  { %v8383_v32 = vcombine.low %v8375_v14, %v8382_v62  ;;  %v8220_v18 = vcombine.low %v8198_v3, %v8205_v27  ;;  %v6227_v50 = vrot.slane %v13869_v55, %v13099_v31  ;;  %v6231_v2 = vrot.slane %v13869_v55, %v13102_v0 }
 0x6b5   :  { %v8221_v8 = vcombine.low %v8212_v34, %v8219_v42  ;;  %v8433_v40 = vcombine.low %v6203_v46, %v6207_v28  ;;  %v8434_v30 = vcombine.low %v6211_v48, %v6215_v37  ;;  %v8435_v12 = vcombine.low %v6219_v4, %v6223_v54 }
 0x6b6   :  { %8894 = vperm.xlu0 %10322, %v8383_v32   ;;  %v8228_v56 = vrot.slane %v8220_v18, %v13107_v1  ;;  %v8436_v6 = vcombine.low %v6227_v50, %v6231_v2  ;;  %v6107_v17 = vrot.slane %v13788_v57, %v13077_v19  ;;  %v6111_v16 = vrot.slane %v13788_v57, %v13084_v21 }
 0x6b7   :  { %v8235_v26 = vrot.slane %v8221_v8, %v13107_v1  ;;  %v8443_v24 = vrot.slane %v8433_v40, %v13107_v1  ;;  %v8450_v55 = vrot.slane %v8434_v30, %v13107_v1  ;;  %v8457_v23 = vrot.slane %v8435_v12, %v13107_v1 }
 0x6b8   :  { %v8464_v36 = vrot.slane %v8436_v6, %v13107_v1  ;;  %v6115_v51 = vrot.slane %v13788_v57, %v13087_v41  ;;  %v6119_v20 = vrot.slane %v13788_v57, %v13090_v39  ;;  %v6123_v45 = vrot.slane %v13788_v57, %v13093_v52 }
 0x6b9   :  { %v8236_v47 = vcombine.low %v8228_v56, %v8235_v26  ;;  %v8465_v35 = vcombine.low %v8443_v24, %v8450_v55  ;;  %v6127_v53 = vrot.slane %v13788_v57, %v13096_v61  ;;  %v6131_v59 = vrot.slane %v13788_v57, %v13099_v31 }
 0x6ba   :  { %v8466_v25 = vcombine.low %v8457_v23, %v8464_v36  ;;  %v6135_v10 = vrot.slane %v13788_v57, %v13102_v0  ;;  %v8286_v44 = vcombine.low %v6107_v17, %v6111_v16  ;;  %v8287_v13 = vcombine.low %v6115_v51, %v6119_v20 }
 0x6bb   :  { %8885 = vperm.xlu1 %10323, %v8236_v47   ;;  %v8473_v49 = vrot.slane %v8465_v35, %v13107_v1  ;;  %v8288_v14 = vcombine.low %v6123_v45, %v6127_v53  ;;  %v6171_v63 = vrot.slane %v13816_v60, %v13077_v19  ;;  %v6175_v46 = vrot.slane %v13816_v60, %v13084_v21 }
 0x6bc   :  { %v8480_v43 = vrot.slane %v8466_v25, %v13107_v1  ;;  %v8289_v38 = vcombine.low %v6131_v59, %v6135_v10  ;;  %v8296_v3 = vrot.slane %v8286_v44, %v13107_v1  ;;  %v8303_v28 = vrot.slane %v8287_v13, %v13107_v1 }
 0x6bd   :  { %v8310_v57 = vrot.slane %v8288_v14, %v13107_v1  ;;  %v6179_v62 = vrot.slane %v13816_v60, %v13087_v41  ;;  %v6183_v27 = vrot.slane %v13816_v60, %v13090_v39  ;;  %v6187_v48 = vrot.slane %v13816_v60, %v13093_v52 }
 0x6be   :  { %v8481_v37 = vcombine.low %v8473_v49, %v8480_v43  ;;  %v8317_v34 = vrot.slane %v8289_v38, %v13107_v1  ;;  %v8318_v42 = vcombine.low %v8296_v3, %v8303_v28  ;;  %v6191_v4 = vrot.slane %v13816_v60, %v13096_v61 }
 0x6bf   :  { %v6195_v54 = vrot.slane %v13816_v60, %v13099_v31  ;;  %v6199_v32 = vrot.slane %v13816_v60, %v13102_v0  ;;  %v8384_v18 = vcombine.low %v6171_v63, %v6175_v46  ;;  %v8385_v50 = vcombine.low %v6179_v62, %v6183_v27 }
 0x6c0   :  { %8900 = vperm.xlu0 %10322, %v8481_v37   ;;  %v8319_v2 = vcombine.low %v8310_v57, %v8317_v34  ;;  %v8326_v8 = vrot.slane %v8318_v42, %v13107_v1  ;;  %v8386_v40 = vcombine.low %v6187_v48, %v6191_v4  ;;  %v5883_v30 = vrot.slane %v13685_v11, %v13077_v19 }
 0x6c1   :  { %v8387_v12 = vcombine.low %v6195_v54, %v6199_v32  ;;  %v8394_v56 = vrot.slane %v8384_v18, %v13107_v1  ;;  %v8401_v6 = vrot.slane %v8385_v50, %v13107_v1  ;;  %v5887_v17 = vrot.slane %v13685_v11, %v13084_v21 }
 0x6c2   :  { %v8333_v60 = vrot.slane %v8319_v2, %v13107_v1  ;;  %v8408_v16 = vrot.slane %v8386_v40, %v13107_v1  ;;  %v5891_v26 = vrot.slane %v13685_v11, %v13087_v41  ;;  %v5895_v24 = vrot.slane %v13685_v11, %v13090_v39 }
 0x6c3   :  { %v8415_v55 = vrot.slane %v8387_v12, %v13107_v1  ;;  %v8416_v23 = vcombine.low %v8394_v56, %v8401_v6  ;;  %v5899_v36 = vrot.slane %v13685_v11, %v13093_v52  ;;  %v5903_v51 = vrot.slane %v13685_v11, %v13096_v61 }
 0x6c4   :  { %v8334_v20 = vcombine.low %v8326_v8, %v8333_v60  ;;  %v5907_v45 = vrot.slane %v13685_v11, %v13099_v31  ;;  %v5911_v47 = vrot.slane %v13685_v11, %v13102_v0  ;;  %v7943_v35 = vcombine.low %v5883_v30, %v5887_v17 }
 0x6c5   :  { %v8417_v53 = vcombine.low %v8408_v16, %v8415_v55  ;;  %v8424_v59 = vrot.slane %v8416_v23, %v13107_v1  ;;  %v7944_v25 = vcombine.low %v5891_v26, %v5895_v24  ;;  %v7945_v10 = vcombine.low %v5899_v36, %v5903_v51 }
 0x6c6   :  { %8891 = vperm.xlu1 %10323, %v8334_v20   ;;  %v7946_v44 = vcombine.low %v5907_v45, %v5911_v47  ;;  %v7953_v13 = vrot.slane %v7943_v35, %v13107_v1  ;;  %v6267_v49 = vrot.slane %v13919_v22, %v13077_v19  ;;  %v6271_v14 = vrot.slane %v13919_v22, %v13084_v21 }
 0x6c7   :  { %v8431_v63 = vrot.slane %v8417_v53, %v13107_v1  ;;  %v7960_v11 = vrot.slane %v7944_v25, %v13107_v1  ;;  %v7967_v46 = vrot.slane %v7945_v10, %v13107_v1  ;;  %v6275_v43 = vrot.slane %v13919_v22, %v13087_v41 }
 0x6c8   :  { %v7974_v38 = vrot.slane %v7946_v44, %v13107_v1  ;;  %v6279_v3 = vrot.slane %v13919_v22, %v13090_v39  ;;  %v6283_v28 = vrot.slane %v13919_v22, %v13093_v52  ;;  %v6287_v57 = vrot.slane %v13919_v22, %v13096_v61 }
 0x6c9   :  { %v8432_v62 = vcombine.low %v8424_v59, %v8431_v63  ;;  %v7975_v27 = vcombine.low %v7953_v13, %v7960_v11  ;;  %v6291_v48 = vrot.slane %v13919_v22, %v13099_v31  ;;  %v6295_v37 = vrot.slane %v13919_v22, %v13102_v0 }
 0x6ca   :  { %v7976_v34 = vcombine.low %v7967_v46, %v7974_v38  ;;  %v8531_v42 = vcombine.low %v6267_v49, %v6271_v14  ;;  %v8532_v4 = vcombine.low %v6275_v43, %v6279_v3  ;;  %v8533_v54 = vcombine.low %v6283_v28, %v6287_v57  ;;  %v14193_v57 = vpop.permute.xlu1 %8780 }
 0x6cb   :  { %8897 = vperm.xlu0 %10322, %v8432_v62   ;;  %v7983_v32 = vrot.slane %v7975_v27, %v13107_v1  ;;  %v8534_v18 = vcombine.low %v6291_v48, %v6295_v37  ;;  %v6363_v50 = vrot.slane %v13966_v9, %v13077_v19  ;;  %v6367_v2 = vrot.slane %v13966_v9, %v13084_v21 }
 0x6cc   :  { %v7990_v8 = vrot.slane %v7976_v34, %v13107_v1  ;;  %v8541_v40 = vrot.slane %v8531_v42, %v13107_v1  ;;  %v8548_v22 = vrot.slane %v8532_v4, %v13107_v1  ;;  %v8555_v30 = vrot.slane %v8533_v54, %v13107_v1  ;;  %v14198_v34 = vpop.permute.xlu0 %8777 }
 0x6cd   :  { %v8562_v12 = vrot.slane %v8534_v18, %v13107_v1  ;;  %v6371_v56 = vrot.slane %v13966_v9, %v13087_v41  ;;  %v6375_v6 = vrot.slane %v13966_v9, %v13090_v39  ;;  %v6379_v17 = vrot.slane %v13966_v9, %v13093_v52 }
 0x6ce   :  { %v7991_v60 = vcombine.low %v7983_v32, %v7990_v8  ;;  %v8563_v16 = vcombine.low %v8541_v40, %v8548_v22  ;;  %v6383_v26 = vrot.slane %v13966_v9, %v13096_v61  ;;  %v6387_v24 = vrot.slane %v13966_v9, %v13099_v31 }
 0x6cf   :  { %v8564_v55 = vcombine.low %v8555_v30, %v8562_v12  ;;  %v6391_v23 = vrot.slane %v13966_v9, %v13102_v0  ;;  %v8678_v36 = vcombine.low %v6363_v50, %v6367_v2  ;;  %v8679_v51 = vcombine.low %v6371_v56, %v6375_v6  ;;  %v14215_v12 = vpop.permute.xlu1 %8783 }
 0x6d0   :  { %8870 = vperm.xlu1 %10323, %v7991_v60   ;;  %v8571_v20 = vrot.slane %v8563_v16, %v13107_v1  ;;  %v8680_v45 = vcombine.low %v6379_v17, %v6383_v26  ;;  %v6235_v47 = vrot.slane %v13866_v5, %v13077_v19  ;;  %v6239_v35 = vrot.slane %v13866_v5, %v13084_v21 }
 0x6d1   :  { %v8578_v53 = vrot.slane %v8564_v55, %v13107_v1  ;;  %v8681_v59 = vcombine.low %v6387_v24, %v6391_v23  ;;  %v8688_v25 = vrot.slane %v8678_v36, %v13107_v1  ;;  %v8695_v10 = vrot.slane %v8679_v51, %v13107_v1 }
 0x6d2   :  { %v8702_v9 = vrot.slane %v8680_v45, %v13107_v1  ;;  %v6243_v44 = vrot.slane %v13866_v5, %v13087_v41  ;;  %v6247_v13 = vrot.slane %v13866_v5, %v13090_v39  ;;  %v6251_v49 = vrot.slane %v13866_v5, %v13093_v52  ;;  %v14227_v45 = vpop.permute.xlu0 %8786 }
 0x6d3   :  { %v8579_v14 = vcombine.low %v8571_v20, %v8578_v53  ;;  %v8709_v63 = vrot.slane %v8681_v59, %v13107_v1  ;;  %v8710_v11 = vcombine.low %v8688_v25, %v8695_v10  ;;  %v6255_v46 = vrot.slane %v13866_v5, %v13096_v61 }
 0x6d4   :  { %v6259_v43 = vrot.slane %v13866_v5, %v13099_v31  ;;  %v6263_v38 = vrot.slane %v13866_v5, %v13102_v0  ;;  %v8482_v3 = vcombine.low %v6235_v47, %v6239_v35  ;;  %v8483_v28 = vcombine.low %v6243_v44, %v6247_v13 }
 0x6d5   :  { %8906 = vperm.xlu0 %10322, %v8579_v14   ;;  %v8711_v62 = vcombine.low %v8702_v9, %v8709_v63  ;;  %v8718_v27 = vrot.slane %v8710_v11, %v13107_v1  ;;  %v8484_v48 = vcombine.low %v6251_v49, %v6255_v46  ;;  %v6331_v37 = vrot.slane %v13969_v33, %v13077_v19  ;;  %v14245_v63 = vpop.permute.xlu1 %8789 }
 0x6d6   :  { %v8485_v42 = vcombine.low %v6259_v43, %v6263_v38  ;;  %v8492_v4 = vrot.slane %v8482_v3, %v13107_v1  ;;  %v8499_v54 = vrot.slane %v8483_v28, %v13107_v1  ;;  %v6335_v5 = vrot.slane %v13969_v33, %v13084_v21  ;;  %v14247_v3 = vpop.permute.xlu0 %8792 }
 0x6d7   :  { %v8725_v32 = vrot.slane %v8711_v62, %v13107_v1  ;;  %v8506_v18 = vrot.slane %v8484_v48, %v13107_v1  ;;  %v6339_v50 = vrot.slane %v13969_v33, %v13087_v41  ;;  %v6343_v2 = vrot.slane %v13969_v33, %v13090_v39 }
 0x6d8   :  { %v8513_v8 = vrot.slane %v8485_v42, %v13107_v1  ;;  %v8514_v40 = vcombine.low %v8492_v4, %v8499_v54  ;;  %v6347_v22 = vrot.slane %v13969_v33, %v13093_v52  ;;  %v6351_v30 = vrot.slane %v13969_v33, %v13096_v61 }
 0x6d9   :  { %v8726_v56 = vcombine.low %v8718_v27, %v8725_v32  ;;  %v6355_v6 = vrot.slane %v13969_v33, %v13099_v31  ;;  %v6359_v17 = vrot.slane %v13969_v33, %v13102_v0  ;;  %v8629_v60 = vcombine.low %v6331_v37, %v6335_v5 }
 0x6da   :  { %v8515_v16 = vcombine.low %v8506_v18, %v8513_v8  ;;  %v8522_v26 = vrot.slane %v8514_v40, %v13107_v1  ;;  %v8630_v24 = vcombine.low %v6339_v50, %v6343_v2  ;;  %v8631_v55 = vcombine.low %v6347_v22, %v6351_v30  ;;  %v14271_v30 = vpop.permute.xlu1 %8795 }
 0x6db   :  { %8915 = vperm.xlu1 %10323, %v8726_v56   ;;  %v8632_v23 = vcombine.low %v6355_v6, %v6359_v17  ;;  %v8639_v36 = vrot.slane %v8629_v60, %v13107_v1  ;;  %v6299_v51 = vrot.slane %v13916_v7, %v13077_v19  ;;  %v6303_v20 = vrot.slane %v13916_v7, %v13084_v21  ;;  %v14277_v6 = vpop.permute.xlu0 %8798 }
 0x6dc   :  { %v8529_v33 = vrot.slane %v8515_v16, %v13107_v1  ;;  %v8646_v47 = vrot.slane %v8630_v24, %v13107_v1  ;;  %v8653_v35 = vrot.slane %v8631_v55, %v13107_v1  ;;  %v6307_v53 = vrot.slane %v13916_v7, %v13087_v41 }
 0x6dd   :  { %v8660_v59 = vrot.slane %v8632_v23, %v13107_v1  ;;  %v6311_v25 = vrot.slane %v13916_v7, %v13090_v39  ;;  %v6315_v10 = vrot.slane %v13916_v7, %v13093_v52  ;;  %v6319_v9 = vrot.slane %v13916_v7, %v13096_v61 }
 0x6de   :  { %v8530_v44 = vcombine.low %v8522_v26, %v8529_v33  ;;  %v8661_v13 = vcombine.low %v8639_v36, %v8646_v47  ;;  %v6323_v49 = vrot.slane %v13916_v7, %v13099_v31  ;;  %v6327_v14 = vrot.slane %v13916_v7, %v13102_v0 }
 0x6df   :  { %v8662_v11 = vcombine.low %v8653_v35, %v8660_v59  ;;  %v8580_v46 = vcombine.low %v6299_v51, %v6303_v20  ;;  %v8581_v43 = vcombine.low %v6307_v53, %v6311_v25  ;;  %v8582_v38 = vcombine.low %v6315_v10, %v6319_v9  ;;  %v8802_v59 = vpop.permute.xlu1 %8801 }
 0x6e0   :  { %8903 = vperm.xlu0 %10322, %v8530_v44   ;;  %v8669_v28 = vrot.slane %v8661_v13, %v13107_v1  ;;  %v8583_v62 = vcombine.low %v6323_v49, %v6327_v14  ;;  %v6395_v27 = vrot.slane %v14016_v15, %v13077_v19  ;;  %v6399_v48 = vrot.slane %v14016_v15, %v13084_v21 }
 0x6e1   :  { %v8676_v7 = vrot.slane %v8662_v11, %v13107_v1  ;;  %v8590_v37 = vrot.slane %v8580_v46, %v13107_v1  ;;  %v8597_v42 = vrot.slane %v8581_v43, %v13107_v1  ;;  %v8604_v4 = vrot.slane %v8582_v38, %v13107_v1 }
 0x6e2   :  { %v8611_v54 = vrot.slane %v8583_v62, %v13107_v1  ;;  %v6403_v5 = vrot.slane %v14016_v15, %v13087_v41  ;;  %v6407_v32 = vrot.slane %v14016_v15, %v13090_v39  ;;  %v6411_v19 = vrot.slane %v14016_v15, %v13093_v52 }
 0x6e3   :  { %v8677_v21 = vcombine.low %v8669_v28, %v8676_v7  ;;  %v8612_v18 = vcombine.low %v8590_v37, %v8597_v42  ;;  %v6415_v50 = vrot.slane %v14016_v15, %v13096_v61  ;;  %v6419_v2 = vrot.slane %v14016_v15, %v13099_v31  ;;  %v8808_v37 = vpop.permute.xlu1 %8807 }
 0x6e4   :  { %v8613_v8 = vcombine.low %v8604_v4, %v8611_v54  ;;  %v6423_v40 = vrot.slane %v14016_v15, %v13102_v0  ;;  %v8727_v22 = vcombine.low %v6395_v27, %v6399_v48  ;;  %v8728_v41 = vcombine.low %v6403_v5, %v6407_v32 }
 0x6e5   :  { %8912 = vperm.xlu0 %10322, %v8677_v21   ;;  %v8620_v39 = vrot.slane %v8612_v18, %v13107_v1  ;;  %v8729_v52 = vcombine.low %v6411_v19, %v6415_v50  ;;  %v14275_v56 = vand.u32 127, %v4788_v29 }
 0x6e6   :  { %v8627_v61 = vrot.slane %v8613_v8, %v13107_v1  ;;  %v8730_v31 = vcombine.low %v6419_v2, %v6423_v40  ;;  %v8737_v17 = vrot.slane %v8727_v22, %v13107_v1  ;;  %v8744_v0 = vrot.slane %v8728_v41, %v13107_v1 }
 0x6e7   :  { %v8751_v15 = vrot.slane %v8729_v52, %v13107_v1  ;;  %v8926_v60 = vadd.s32 4294967288, %v14275_v56  ;;  %v14286_v16 = vsub.s32 %v14275_v56, %v13074_v58  ;;  %v8940_v26 = vadd.s32 4294967272, %v14275_v56 }
 0x6e8   :  { %v8628_v24 = vcombine.low %v8620_v39, %v8627_v61  ;;  %v8758_v55 = vrot.slane %v8730_v31, %v13107_v1  ;;  %v8759_v23 = vcombine.low %v8737_v17, %v8744_v0  ;;  %v8933_v36 = vadd.s32 4294967280, %v14275_v56 }
 0x6e9   :  { %v14292_v51 = vsub.s32 %v8926_v60, %v13074_v58  ;;  %v8925_v20 = vrot.slane %v14198_v34, %v14286_v16  ;;  %v14297_v33 = vsub.s32 %v8940_v26, %v13074_v58  ;;  %v8947_v10 = vadd.s32 4294967264, %v14275_v56  ;;  %v8805_v34 = vpop.permute.xlu0 %8804 }
 0x6ea   :  { %8909 = vperm.xlu0 %10322, %v8628_v24   ;;  %v8760_v47 = vcombine.low %v8751_v15, %v8758_v55  ;;  %v8767_v35 = vrot.slane %v8759_v23, %v13107_v1  ;;  %v14301_v53 = vsub.s32 %v8933_v36, %v13074_v58  ;;  %v8954_v49 = vadd.s32 4294967256, %v14275_v56 }
 0x6eb   :  { %v8930_v25 = vrot.slane %v14193_v57, %v14292_v51  ;;  %v8944_v44 = vrot.slane %v14227_v45, %v14297_v33  ;;  %v14314_v11 = vsub.s32 %v8947_v10, %v13074_v58  ;;  %v8961_v57 = vadd.s32 4294967248, %v14275_v56 }
 0x6ec   :  { %v8774_v9 = vrot.slane %v8760_v47, %v13107_v1  ;;  %v8937_v13 = vrot.slane %v14215_v12, %v14301_v53  ;;  %v14319_v38 = vsub.s32 %v8954_v49, %v13074_v58  ;;  %v8968_v45 = vadd.s32 4294967240, %v14275_v56 }
 0x6ed   :  { %v8932_v14 = vsel %vm8931_vm3, %v8930_v25, %v8925_v20  ;;  %v8951_v12 = vrot.slane %v14245_v63, %v14314_v11  ;;  %v14325_v28 = vsub.s32 %v8961_v57, %v13074_v58  ;;  %v8975_v7 = vadd.s32 4294967232, %v14275_v56  ;;  %v8811_v54 = vpop.permute.xlu0 %8810 }
 0x6ee   :  { %v8775_v46 = vcombine.low %v8767_v35, %v8774_v9  ;;  %v8939_v43 = vsel %vm8938_vm4, %v8937_v13, %v8932_v14  ;;  %v8958_v27 = vrot.slane %v14247_v3, %v14319_v38  ;;  %v14331_v48 = vsub.s32 %v8968_v45, %v13074_v58 }
 0x6ef   :  { %v8946_v62 = vsel %vm8945_vm5, %v8944_v44, %v8939_v43  ;;  %v8965_v63 = vrot.slane %v14271_v30, %v14325_v28  ;;  %v8982_v4 = vadd.s32 4294967224, %v14275_v56  ;;  %v14342_v32 = vsub.s32 %v8975_v7, %v13074_v58 }
 0x6f0   :  { %8918 = vperm.xlu0 %10322, %v8775_v46   ;;  %v8953_v42 = vsel %vm8952_vm6, %v8951_v12, %v8946_v62  ;;  %v8972_v3 = vrot.slane %v14277_v6, %v14331_v48  ;;  %v8989_v19 = vadd.s32 4294967216, %v14275_v56  ;;  %v8996_v50 = vadd.s32 4294967208, %v14275_v56  ;;  %v8814_v6 = vpop.permute.xlu1 %8813 }
 0x6f1   :  { %v8960_v5 = vsel %vm8959_vm7, %v8958_v27, %v8953_v42  ;;  %v14347_v18 = vsub.s32 %v8982_v4, %v13074_v58  ;;  %v8979_v2 = vrot.slane %v8802_v59, %v14342_v32  ;;  %v9003_v30 = vadd.s32 4294967200, %v14275_v56  ;;  %v8817_v15 = vpop.permute.xlu0 %8816 }
 0x6f2   :  { %v8967_v21 = vsel %vm8966_vm8, %v8965_v63, %v8960_v5  ;;  %v14352_v8 = vsub.s32 %v8989_v19, %v13074_v58  ;;  %v14357_v41 = vsub.s32 %v8996_v50, %v13074_v58  ;;  %v9010_v61 = vadd.s32 4294967192, %v14275_v56 }
 0x6f3   :  { %v8974_v40 = vsel %vm8973_vm9, %v8972_v3, %v8967_v21  ;;  %v8986_v22 = vrot.slane %v8805_v34, %v14347_v18  ;;  %v14366_v0 = vsub.s32 %v9003_v30, %v13074_v58 }
 0x6f4   :  { %v8981_v39 = vsel %vm8980_vm10, %v8979_v2, %v8974_v40  ;;  %v8993_v52 = vrot.slane %v8808_v37, %v14352_v8  ;;  %v9000_v17 = vrot.slane %v8811_v54, %v14357_v41  ;;  %v14370_v26 = vsub.s32 %v9010_v61, %v13074_v58  ;;  %v14379_v47 = vpop.permute.xlu1 %8819 }
 0x6f5   :  { %v8988_v31 = vsel %vm8987_vm11, %v8986_v22, %v8981_v39  ;;  %v9007_v55 = vrot.slane %v8814_v6, %v14366_v0  ;;  %v14381_v25 = vpop.permute.xlu0 %8822 }
 0x6f6   :  { %v8995_v60 = vsel %vm8994_vm12, %v8993_v52, %v8988_v31  ;;  %v9014_v23 = vrot.slane %v8817_v15, %v14370_v26 }
 0x6f7   :  { %v9002_v24 = vsel %vm9001_vm13, %v9000_v17, %v8995_v60 }
 0x6f8   :  { %v9009_v36 = vsel %vm9008_vm14, %v9007_v55, %v9002_v24  ;;  %v8826_v35 = vpop.permute.xlu1 %8825 }
 0x6f9   :  { %v14377_v20 = vsel %vm9015_vm15, %v9014_v23, %v9009_v36  ;;  %v8829_v34 = vpop.permute.xlu0 %8828  ;;  %v9034_v5 = vrot.slane %v8826_v35, %v14286_v16 }
 0x6fa   :  { %v9038_v3 = vrot.slane %v8829_v34, %v14292_v51 }
 0x6fc   :  { %v8832_v59 = vpop.permute.xlu1 %8831  ;;  %v9039_v2 = vsel %vm8931_vm3, %v9038_v3, %v9034_v5 }
 0x6fd   :  { %v8835_v44 = vpop.permute.xlu0 %8834  ;;  %v9043_v19 = vrot.slane %v8832_v59, %v14301_v53 }
 0x6fe   :  { %v9048_v40 = vrot.slane %v8835_v44, %v14297_v33 }
 0x6ff   :  { %v9044_v30 = vsel %vm8938_vm4, %v9043_v19, %v9039_v2 }
 0x700   :  { %v8838_v10 = vpop.permute.xlu1 %8837  ;;  %v9049_v31 = vsel %vm8945_vm5, %v9048_v40, %v9044_v30 }
 0x701   :  { %v8841_v49 = vpop.permute.xlu0 %8840  ;;  %v9053_v39 = vrot.slane %v8838_v10, %v14314_v11 }
 0x703   :  { %v9054_v60 = vsel %vm8952_vm6, %v9053_v39, %v9049_v31 }
 0x704   :  { %v8844_v9 = vpop.permute.xlu1 %8843 }
 0x705   :  { %v8847_v57 = vpop.permute.xlu0 %8846 }
 0x706   :  { %v9068_v35 = vrot.slane %v8847_v57, %v14331_v48  ;;  %v9017_v57 = vadd.s32 4294967184, %v14275_v56 }
 0x708   :  { %v8850_v13 = vpop.permute.xlu1 %8849 }
 0x709   :  { %v8853_v43 = vpop.permute.xlu0 %8852  ;;  %v9073_v34 = vrot.slane %v8850_v13, %v14342_v32 }
 0x70c   :  { %v14383_v14 = vpop.permute.xlu1 %8858 }
 0x710   :  { %v8856_v46 = vpop.permute.xlu1 %8855 }
 0x714   :  { %v14385_v45 = vpop.permute.xlu1 %8864  ;;  %v8877_v12 = vpop.permute.xlu0 %8876 }
 0x715   :  { %v9117_v52 = vrot.slane %v8877_v12, %v14292_v51  ;;  %v9098_v30 = vrot.slane %v14385_v45, %v14370_v26 }
 0x718   :  { %v14387_v62 = vpop.permute.xlu1 %8861 }
 0x719   :  { %v9093_v19 = vrot.slane %v14387_v62, %v14366_v0 }
 0x71c   :  { %v14389_v7 = vpop.permute.xlu1 %8867 }
 0x71f   :  { %v8883_v27 = vpop.permute.xlu0 %8882 }
 0x720   :  { %v9127_v24 = vrot.slane %v8883_v27, %v14297_v33 }
 0x724   :  { %v8874_v42 = vpop.permute.xlu1 %8873 }
 0x725   :  { %v9113_v21 = vrot.slane %v8874_v42, %v14286_v16  ;;  %v9058_v16 = vrot.slane %v8841_v49, %v14319_v38  ;;  %v9078_v49 = vrot.slane %v8853_v43, %v14347_v18  ;;  %v9020_v43 = vsub.s32 %v9017_v57, %v13074_v58 }
 0x727   :  { %v9118_v61 = vsel %vm8931_vm3, %v9117_v52, %v9113_v21  ;;  %v9059_v36 = vsel %vm8959_vm7, %v9058_v16, %v9054_v60  ;;  %v9021_v40 = vrot.slane %v14379_v47, %v9020_v43  ;;  %v9103_v62 = vrot.slane %v14389_v7, %v9020_v43 }
 0x72a   :  { %v8889_v37 = vpop.permute.xlu0 %8888 }
 0x72f   :  { %v8880_v4 = vpop.permute.xlu1 %8879 }
 0x730   :  { %v9122_v22 = vrot.slane %v8880_v4, %v14301_v53  ;;  %v9063_v53 = vrot.slane %v8844_v9, %v14325_v28  ;;  %v9137_v9 = vrot.slane %v8889_v37, %v14319_v38  ;;  %v9024_v38 = vadd.s32 4294967176, %v14275_v56 }
 0x732   :  { %v9123_v17 = vsel %vm8938_vm4, %v9122_v22, %v9118_v61 }
 0x733   :  { %v9128_v51 = vsel %vm8945_vm5, %v9127_v24, %v9123_v17 }
 0x735   :  { %v8895_v63 = vpop.permute.xlu0 %8894 }
 0x736   :  { %v9147_v42 = vrot.slane %v8895_v63, %v14331_v48 }
 0x73a   :  { %v8886_v50 = vpop.permute.xlu1 %8885 }
 0x73b   :  { %v9132_v15 = vrot.slane %v8886_v50, %v14314_v11  ;;  %v9064_v11 = vsel %vm8966_vm8, %v9063_v53, %v9059_v36 }
 0x73c   :  { %v9069_v44 = vsel %vm8973_vm9, %v9068_v35, %v9064_v11 }
 0x73d   :  { %v9133_v59 = vsel %vm8952_vm6, %v9132_v15, %v9128_v51  ;;  %v9074_v27 = vsel %vm8980_vm10, %v9073_v34, %v9069_v44 }
 0x73e   :  { %v9138_v33 = vsel %vm8959_vm7, %v9137_v9, %v9133_v59  ;;  %v9079_v37 = vsel %vm8987_vm11, %v9078_v49, %v9074_v27 }
 0x73f   :  { %v8901_v54 = vpop.permute.xlu0 %8900 }
 0x740   :  { %v9157_v50 = vrot.slane %v8901_v54, %v14347_v18 }
 0x745   :  { %v8892_v55 = vpop.permute.xlu1 %8891 }
 0x746   :  { %v9142_v10 = vrot.slane %v8892_v55, %v14325_v28  ;;  %v9083_v28 = vrot.slane %v8856_v46, %v14352_v8  ;;  %v9088_v46 = vrot.slane %v14383_v14, %v14357_v41 }
 0x748   :  { %v9143_v12 = vsel %vm8966_vm8, %v9142_v10, %v9138_v33  ;;  %v9084_v3 = vsel %vm8994_vm12, %v9083_v28, %v9079_v37 }
 0x749   :  { %v9148_v13 = vsel %vm8973_vm9, %v9147_v42, %v9143_v12  ;;  %v9089_v2 = vsel %vm9001_vm13, %v9088_v46, %v9084_v3 }
 0x74a   :  { %v8898_v6 = vpop.permute.xlu0 %8897  ;;  %v9094_v22 = vsel %vm9008_vm14, %v9093_v19, %v9089_v2 }
 0x74b   :  { %v9152_v5 = vrot.slane %v8898_v6, %v14342_v32  ;;  %v9027_v32 = vsub.s32 %v9024_v38, %v13074_v58  ;;  %v9099_v47 = vsel %vm9015_vm15, %v9098_v30, %v9094_v22  ;;  %v9023_v6 = vsel %vm9022_vm0, %v9021_v40, %v14377_v20 }
 0x74c   :  { %v9104_v61 = vsel %vm9022_vm0, %v9103_v62, %v9099_v47 }
 0x74d   :  { %v9153_v48 = vsel %vm8980_vm10, %v9152_v5, %v9148_v13  ;;  %v9028_v54 = vrot.slane %v14381_v25, %v9027_v32 }
 0x74e   :  { %v9158_v14 = vsel %vm8987_vm11, %v9157_v50, %v9153_v48 }
 0x74f   :  { %v8871_v63 = vpop.permute.xlu1 %8870  ;;  %v9030_v15 = vsel %vm9029_vm1, %v9028_v54, %v9023_v6 }
 0x754   :  { %v8907_v23 = vpop.permute.xlu0 %8906 }
 0x755   :  { %v9167_v18 = vrot.slane %v8907_v23, %v14357_v41 }
 0x75a   :  { %v8916_v52 = vpop.permute.xlu1 %8915 }
 0x75b   :  { %v9182_v17 = vrot.slane %v8916_v52, %v9020_v43 }
 0x75f   :  { %v8904_v4 = vpop.permute.xlu0 %8903 }
 0x760   :  { %v9162_v21 = vrot.slane %v8904_v4, %v14352_v8  ;;  %v9108_v8 = vrot.slane %v8871_v63, %v9027_v32 }
 0x762   :  { %v9163_v39 = vsel %vm8994_vm12, %v9162_v21, %v9158_v14  ;;  %v9109_v41 = vsel %vm9029_vm1, %v9108_v8, %v9104_v61 }
 0x763   :  { %v9168_v31 = vsel %vm9001_vm13, %v9167_v18, %v9163_v39  ;;  %v9189_v60 = vcombine.low %v9030_v15, %v9109_v41 }
 0x764   :  { %v8913_v56 = vpop.permute.xlu0 %8912 }
 0x765   :  { %v9177_v45 = vrot.slane %v8913_v56, %v14370_v26  ;;  %v9196_v26 = vrot.slane %v9189_v60, %v13107_v1 }
 0x769   :  { %v8910_v58 = vpop.permute.xlu0 %8909 }
 0x76a   :  { %v9172_v7 = vrot.slane %v8910_v58, %v14366_v0 }
 0x76c   :  { %v9173_v16 = vsel %vm9008_vm14, %v9172_v7, %v9168_v31 }
 0x76d   :  { %v9178_v25 = vsel %vm9015_vm15, %v9177_v45, %v9173_v16 }
 0x76e   :  { %v9183_v0 = vsel %vm9022_vm0, %v9182_v17, %v9178_v25 }
 0x76f   :  { %v8919_v53 = vpop.permute.xlu0 %8918 }
 0x770   :  { %v9187_v20 = vrot.slane %v8919_v53, %v9027_v32 }
 0x772   :  { %v9188_v24 = vsel %vm9029_vm1, %v9187_v20, %v9183_v0 }
 0x773   :  { %v9203_v55 = vrot.slane %v9188_v24, %v13107_v1 }
 0x775   :  { %v9204_v51 = vcombine.low %v9196_v26, %v9203_v55 }
 0x777   :  { %v9211_v23 = vrot.slane %v9204_v51, %v13107_v1 }
 0x779   :  { %9217 = vst.msk [vmem:[%s14482_s13] sm:$0x7] %vm9215_vm2, %v9211_v23 }

</bundles_post_ra>
